<compile_context>
chip_gen: v7x
topology: tpu7x:2x2x1
jax: 0.10.0
libtpu: 0.0.40
codegen_flags: <defaults>
</compile_context>

<pallas_src>
import functools
import math

import jax
import jax.numpy as jnp
from jax import lax
from jax.experimental import pallas as pl
from jax.experimental.pallas import tpu as pltpu

EPS = 1e-5


# -------------- fused Conv2d(3x3, SAME) + folded BN + ReLU + MaxPool(2x2) --------------


def _conv_pool_kernel(xk_ref, w_ref, scale_ref, shift_ref, o_ref, *, rows):
    """One pooled image per grid step.

    xk_ref   : (1, 4*rows, K) bf16  parity-major 9-tap im2col (K = 9*Cin, maybe zero-padded).
               Row p*rows + s holds the 9 taps of the conv output at pooling parity
               p = 2*r2 + pc and pooled site s = hh*Wo + wc.
    w_ref    : (K, Cout) bf16       conv weight, rows ordered (dy, dx, cin).
    scale_ref: (1, Cout) f32        gamma / sqrt(running_var + eps)
    shift_ref: (1, Cout) f32        beta + (conv_bias - running_mean) * scale
    o_ref    : (1, rows, Cout) bf16 pooled output, rows ordered (hh, wc).
    """
    # Single MXU matmul covering all 4 pooling parities stacked along M.
    y = jnp.dot(xk_ref[0], w_ref[...], preferred_element_type=jnp.float32)
    y = jnp.maximum(y * scale_ref[...] + shift_ref[...], 0.0)        # folded BN + ReLU (f32)
    # 2x2 max pool == elementwise max over the four contiguous parity slabs.
    pooled = jnp.maximum(jnp.maximum(y[0 * rows:1 * rows], y[1 * rows:2 * rows]),
                         jnp.maximum(y[2 * rows:3 * rows], y[3 * rows:4 * rows]))
    o_ref[0] = pooled.astype(o_ref.dtype)


def conv_bn_relu_pool(x, w_k, scale, shift):
    """x: (N, H, W, Cin) bf16 NHWC; w_k: (9*Cin, Cout) bf16; scale/shift: (1, Cout) f32.

    Returns conv(3x3, SAME) -> BN(eval, folded) -> ReLU -> maxpool(2x2): (N, H//2, W//2, Cout) bf16.
    """
    N, H, W, Cin = x.shape
    assert H % 2 == 0 and W % 2 == 0, "2x2 maxpool requires even spatial dims"
    Ho, Wo = H // 2, W // 2
    K, Cout = w_k.shape
    assert K == 9 * Cin
    R = Ho * Wo

    # ---- wrapper-side im2col (pure XLA layout plumbing; fuses into a few tiny kernels) ----
    xp = jnp.pad(x, ((0, 0), (1, 1), (1, 1), (0, 0)))          # SAME pad: (N, H+2, W+2, Cin)
    # S[a][b][n, hh, wc, c] = xp[n, 2*hh + a, 2*wc + b, c]  (16 shared strided slices)
    S = [[xp[:, a:a + 2 * Ho:2, b:b + 2 * Wo:2, :] for b in range(4)] for a in range(4)]
    parities = []
    for r2 in range(2):
        for pc in range(2):
            taps = [S[r2 + dy][pc + dx] for dy in range(3) for dx in range(3)]
            parities.append(jnp.concatenate(taps, axis=-1))     # (N, Ho, Wo, 9*Cin)
    xk = jnp.stack(parities, axis=1).reshape(N, 4 * R, K)       # parity-major rows

    # Pad K to a sublane multiple (only stage 1, K=9 -> 16); zero rows of w_k match.
    kpad = (-K) % 8
    if kpad:
        xk = jnp.pad(xk, ((0, 0), (0, 0), (0, kpad)))
        w_k = jnp.pad(w_k, ((0, kpad), (0, 0)))
        K += kpad

    out = pl.pallas_call(
        functools.partial(_conv_pool_kernel, rows=R),
        out_shape=jax.ShapeDtypeStruct((N, R, Cout), jnp.bfloat16),
        grid=(N,),
        in_specs=[pl.BlockSpec((1, 4 * R, K), lambda n: (n, 0, 0)),
                  pl.BlockSpec((K, Cout), lambda n: (0, 0)),
                  pl.BlockSpec((1, Cout), lambda n: (0, 0)),
                  pl.BlockSpec((1, Cout), lambda n: (0, 0))],
        out_specs=pl.BlockSpec((1, R, Cout), lambda n: (n, 0, 0)),
        compiler_params=pltpu.CompilerParams(dimension_semantics=("parallel",)),
    )(xk, w_k, scale, shift)
    return out.reshape(N, Ho, Wo, Cout)


# ------------------------------------- fc layer -----------------------------------------


def _linear_kernel(x_ref, w_ref, b_ref, o_ref):
    o_ref[...] = jnp.dot(x_ref[...], w_ref[...],
                         preferred_element_type=jnp.float32) + b_ref[...]


def linear(x, w, b):
    """x: (B, F) bf16; w: (F, O) bf16; b: (1, O) f32 -> (B, O) f32."""
    B, F = x.shape
    O = w.shape[1]
    return pl.pallas_call(
        _linear_kernel,
        out_shape=jax.ShapeDtypeStruct((B, O), jnp.float32),
        grid=(1,),
        in_specs=[pl.BlockSpec((B, F), lambda i: (0, 0)),
                  pl.BlockSpec((F, O), lambda i: (0, 0)),
                  pl.BlockSpec((1, O), lambda i: (0, 0))],
        out_specs=pl.BlockSpec((B, O), lambda i: (0, 0)),
    )(x, w, b)


# ------------------------------ params / full forward -----------------------------------


def fold_bn(conv_bias, gamma, beta, mean, var, eps=EPS):
    scale = gamma * lax.rsqrt(var + eps)
    shift = beta + (conv_bias - mean) * scale
    return scale.reshape(1, -1), shift.reshape(1, -1)


def init_params(key, image_size, n_filters):
    ks = jax.random.split(key, 14)
    s_final = (image_size // 32) ** 2
    f = math.ceil(image_size / 32 * image_size / 32 * n_filters)
    p = {}

    # conv1: Conv2d(1, n_filters, 3, padding=1) + BatchNorm2d (eval) ----------------------
    w1 = math.sqrt(2.0 / 9.0) * jax.random.normal(ks[0], (3, 3, 1, n_filters), jnp.float32)
    p["w1_hwio"] = w1
    p["w1_k"] = w1.reshape(9, n_filters).astype(jnp.bfloat16)        # rows = (dy, dx, cin)
    p["b1"] = 0.05 * jax.random.normal(ks[1], (n_filters,), jnp.float32)
    p["g1"] = 1.0 + 0.1 * jax.random.normal(ks[2], (n_filters,), jnp.float32)
    p["be1"] = 0.05 * jax.random.normal(ks[3], (n_filters,), jnp.float32)
    p["m1"] = 0.05 * jax.random.normal(ks[4], (n_filters,), jnp.float32)
    p["v1"] = 0.5 + jax.random.uniform(ks[5], (n_filters,), jnp.float32)
    p["scale1"], p["shift1"] = fold_bn(p["b1"], p["g1"], p["be1"], p["m1"], p["v1"])

    # conv2: Conv2d(n_filters, n_filters, 3, padding=1) + BN (eval); shared by 4 stages ---
    w2 = math.sqrt(2.0 / (9.0 * n_filters)) * jax.random.normal(
        ks[6], (3, 3, n_filters, n_filters), jnp.float32)
    p["w2_hwio"] = w2
    p["w2_k"] = w2.reshape(9 * n_filters, n_filters).astype(jnp.bfloat16)
    p["b2"] = 0.05 * jax.random.normal(ks[7], (n_filters,), jnp.float32)
    p["g2"] = 1.0 + 0.1 * jax.random.normal(ks[8], (n_filters,), jnp.float32)
    p["be2"] = 0.05 * jax.random.normal(ks[9], (n_filters,), jnp.float32)
    p["m2"] = 0.05 * jax.random.normal(ks[10], (n_filters,), jnp.float32)
    p["v2"] = 0.5 + jax.random.uniform(ks[11], (n_filters,), jnp.float32)
    p["scale2"], p["shift2"] = fold_bn(p["b2"], p["g2"], p["be2"], p["m2"], p["v2"])

    # fc: Linear(f, 256).  wfc_nchw rows follow torch's x5.view(-1, C*Hf*Wf) order; the
    # kernel uses the HWC-permuted copy so the wrapper flatten is a plain reshape.
    wfc_nchw = (1.0 / math.sqrt(f)) * jax.random.normal(ks[12], (f, 256), jnp.float32)
    p["wfc_nchw"] = wfc_nchw
    p["wfc_hwc"] = (wfc_nchw.reshape(n_filters, s_final, 256)
                    .transpose(1, 0, 2).reshape(f, 256).astype(jnp.bfloat16))
    p["bfc"] = 0.01 * jax.random.normal(ks[13], (1, 256), jnp.float32)
    return p


def deep2d_encoder_forward(x_nchw, params, image_size, n_filters):
    assert image_size % 32 == 0, "module pools 5x; image_size must be divisible by 32"
    x = jnp.transpose(x_nchw, (0, 2, 3, 1)).astype(jnp.bfloat16)     # NCHW -> NHWC, bf16
    h = conv_bn_relu_pool(x, params["w1_k"], params["scale1"], params["shift1"])
    for _ in range(4):               # conv2 (shared weights) + pool, applied 4 times
        h = conv_bn_relu_pool(h, params["w2_k"], params["scale2"], params["shift2"])
    n = h.shape[0]
    f = math.ceil(image_size / 32 * image_size / 32 * n_filters)
    flat = h.reshape(n, f)           # HWC order; FC weight rows are pre-permuted to match
    return linear(flat, params["wfc_hwc"], params["bfc"])


# --------------------------- pure-JAX f32 reference (for test) --------------------------


def _reference_forward(x_nchw, params):
    x = jnp.transpose(x_nchw, (0, 2, 3, 1))                          # NHWC f32

    def stage(h, w_hwio, b, g, be, m, v):
        y = lax.conv_general_dilated(h, w_hwio, (1, 1), "SAME",
                                     dimension_numbers=("NHWC", "HWIO", "NHWC"),
                                     precision=lax.Precision.HIGHEST) + b
        y = g * (y - m) * lax.rsqrt(v + EPS) + be                    # BN (eval)
        y = jnp.maximum(y, 0.0)
        return lax.reduce_window(y, -jnp.inf, lax.max,
                                 (1, 2, 2, 1), (1, 2, 2, 1), "VALID")

    h = stage(x, params["w1_hwio"], params["b1"], params["g1"], params["be1"],
              params["m1"], params["v1"])
    for _ in range(4):
        h = stage(h, params["w2_hwio"], params["b2"], params["g2"], params["be2"],
                  params["m2"], params["v2"])
    n = h.shape[0]
    flat = jnp.transpose(h, (0, 3, 1, 2)).reshape(n, -1)             # NCHW flatten (as torch)
    return jnp.dot(flat, params["wfc_nchw"],
                   precision=lax.Precision.HIGHEST) + params["bfc"]


if __name__ == "__main__":
    IMAGE_SIZE = 64          # small, divisible by 32 (the module pools 5x)
    N_FILTERS = 32
    BATCH = 2

    key = jax.random.PRNGKey(0)
    k_x, k_p = jax.random.split(key)
    x = jax.random.normal(k_x, (BATCH, 1, IMAGE_SIZE, IMAGE_SIZE), jnp.float32)
    params = init_params(k_p, IMAGE_SIZE, N_FILTERS)

    fwd = jax.jit(functools.partial(deep2d_encoder_forward,
                                    image_size=IMAGE_SIZE, n_filters=N_FILTERS))
    out = jax.block_until_ready(fwd(x, params))

    assert out.shape == (BATCH, 256), out.shape
    assert bool(jnp.all(jnp.isfinite(out)))

    # Loose-tolerance check against the f32 lax.conv reference (kernel path runs in bf16).
    ref = jax.jit(_reference_forward)(x, params)
    err = float(jnp.max(jnp.abs(out - ref)))
    tol = 0.1 * float(jnp.max(jnp.abs(ref))) + 0.05
    assert err < tol, (err, tol)

    print("KERNEL_OK")
</pallas_src>

<mosaic_0001>
module attributes {stable_mosaic.version = 11 : i64} {
  func.func @_conv_pool_kernel(%arg0: i32, %arg1: memref<1x4096x16xbf16, #tpu.memory_space<vmem>>, %arg2: memref<16x32xbf16, #tpu.memory_space<vmem>>, %arg3: memref<1x32xf32, #tpu.memory_space<vmem>>, %arg4: memref<1x32xf32, #tpu.memory_space<vmem>>, %arg5: memref<1x1024x32xbf16, #tpu.memory_space<vmem>>) attributes {dimension_semantics = [#tpu.dimension_semantics<parallel>], iteration_bounds = array<i64: 2>, scalar_prefetch = 0 : i64, scratch_operands = 0 : i64, tpu.core_type = #tpu.core_type<tc>, window_params = [{transform_indices = @transform_0, window_bounds = array<i64: 1, 4096, 16>}, {pipeline_mode = #tpu.pipeline_mode<synchronous>, transform_indices = @transform_1, window_bounds = array<i64: 16, 32>}, {pipeline_mode = #tpu.pipeline_mode<synchronous>, transform_indices = @transform_2, window_bounds = array<i64: 1, 32>}, {pipeline_mode = #tpu.pipeline_mode<synchronous>, transform_indices = @transform_3, window_bounds = array<i64: 1, 32>}, {transform_indices = @transform_4, window_bounds = array<i64: 1, 1024, 32>}]} {
    %c0 = arith.constant 0 : index
    %c0_0 = arith.constant 0 : index
    %c0_1 = arith.constant 0 : index
    %0 = vector.load %arg1[%c0, %c0_0, %c0_1] : memref<1x4096x16xbf16, #tpu.memory_space<vmem>>, vector<1x4096x16xbf16>
    %1 = vector.shape_cast %0 : vector<1x4096x16xbf16> to vector<4096x16xbf16>
    %c0_2 = arith.constant 0 : index
    %c0_3 = arith.constant 0 : index
    %2 = vector.load %arg2[%c0_2, %c0_3] : memref<16x32xbf16, #tpu.memory_space<vmem>>, vector<16x32xbf16>
    %cst = arith.constant dense<0.000000e+00> : vector<4096x32xf32>
    %3 = tpu.matmul %1, %2, %cst {dimension_numbers = #tpu.dot_dimension_numbers<[1], [0], [0], [1], [0, 0, 1, 1], [], []>} : vector<4096x16xbf16>, vector<16x32xbf16>, vector<4096x32xf32> -> vector<4096x32xf32>
    %c0_4 = arith.constant 0 : index
    %c0_5 = arith.constant 0 : index
    %4 = vector.load %arg3[%c0_4, %c0_5] : memref<1x32xf32, #tpu.memory_space<vmem>>, vector<1x32xf32>
    %5 = vector.broadcast %4 : vector<1x32xf32> to vector<4096x32xf32>
    %6 = arith.mulf %3, %5 : vector<4096x32xf32>
    %c0_6 = arith.constant 0 : index
    %c0_7 = arith.constant 0 : index
    %7 = vector.load %arg4[%c0_6, %c0_7] : memref<1x32xf32, #tpu.memory_space<vmem>>, vector<1x32xf32>
    %8 = vector.broadcast %7 : vector<1x32xf32> to vector<4096x32xf32>
    %9 = arith.addf %6, %8 : vector<4096x32xf32>
    %cst_8 = arith.constant 0.000000e+00 : f32
    %10 = vector.broadcast %cst_8 : f32 to vector<4096x32xf32>
    %11 = arith.maximumf %9, %10 : vector<4096x32xf32>
    %12 = vector.extract_strided_slice %11 {offsets = [0, 0], sizes = [1024, 32], strides = [1, 1]} : vector<4096x32xf32> to vector<1024x32xf32>
    %13 = vector.extract_strided_slice %11 {offsets = [1024, 0], sizes = [1024, 32], strides = [1, 1]} : vector<4096x32xf32> to vector<1024x32xf32>
    %14 = arith.maximumf %12, %13 : vector<1024x32xf32>
    %15 = vector.extract_strided_slice %11 {offsets = [2048, 0], sizes = [1024, 32], strides = [1, 1]} : vector<4096x32xf32> to vector<1024x32xf32>
    %16 = vector.extract_strided_slice %11 {offsets = [3072, 0], sizes = [1024, 32], strides = [1, 1]} : vector<4096x32xf32> to vector<1024x32xf32>
    %17 = arith.maximumf %15, %16 : vector<1024x32xf32>
    %18 = arith.maximumf %14, %17 : vector<1024x32xf32>
    %19 = arith.truncf %18 : vector<1024x32xf32> to vector<1024x32xbf16>
    %c0_9 = arith.constant 0 : index
    %c0_10 = arith.constant 0 : index
    %c0_11 = arith.constant 0 : index
    %20 = vector.load %arg5[%c0_9, %c0_10, %c0_11] : memref<1x1024x32xbf16, #tpu.memory_space<vmem>>, vector<1x1024x32xbf16>
    %21 = vector.shape_cast %20 : vector<1x1024x32xbf16> to vector<1024x32xbf16>
    %22 = vector.shape_cast %19 : vector<1024x32xbf16> to vector<1x1024x32xbf16>
    tpu.vector_store %arg5[%c0_9, %c0_10, %c0_11], %22 {strides = array<i32>} : memref<1x1024x32xbf16, #tpu.memory_space<vmem>>, vector<1x1024x32xbf16>,
    return
  }
  func.func @transform_0(%arg0: i32) -> (i32, i32, i32) {
    %c0_i32 = arith.constant 0 : i32
    %c0_i32_0 = arith.constant 0 : i32
    %c0_i32_1 = arith.constant 0 : i32
    return %arg0, %c0_i32, %c0_i32_0 : i32, i32, i32
  }
  func.func @transform_1(%arg0: i32) -> (i32, i32) {
    %c0_i32 = arith.constant 0 : i32
    %c0_i32_0 = arith.constant 0 : i32
    %c0_i32_1 = arith.constant 0 : i32
    return %c0_i32, %c0_i32_0 : i32, i32
  }
  func.func @transform_2(%arg0: i32) -> (i32, i32) {
    %c0_i32 = arith.constant 0 : i32
    %c0_i32_0 = arith.constant 0 : i32
    %c0_i32_1 = arith.constant 0 : i32
    return %c0_i32, %c0_i32_0 : i32, i32
  }
  func.func @transform_3(%arg0: i32) -> (i32, i32) {
    %c0_i32 = arith.constant 0 : i32
    %c0_i32_0 = arith.constant 0 : i32
    %c0_i32_1 = arith.constant 0 : i32
    return %c0_i32, %c0_i32_0 : i32, i32
  }
  func.func @transform_4(%arg0: i32) -> (i32, i32, i32) {
    %c0_i32 = arith.constant 0 : i32
    %c0_i32_0 = arith.constant 0 : i32
    %c0_i32_1 = arith.constant 0 : i32
    return %arg0, %c0_i32, %c0_i32_0 : i32, i32, i32
  }
}

module attributes {stable_mosaic.version = 11 : i64} {
  func.func @_conv_pool_kernel(%arg0: i32, %arg1: memref<1x1024x288xbf16, #tpu.memory_space<vmem>>, %arg2: memref<288x32xbf16, #tpu.memory_space<vmem>>, %arg3: memref<1x32xf32, #tpu.memory_space<vmem>>, %arg4: memref<1x32xf32, #tpu.memory_space<vmem>>, %arg5: memref<1x256x32xbf16, #tpu.memory_space<vmem>>) attributes {dimension_semantics = [#tpu.dimension_semantics<parallel>], iteration_bounds = array<i64: 2>, scalar_prefetch = 0 : i64, scratch_operands = 0 : i64, tpu.core_type = #tpu.core_type<tc>, window_params = [{transform_indices = @transform_0, window_bounds = array<i64: 1, 1024, 288>}, {pipeline_mode = #tpu.pipeline_mode<synchronous>, transform_indices = @transform_1, window_bounds = array<i64: 288, 32>}, {pipeline_mode = #tpu.pipeline_mode<synchronous>, transform_indices = @transform_2, window_bounds = array<i64: 1, 32>}, {pipeline_mode = #tpu.pipeline_mode<synchronous>, transform_indices = @transform_3, window_bounds = array<i64: 1, 32>}, {transform_indices = @transform_4, window_bounds = array<i64: 1, 256, 32>}]} {
    %c0 = arith.constant 0 : index
    %c0_0 = arith.constant 0 : index
    %c0_1 = arith.constant 0 : index
    %0 = vector.load %arg1[%c0, %c0_0, %c0_1] : memref<1x1024x288xbf16, #tpu.memory_space<vmem>>, vector<1x1024x288xbf16>
    %1 = vector.shape_cast %0 : vector<1x1024x288xbf16> to vector<1024x288xbf16>
    %c0_2 = arith.constant 0 : index
    %c0_3 = arith.constant 0 : index
    %2 = vector.load %arg2[%c0_2, %c0_3] : memref<288x32xbf16, #tpu.memory_space<vmem>>, vector<288x32xbf16>
    %cst = arith.constant dense<0.000000e+00> : vector<1024x32xf32>
    %3 = tpu.matmul %1, %2, %cst {dimension_numbers = #tpu.dot_dimension_numbers<[1], [0], [0], [1], [0, 0, 1, 1], [], []>} : vector<1024x288xbf16>, vector<288x32xbf16>, vector<1024x32xf32> -> vector<1024x32xf32>
    %c0_4 = arith.constant 0 : index
    %c0_5 = arith.constant 0 : index
    %4 = vector.load %arg3[%c0_4, %c0_5] : memref<1x32xf32, #tpu.memory_space<vmem>>, vector<1x32xf32>
    %5 = vector.broadcast %4 : vector<1x32xf32> to vector<1024x32xf32>
    %6 = arith.mulf %3, %5 : vector<1024x32xf32>
    %c0_6 = arith.constant 0 : index
    %c0_7 = arith.constant 0 : index
    %7 = vector.load %arg4[%c0_6, %c0_7] : memref<1x32xf32, #tpu.memory_space<vmem>>, vector<1x32xf32>
    %8 = vector.broadcast %7 : vector<1x32xf32> to vector<1024x32xf32>
    %9 = arith.addf %6, %8 : vector<1024x32xf32>
    %cst_8 = arith.constant 0.000000e+00 : f32
    %10 = vector.broadcast %cst_8 : f32 to vector<1024x32xf32>
    %11 = arith.maximumf %9, %10 : vector<1024x32xf32>
    %12 = vector.extract_strided_slice %11 {offsets = [0, 0], sizes = [256, 32], strides = [1, 1]} : vector<1024x32xf32> to vector<256x32xf32>
    %13 = vector.extract_strided_slice %11 {offsets = [256, 0], sizes = [256, 32], strides = [1, 1]} : vector<1024x32xf32> to vector<256x32xf32>
    %14 = arith.maximumf %12, %13 : vector<256x32xf32>
    %15 = vector.extract_strided_slice %11 {offsets = [512, 0], sizes = [256, 32], strides = [1, 1]} : vector<1024x32xf32> to vector<256x32xf32>
    %16 = vector.extract_strided_slice %11 {offsets = [768, 0], sizes = [256, 32], strides = [1, 1]} : vector<1024x32xf32> to vector<256x32xf32>
    %17 = arith.maximumf %15, %16 : vector<256x32xf32>
    %18 = arith.maximumf %14, %17 : vector<256x32xf32>
    %19 = arith.truncf %18 : vector<256x32xf32> to vector<256x32xbf16>
    %c0_9 = arith.constant 0 : index
    %c0_10 = arith.constant 0 : index
    %c0_11 = arith.constant 0 : index
    %20 = vector.load %arg5[%c0_9, %c0_10, %c0_11] : memref<1x256x32xbf16, #tpu.memory_space<vmem>>, vector<1x256x32xbf16>
    %21 = vector.shape_cast %20 : vector<1x256x32xbf16> to vector<256x32xbf16>
    %22 = vector.shape_cast %19 : vector<256x32xbf16> to vector<1x256x32xbf16>
    tpu.vector_store %arg5[%c0_9, %c0_10, %c0_11], %22 {strides = array<i32>} : memref<1x256x32xbf16, #tpu.memory_space<vmem>>, vector<1x256x32xbf16>,
    return
  }
  func.func @transform_0(%arg0: i32) -> (i32, i32, i32) {
    %c0_i32 = arith.constant 0 : i32
    %c0_i32_0 = arith.constant 0 : i32
    %c0_i32_1 = arith.constant 0 : i32
    return %arg0, %c0_i32, %c0_i32_0 : i32, i32, i32
  }
  func.func @transform_1(%arg0: i32) -> (i32, i32) {
    %c0_i32 = arith.constant 0 : i32
    %c0_i32_0 = arith.constant 0 : i32
    %c0_i32_1 = arith.constant 0 : i32
    return %c0_i32, %c0_i32_0 : i32, i32
  }
  func.func @transform_2(%arg0: i32) -> (i32, i32) {
    %c0_i32 = arith.constant 0 : i32
    %c0_i32_0 = arith.constant 0 : i32
    %c0_i32_1 = arith.constant 0 : i32
    return %c0_i32, %c0_i32_0 : i32, i32
  }
  func.func @transform_3(%arg0: i32) -> (i32, i32) {
    %c0_i32 = arith.constant 0 : i32
    %c0_i32_0 = arith.constant 0 : i32
    %c0_i32_1 = arith.constant 0 : i32
    return %c0_i32, %c0_i32_0 : i32, i32
  }
  func.func @transform_4(%arg0: i32) -> (i32, i32, i32) {
    %c0_i32 = arith.constant 0 : i32
    %c0_i32_0 = arith.constant 0 : i32
    %c0_i32_1 = arith.constant 0 : i32
    return %arg0, %c0_i32, %c0_i32_0 : i32, i32, i32
  }
}

module attributes {stable_mosaic.version = 11 : i64} {
  func.func @_conv_pool_kernel(%arg0: i32, %arg1: memref<1x256x288xbf16, #tpu.memory_space<vmem>>, %arg2: memref<288x32xbf16, #tpu.memory_space<vmem>>, %arg3: memref<1x32xf32, #tpu.memory_space<vmem>>, %arg4: memref<1x32xf32, #tpu.memory_space<vmem>>, %arg5: memref<1x64x32xbf16, #tpu.memory_space<vmem>>) attributes {dimension_semantics = [#tpu.dimension_semantics<parallel>], iteration_bounds = array<i64: 2>, scalar_prefetch = 0 : i64, scratch_operands = 0 : i64, tpu.core_type = #tpu.core_type<tc>, window_params = [{transform_indices = @transform_0, window_bounds = array<i64: 1, 256, 288>}, {pipeline_mode = #tpu.pipeline_mode<synchronous>, transform_indices = @transform_1, window_bounds = array<i64: 288, 32>}, {pipeline_mode = #tpu.pipeline_mode<synchronous>, transform_indices = @transform_2, window_bounds = array<i64: 1, 32>}, {pipeline_mode = #tpu.pipeline_mode<synchronous>, transform_indices = @transform_3, window_bounds = array<i64: 1, 32>}, {transform_indices = @transform_4, window_bounds = array<i64: 1, 64, 32>}]} {
    %c0 = arith.constant 0 : index
    %c0_0 = arith.constant 0 : index
    %c0_1 = arith.constant 0 : index
    %0 = vector.load %arg1[%c0, %c0_0, %c0_1] : memref<1x256x288xbf16, #tpu.memory_space<vmem>>, vector<1x256x288xbf16>
    %1 = vector.shape_cast %0 : vector<1x256x288xbf16> to vector<256x288xbf16>
    %c0_2 = arith.constant 0 : index
    %c0_3 = arith.constant 0 : index
    %2 = vector.load %arg2[%c0_2, %c0_3] : memref<288x32xbf16, #tpu.memory_space<vmem>>, vector<288x32xbf16>
    %cst = arith.constant dense<0.000000e+00> : vector<256x32xf32>
    %3 = tpu.matmul %1, %2, %cst {dimension_numbers = #tpu.dot_dimension_numbers<[1], [0], [0], [1], [0, 0, 1, 1], [], []>} : vector<256x288xbf16>, vector<288x32xbf16>, vector<256x32xf32> -> vector<256x32xf32>
    %c0_4 = arith.constant 0 : index
    %c0_5 = arith.constant 0 : index
    %4 = vector.load %arg3[%c0_4, %c0_5] : memref<1x32xf32, #tpu.memory_space<vmem>>, vector<1x32xf32>
    %5 = vector.broadcast %4 : vector<1x32xf32> to vector<256x32xf32>
    %6 = arith.mulf %3, %5 : vector<256x32xf32>
    %c0_6 = arith.constant 0 : index
    %c0_7 = arith.constant 0 : index
    %7 = vector.load %arg4[%c0_6, %c0_7] : memref<1x32xf32, #tpu.memory_space<vmem>>, vector<1x32xf32>
    %8 = vector.broadcast %7 : vector<1x32xf32> to vector<256x32xf32>
    %9 = arith.addf %6, %8 : vector<256x32xf32>
    %cst_8 = arith.constant 0.000000e+00 : f32
    %10 = vector.broadcast %cst_8 : f32 to vector<256x32xf32>
    %11 = arith.maximumf %9, %10 : vector<256x32xf32>
    %12 = vector.extract_strided_slice %11 {offsets = [0, 0], sizes = [64, 32], strides = [1, 1]} : vector<256x32xf32> to vector<64x32xf32>
    %13 = vector.extract_strided_slice %11 {offsets = [64, 0], sizes = [64, 32], strides = [1, 1]} : vector<256x32xf32> to vector<64x32xf32>
    %14 = arith.maximumf %12, %13 : vector<64x32xf32>
    %15 = vector.extract_strided_slice %11 {offsets = [128, 0], sizes = [64, 32], strides = [1, 1]} : vector<256x32xf32> to vector<64x32xf32>
    %16 = vector.extract_strided_slice %11 {offsets = [192, 0], sizes = [64, 32], strides = [1, 1]} : vector<256x32xf32> to vector<64x32xf32>
    %17 = arith.maximumf %15, %16 : vector<64x32xf32>
    %18 = arith.maximumf %14, %17 : vector<64x32xf32>
    %19 = arith.truncf %18 : vector<64x32xf32> to vector<64x32xbf16>
    %c0_9 = arith.constant 0 : index
    %c0_10 = arith.constant 0 : index
    %c0_11 = arith.constant 0 : index
    %20 = vector.load %arg5[%c0_9, %c0_10, %c0_11] : memref<1x64x32xbf16, #tpu.memory_space<vmem>>, vector<1x64x32xbf16>
    %21 = vector.shape_cast %20 : vector<1x64x32xbf16> to vector<64x32xbf16>
    %22 = vector.shape_cast %19 : vector<64x32xbf16> to vector<1x64x32xbf16>
    tpu.vector_store %arg5[%c0_9, %c0_10, %c0_11], %22 {strides = array<i32>} : memref<1x64x32xbf16, #tpu.memory_space<vmem>>, vector<1x64x32xbf16>,
    return
  }
  func.func @transform_0(%arg0: i32) -> (i32, i32, i32) {
    %c0_i32 = arith.constant 0 : i32
    %c0_i32_0 = arith.constant 0 : i32
    %c0_i32_1 = arith.constant 0 : i32
    return %arg0, %c0_i32, %c0_i32_0 : i32, i32, i32
  }
  func.func @transform_1(%arg0: i32) -> (i32, i32) {
    %c0_i32 = arith.constant 0 : i32
    %c0_i32_0 = arith.constant 0 : i32
    %c0_i32_1 = arith.constant 0 : i32
    return %c0_i32, %c0_i32_0 : i32, i32
  }
  func.func @transform_2(%arg0: i32) -> (i32, i32) {
    %c0_i32 = arith.constant 0 : i32
    %c0_i32_0 = arith.constant 0 : i32
    %c0_i32_1 = arith.constant 0 : i32
    return %c0_i32, %c0_i32_0 : i32, i32
  }
  func.func @transform_3(%arg0: i32) -> (i32, i32) {
    %c0_i32 = arith.constant 0 : i32
    %c0_i32_0 = arith.constant 0 : i32
    %c0_i32_1 = arith.constant 0 : i32
    return %c0_i32, %c0_i32_0 : i32, i32
  }
  func.func @transform_4(%arg0: i32) -> (i32, i32, i32) {
    %c0_i32 = arith.constant 0 : i32
    %c0_i32_0 = arith.constant 0 : i32
    %c0_i32_1 = arith.constant 0 : i32
    return %arg0, %c0_i32, %c0_i32_0 : i32, i32, i32
  }
}

module attributes {stable_mosaic.version = 11 : i64} {
  func.func @_conv_pool_kernel(%arg0: i32, %arg1: memref<1x64x288xbf16, #tpu.memory_space<vmem>>, %arg2: memref<288x32xbf16, #tpu.memory_space<vmem>>, %arg3: memref<1x32xf32, #tpu.memory_space<vmem>>, %arg4: memref<1x32xf32, #tpu.memory_space<vmem>>, %arg5: memref<1x16x32xbf16, #tpu.memory_space<vmem>>) attributes {dimension_semantics = [#tpu.dimension_semantics<parallel>], iteration_bounds = array<i64: 2>, scalar_prefetch = 0 : i64, scratch_operands = 0 : i64, tpu.core_type = #tpu.core_type<tc>, window_params = [{transform_indices = @transform_0, window_bounds = array<i64: 1, 64, 288>}, {pipeline_mode = #tpu.pipeline_mode<synchronous>, transform_indices = @transform_1, window_bounds = array<i64: 288, 32>}, {pipeline_mode = #tpu.pipeline_mode<synchronous>, transform_indices = @transform_2, window_bounds = array<i64: 1, 32>}, {pipeline_mode = #tpu.pipeline_mode<synchronous>, transform_indices = @transform_3, window_bounds = array<i64: 1, 32>}, {transform_indices = @transform_4, window_bounds = array<i64: 1, 16, 32>}]} {
    %c0 = arith.constant 0 : index
    %c0_0 = arith.constant 0 : index
    %c0_1 = arith.constant 0 : index
    %0 = vector.load %arg1[%c0, %c0_0, %c0_1] : memref<1x64x288xbf16, #tpu.memory_space<vmem>>, vector<1x64x288xbf16>
    %1 = vector.shape_cast %0 : vector<1x64x288xbf16> to vector<64x288xbf16>
    %c0_2 = arith.constant 0 : index
    %c0_3 = arith.constant 0 : index
    %2 = vector.load %arg2[%c0_2, %c0_3] : memref<288x32xbf16, #tpu.memory_space<vmem>>, vector<288x32xbf16>
    %cst = arith.constant dense<0.000000e+00> : vector<64x32xf32>
    %3 = tpu.matmul %1, %2, %cst {dimension_numbers = #tpu.dot_dimension_numbers<[1], [0], [0], [1], [0, 0, 1, 1], [], []>} : vector<64x288xbf16>, vector<288x32xbf16>, vector<64x32xf32> -> vector<64x32xf32>
    %c0_4 = arith.constant 0 : index
    %c0_5 = arith.constant 0 : index
    %4 = vector.load %arg3[%c0_4, %c0_5] : memref<1x32xf32, #tpu.memory_space<vmem>>, vector<1x32xf32>
    %5 = vector.broadcast %4 : vector<1x32xf32> to vector<64x32xf32>
    %6 = arith.mulf %3, %5 : vector<64x32xf32>
    %c0_6 = arith.constant 0 : index
    %c0_7 = arith.constant 0 : index
    %7 = vector.load %arg4[%c0_6, %c0_7] : memref<1x32xf32, #tpu.memory_space<vmem>>, vector<1x32xf32>
    %8 = vector.broadcast %7 : vector<1x32xf32> to vector<64x32xf32>
    %9 = arith.addf %6, %8 : vector<64x32xf32>
    %cst_8 = arith.constant 0.000000e+00 : f32
    %10 = vector.broadcast %cst_8 : f32 to vector<64x32xf32>
    %11 = arith.maximumf %9, %10 : vector<64x32xf32>
    %12 = vector.extract_strided_slice %11 {offsets = [0, 0], sizes = [16, 32], strides = [1, 1]} : vector<64x32xf32> to vector<16x32xf32>
    %13 = vector.extract_strided_slice %11 {offsets = [16, 0], sizes = [16, 32], strides = [1, 1]} : vector<64x32xf32> to vector<16x32xf32>
    %14 = arith.maximumf %12, %13 : vector<16x32xf32>
    %15 = vector.extract_strided_slice %11 {offsets = [32, 0], sizes = [16, 32], strides = [1, 1]} : vector<64x32xf32> to vector<16x32xf32>
    %16 = vector.extract_strided_slice %11 {offsets = [48, 0], sizes = [16, 32], strides = [1, 1]} : vector<64x32xf32> to vector<16x32xf32>
    %17 = arith.maximumf %15, %16 : vector<16x32xf32>
    %18 = arith.maximumf %14, %17 : vector<16x32xf32>
    %19 = arith.truncf %18 : vector<16x32xf32> to vector<16x32xbf16>
    %c0_9 = arith.constant 0 : index
    %c0_10 = arith.constant 0 : index
    %c0_11 = arith.constant 0 : index
    %20 = vector.load %arg5[%c0_9, %c0_10, %c0_11] : memref<1x16x32xbf16, #tpu.memory_space<vmem>>, vector<1x16x32xbf16>
    %21 = vector.shape_cast %20 : vector<1x16x32xbf16> to vector<16x32xbf16>
    %22 = vector.shape_cast %19 : vector<16x32xbf16> to vector<1x16x32xbf16>
    tpu.vector_store %arg5[%c0_9, %c0_10, %c0_11], %22 {strides = array<i32>} : memref<1x16x32xbf16, #tpu.memory_space<vmem>>, vector<1x16x32xbf16>,
    return
  }
  func.func @transform_0(%arg0: i32) -> (i32, i32, i32) {
    %c0_i32 = arith.constant 0 : i32
    %c0_i32_0 = arith.constant 0 : i32
    %c0_i32_1 = arith.constant 0 : i32
    return %arg0, %c0_i32, %c0_i32_0 : i32, i32, i32
  }
  func.func @transform_1(%arg0: i32) -> (i32, i32) {
    %c0_i32 = arith.constant 0 : i32
    %c0_i32_0 = arith.constant 0 : i32
    %c0_i32_1 = arith.constant 0 : i32
    return %c0_i32, %c0_i32_0 : i32, i32
  }
  func.func @transform_2(%arg0: i32) -> (i32, i32) {
    %c0_i32 = arith.constant 0 : i32
    %c0_i32_0 = arith.constant 0 : i32
    %c0_i32_1 = arith.constant 0 : i32
    return %c0_i32, %c0_i32_0 : i32, i32
  }
  func.func @transform_3(%arg0: i32) -> (i32, i32) {
    %c0_i32 = arith.constant 0 : i32
    %c0_i32_0 = arith.constant 0 : i32
    %c0_i32_1 = arith.constant 0 : i32
    return %c0_i32, %c0_i32_0 : i32, i32
  }
  func.func @transform_4(%arg0: i32) -> (i32, i32, i32) {
    %c0_i32 = arith.constant 0 : i32
    %c0_i32_0 = arith.constant 0 : i32
    %c0_i32_1 = arith.constant 0 : i32
    return %arg0, %c0_i32, %c0_i32_0 : i32, i32, i32
  }
}

module attributes {stable_mosaic.version = 11 : i64} {
  func.func @_conv_pool_kernel(%arg0: i32, %arg1: memref<1x16x288xbf16, #tpu.memory_space<vmem>>, %arg2: memref<288x32xbf16, #tpu.memory_space<vmem>>, %arg3: memref<1x32xf32, #tpu.memory_space<vmem>>, %arg4: memref<1x32xf32, #tpu.memory_space<vmem>>, %arg5: memref<1x4x32xbf16, #tpu.memory_space<vmem>>) attributes {dimension_semantics = [#tpu.dimension_semantics<parallel>], iteration_bounds = array<i64: 2>, scalar_prefetch = 0 : i64, scratch_operands = 0 : i64, tpu.core_type = #tpu.core_type<tc>, window_params = [{transform_indices = @transform_0, window_bounds = array<i64: 1, 16, 288>}, {pipeline_mode = #tpu.pipeline_mode<synchronous>, transform_indices = @transform_1, window_bounds = array<i64: 288, 32>}, {pipeline_mode = #tpu.pipeline_mode<synchronous>, transform_indices = @transform_2, window_bounds = array<i64: 1, 32>}, {pipeline_mode = #tpu.pipeline_mode<synchronous>, transform_indices = @transform_3, window_bounds = array<i64: 1, 32>}, {transform_indices = @transform_4, window_bounds = array<i64: 1, 4, 32>}]} {
    %c0 = arith.constant 0 : index
    %c0_0 = arith.constant 0 : index
    %c0_1 = arith.constant 0 : index
    %0 = vector.load %arg1[%c0, %c0_0, %c0_1] : memref<1x16x288xbf16, #tpu.memory_space<vmem>>, vector<1x16x288xbf16>
    %1 = vector.shape_cast %0 : vector<1x16x288xbf16> to vector<16x288xbf16>
    %c0_2 = arith.constant 0 : index
    %c0_3 = arith.constant 0 : index
    %2 = vector.load %arg2[%c0_2, %c0_3] : memref<288x32xbf16, #tpu.memory_space<vmem>>, vector<288x32xbf16>
    %cst = arith.constant dense<0.000000e+00> : vector<16x32xf32>
    %3 = tpu.matmul %1, %2, %cst {dimension_numbers = #tpu.dot_dimension_numbers<[1], [0], [0], [1], [0, 0, 1, 1], [], []>} : vector<16x288xbf16>, vector<288x32xbf16>, vector<16x32xf32> -> vector<16x32xf32>
    %c0_4 = arith.constant 0 : index
    %c0_5 = arith.constant 0 : index
    %4 = vector.load %arg3[%c0_4, %c0_5] : memref<1x32xf32, #tpu.memory_space<vmem>>, vector<1x32xf32>
    %5 = vector.broadcast %4 : vector<1x32xf32> to vector<16x32xf32>
    %6 = arith.mulf %3, %5 : vector<16x32xf32>
    %c0_6 = arith.constant 0 : index
    %c0_7 = arith.constant 0 : index
    %7 = vector.load %arg4[%c0_6, %c0_7] : memref<1x32xf32, #tpu.memory_space<vmem>>, vector<1x32xf32>
    %8 = vector.broadcast %7 : vector<1x32xf32> to vector<16x32xf32>
    %9 = arith.addf %6, %8 : vector<16x32xf32>
    %cst_8 = arith.constant 0.000000e+00 : f32
    %10 = vector.broadcast %cst_8 : f32 to vector<16x32xf32>
    %11 = arith.maximumf %9, %10 : vector<16x32xf32>
    %12 = vector.extract_strided_slice %11 {offsets = [0, 0], sizes = [4, 32], strides = [1, 1]} : vector<16x32xf32> to vector<4x32xf32>
    %13 = vector.extract_strided_slice %11 {offsets = [4, 0], sizes = [4, 32], strides = [1, 1]} : vector<16x32xf32> to vector<4x32xf32>
    %14 = arith.maximumf %12, %13 : vector<4x32xf32>
    %15 = vector.extract_strided_slice %11 {offsets = [8, 0], sizes = [4, 32], strides = [1, 1]} : vector<16x32xf32> to vector<4x32xf32>
    %16 = vector.extract_strided_slice %11 {offsets = [12, 0], sizes = [4, 32], strides = [1, 1]} : vector<16x32xf32> to vector<4x32xf32>
    %17 = arith.maximumf %15, %16 : vector<4x32xf32>
    %18 = arith.maximumf %14, %17 : vector<4x32xf32>
    %19 = arith.truncf %18 : vector<4x32xf32> to vector<4x32xbf16>
    %c0_9 = arith.constant 0 : index
    %c0_10 = arith.constant 0 : index
    %c0_11 = arith.constant 0 : index
    %20 = vector.load %arg5[%c0_9, %c0_10, %c0_11] : memref<1x4x32xbf16, #tpu.memory_space<vmem>>, vector<1x4x32xbf16>
    %21 = vector.shape_cast %20 : vector<1x4x32xbf16> to vector<4x32xbf16>
    %22 = vector.shape_cast %19 : vector<4x32xbf16> to vector<1x4x32xbf16>
    tpu.vector_store %arg5[%c0_9, %c0_10, %c0_11], %22 {strides = array<i32>} : memref<1x4x32xbf16, #tpu.memory_space<vmem>>, vector<1x4x32xbf16>,
    return
  }
  func.func @transform_0(%arg0: i32) -> (i32, i32, i32) {
    %c0_i32 = arith.constant 0 : i32
    %c0_i32_0 = arith.constant 0 : i32
    %c0_i32_1 = arith.constant 0 : i32
    return %arg0, %c0_i32, %c0_i32_0 : i32, i32, i32
  }
  func.func @transform_1(%arg0: i32) -> (i32, i32) {
    %c0_i32 = arith.constant 0 : i32
    %c0_i32_0 = arith.constant 0 : i32
    %c0_i32_1 = arith.constant 0 : i32
    return %c0_i32, %c0_i32_0 : i32, i32
  }
  func.func @transform_2(%arg0: i32) -> (i32, i32) {
    %c0_i32 = arith.constant 0 : i32
    %c0_i32_0 = arith.constant 0 : i32
    %c0_i32_1 = arith.constant 0 : i32
    return %c0_i32, %c0_i32_0 : i32, i32
  }
  func.func @transform_3(%arg0: i32) -> (i32, i32) {
    %c0_i32 = arith.constant 0 : i32
    %c0_i32_0 = arith.constant 0 : i32
    %c0_i32_1 = arith.constant 0 : i32
    return %c0_i32, %c0_i32_0 : i32, i32
  }
  func.func @transform_4(%arg0: i32) -> (i32, i32, i32) {
    %c0_i32 = arith.constant 0 : i32
    %c0_i32_0 = arith.constant 0 : i32
    %c0_i32_1 = arith.constant 0 : i32
    return %arg0, %c0_i32, %c0_i32_0 : i32, i32, i32
  }
}

module attributes {stable_mosaic.version = 11 : i64} {
  func.func @_linear_kernel(%arg0: i32, %arg1: memref<2x128xbf16, #tpu.memory_space<vmem>>, %arg2: memref<128x256xbf16, #tpu.memory_space<vmem>>, %arg3: memref<1x256xf32, #tpu.memory_space<vmem>>, %arg4: memref<2x256xf32, #tpu.memory_space<vmem>>) attributes {dimension_semantics = [#tpu.dimension_semantics<arbitrary>], iteration_bounds = array<i64: 1>, scalar_prefetch = 0 : i64, scratch_operands = 0 : i64, tpu.core_type = #tpu.core_type<tc>, window_params = [{pipeline_mode = #tpu.pipeline_mode<synchronous>, transform_indices = @transform_0, window_bounds = array<i64: 2, 128>}, {pipeline_mode = #tpu.pipeline_mode<synchronous>, transform_indices = @transform_1, window_bounds = array<i64: 128, 256>}, {pipeline_mode = #tpu.pipeline_mode<synchronous>, transform_indices = @transform_2, window_bounds = array<i64: 1, 256>}, {pipeline_mode = #tpu.pipeline_mode<synchronous>, transform_indices = @transform_3, window_bounds = array<i64: 2, 256>}]} {
    %c0 = arith.constant 0 : index
    %c0_0 = arith.constant 0 : index
    %0 = vector.load %arg1[%c0, %c0_0] : memref<2x128xbf16, #tpu.memory_space<vmem>>, vector<2x128xbf16>
    %c0_1 = arith.constant 0 : index
    %c0_2 = arith.constant 0 : index
    %1 = vector.load %arg2[%c0_1, %c0_2] : memref<128x256xbf16, #tpu.memory_space<vmem>>, vector<128x256xbf16>
    %cst = arith.constant dense<0.000000e+00> : vector<2x256xf32>
    %2 = tpu.matmul %0, %1, %cst {dimension_numbers = #tpu.dot_dimension_numbers<[1], [0], [0], [1], [0, 0, 1, 1], [], []>} : vector<2x128xbf16>, vector<128x256xbf16>, vector<2x256xf32> -> vector<2x256xf32>
    %c0_3 = arith.constant 0 : index
    %c0_4 = arith.constant 0 : index
    %3 = vector.load %arg3[%c0_3, %c0_4] : memref<1x256xf32, #tpu.memory_space<vmem>>, vector<1x256xf32>
    %4 = vector.broadcast %3 : vector<1x256xf32> to vector<2x256xf32>
    %5 = arith.addf %2, %4 : vector<2x256xf32>
    %c0_5 = arith.constant 0 : index
    %c0_6 = arith.constant 0 : index
    %6 = vector.load %arg4[%c0_5, %c0_6] : memref<2x256xf32, #tpu.memory_space<vmem>>, vector<2x256xf32>
    tpu.vector_store %arg4[%c0_5, %c0_6], %5 {strides = array<i32>} : memref<2x256xf32, #tpu.memory_space<vmem>>, vector<2x256xf32>,
    return
  }
  func.func @transform_0(%arg0: i32) -> (i32, i32) {
    %c0_i32 = arith.constant 0 : i32
    %c0_i32_0 = arith.constant 0 : i32
    %c0_i32_1 = arith.constant 0 : i32
    return %c0_i32, %c0_i32_0 : i32, i32
  }
  func.func @transform_1(%arg0: i32) -> (i32, i32) {
    %c0_i32 = arith.constant 0 : i32
    %c0_i32_0 = arith.constant 0 : i32
    %c0_i32_1 = arith.constant 0 : i32
    return %c0_i32, %c0_i32_0 : i32, i32
  }
  func.func @transform_2(%arg0: i32) -> (i32, i32) {
    %c0_i32 = arith.constant 0 : i32
    %c0_i32_0 = arith.constant 0 : i32
    %c0_i32_1 = arith.constant 0 : i32
    return %c0_i32, %c0_i32_0 : i32, i32
  }
  func.func @transform_3(%arg0: i32) -> (i32, i32) {
    %c0_i32 = arith.constant 0 : i32
    %c0_i32_0 = arith.constant 0 : i32
    %c0_i32_1 = arith.constant 0 : i32
    return %c0_i32, %c0_i32_0 : i32, i32
  }
}

</mosaic_0001>

<bundles_post_ra>
// kernel: deep2d_encoder_forward.6
= control target key start
LH: loop header
LB: loop body
LE: loop exit
PB: predicated region body
PF: predicated region fallthrough
CT: control target
= control target key end

     0   :  { %s9344_s15 = smov 0   ;;  %s13775_s0 = inlined_call_operand.vmem [shape: bf16[2,4096,16], index: 0, kind: input, shape index: {}]   ;;  %s13776_s1 = inlined_call_operand.vmem [shape: bf16[16,32], index: 1, kind: input, shape index: {}]   ;;  %s13777_s2 = inlined_call_operand.vmem [shape: f32[1,32], index: 2, kind: input, shape index: {}]   ;;  %s13778_s3 = inlined_call_operand.vmem [shape: f32[1,32], index: 3, kind: input, shape index: {}]   ;;  %s13779_s4 = inlined_call_operand.vmem [shape: bf16[2,1024,32], index: 4, kind: output, shape index: {}]  }
   0x1 LB: > { %s7479_s16 = sadd.s32 4294967295, %s9317_s15   ;;  %p7483_p0 = scmp.ge.s32.totalorder %s9317_s15, 1  ;;  %s9317_s15 = sphi %s9344_s15, %s14_s15  }
   0x2   : > { %p162_p1 = scmp.lt.s32.totalorder %s9317_s15, 3 }
   0x4   : > { %p163_p2 = pnand %p7483_p0, %p162_p1 }
   0x6   : > { %166 = sbr.rel (%p163_p2) target bundleno = 881 (0x371), region = 36 }
   0xd   : > { %v9044_v0 = vld [vmem:[%s13776_s1] sm:$0xff]   ;;  %p188_p3 = scmp.lt.s32.totalorder %s7479_s16, 1  ;;  %vm1999_vm0 = vcmask 130048   ;;  %vm7295_vm1 = vcmask 257024  }
   0xe   : > { %8520 = vmatprep.subr.bf16.mxu0 %v9044_v0  ;;  %9034 = vmatprep.subr.bf16.mxu1 %v9044_v0 }
   0xf   : > { %s14842_s16 = smov (!%p188_p3, %s7479_s16), 1  ;;  %8521 = vmatpush3.bf16.msra.mxu0 %v9044_v0  ;;  %9035 = vmatpush3.bf16.msra.mxu1 %v9044_v0 }
  0x10   : > { %s8133_s19 = sshll.u32 %s14842_s16, 11  ;;  %s8134_s9 = sshll.u32 %s14842_s16, 9 }
  0x11   : > { %s9361_s22 = scalar_lea.vmem %s13775_s0, %s8133_s19  ;;  %s11842_s12 = scalar_lea.vmem %s13779_s4, %s8134_s9 }
  0x12   : > { %v9045_v1 = vld [vmem:[%s9361_s22] sm:$0xff]   ;;  %v9047_v3 = vld [vmem:[%s9361_s22 + $0x8] sm:$0xff]   ;;  %v9049_v5 = vld [vmem:[%s9361_s22 + $0x10] sm:$0xff]  }
  0x13   : > { %v9046_v2 = vld [vmem:[%s9361_s22 + $0x400] sm:$0xff]   ;;  %8522 = vmatprep.mubr.msk.bf16.mxu0 %vm1999_vm0, %v9045_v1  ;;  %v9048_v4 = vld [vmem:[%s9361_s22 + $0x408] sm:$0xff]   ;;  %v9050_v6 = vld [vmem:[%s9361_s22 + $0x410] sm:$0xff]  }
  0x14   : > { %8778 = vmatprep.mubr.msk.bf16.mxu1 %vm1999_vm0, %v9046_v2  ;;  %8523 = vmatmul.mubr.msk.bf16.vlgmr.msra.gmra.mrb[0].mxu0 %vm1999_vm0, %v9047_v3  ;;  %v9051_v7 = vld [vmem:[%s9361_s22 + $0x18] sm:$0xff]   ;;  %v9053_v9 = vld [vmem:[%s9361_s22 + $0x20] sm:$0xff]   ;;  %v9055_v11 = vld [vmem:[%s9361_s22 + $0x28] sm:$0xff]  }
  0x15   : > { %8779 = vmatmul.mubr.msk.bf16.vlgmr.msra.gmra.mrb[0].mxu1 %vm1999_vm0, %v9048_v4  ;;  %8526 = vmatprep.mubr.msk.bf16.mxu0 %vm1999_vm0, %v9049_v5  ;;  %v9052_v8 = vld [vmem:[%s9361_s22 + $0x418] sm:$0xff]   ;;  %v9054_v10 = vld [vmem:[%s9361_s22 + $0x420] sm:$0xff]   ;;  %v9056_v12 = vld [vmem:[%s9361_s22 + $0x428] sm:$0xff]  }
  0x16   : > { %8782 = vmatprep.mubr.msk.bf16.mxu1 %vm1999_vm0, %v9050_v6  ;;  %v9057_v13 = vld [vmem:[%s9361_s22 + $0x30] sm:$0xff]   ;;  %v9059_v15 = vld [vmem:[%s9361_s22 + $0x38] sm:$0xff]   ;;  %v9061_v17 = vld [vmem:[%s9361_s22 + $0x40] sm:$0xff]  }
  0x17   : > { %v9058_v14 = vld [vmem:[%s9361_s22 + $0x430] sm:$0xff]   ;;  %v9060_v16 = vld [vmem:[%s9361_s22 + $0x438] sm:$0xff]   ;;  %v9062_v18 = vld [vmem:[%s9361_s22 + $0x440] sm:$0xff]  }
  0x18   : > { %v9063_v19 = vld [vmem:[%s9361_s22 + $0x48] sm:$0xff]   ;;  %v9065_v21 = vld [vmem:[%s9361_s22 + $0x50] sm:$0xff]   ;;  %v9067_v23 = vld [vmem:[%s9361_s22 + $0x58] sm:$0xff]  }
  0x19   : > { %v9064_v20 = vld [vmem:[%s9361_s22 + $0x448] sm:$0xff]   ;;  %v9066_v22 = vld [vmem:[%s9361_s22 + $0x450] sm:$0xff]   ;;  %v9068_v24 = vld [vmem:[%s9361_s22 + $0x458] sm:$0xff]  }
  0x1a   : > { %v9069_v25 = vld [vmem:[%s9361_s22 + $0x60] sm:$0xff]   ;;  %v9071_v27 = vld [vmem:[%s9361_s22 + $0x68] sm:$0xff]   ;;  %v9073_v29 = vld [vmem:[%s9361_s22 + $0x70] sm:$0xff]  }
  0x1b   : > { %v9070_v26 = vld [vmem:[%s9361_s22 + $0x460] sm:$0xff]   ;;  %v9072_v28 = vld [vmem:[%s9361_s22 + $0x468] sm:$0xff]   ;;  %v9074_v30 = vld [vmem:[%s9361_s22 + $0x470] sm:$0xff]  }
  0x1c   : > { %8527 = vmatmul.mubr.msk.bf16.gmra.mrb[4].mxu0 %vm1999_vm0, %v9051_v7  ;;  %v9075_v31 = vld [vmem:[%s9361_s22 + $0x78] sm:$0xff]   ;;  %v9077_v33 = vld [vmem:[%s9361_s22 + $0x80] sm:$0xff]   ;;  %v9079_v35 = vld [vmem:[%s9361_s22 + $0x88] sm:$0xff]  }
  0x1d   : > { %8783 = vmatmul.mubr.msk.bf16.gmra.mrb[4].mxu1 %vm1999_vm0, %v9052_v8  ;;  %8530 = vmatprep.mubr.msk.bf16.mxu0 %vm1999_vm0, %v9053_v9  ;;  %v9076_v32 = vld [vmem:[%s9361_s22 + $0x478] sm:$0xff]   ;;  %v9078_v34 = vld [vmem:[%s9361_s22 + $0x480] sm:$0xff]   ;;  %v9080_v36 = vld [vmem:[%s9361_s22 + $0x488] sm:$0xff]  }
  0x1e   : > { %8786 = vmatprep.mubr.msk.bf16.mxu1 %vm1999_vm0, %v9054_v10  ;;  %v9081_v37 = vld [vmem:[%s9361_s22 + $0x90] sm:$0xff]   ;;  %v9083_v39 = vld [vmem:[%s9361_s22 + $0x98] sm:$0xff]   ;;  %v9085_v41 = vld [vmem:[%s9361_s22 + $0xa0] sm:$0xff]  }
  0x1f   : > { %v9082_v38 = vld [vmem:[%s9361_s22 + $0x490] sm:$0xff]   ;;  %v9084_v40 = vld [vmem:[%s9361_s22 + $0x498] sm:$0xff]   ;;  %v9086_v42 = vld [vmem:[%s9361_s22 + $0x4a0] sm:$0xff]  }
  0x20   : > { %v9087_v43 = vld [vmem:[%s9361_s22 + $0xa8] sm:$0xff]   ;;  %v9089_v45 = vld [vmem:[%s9361_s22 + $0xb0] sm:$0xff]   ;;  %v9091_v47 = vld [vmem:[%s9361_s22 + $0xb8] sm:$0xff]  }
  0x21   : > { %v9088_v44 = vld [vmem:[%s9361_s22 + $0x4a8] sm:$0xff]   ;;  %v9090_v46 = vld [vmem:[%s9361_s22 + $0x4b0] sm:$0xff]   ;;  %v9092_v48 = vld [vmem:[%s9361_s22 + $0x4b8] sm:$0xff]  }
  0x22   : > { %v9093_v49 = vld [vmem:[%s9361_s22 + $0xc0] sm:$0xff]   ;;  %v9095_v51 = vld [vmem:[%s9361_s22 + $0xc8] sm:$0xff]   ;;  %v9097_v53 = vld [vmem:[%s9361_s22 + $0xd0] sm:$0xff]  }
  0x23   : > { %v9094_v50 = vld [vmem:[%s9361_s22 + $0x4c0] sm:$0xff]   ;;  %v9096_v52 = vld [vmem:[%s9361_s22 + $0x4c8] sm:$0xff]   ;;  %v9098_v54 = vld [vmem:[%s9361_s22 + $0x4d0] sm:$0xff]  }
  0x24   : > { %8531 = vmatmul.mubr.msk.bf16.gmra.mrb[8].mxu0 %vm1999_vm0, %v9055_v11  ;;  %v9099_v55 = vld [vmem:[%s9361_s22 + $0xd8] sm:$0xff]   ;;  %v9101_v57 = vld [vmem:[%s9361_s22 + $0xe0] sm:$0xff]   ;;  %v9103_v59 = vld [vmem:[%s9361_s22 + $0xe8] sm:$0xff]  }
  0x25   : > { %8787 = vmatmul.mubr.msk.bf16.gmra.mrb[8].mxu1 %vm1999_vm0, %v9056_v12  ;;  %8534 = vmatprep.mubr.msk.bf16.mxu0 %vm1999_vm0, %v9057_v13  ;;  %v9100_v56 = vld [vmem:[%s9361_s22 + $0x4d8] sm:$0xff]   ;;  %v9102_v58 = vld [vmem:[%s9361_s22 + $0x4e0] sm:$0xff]   ;;  %v9104_v60 = vld [vmem:[%s9361_s22 + $0x4e8] sm:$0xff]  }
  0x26   : > { %8790 = vmatprep.mubr.msk.bf16.mxu1 %vm1999_vm0, %v9058_v14  ;;  %v9105_v61 = vld [vmem:[%s9361_s22 + $0xf0] sm:$0xff]   ;;  %v9107_v63 = vld [vmem:[%s9361_s22 + $0xf8] sm:$0xff]   ;;  %v9109_v1 = vld [vmem:[%s9361_s22 + $0x100] sm:$0xff]  }
  0x27   : > { %v9106_v62 = vld [vmem:[%s9361_s22 + $0x4f0] sm:$0xff]   ;;  %v9108_v0 = vld [vmem:[%s9361_s22 + $0x4f8] sm:$0xff]   ;;  %v9110_v2 = vld [vmem:[%s9361_s22 + $0x500] sm:$0xff]  }
  0x28   : > { %v9111_v3 = vld [vmem:[%s9361_s22 + $0x108] sm:$0xff]   ;;  %v9113_v5 = vld [vmem:[%s9361_s22 + $0x110] sm:$0xff]   ;;  %v9115_v7 = vld [vmem:[%s9361_s22 + $0x118] sm:$0xff]  }
  0x29   : > { %v9112_v4 = vld [vmem:[%s9361_s22 + $0x508] sm:$0xff]   ;;  %v9114_v6 = vld [vmem:[%s9361_s22 + $0x510] sm:$0xff]   ;;  %v9116_v8 = vld [vmem:[%s9361_s22 + $0x518] sm:$0xff]  }
  0x2a   : > { %v9117_v9 = vld [vmem:[%s9361_s22 + $0x120] sm:$0xff]   ;;  %v9119_v11 = vld [vmem:[%s9361_s22 + $0x128] sm:$0xff]   ;;  %v9121_v13 = vld [vmem:[%s9361_s22 + $0x130] sm:$0xff]  }
  0x2b   : > { %v9118_v10 = vld [vmem:[%s9361_s22 + $0x520] sm:$0xff]   ;;  %v9120_v12 = vld [vmem:[%s9361_s22 + $0x528] sm:$0xff]   ;;  %v9122_v14 = vld [vmem:[%s9361_s22 + $0x530] sm:$0xff]  }
  0x2c   : > { %8535 = vmatmul.mubr.msk.bf16.gmra.mrb[12].mxu0 %vm1999_vm0, %v9059_v15  ;;  %v9123_v15 = vld [vmem:[%s9361_s22 + $0x138] sm:$0xff]  }
  0x2d   : > { %8791 = vmatmul.mubr.msk.bf16.gmra.mrb[12].mxu1 %vm1999_vm0, %v9060_v16  ;;  %8538 = vmatprep.mubr.msk.bf16.mxu0 %vm1999_vm0, %v9061_v17  ;;  %v9124_v16 = vld [vmem:[%s9361_s22 + $0x538] sm:$0xff]   ;;  %v9125_v17 = vld [vmem:[%s9361_s22 + $0x140] sm:$0xff]  }
  0x2e   : > { %8794 = vmatprep.mubr.msk.bf16.mxu1 %vm1999_vm0, %v9062_v18  ;;  %v9126_v18 = vld [vmem:[%s9361_s22 + $0x540] sm:$0xff]  }
  0x34   : > { %8539 = vmatmul.mubr.msk.bf16.gmra.mrb[16].mxu0 %vm1999_vm0, %v9063_v19  ;;  %v9127_v19 = vld [vmem:[%s9361_s22 + $0x148] sm:$0xff]  }
  0x35   : > { %8795 = vmatmul.mubr.msk.bf16.gmra.mrb[16].mxu1 %vm1999_vm0, %v9064_v20  ;;  %8542 = vmatprep.mubr.msk.bf16.mxu0 %vm1999_vm0, %v9065_v21  ;;  %v9128_v20 = vld [vmem:[%s9361_s22 + $0x548] sm:$0xff]   ;;  %v9129_v21 = vld [vmem:[%s9361_s22 + $0x150] sm:$0xff]  }
  0x36   : > { %8798 = vmatprep.mubr.msk.bf16.mxu1 %vm1999_vm0, %v9066_v22  ;;  %v9130_v22 = vld [vmem:[%s9361_s22 + $0x550] sm:$0xff]  }
  0x3c   : > { %8543 = vmatmul.mubr.msk.bf16.gmra.mrb[20].mxu0 %vm1999_vm0, %v9067_v23  ;;  %v9131_v23 = vld [vmem:[%s9361_s22 + $0x158] sm:$0xff]  }
  0x3d   : > { %8799 = vmatmul.mubr.msk.bf16.gmra.mrb[20].mxu1 %vm1999_vm0, %v9068_v24  ;;  %8546 = vmatprep.mubr.msk.bf16.mxu0 %vm1999_vm0, %v9069_v25  ;;  %v9132_v24 = vld [vmem:[%s9361_s22 + $0x558] sm:$0xff]   ;;  %v9133_v25 = vld [vmem:[%s9361_s22 + $0x160] sm:$0xff]  }
  0x3e   : > { %8802 = vmatprep.mubr.msk.bf16.mxu1 %vm1999_vm0, %v9070_v26  ;;  %v9134_v26 = vld [vmem:[%s9361_s22 + $0x560] sm:$0xff]  }
  0x44   : > { %8547 = vmatmul.mubr.msk.bf16.gmra.mrb[24].mxu0 %vm1999_vm0, %v9071_v27  ;;  %v9135_v27 = vld [vmem:[%s9361_s22 + $0x168] sm:$0xff]  }
  0x45   : > { %8803 = vmatmul.mubr.msk.bf16.gmra.mrb[24].mxu1 %vm1999_vm0, %v9072_v28  ;;  %8550 = vmatprep.mubr.msk.bf16.mxu0 %vm1999_vm0, %v9073_v29  ;;  %v9136_v28 = vld [vmem:[%s9361_s22 + $0x568] sm:$0xff]   ;;  %v9137_v29 = vld [vmem:[%s9361_s22 + $0x170] sm:$0xff]  }
  0x46   : > { %8806 = vmatprep.mubr.msk.bf16.mxu1 %vm1999_vm0, %v9074_v30  ;;  %v9138_v30 = vld [vmem:[%s9361_s22 + $0x570] sm:$0xff]  }
  0x4c   : > { %8551 = vmatmul.mubr.msk.bf16.gmra.mrb[28].mxu0 %vm1999_vm0, %v9075_v31  ;;  %v9139_v31 = vld [vmem:[%s9361_s22 + $0x178] sm:$0xff]  }
  0x4d   : > { %8807 = vmatmul.mubr.msk.bf16.gmra.mrb[28].mxu1 %vm1999_vm0, %v9076_v32  ;;  %8554 = vmatprep.mubr.msk.bf16.mxu0 %vm1999_vm0, %v9077_v33  ;;  %v9140_v32 = vld [vmem:[%s9361_s22 + $0x578] sm:$0xff]   ;;  %v9141_v33 = vld [vmem:[%s9361_s22 + $0x180] sm:$0xff]  }
  0x4e   : > { %8810 = vmatprep.mubr.msk.bf16.mxu1 %vm1999_vm0, %v9078_v34  ;;  %v9142_v34 = vld [vmem:[%s9361_s22 + $0x580] sm:$0xff]  }
  0x54   : > { %8555 = vmatmul.mubr.msk.bf16.gmra.mrb[32].mxu0 %vm1999_vm0, %v9079_v35  ;;  %v9143_v35 = vld [vmem:[%s9361_s22 + $0x188] sm:$0xff]  }
  0x55   : > { %8811 = vmatmul.mubr.msk.bf16.gmra.mrb[32].mxu1 %vm1999_vm0, %v9080_v36  ;;  %8558 = vmatprep.mubr.msk.bf16.mxu0 %vm1999_vm0, %v9081_v37  ;;  %v9144_v36 = vld [vmem:[%s9361_s22 + $0x588] sm:$0xff]   ;;  %v9145_v37 = vld [vmem:[%s9361_s22 + $0x190] sm:$0xff]  }
  0x56   : > { %8814 = vmatprep.mubr.msk.bf16.mxu1 %vm1999_vm0, %v9082_v38  ;;  %v9146_v38 = vld [vmem:[%s9361_s22 + $0x590] sm:$0xff]  }
  0x5c   : > { %8559 = vmatmul.mubr.msk.bf16.gmra.mrb[36].mxu0 %vm1999_vm0, %v9083_v39  ;;  %v9147_v39 = vld [vmem:[%s9361_s22 + $0x198] sm:$0xff]  }
  0x5d   : > { %8815 = vmatmul.mubr.msk.bf16.gmra.mrb[36].mxu1 %vm1999_vm0, %v9084_v40  ;;  %8562 = vmatprep.mubr.msk.bf16.mxu0 %vm1999_vm0, %v9085_v41  ;;  %v9148_v40 = vld [vmem:[%s9361_s22 + $0x598] sm:$0xff]   ;;  %v9149_v41 = vld [vmem:[%s9361_s22 + $0x1a0] sm:$0xff]  }
  0x5e   : > { %8818 = vmatprep.mubr.msk.bf16.mxu1 %vm1999_vm0, %v9086_v42  ;;  %v9150_v42 = vld [vmem:[%s9361_s22 + $0x5a0] sm:$0xff]  }
  0x64   : > { %8563 = vmatmul.mubr.msk.bf16.gmra.mrb[40].mxu0 %vm1999_vm0, %v9087_v43  ;;  %v9151_v43 = vld [vmem:[%s9361_s22 + $0x1a8] sm:$0xff]  }
  0x65   : > { %8819 = vmatmul.mubr.msk.bf16.gmra.mrb[40].mxu1 %vm1999_vm0, %v9088_v44  ;;  %8566 = vmatprep.mubr.msk.bf16.mxu0 %vm1999_vm0, %v9089_v45  ;;  %v9152_v44 = vld [vmem:[%s9361_s22 + $0x5a8] sm:$0xff]   ;;  %v9153_v45 = vld [vmem:[%s9361_s22 + $0x1b0] sm:$0xff]  }
  0x66   : > { %8822 = vmatprep.mubr.msk.bf16.mxu1 %vm1999_vm0, %v9090_v46  ;;  %v9154_v46 = vld [vmem:[%s9361_s22 + $0x5b0] sm:$0xff]  }
  0x6c   : > { %8567 = vmatmul.mubr.msk.bf16.gmra.mrb[44].mxu0 %vm1999_vm0, %v9091_v47  ;;  %v9155_v47 = vld [vmem:[%s9361_s22 + $0x1b8] sm:$0xff]  }
  0x6d   : > { %8823 = vmatmul.mubr.msk.bf16.gmra.mrb[44].mxu1 %vm1999_vm0, %v9092_v48  ;;  %8570 = vmatprep.mubr.msk.bf16.mxu0 %vm1999_vm0, %v9093_v49  ;;  %v9156_v49 = vld [vmem:[%s9361_s22 + $0x5b8] sm:$0xff]  }
  0x6e   : > { %8826 = vmatprep.mubr.msk.bf16.mxu1 %vm1999_vm0, %v9094_v50  ;;  %v9157_v50 = vld [vmem:[%s9361_s22 + $0x1c0] sm:$0xff]  }
  0x74   : > { %8571 = vmatmul.mubr.msk.bf16.gmra.mrb[48].mxu0 %vm1999_vm0, %v9095_v51 }
  0x75   : > { %8827 = vmatmul.mubr.msk.bf16.gmra.mrb[48].mxu1 %vm1999_vm0, %v9096_v52  ;;  %8574 = vmatprep.mubr.msk.bf16.mxu0 %vm1999_vm0, %v9097_v53 }
  0x76   : > { %8830 = vmatprep.mubr.msk.bf16.mxu1 %vm1999_vm0, %v9098_v54 }
  0x7c   : > { %8575 = vmatmul.mubr.msk.bf16.gmra.mrb[52].mxu0 %vm1999_vm0, %v9099_v55 }
  0x7d   : > { %8831 = vmatmul.mubr.msk.bf16.gmra.mrb[52].mxu1 %vm1999_vm0, %v9100_v56  ;;  %8578 = vmatprep.mubr.msk.bf16.mxu0 %vm1999_vm0, %v9101_v57  ;;  %v9158_v57 = vld [vmem:[%s9361_s22 + $0x5c0] sm:$0xff]  }
  0x7e   : > { %8834 = vmatprep.mubr.msk.bf16.mxu1 %vm1999_vm0, %v9102_v58 }
  0x84   : > { %8579 = vmatmul.mubr.msk.bf16.gmra.mrb[56].mxu0 %vm1999_vm0, %v9103_v59 }
  0x85   : > { %8835 = vmatmul.mubr.msk.bf16.gmra.mrb[56].mxu1 %vm1999_vm0, %v9104_v60  ;;  %8582 = vmatprep.mubr.msk.bf16.mxu0 %vm1999_vm0, %v9105_v61  ;;  %v9159_v60 = vld [vmem:[%s9361_s22 + $0x1c8] sm:$0xff]  }
  0x86   : > { %8838 = vmatprep.mubr.msk.bf16.mxu1 %vm1999_vm0, %v9106_v62 }
  0x8c   : > { %8583 = vmatmul.mubr.msk.bf16.gmra.mrb[60].mxu0 %vm1999_vm0, %v9107_v63  ;;  %v9160_v63 = vld [vmem:[%s9361_s22 + $0x5c8] sm:$0xff]  }
  0x8d   : > { %8839 = vmatmul.mubr.msk.bf16.gmra.mrb[60].mxu1 %vm1999_vm0, %v9108_v0  ;;  %8586 = vmatprep.mubr.msk.bf16.mxu0 %vm1999_vm0, %v9109_v1  ;;  %v9161_v0 = vld [vmem:[%s9361_s22 + $0x1d0] sm:$0xff]  }
  0x8e   : > { %8842 = vmatprep.mubr.msk.bf16.mxu1 %vm1999_vm0, %v9110_v2 }
  0x94   : > { %8587 = vmatmul.mubr.msk.bf16.gmra.mrb[64].mxu0 %vm1999_vm0, %v9111_v3 }
  0x95   : > { %8843 = vmatmul.mubr.msk.bf16.gmra.mrb[64].mxu1 %vm1999_vm0, %v9112_v4  ;;  %8590 = vmatprep.mubr.msk.bf16.mxu0 %vm1999_vm0, %v9113_v5  ;;  %v9162_v5 = vld [vmem:[%s9361_s22 + $0x5d0] sm:$0xff]  }
  0x96   : > { %8846 = vmatprep.mubr.msk.bf16.mxu1 %vm1999_vm0, %v9114_v6 }
  0x9c   : > { %8591 = vmatmul.mubr.msk.bf16.gmra.mrb[68].mxu0 %vm1999_vm0, %v9115_v7 }
  0x9d   : > { %8847 = vmatmul.mubr.msk.bf16.gmra.mrb[68].mxu1 %vm1999_vm0, %v9116_v8  ;;  %8594 = vmatprep.mubr.msk.bf16.mxu0 %vm1999_vm0, %v9117_v9  ;;  %v9163_v8 = vld [vmem:[%s9361_s22 + $0x1d8] sm:$0xff]  }
  0x9e   : > { %8850 = vmatprep.mubr.msk.bf16.mxu1 %vm1999_vm0, %v9118_v10 }
  0xa4   : > { %8595 = vmatmul.mubr.msk.bf16.gmra.mrb[72].mxu0 %vm1999_vm0, %v9119_v11  ;;  %v9164_v11 = vld [vmem:[%s9361_s22 + $0x5d8] sm:$0xff]  }
  0xa5   : > { %8851 = vmatmul.mubr.msk.bf16.gmra.mrb[72].mxu1 %vm1999_vm0, %v9120_v12  ;;  %8598 = vmatprep.mubr.msk.bf16.mxu0 %vm1999_vm0, %v9121_v13  ;;  %v9165_v12 = vld [vmem:[%s9361_s22 + $0x1e0] sm:$0xff]  }
  0xa6   : > { %8854 = vmatprep.mubr.msk.bf16.mxu1 %vm1999_vm0, %v9122_v14 }
  0xac   : > { %8599 = vmatmul.mubr.msk.bf16.gmra.mrb[76].mxu0 %vm1999_vm0, %v9123_v15 }
  0xad   : > { %8855 = vmatmul.mubr.msk.bf16.gmra.mrb[76].mxu1 %vm1999_vm0, %v9124_v16  ;;  %8602 = vmatprep.mubr.msk.bf16.mxu0 %vm1999_vm0, %v9125_v17  ;;  %v9166_v17 = vld [vmem:[%s9361_s22 + $0x5e0] sm:$0xff]  }
  0xae   : > { %8858 = vmatprep.mubr.msk.bf16.mxu1 %vm1999_vm0, %v9126_v18 }
  0xb4   : > { %8603 = vmatmul.mubr.msk.bf16.gmra.mrb[80].mxu0 %vm1999_vm0, %v9127_v19 }
  0xb5   : > { %8859 = vmatmul.mubr.msk.bf16.gmra.mrb[80].mxu1 %vm1999_vm0, %v9128_v20  ;;  %8606 = vmatprep.mubr.msk.bf16.mxu0 %vm1999_vm0, %v9129_v21 }
  0xb6   : > { %8862 = vmatprep.mubr.msk.bf16.mxu1 %vm1999_vm0, %v9130_v22  ;;  %v9167_v22 = vld [vmem:[%s9361_s22 + $0x1e8] sm:$0xff]  }
  0xbc   : > { %8607 = vmatmul.mubr.msk.bf16.gmra.mrb[84].mxu0 %vm1999_vm0, %v9131_v23 }
  0xbd   : > { %8863 = vmatmul.mubr.msk.bf16.gmra.mrb[84].mxu1 %vm1999_vm0, %v9132_v24  ;;  %8610 = vmatprep.mubr.msk.bf16.mxu0 %vm1999_vm0, %v9133_v25  ;;  %v9168_v25 = vld [vmem:[%s9361_s22 + $0x5e8] sm:$0xff]  }
  0xbe   : > { %8866 = vmatprep.mubr.msk.bf16.mxu1 %vm1999_vm0, %v9134_v26  ;;  %v9169_v26 = vld [vmem:[%s9361_s22 + $0x1f0] sm:$0xff]  }
  0xc4   : > { %8611 = vmatmul.mubr.msk.bf16.gmra.mrb[88].mxu0 %vm1999_vm0, %v9135_v27 }
  0xc5   : > { %8867 = vmatmul.mubr.msk.bf16.gmra.mrb[88].mxu1 %vm1999_vm0, %v9136_v28  ;;  %8614 = vmatprep.mubr.msk.bf16.mxu0 %vm1999_vm0, %v9137_v29  ;;  %v9170_v29 = vld [vmem:[%s9361_s22 + $0x5f0] sm:$0xff]  }
  0xc6   : > { %8870 = vmatprep.mubr.msk.bf16.mxu1 %vm1999_vm0, %v9138_v30 }
  0xcc   : > { %8615 = vmatmul.mubr.msk.bf16.gmra.mrb[92].mxu0 %vm1999_vm0, %v9139_v31 }
  0xcd   : > { %8871 = vmatmul.mubr.msk.bf16.gmra.mrb[92].mxu1 %vm1999_vm0, %v9140_v32  ;;  %8618 = vmatprep.mubr.msk.bf16.mxu0 %vm1999_vm0, %v9141_v33 }
  0xce   : > { %8874 = vmatprep.mubr.msk.bf16.mxu1 %vm1999_vm0, %v9142_v34  ;;  %v9171_v34 = vld [vmem:[%s9361_s22 + $0x1f8] sm:$0xff]  }
  0xd4   : > { %8619 = vmatmul.mubr.msk.bf16.gmra.mrb[96].mxu0 %vm1999_vm0, %v9143_v35 }
  0xd5   : > { %8875 = vmatmul.mubr.msk.bf16.gmra.mrb[96].mxu1 %vm1999_vm0, %v9144_v36  ;;  %8622 = vmatprep.mubr.msk.bf16.mxu0 %vm1999_vm0, %v9145_v37  ;;  %v9172_v37 = vld [vmem:[%s9361_s22 + $0x5f8] sm:$0xff]  }
  0xd6   : > { %8878 = vmatprep.mubr.msk.bf16.mxu1 %vm1999_vm0, %v9146_v38  ;;  %v9173_v38 = vld [vmem:[%s9361_s22 + $0x200] sm:$0xff]  }
  0xdc   : > { %8623 = vmatmul.mubr.msk.bf16.gmra.mrb[100].mxu0 %vm1999_vm0, %v9147_v39 }
  0xdd   : > { %8879 = vmatmul.mubr.msk.bf16.gmra.mrb[100].mxu1 %vm1999_vm0, %v9148_v40  ;;  %8626 = vmatprep.mubr.msk.bf16.mxu0 %vm1999_vm0, %v9149_v41  ;;  %v9174_v41 = vld [vmem:[%s9361_s22 + $0x600] sm:$0xff]  }
  0xde   : > { %8882 = vmatprep.mubr.msk.bf16.mxu1 %vm1999_vm0, %v9150_v42 }
  0xe4   : > { %8627 = vmatmul.mubr.msk.bf16.gmra.mrb[104].mxu0 %vm1999_vm0, %v9151_v43 }
  0xe5   : > { %8883 = vmatmul.mubr.msk.bf16.gmra.mrb[104].mxu1 %vm1999_vm0, %v9152_v44  ;;  %8630 = vmatprep.mubr.msk.bf16.mxu0 %vm1999_vm0, %v9153_v45 }
  0xe6   : > { %8886 = vmatprep.mubr.msk.bf16.mxu1 %vm1999_vm0, %v9154_v46  ;;  %v9175_v46 = vld [vmem:[%s9361_s22 + $0x208] sm:$0xff]  }
  0xe7   : > { %v9584_v48 = vpop.f32.mrb[0].mxu0 }
  0xe8   : > { %v9588_v51 = vpop.f32.mrb[0].mxu1  ;;  %v9590_v52 = vpop.f32.mrb[1].mxu0 }
  0xe9   : > { %v9592_v53 = vpop.f32.mrb[1].mxu1  ;;  %v9594_v54 = vpop.f32.mrb[2].mxu0 }
  0xea   : > { %v9596_v55 = vpop.f32.mrb[2].mxu1  ;;  %v9598_v56 = vpop.f32.mrb[3].mxu0 }
  0xeb   : > { %v9601_v58 = vpop.f32.mrb[3].mxu1 }
  0xec   : > { %8631 = vmatmul.mubr.msk.bf16.gmra.mrb[108].mxu0 %vm1999_vm0, %v9155_v47 }
  0xed   : > { %8887 = vmatmul.mubr.msk.bf16.gmra.mrb[108].mxu1 %vm1999_vm0, %v9156_v49  ;;  %8634 = vmatprep.mubr.msk.bf16.mxu0 %vm1999_vm0, %v9157_v50  ;;  %v9176_v50 = vld [vmem:[%s9361_s22 + $0x608] sm:$0xff]  }
  0xee   : > { %8890 = vmatprep.mubr.msk.bf16.mxu1 %vm1999_vm0, %v9158_v57  ;;  %v9177_v57 = vld [vmem:[%s9361_s22 + $0x210] sm:$0xff]  }
  0xef   : > { %v9607_v59 = vpop.f32.mrb[4].mxu0 }
  0xf0   : > { %v9610_v61 = vpop.f32.mrb[4].mxu1  ;;  %v9612_v62 = vpop.f32.mrb[5].mxu0 }
  0xf1   : > { %v9616_v1 = vpop.f32.mrb[5].mxu1  ;;  %v9618_v2 = vpop.f32.mrb[6].mxu0 }
  0xf2   : > { %v9620_v3 = vpop.f32.mrb[6].mxu1  ;;  %v9622_v4 = vpop.f32.mrb[7].mxu0 }
  0xf3   : > { %v9625_v6 = vpop.f32.mrb[7].mxu1 }
  0xf4   : > { %8635 = vmatmul.mubr.msk.bf16.gmra.mrb[112].mxu0 %vm1999_vm0, %v9159_v60 }
  0xf5   : > { %8891 = vmatmul.mubr.msk.bf16.gmra.mrb[112].mxu1 %vm1999_vm0, %v9160_v63  ;;  %8638 = vmatprep.mubr.msk.bf16.mxu0 %vm1999_vm0, %v9161_v0  ;;  %v9178_v0 = vld [vmem:[%s9361_s22 + $0x610] sm:$0xff]  }
  0xf6   : > { %8894 = vmatprep.mubr.msk.bf16.mxu1 %vm1999_vm0, %v9162_v5 }
  0xf7   : > { %v9631_v7 = vpop.f32.mrb[8].mxu0 }
  0xf8   : > { %v9634_v9 = vpop.f32.mrb[8].mxu1  ;;  %v9636_v10 = vpop.f32.mrb[9].mxu0 }
  0xf9   : > { %v9640_v13 = vpop.f32.mrb[9].mxu1  ;;  %v9642_v14 = vpop.f32.mrb[10].mxu0 }
  0xfa   : > { %v9644_v15 = vpop.f32.mrb[10].mxu1  ;;  %v9646_v16 = vpop.f32.mrb[11].mxu0 }
  0xfb   : > { %v9649_v18 = vpop.f32.mrb[11].mxu1 }
  0xfc   : > { %8639 = vmatmul.mubr.msk.bf16.gmra.mrb[116].mxu0 %vm1999_vm0, %v9163_v8 }
  0xfd   : > { %8895 = vmatmul.mubr.msk.bf16.gmra.mrb[116].mxu1 %vm1999_vm0, %v9164_v11  ;;  %8642 = vmatprep.mubr.msk.bf16.mxu0 %vm1999_vm0, %v9165_v12 }
  0xfe   : > { %8898 = vmatprep.mubr.msk.bf16.mxu1 %vm1999_vm0, %v9166_v17  ;;  %v9179_v17 = vld [vmem:[%s9361_s22 + $0x218] sm:$0xff]  }
  0xff   : > { %v9655_v19 = vpop.f32.mrb[12].mxu0 }
 0x100   : > { %v9657_v20 = vpop.f32.mrb[12].mxu1  ;;  %v9659_v21 = vpop.f32.mrb[13].mxu0 }
 0x101   : > { %v9662_v23 = vpop.f32.mrb[13].mxu1  ;;  %v9664_v24 = vpop.f32.mrb[14].mxu0 }
 0x102   : > { %v9668_v27 = vpop.f32.mrb[14].mxu1  ;;  %v9670_v28 = vpop.f32.mrb[15].mxu0 }
 0x103   : > { %v9673_v30 = vpop.f32.mrb[15].mxu1 }
 0x104   : > { %8643 = vmatmul.mubr.msk.bf16.gmra.mrb[120].mxu0 %vm1999_vm0, %v9167_v22 }
 0x105   : > { %8899 = vmatmul.mubr.msk.bf16.gmra.mrb[120].mxu1 %vm1999_vm0, %v9168_v25  ;;  %8646 = vmatprep.mubr.msk.bf16.mxu0 %vm1999_vm0, %v9169_v26  ;;  %v9180_v26 = vld [vmem:[%s9361_s22 + $0x618] sm:$0xff]  }
 0x106   : > { %8902 = vmatprep.mubr.msk.bf16.mxu1 %vm1999_vm0, %v9170_v29  ;;  %v9181_v29 = vld [vmem:[%s9361_s22 + $0x220] sm:$0xff]  }
 0x107   : > { %v9679_v31 = vpop.f32.mrb[16].mxu0 }
 0x108   : > { %v9681_v32 = vpop.f32.mrb[16].mxu1  ;;  %v9683_v33 = vpop.f32.mrb[17].mxu0 }
 0x109   : > { %v9686_v35 = vpop.f32.mrb[17].mxu1  ;;  %v9688_v36 = vpop.f32.mrb[18].mxu0 }
 0x10a   : > { %v9692_v39 = vpop.f32.mrb[18].mxu1  ;;  %v9694_v40 = vpop.f32.mrb[19].mxu0 }
 0x10b   : > { %v9697_v42 = vpop.f32.mrb[19].mxu1 }
 0x10c   : > { %8647 = vmatmul.mubr.msk.bf16.gmra.mrb[124].mxu0 %vm1999_vm0, %v9171_v34 }
 0x10d   : > { %8903 = vmatmul.mubr.msk.bf16.gmra.mrb[124].mxu1 %vm1999_vm0, %v9172_v37  ;;  %8650 = vmatprep.mubr.msk.bf16.mxu0 %vm1999_vm0, %v9173_v38  ;;  %v9182_v38 = vld [vmem:[%s9361_s22 + $0x620] sm:$0xff]  }
 0x10e   : > { %8906 = vmatprep.mubr.msk.bf16.mxu1 %vm1999_vm0, %v9174_v41 }
 0x10f   : > { %v9703_v43 = vpop.f32.mrb[20].mxu0 }
 0x110   : > { %v9705_v44 = vpop.f32.mrb[20].mxu1  ;;  %v9707_v45 = vpop.f32.mrb[21].mxu0 }
 0x111   : > { %v9710_v47 = vpop.f32.mrb[21].mxu1  ;;  %v9712_v49 = vpop.f32.mrb[22].mxu0 }
 0x112   : > { %v9716_v60 = vpop.f32.mrb[22].mxu1  ;;  %v9718_v63 = vpop.f32.mrb[23].mxu0 }
 0x113   : > { %v9721_v5 = vpop.f32.mrb[23].mxu1 }
 0x114   : > { %8651 = vmatmul.mubr.msk.bf16.gmra.mrb[128].mxu0 %vm1999_vm0, %v9175_v46 }
 0x115   : > { %8907 = vmatmul.mubr.msk.bf16.gmra.mrb[128].mxu1 %vm1999_vm0, %v9176_v50  ;;  %8654 = vmatprep.mubr.msk.bf16.mxu0 %vm1999_vm0, %v9177_v57 }
 0x116   : > { %8910 = vmatprep.mubr.msk.bf16.mxu1 %vm1999_vm0, %v9178_v0  ;;  %v9183_v0 = vld [vmem:[%s9361_s22 + $0x228] sm:$0xff]  }
 0x117   : > { %v9727_v8 = vpop.f32.mrb[24].mxu0 }
 0x118   : > { %v9729_v11 = vpop.f32.mrb[24].mxu1  ;;  %v9731_v12 = vpop.f32.mrb[25].mxu0 }
 0x119   : > { %14021 = vst [vmem:[#allocation2_spill] sm:$0xff] %v9731_v12  ;;  %v9734_v22 = vpop.f32.mrb[25].mxu1  ;;  %v9736_v25 = vpop.f32.mrb[26].mxu0 }
 0x11a   : > { %14022 = vst [vmem:[#allocation3_spill] sm:$0xff] %v9734_v22  ;;  %14023 = vst [vmem:[#allocation4_spill] sm:$0xff] %v9736_v25  ;;  %v9740_v34 = vpop.f32.mrb[26].mxu1  ;;  %v9742_v37 = vpop.f32.mrb[27].mxu0  ;;  %v9185_v25 = vld [vmem:[%s9361_s22 + $0x230] sm:$0xff]  }
 0x11b   : > { %14024 = vst [vmem:[#allocation5_spill] sm:$0xff] %v9740_v34  ;;  %14025 = vst [vmem:[#allocation6_spill] sm:$0xff] %v9742_v37  ;;  %v9745_v41 = vpop.f32.mrb[27].mxu1 }
 0x11c   : > { %14026 = vst [vmem:[#allocation7_spill] sm:$0xff] %v9745_v41  ;;  %8655 = vmatmul.mubr.msk.bf16.gmra.mrb[132].mxu0 %vm1999_vm0, %v9179_v17  ;;  %v9184_v41 = vld [vmem:[%s9361_s22 + $0x628] sm:$0xff]  }
 0x11d   : > { %8911 = vmatmul.mubr.msk.bf16.gmra.mrb[132].mxu1 %vm1999_vm0, %v9180_v26  ;;  %8658 = vmatprep.mubr.msk.bf16.mxu0 %vm1999_vm0, %v9181_v29  ;;  %v9186_v29 = vld [vmem:[%s9361_s22 + $0x630] sm:$0xff]  }
 0x11e   : > { %8914 = vmatprep.mubr.msk.bf16.mxu1 %vm1999_vm0, %v9182_v38 }
 0x11f   : > { %v9751_v46 = vpop.f32.mrb[28].mxu0 }
 0x120   : > { %14027 = vst [vmem:[#allocation8_spill] sm:$0xff] %v9751_v46  ;;  %v9753_v50 = vpop.f32.mrb[28].mxu1  ;;  %v9755_v57 = vpop.f32.mrb[29].mxu0  ;;  %v9188_v46 = vld [vmem:[%s9361_s22 + $0x638] sm:$0xff]  }
 0x121   : > { %14028 = vst [vmem:[#allocation9_spill] sm:$0xff] %v9753_v50  ;;  %14029 = vst [vmem:[#allocation10_spill] sm:$0xff] %v9755_v57  ;;  %v9758_v37 = vpop.f32.mrb[29].mxu1  ;;  %v9760_v34 = vpop.f32.mrb[30].mxu0  ;;  %v9774_v50 = vld [vmem:[%s13777_s2] ss:$0 sm:$0xff] }
 0x122   : > { %14030 = vst [vmem:[#allocation11_spill] sm:$0xff] %v9758_v37  ;;  %14031 = vst [vmem:[#allocation12_spill] sm:$0xff] %v9760_v34  ;;  %v9764_v17 = vpop.f32.mrb[30].mxu1  ;;  %v9766_v26 = vpop.f32.mrb[31].mxu0  ;;  %v4859_v34 = vmul.f32 %v9594_v54, %v9774_v50  ;;  %v5113_v54 = vmul.f32 %v9774_v50, %v9601_v58  ;;  %v5118_v58 = vmul.f32 %v9610_v61, %v9774_v50 }
 0x123   : > { %14032 = vst [vmem:[#allocation13_spill] sm:$0xff] %v9764_v17  ;;  %14033 = vst [vmem:[#allocation14_spill] sm:$0xff] %v9766_v26  ;;  %v9769_v38 = vpop.f32.mrb[31].mxu1  ;;  %v4858_v26 = vmul.f32 %v9584_v48, %v9774_v50  ;;  %v4863_v61 = vmul.f32 %v9618_v2, %v9774_v50 }
 0x124   : > { %14034 = vst [vmem:[#allocation15_spill] sm:$0xff] %v9769_v38  ;;  %8659 = vmatmul.mubr.msk.bf16.gmra.mrb[136].mxu0 %vm1999_vm0, %v9183_v0  ;;  %v9787_v38 = vld [vmem:[%s13778_s3] ss:$0 sm:$0xff]  ;;  %v5114_v0 = vmul.f32 %v9588_v51, %v9774_v50 }
 0x125   : > { %8915 = vmatmul.mubr.msk.bf16.gmra.mrb[136].mxu1 %vm1999_vm0, %v9184_v41  ;;  %8662 = vmatprep.mubr.msk.bf16.mxu0 %vm1999_vm0, %v9185_v25  ;;  %v4856_v41 = vmul.f32 %v9774_v50, %v9590_v52  ;;  %v5112_v25 = vmul.f32 %v9774_v50, %v9592_v53  ;;  %v9189_v51 = vld [vmem:[%s9361_s22 + $0x240] sm:$0xff]   ;;  %v5115_v52 = vmul.f32 %v9596_v55, %v9774_v50 }
 0x126   : > { %8918 = vmatprep.mubr.msk.bf16.mxu1 %vm1999_vm0, %v9186_v29  ;;  %v4857_v53 = vmul.f32 %v9774_v50, %v9598_v56  ;;  %v9818_v12 = vadd.f32 %v9787_v38, %v4858_v26  ;;  %v9837_v26 = vadd.f32 %v9787_v38, %v4859_v34  ;;  %v5116_v34 = vmul.f32 %v9774_v50, %v9616_v1 }
 0x127   : > { %v9782_v17 = vpop.f32.mrb[32].mxu0  ;;  %v9828_v55 = vadd.f32 %v9787_v38, %v4856_v41  ;;  %v9831_v56 = vadd.f32 %v9787_v38, %v5112_v25  ;;  %v9846_v41 = vadd.f32 %v9787_v38, %v5115_v52  ;;  %v4861_v25 = vmul.f32 %v9774_v50, %v9622_v4 }
 0x128   : > { %14035 = vst [vmem:[#allocation16_spill] sm:$0xff] %v9782_v17  ;;  %v9795_v29 = vpop.f32.mrb[32].mxu1  ;;  %v9797_v48 = vpop.f32.mrb[33].mxu0  ;;  %v9187_v17 = vld [vmem:[%s9361_s22 + $0x238] sm:$0xff]   ;;  %14041 = vst [vmem:[#allocation22_spill] sm:$0xff] %v9818_v12  ;;  %v9895_v4 = vadd.f32 %v9787_v38, %v5116_v34  ;;  %v4866_v34 = vmul.f32 %v9631_v7, %v9774_v50 }
 0x129   : > { %14036 = vst [vmem:[#allocation17_spill] sm:$0xff] %v9795_v29  ;;  %14037 = vst [vmem:[#allocation18_spill] sm:$0xff] %v9797_v48  ;;  %v9802_v37 = vpop.f32.mrb[33].mxu1  ;;  %v9804_v57 = vpop.f32.mrb[34].mxu0  ;;  %v9190_v48 = vld [vmem:[%s9361_s22 + $0x640] sm:$0xff]  }
 0x12a   : > { %14038 = vst [vmem:[#allocation19_spill] sm:$0xff] %v9802_v37  ;;  %14039 = vst [vmem:[#allocation20_spill] sm:$0xff] %v9804_v57  ;;  %v9812_v22 = vpop.f32.mrb[34].mxu1  ;;  %v9814_v29 = vpop.f32.mrb[35].mxu0  ;;  %v9825_v37 = vadd.f32 %v9787_v38, %v5114_v0  ;;  %v4860_v0 = vmul.f32 %v9774_v50, %v9612_v62  ;;  %v9879_v62 = vadd.f32 %v9787_v38, %v5118_v58 }
 0x12b   : > { %14040 = vst [vmem:[#allocation21_spill] sm:$0xff] %v9814_v29  ;;  %v9822_v57 = vpop.f32.mrb[35].mxu1  ;;  %14043 = vst [vmem:[#allocation24_spill] sm:$0xff] %v9828_v55  ;;  %v4862_v29 = vmul.f32 %v9607_v59, %v9774_v50  ;;  %v9849_v59 = vadd.f32 %v9787_v38, %v4857_v53  ;;  %v9193_v55 = vld [vmem:[%s9361_s22 + $0x250] sm:$0xff]   ;;  %v9898_v58 = vadd.f32 %v9787_v38, %v4863_v61 }
 0x12c   : > { %14042 = vst [vmem:[#allocation23_spill] sm:$0xff] %v9825_v37  ;;  %14044 = vst [vmem:[#allocation25_spill] sm:$0xff] %v9831_v56  ;;  %8663 = vmatmul.mubr.msk.bf16.gmra.mrb[140].mxu0 %vm1999_vm0, %v9187_v17  ;;  %v5119_v17 = vmul.f32 %v9620_v3, %v9774_v50  ;;  %v9191_v3 = vld [vmem:[%s9361_s22 + $0x248] sm:$0xff]   ;;  %v9882_v1 = vadd.f32 %v9787_v38, %v4860_v0  ;;  %v9910_v37 = vadd.f32 %v9787_v38, %v4861_v25  ;;  %v9196_v25 = vld [vmem:[%s9361_s22 + $0x658] sm:$0xff]  }
 0x12d   : > { %14045 = vst [vmem:[#allocation26_spill] sm:$0xff] %v9837_v26  ;;  %8919 = vmatmul.mubr.msk.bf16.gmra.mrb[140].mxu1 %vm1999_vm0, %v9188_v46  ;;  %8666 = vmatprep.mubr.msk.bf16.mxu0 %vm1999_vm0, %v9189_v51  ;;  %14046 = vst [vmem:[#allocation27_spill] sm:$0xff] %v9846_v41  ;;  %v9858_v46 = vadd.f32 %v9787_v38, %v5113_v54  ;;  %v9870_v52 = vadd.f32 %v9787_v38, %v4862_v29  ;;  %v9192_v56 = vld [vmem:[%s9361_s22 + $0x648] sm:$0xff]  }
 0x12e   : > { %14047 = vst [vmem:[#allocation28_spill] sm:$0xff] %v9849_v59  ;;  %8922 = vmatprep.mubr.msk.bf16.mxu1 %vm1999_vm0, %v9190_v48  ;;  %14050 = vst [vmem:[#allocation31_spill] sm:$0xff] %v9879_v62  ;;  %v5117_v48 = vmul.f32 %v9774_v50, %v9625_v6  ;;  %v9194_v6 = vld [vmem:[%s9361_s22 + $0x650] sm:$0xff]   ;;  %v5122_v59 = vmul.f32 %v9634_v9, %v9774_v50  ;;  %v4864_v41 = vmul.f32 %v9774_v50, %v9636_v10 }
 0x12f   : > { %14048 = vst [vmem:[#allocation29_spill] sm:$0xff] %v9858_v46  ;;  %v9864_v51 = vpop.f32.mrb[36].mxu0  ;;  %14049 = vst [vmem:[#allocation30_spill] sm:$0xff] %v9870_v52  ;;  %v4867_v61 = vmul.f32 %v9642_v14, %v9774_v50 }
 0x130   : > { %v9872_v53 = vpop.f32.mrb[36].mxu1  ;;  %v9874_v54 = vpop.f32.mrb[37].mxu0  ;;  %14051 = vst [vmem:[#allocation32_spill] sm:$0xff] %v9882_v1  ;;  %14054 = vst [vmem:[#allocation35_spill] sm:$0xff] %v9895_v4  ;;  %v9927_v7 = vadd.f32 %v9787_v38, %v5117_v48  ;;  %v9201_v4 = vld [vmem:[%s9361_s22 + $0x270] sm:$0xff]  }
 0x131   : > { %v9886_v2 = vpop.f32.mrb[37].mxu1  ;;  %v9888_v29 = vpop.f32.mrb[38].mxu0  ;;  %14055 = vst [vmem:[#allocation36_spill] sm:$0xff] %v9898_v58  ;;  %14057 = vst [vmem:[#allocation38_spill] sm:$0xff] %v9910_v37  ;;  %v9197_v37 = vld [vmem:[%s9361_s22 + $0x260] sm:$0xff]  }
 0x132   : > { %14052 = vst [vmem:[#allocation33_spill] sm:$0xff] %v9886_v2  ;;  %14053 = vst [vmem:[#allocation34_spill] sm:$0xff] %v9888_v29  ;;  %v9900_v0 = vpop.f32.mrb[38].mxu1  ;;  %v9902_v26 = vpop.f32.mrb[39].mxu0  ;;  %v9907_v29 = vadd.f32 %v9787_v38, %v5119_v17  ;;  %v5120_v17 = vmul.f32 %v9774_v50, %v9640_v13  ;;  %v5123_v13 = vmul.f32 %v9644_v15, %v9774_v50  ;;  %v9198_v58 = vld [vmem:[%s9361_s22 + $0x660] sm:$0xff]  }
 0x133   : > { %v9914_v12 = vpop.f32.mrb[39].mxu1  ;;  %14058 = vst [vmem:[#allocation39_spill] sm:$0xff] %v9927_v7  ;;  %v9950_v15 = vadd.f32 %v9787_v38, %v5122_v59  ;;  %v9967_v59 = vadd.f32 %v9787_v38, %v4867_v61  ;;  %v5124_v61 = vmul.f32 %v9774_v50, %v9662_v23 }
 0x134   : > { %14056 = vst [vmem:[#allocation37_spill] sm:$0xff] %v9907_v29  ;;  %8667 = vmatmul.mubr.msk.bf16.gmra.mrb[144].mxu0 %vm1999_vm0, %v9191_v3  ;;  %v4865_v3 = vmul.f32 %v9774_v50, %v9646_v16  ;;  %v9953_v16 = vadd.f32 %v9787_v38, %v4864_v41  ;;  %v5126_v41 = vmul.f32 %v9657_v20, %v9774_v50 }
 0x135   : > { %8923 = vmatmul.mubr.msk.bf16.gmra.mrb[144].mxu1 %vm1999_vm0, %v9192_v56  ;;  %8670 = vmatprep.mubr.msk.bf16.mxu0 %vm1999_vm0, %v9193_v55  ;;  %v9943_v56 = vadd.f32 %v9787_v38, %v4866_v34  ;;  %v5121_v55 = vmul.f32 %v9774_v50, %v9649_v18  ;;  %14060 = vst [vmem:[#allocation41_spill] sm:$0xff] %v9950_v15  ;;  %v9195_v18 = vld [vmem:[%s9361_s22 + $0x258] sm:$0xff]   ;;  %14063 = vst [vmem:[#allocation44_spill] sm:$0xff] %v9967_v59  ;;  %v14120_v15 = vld [vmem:[#allocation15_spill] sm:$0xff] }
 0x136   : > { %8926 = vmatprep.mubr.msk.bf16.mxu1 %vm1999_vm0, %v9194_v6  ;;  %14061 = vst [vmem:[#allocation42_spill] sm:$0xff] %v9953_v16  ;;  %v9956_v6 = vadd.f32 %v9787_v38, %v5120_v17  ;;  %v4870_v34 = vmul.f32 %v9655_v19, %v9774_v50  ;;  %v4868_v17 = vmul.f32 %v9774_v50, %v9659_v21  ;;  %v9210_v16 = vld [vmem:[%s9361_s22 + $0x690] sm:$0xff]  }
 0x137   : > { %14059 = vst [vmem:[#allocation40_spill] sm:$0xff] %v9943_v56  ;;  %v9947_v10 = vpop.f32.mrb[40].mxu0  ;;  %v9980_v29 = vadd.f32 %v9787_v38, %v5123_v13  ;;  %v9983_v9 = vadd.f32 %v9787_v38, %v4865_v3  ;;  %v4871_v20 = vmul.f32 %v9664_v24, %v9774_v50  ;;  %v9996_v1 = vadd.f32 %v9787_v38, %v5121_v55 }
 0x138   : > { %14062 = vst [vmem:[#allocation43_spill] sm:$0xff] %v9956_v6  ;;  %v9960_v14 = vpop.f32.mrb[40].mxu1  ;;  %v9962_v48 = vpop.f32.mrb[41].mxu0  ;;  %v5127_v13 = vmul.f32 %v9668_v27, %v9774_v50  ;;  %v4869_v3 = vmul.f32 %v9774_v50, %v9670_v28  ;;  %v10008_v46 = vadd.f32 %v9787_v38, %v4870_v34  ;;  %v10013_v27 = vadd.f32 %v9787_v38, %v5126_v41 }
 0x139   : > { %v9973_v2 = vpop.f32.mrb[41].mxu1  ;;  %v9975_v19 = vpop.f32.mrb[42].mxu0  ;;  %14064 = vst [vmem:[#allocation45_spill] sm:$0xff] %v9980_v29  ;;  %14065 = vst [vmem:[#allocation46_spill] sm:$0xff] %v9983_v9  ;;  %v10016_v28 = vadd.f32 %v9787_v38, %v4868_v17  ;;  %v5125_v24 = vmul.f32 %v9774_v50, %v9673_v30  ;;  %v10025_v55 = vadd.f32 %v9787_v38, %v5124_v61 }
 0x13a   : > { %v9989_v7 = vpop.f32.mrb[42].mxu1  ;;  %v9991_v21 = vpop.f32.mrb[43].mxu0  ;;  %14066 = vst [vmem:[#allocation47_spill] sm:$0xff] %v9996_v1  ;;  %14067 = vst [vmem:[#allocation48_spill] sm:$0xff] %v10008_v46  ;;  %v10028_v41 = vadd.f32 %v9787_v38, %v4871_v20  ;;  %v10033_v30 = vadd.f32 %v9787_v38, %v5127_v13  ;;  %v4872_v17 = vmul.f32 %v9774_v50, %v9683_v33 }
 0x13b   : > { %v10002_v23 = vpop.f32.mrb[43].mxu1  ;;  %14068 = vst [vmem:[#allocation49_spill] sm:$0xff] %v10013_v27  ;;  %14069 = vst [vmem:[#allocation50_spill] sm:$0xff] %v10016_v28  ;;  %v5128_v13 = vmul.f32 %v9774_v50, %v9686_v35  ;;  %v10057_v20 = vadd.f32 %v9787_v38, %v5125_v24  ;;  %v9200_v35 = vld [vmem:[%s9361_s22 + $0x668] sm:$0xff]   ;;  %v5131_v34 = vmul.f32 %v9692_v39, %v9774_v50  ;;  %v9204_v27 = vld [vmem:[%s9361_s22 + $0x678] sm:$0xff]  }
 0x13c   : > { %8671 = vmatmul.mubr.msk.bf16.gmra.mrb[148].mxu0 %vm1999_vm0, %v9195_v18  ;;  %14070 = vst [vmem:[#allocation51_spill] sm:$0xff] %v10025_v55  ;;  %14071 = vst [vmem:[#allocation52_spill] sm:$0xff] %v10028_v41  ;;  %v4873_v24 = vmul.f32 %v9774_v50, %v9694_v40  ;;  %v5129_v1 = vmul.f32 %v9774_v50, %v9697_v42  ;;  %v10091_v40 = vadd.f32 %v9787_v38, %v4872_v17 }
 0x13d   : > { %8927 = vmatmul.mubr.msk.bf16.gmra.mrb[148].mxu1 %vm1999_vm0, %v9196_v25  ;;  %8674 = vmatprep.mubr.msk.bf16.mxu0 %vm1999_vm0, %v9197_v37  ;;  %14072 = vst [vmem:[#allocation53_spill] sm:$0xff] %v10033_v30  ;;  %v10036_v37 = vadd.f32 %v9787_v38, %v4869_v3  ;;  %v4874_v25 = vmul.f32 %v9679_v31, %v9774_v50  ;;  %v9199_v31 = vld [vmem:[%s9361_s22 + $0x268] sm:$0xff]   ;;  %14074 = vst [vmem:[#allocation55_spill] sm:$0xff] %v10057_v20  ;;  %v9209_v30 = vld [vmem:[%s9361_s22 + $0x290] sm:$0xff]  }
 0x13e   : > { %8930 = vmatprep.mubr.msk.bf16.mxu1 %vm1999_vm0, %v9198_v58  ;;  %v5130_v58 = vmul.f32 %v9681_v32, %v9774_v50  ;;  %v4875_v32 = vmul.f32 %v9688_v36, %v9774_v50  ;;  %v9202_v36 = vld [vmem:[%s9361_s22 + $0x670] sm:$0xff]   ;;  %14077 = vst [vmem:[#allocation58_spill] sm:$0xff] %v10091_v40  ;;  %v10094_v41 = vadd.f32 %v9787_v38, %v5128_v13 }
 0x13f   : > { %14073 = vst [vmem:[#allocation54_spill] sm:$0xff] %v10036_v37  ;;  %v10040_v61 = vpop.f32.mrb[44].mxu0  ;;  %v10081_v29 = vadd.f32 %v9787_v38, %v4874_v25  ;;  %v4878_v9 = vmul.f32 %v9703_v43, %v9774_v50  ;;  %v4876_v17 = vmul.f32 %v9774_v50, %v9707_v45  ;;  %v10110_v13 = vadd.f32 %v9787_v38, %v5131_v34 }
 0x140   : > { %v10049_v3 = vpop.f32.mrb[44].mxu1  ;;  %v10051_v18 = vpop.f32.mrb[45].mxu0  ;;  %v10088_v39 = vadd.f32 %v9787_v38, %v5130_v58  ;;  %14078 = vst [vmem:[#allocation59_spill] sm:$0xff] %v10094_v41  ;;  %v10101_v42 = vadd.f32 %v9787_v38, %v4875_v32  ;;  %v5134_v58 = vmul.f32 %v9705_v44, %v9774_v50  ;;  %v10113_v43 = vadd.f32 %v9787_v38, %v4873_v24  ;;  %v9205_v41 = vld [vmem:[%s9361_s22 + $0x280] sm:$0xff]  }
 0x141   : > { %v10061_v33 = vpop.f32.mrb[45].mxu1  ;;  %v10063_v62 = vpop.f32.mrb[46].mxu0  ;;  %14075 = vst [vmem:[#allocation56_spill] sm:$0xff] %v10081_v29  ;;  %14080 = vst [vmem:[#allocation61_spill] sm:$0xff] %v10110_v13  ;;  %v4879_v44 = vmul.f32 %v9712_v49, %v9774_v50  ;;  %v10122_v32 = vadd.f32 %v9787_v38, %v5129_v1  ;;  %v4877_v34 = vmul.f32 %v9774_v50, %v9718_v63  ;;  %v14090_v13 = vld [vmem:[#allocation2_spill] sm:$0xff]  ;;  %v14091_v29 = vld [vmem:[#allocation3_spill] sm:$0xff] }
 0x142   : > { %v10073_v52 = vpop.f32.mrb[46].mxu1  ;;  %v10075_v28 = vpop.f32.mrb[47].mxu0  ;;  %14076 = vst [vmem:[#allocation57_spill] sm:$0xff] %v10088_v39  ;;  %14079 = vst [vmem:[#allocation60_spill] sm:$0xff] %v10101_v42  ;;  %v10143_v25 = vadd.f32 %v9787_v38, %v5134_v58  ;;  %v5133_v24 = vmul.f32 %v9774_v50, %v9721_v5  ;;  %v9206_v5 = vld [vmem:[%s9361_s22 + $0x680] sm:$0xff]   ;;  %v4880_v37 = vmul.f32 %v9774_v50, %v14090_v13  ;;  %v14094_v13 = vld [vmem:[#allocation5_spill] sm:$0xff] }
 0x143   : > { %v10085_v46 = vpop.f32.mrb[47].mxu1  ;;  %14081 = vst [vmem:[#allocation62_spill] sm:$0xff] %v10113_v43  ;;  %14082 = vst [vmem:[#allocation63_spill] sm:$0xff] %v10122_v32  ;;  %v10162_v58 = vadd.f32 %v9787_v38, %v4879_v44  ;;  %v10174_v40 = vadd.f32 %v9787_v38, %v4877_v34  ;;  %v5138_v43 = vmul.f32 %v9729_v11, %v9774_v50  ;;  %v14093_v44 = vld [vmem:[#allocation4_spill] sm:$0xff]  ;;  %v14095_v34 = vld [vmem:[#allocation6_spill] sm:$0xff] }
 0x144   : > { %8675 = vmatmul.mubr.msk.bf16.gmra.mrb[152].mxu0 %vm1999_vm0, %v9199_v31  ;;  %v5132_v31 = vmul.f32 %v9774_v50, %v9710_v47  ;;  %14084 = vst [vmem:[#allocation65_spill] sm:$0xff] %v10143_v25  ;;  %v10146_v47 = vadd.f32 %v9787_v38, %v4876_v17  ;;  %v4881_v32 = vmul.f32 %v9774_v50, %v14095_v34  ;;  %v9208_v25 = vld [vmem:[%s9361_s22 + $0x688] sm:$0xff]  }
 0x145   : > { %8931 = vmatmul.mubr.msk.bf16.gmra.mrb[152].mxu1 %vm1999_vm0, %v9200_v35  ;;  %8678 = vmatprep.mubr.msk.bf16.mxu0 %vm1999_vm0, %v9201_v4  ;;  %v5135_v4 = vmul.f32 %v9716_v60, %v9774_v50  ;;  %v9203_v60 = vld [vmem:[%s9361_s22 + $0x278] sm:$0xff]   ;;  %14087 = vst [vmem:[#allocation68_spill] sm:$0xff] %v10162_v58  ;;  %14089 = vst [vmem:[#allocation70_spill] sm:$0xff] %v10174_v40  ;;  %v10217_v34 = vadd.f32 %v9787_v38, %v4880_v37 }
 0x146   : > { %8934 = vmatprep.mubr.msk.bf16.mxu1 %vm1999_vm0, %v9202_v36  ;;  %v10134_v36 = vadd.f32 %v9787_v38, %v4878_v9  ;;  %14085 = vst [vmem:[#allocation66_spill] sm:$0xff] %v10146_v47  ;;  %v10159_v63 = vadd.f32 %v9787_v38, %v5132_v31  ;;  %v4882_v31 = vmul.f32 %v9727_v8, %v9774_v50  ;;  %v14104_v37 = vld [vmem:[#allocation9_spill] sm:$0xff] }
 0x147   : > { %v10128_v35 = vpop.f32.mrb[48].mxu0  ;;  %v10171_v20 = vadd.f32 %v9787_v38, %v5135_v4  ;;  %v5136_v4 = vmul.f32 %v9774_v50, %v14091_v29  ;;  %v10191_v8 = vadd.f32 %v9787_v38, %v5133_v24  ;;  %14099 = vst [vmem:[#allocation5_spill] sm:$0xff] %v10217_v34  ;;  %v5142_v58 = vmul.f32 %v14104_v37, %v9774_v50  ;;  %v14111_v37 = vld [vmem:[#allocation12_spill] sm:$0xff] }
 0x148   : > { %14083 = vst [vmem:[#allocation64_spill] sm:$0xff] %v10134_v36  ;;  %v10136_v1 = vpop.f32.mrb[48].mxu1  ;;  %v10138_v45 = vpop.f32.mrb[49].mxu0  ;;  %14086 = vst [vmem:[#allocation67_spill] sm:$0xff] %v10159_v63  ;;  %v4883_v36 = vmul.f32 %v14093_v44, %v9774_v50  ;;  %v14101_v44 = vld [vmem:[#allocation8_spill] sm:$0xff]  ;;  %v14105_v63 = vld [vmem:[#allocation10_spill] sm:$0xff]  ;;  %v4887_v59 = vmul.f32 %v14111_v37, %v9774_v50  ;;  %v5141_v37 = vmul.f32 %v9774_v50, %v14120_v15 }
 0x149   : > { %v10150_v49 = vpop.f32.mrb[49].mxu1  ;;  %v10152_v9 = vpop.f32.mrb[50].mxu0  ;;  %14088 = vst [vmem:[#allocation69_spill] sm:$0xff] %v10171_v20  ;;  %14092 = vst [vmem:[#allocation2_spill] sm:$0xff] %v10191_v8  ;;  %v10247_v20 = vadd.f32 %v9787_v38, %v4881_v32 }
 0x14a   : > { %v10164_v17 = vpop.f32.mrb[50].mxu1  ;;  %v10166_v42 = vpop.f32.mrb[51].mxu0 }
 0x14b   : > { %v10178_v39 = vpop.f32.mrb[51].mxu1  ;;  %14109 = vst [vmem:[#allocation72_spill] sm:$0xff] %v10247_v20  ;;  %v5147_v20 = vmul.f32 %v9812_v22, %v9774_v50 }
 0x14c   : > { %8679 = vmatmul.mubr.msk.bf16.gmra.mrb[156].mxu0 %vm1999_vm0, %v9203_v60  ;;  %v5139_v60 = vmul.f32 %v14094_v13, %v9774_v50  ;;  %v10214_v13 = vadd.f32 %v9787_v38, %v5138_v43  ;;  %v10231_v43 = vadd.f32 %v9787_v38, %v4883_v36  ;;  %v14110_v36 = vld [vmem:[#allocation11_spill] sm:$0xff] }
 0x14d   : > { %8935 = vmatmul.mubr.msk.bf16.gmra.mrb[156].mxu1 %vm1999_vm0, %v9204_v27  ;;  %8682 = vmatprep.mubr.msk.bf16.mxu0 %vm1999_vm0, %v9205_v41  ;;  %v10207_v27 = vadd.f32 %v9787_v38, %v4882_v31  ;;  %v14097_v41 = vld [vmem:[#allocation7_spill] sm:$0xff]  ;;  %v4886_v31 = vmul.f32 %v14101_v44, %v9774_v50  ;;  %v5140_v8 = vmul.f32 %v9774_v50, %v14110_v36 }
 0x14e   : > { %8938 = vmatprep.mubr.msk.bf16.mxu1 %vm1999_vm0, %v9206_v5  ;;  %v5137_v11 = vmul.f32 %v9774_v50, %v14097_v41  ;;  %14098 = vst [vmem:[#allocation4_spill] sm:$0xff] %v10214_v13  ;;  %v10220_v5 = vadd.f32 %v9787_v38, %v5136_v4  ;;  %v9207_v41 = vld [vmem:[%s9361_s22 + $0x288] sm:$0xff]   ;;  %14103 = vst [vmem:[#allocation8_spill] sm:$0xff] %v10231_v43  ;;  %v4884_v4 = vmul.f32 %v9774_v50, %v14105_v63 }
 0x14f   : > { %14096 = vst [vmem:[#allocation3_spill] sm:$0xff] %v10207_v27  ;;  %v10211_v29 = vpop.f32.mrb[52].mxu0  ;;  %v10244_v55 = vadd.f32 %v9787_v38, %v5139_v60  ;;  %v14115_v60 = vld [vmem:[#allocation13_spill] sm:$0xff]  ;;  %v5145_v13 = vmul.f32 %v9774_v50, %v9822_v57 }
 0x150   : > { %14100 = vst [vmem:[#allocation6_spill] sm:$0xff] %v10220_v5  ;;  %v10224_v24 = vpop.f32.mrb[52].mxu1  ;;  %v10226_v40 = vpop.f32.mrb[53].mxu0  ;;  %v10260_v56 = vadd.f32 %v9787_v38, %v5137_v11  ;;  %v5143_v32 = vmul.f32 %v14115_v60, %v9774_v50  ;;  %v10277_v60 = vadd.f32 %v9787_v38, %v5142_v58  ;;  %v10289_v11 = vadd.f32 %v9787_v38, %v5140_v8  ;;  %v9213_v5 = vld [vmem:[%s9361_s22 + $0x2a0] sm:$0xff]  }
 0x151   : > { %14102 = vst [vmem:[#allocation7_spill] sm:$0xff] %v10226_v40  ;;  %v10237_v47 = vpop.f32.mrb[53].mxu1  ;;  %v10239_v44 = vpop.f32.mrb[54].mxu0  ;;  %14108 = vst [vmem:[#allocation71_spill] sm:$0xff] %v10244_v55  ;;  %v10272_v40 = vadd.f32 %v9787_v38, %v4886_v31  ;;  %v10292_v58 = vadd.f32 %v9787_v38, %v4887_v59  ;;  %v14125_v31 = vld [vmem:[#allocation17_spill] sm:$0xff]  ;;  %v10321_v59 = vadd.f32 %v9787_v38, %v5141_v37 }
 0x152   : > { %14106 = vst [vmem:[#allocation9_spill] sm:$0xff] %v10237_v47  ;;  %14107 = vst [vmem:[#allocation10_spill] sm:$0xff] %v10239_v44  ;;  %v10253_v6 = vpop.f32.mrb[54].mxu1  ;;  %v10255_v63 = vpop.f32.mrb[55].mxu0  ;;  %v14116_v44 = vld [vmem:[#allocation14_spill] sm:$0xff]  ;;  %v10297_v15 = vadd.f32 %v9787_v38, %v5143_v32  ;;  %v14127_v32 = vld [vmem:[#allocation19_spill] sm:$0xff] }
 0x153   : > { %14112 = vst [vmem:[#allocation11_spill] sm:$0xff] %v10253_v6  ;;  %14113 = vst [vmem:[#allocation12_spill] sm:$0xff] %v10255_v63  ;;  %v4885_v47 = vmul.f32 %v9774_v50, %v14116_v44  ;;  %v10266_v36 = vpop.f32.mrb[55].mxu1  ;;  %v10280_v44 = vadd.f32 %v9787_v38, %v4884_v4  ;;  %v14126_v63 = vld [vmem:[#allocation18_spill] sm:$0xff]  ;;  %v5144_v6 = vmul.f32 %v9774_v50, %v14127_v32  ;;  %v9212_v32 = vld [vmem:[%s9361_s22 + $0x698] sm:$0xff]  }
 0x154   : > { %14114 = vst [vmem:[#allocation73_spill] sm:$0xff] %v10260_v56  ;;  %14117 = vst [vmem:[#allocation13_spill] sm:$0xff] %v10272_v40  ;;  %8683 = vmatmul.mubr.msk.bf16.gmra.mrb[160].mxu0 %vm1999_vm0, %v9207_v41  ;;  %v4888_v4 = vmul.f32 %v9774_v50, %v14126_v63  ;;  %v14132_v55 = vld [vmem:[#allocation21_spill] sm:$0xff] }
 0x155   : > { %14118 = vst [vmem:[#allocation14_spill] sm:$0xff] %v10277_v60  ;;  %14119 = vst [vmem:[#allocation74_spill] sm:$0xff] %v10280_v44  ;;  %8939 = vmatmul.mubr.msk.bf16.gmra.mrb[160].mxu1 %vm1999_vm0, %v9208_v25  ;;  %8686 = vmatprep.mubr.msk.bf16.mxu0 %vm1999_vm0, %v9209_v30  ;;  %v10300_v30 = vadd.f32 %v9787_v38, %v4885_v47  ;;  %v14124_v25 = vld [vmem:[#allocation16_spill] sm:$0xff]  ;;  %v4889_v37 = vmul.f32 %v9774_v50, %v14132_v55 }
 0x156   : > { %14121 = vst [vmem:[#allocation15_spill] sm:$0xff] %v10292_v58  ;;  %8942 = vmatprep.mubr.msk.bf16.mxu1 %vm1999_vm0, %v9210_v16  ;;  %14122 = vst [vmem:[#allocation75_spill] sm:$0xff] %v10297_v15  ;;  %v4890_v41 = vmul.f32 %v14124_v25, %v9774_v50  ;;  %v5146_v16 = vmul.f32 %v14125_v31, %v9774_v50  ;;  %v9211_v25 = vld [vmem:[%s9361_s22 + $0x298] sm:$0xff]   ;;  %v14129_v31 = vld [vmem:[#allocation20_spill] sm:$0xff]  ;;  %v10355_v55 = vadd.f32 %v9787_v38, %v4888_v4 }
 0x157   : > { %14123 = vst [vmem:[#allocation76_spill] sm:$0xff] %v10300_v30  ;;  %v10304_v8 = vpop.f32.mrb[56].mxu0  ;;  %14128 = vst [vmem:[#allocation16_spill] sm:$0xff] %v10321_v59  ;;  %v4891_v40 = vmul.f32 %v14129_v31, %v9774_v50  ;;  %v9214_v31 = vld [vmem:[%s9361_s22 + $0x6a0] sm:$0xff]   ;;  %v10358_v58 = vadd.f32 %v9787_v38, %v5144_v6  ;;  %v4892_v4 = vmul.f32 %v9774_v50, %v9874_v54 }
 0x158   : > { %v10313_v47 = vpop.f32.mrb[56].mxu1  ;;  %v10315_v56 = vpop.f32.mrb[57].mxu0  ;;  %v10352_v22 = vadd.f32 %v9787_v38, %v5146_v16  ;;  %14135 = vst [vmem:[#allocation21_spill] sm:$0xff] %v10355_v55  ;;  %v5150_v16 = vmul.f32 %v9872_v53, %v9774_v50  ;;  %v10374_v6 = vadd.f32 %v9787_v38, %v5147_v20  ;;  %v5151_v20 = vmul.f32 %v9900_v0, %v9774_v50  ;;  %v9215_v0 = vld [vmem:[%s9361_s22 + $0x2a8] sm:$0xff]   ;;  %v9217_v55 = vld [vmem:[%s9361_s22 + $0x2b0] sm:$0xff]  }
 0x159   : > { %v10325_v63 = vpop.f32.mrb[57].mxu1  ;;  %v10327_v43 = vpop.f32.mrb[58].mxu0  ;;  %14136 = vst [vmem:[#allocation77_spill] sm:$0xff] %v10358_v58  ;;  %v10365_v57 = vadd.f32 %v9787_v38, %v4891_v40  ;;  %v9216_v58 = vld [vmem:[%s9361_s22 + $0x6a8] sm:$0xff]  }
 0x15a   : > { %14130 = vst [vmem:[#allocation17_spill] sm:$0xff] %v10325_v63  ;;  %14131 = vst [vmem:[#allocation18_spill] sm:$0xff] %v10327_v43  ;;  %v10337_v44 = vpop.f32.mrb[58].mxu1  ;;  %v10339_v60 = vpop.f32.mrb[59].mxu0  ;;  %v10345_v63 = vadd.f32 %v9787_v38, %v4890_v41  ;;  %v4894_v43 = vmul.f32 %v9864_v51, %v9774_v50  ;;  %v10377_v51 = vadd.f32 %v9787_v38, %v4889_v37  ;;  %v14141_v41 = vld [vmem:[#allocation34_spill] sm:$0xff] }
 0x15b   : > { %v10349_v34 = vpop.f32.mrb[59].mxu1  ;;  %14134 = vst [vmem:[#allocation20_spill] sm:$0xff] %v10352_v22  ;;  %14137 = vst [vmem:[#allocation78_spill] sm:$0xff] %v10365_v57  ;;  %v4895_v53 = vmul.f32 %v14141_v41, %v9774_v50  ;;  %v10435_v15 = vadd.f32 %v9787_v38, %v5151_v20  ;;  %v5152_v20 = vmul.f32 %v9774_v50, %v9973_v2 }
 0x15c   : > { %14133 = vst [vmem:[#allocation19_spill] sm:$0xff] %v10345_v63  ;;  %8687 = vmatmul.mubr.msk.bf16.gmra.mrb[164].mxu0 %vm1999_vm0, %v9211_v25  ;;  %14138 = vst [vmem:[#allocation79_spill] sm:$0xff] %v10374_v6  ;;  %v14140_v25 = vld [vmem:[#allocation33_spill] sm:$0xff]  ;;  %v10398_v54 = vadd.f32 %v9787_v38, %v4894_v43  ;;  %v10407_v63 = vadd.f32 %v9787_v38, %v5150_v16  ;;  %v4896_v6 = vmul.f32 %v9774_v50, %v9962_v48 }
 0x15d   : > { %8943 = vmatmul.mubr.msk.bf16.gmra.mrb[164].mxu1 %vm1999_vm0, %v9212_v32  ;;  %8690 = vmatprep.mubr.msk.bf16.mxu0 %vm1999_vm0, %v9213_v5  ;;  %14139 = vst [vmem:[#allocation80_spill] sm:$0xff] %v10377_v51  ;;  %v5148_v40 = vmul.f32 %v9774_v50, %v14140_v25  ;;  %v10386_v32 = vadd.f32 %v9787_v38, %v5145_v13  ;;  %14148 = vst [vmem:[#allocation85_spill] sm:$0xff] %v10435_v15 }
 0x15e   : > { %8946 = vmatprep.mubr.msk.bf16.mxu1 %vm1999_vm0, %v9214_v31  ;;  %v4893_v5 = vmul.f32 %v9774_v50, %v9902_v26  ;;  %14143 = vst [vmem:[#allocation34_spill] sm:$0xff] %v10398_v54  ;;  %14144 = vst [vmem:[#allocation81_spill] sm:$0xff] %v10407_v63  ;;  %v10410_v25 = vadd.f32 %v9787_v38, %v4892_v4  ;;  %v5149_v31 = vmul.f32 %v9774_v50, %v9914_v12  ;;  %v9218_v12 = vld [vmem:[%s9361_s22 + $0x6b0] sm:$0xff]  }
 0x15f   : > { %14142 = vst [vmem:[#allocation33_spill] sm:$0xff] %v10386_v32  ;;  %v10392_v37 = vpop.f32.mrb[60].mxu0  ;;  %v10423_v26 = vadd.f32 %v9787_v38, %v5148_v40  ;;  %v10426_v16 = vadd.f32 %v9787_v38, %v4895_v53  ;;  %v4898_v40 = vmul.f32 %v9947_v10, %v9774_v50  ;;  %v5154_v51 = vmul.f32 %v9960_v14, %v9774_v50 }
 0x160   : > { %v10400_v13 = vpop.f32.mrb[60].mxu1  ;;  %v10402_v27 = vpop.f32.mrb[61].mxu0  ;;  %14145 = vst [vmem:[#allocation82_spill] sm:$0xff] %v10410_v25  ;;  %v10438_v22 = vadd.f32 %v9787_v38, %v4893_v5  ;;  %v10455_v10 = vadd.f32 %v9787_v38, %v5149_v31  ;;  %v4899_v53 = vmul.f32 %v9975_v19, %v9774_v50  ;;  %v5155_v14 = vmul.f32 %v9989_v7, %v9774_v50  ;;  %v9220_v5 = vld [vmem:[%s9361_s22 + $0x6b8] sm:$0xff]  }
 0x161   : > { %v10414_v41 = vpop.f32.mrb[61].mxu1  ;;  %v10416_v43 = vpop.f32.mrb[62].mxu0  ;;  %14146 = vst [vmem:[#allocation83_spill] sm:$0xff] %v10423_v26  ;;  %14147 = vst [vmem:[#allocation84_spill] sm:$0xff] %v10426_v16  ;;  %v10478_v7 = vadd.f32 %v9787_v38, %v5154_v51  ;;  %v9222_v16 = vld [vmem:[%s9361_s22 + $0x6c0] sm:$0xff]   ;;  %v9225_v26 = vld [vmem:[%s9361_s22 + $0x2d0] sm:$0xff]  }
 0x162   : > { %v10428_v4 = vpop.f32.mrb[62].mxu1  ;;  %v10430_v57 = vpop.f32.mrb[63].mxu0  ;;  %14149 = vst [vmem:[#allocation86_spill] sm:$0xff] %v10438_v22  ;;  %14150 = vst [vmem:[#allocation87_spill] sm:$0xff] %v10455_v10  ;;  %v10495_v51 = vadd.f32 %v9787_v38, %v4899_v53  ;;  %v9221_v22 = vld [vmem:[%s9361_s22 + $0x2c0] sm:$0xff]   ;;  %v10508_v15 = vadd.f32 %v9787_v38, %v5155_v14  ;;  %v5156_v53 = vmul.f32 %v9774_v50, %v10061_v33 }
 0x163   : > { %v10442_v59 = vpop.f32.mrb[63].mxu1  ;;  %14151 = vst [vmem:[#allocation88_spill] sm:$0xff] %v10478_v7  ;;  %v5159_v14 = vmul.f32 %v10073_v52, %v9774_v50 }
 0x164   : > { %8691 = vmatmul.mubr.msk.bf16.gmra.mrb[168].mxu0 %vm1999_vm0, %v9215_v0  ;;  %v4897_v0 = vmul.f32 %v9774_v50, %v9991_v21  ;;  %v10481_v21 = vadd.f32 %v9787_v38, %v4896_v6  ;;  %14154 = vst [vmem:[#allocation91_spill] sm:$0xff] %v10495_v51  ;;  %v5158_v6 = vmul.f32 %v10049_v3, %v9774_v50  ;;  %14155 = vst [vmem:[#allocation92_spill] sm:$0xff] %v10508_v15  ;;  %v14186_v51 = vld [vmem:[#allocation17_spill] sm:$0xff] }
 0x165   : > { %8947 = vmatmul.mubr.msk.bf16.gmra.mrb[168].mxu1 %vm1999_vm0, %v9216_v58  ;;  %8694 = vmatprep.mubr.msk.bf16.mxu0 %vm1999_vm0, %v9217_v55  ;;  %v10471_v58 = vadd.f32 %v9787_v38, %v4898_v40  ;;  %v5153_v55 = vmul.f32 %v9774_v50, %v10002_v23  ;;  %v4902_v40 = vmul.f32 %v10040_v61, %v9774_v50  ;;  %v9219_v23 = vld [vmem:[%s9361_s22 + $0x2b8] sm:$0xff]  }
 0x166   : > { %8950 = vmatprep.mubr.msk.bf16.mxu1 %vm1999_vm0, %v9218_v12  ;;  %14152 = vst [vmem:[#allocation89_spill] sm:$0xff] %v10481_v21  ;;  %v10484_v12 = vadd.f32 %v9787_v38, %v5152_v20  ;;  %v4900_v20 = vmul.f32 %v9774_v50, %v10051_v18  ;;  %v10511_v48 = vadd.f32 %v9787_v38, %v4897_v0 }
 0x167   : > { %v10475_v2 = vpop.f32.mrb[64].mxu0  ;;  %v4903_v3 = vmul.f32 %v10063_v62, %v9774_v50  ;;  %v10524_v25 = vadd.f32 %v9787_v38, %v5153_v55  ;;  %v4901_v0 = vmul.f32 %v9774_v50, %v10075_v28  ;;  %v10536_v32 = vadd.f32 %v9787_v38, %v4902_v40 }
 0x168   : > { %14153 = vst [vmem:[#allocation90_spill] sm:$0xff] %v10484_v12  ;;  %v10488_v19 = vpop.f32.mrb[64].mxu1  ;;  %v10490_v31 = vpop.f32.mrb[65].mxu0  ;;  %14156 = vst [vmem:[#allocation93_spill] sm:$0xff] %v10511_v48  ;;  %v10541_v52 = vadd.f32 %v9787_v38, %v5158_v6  ;;  %v10544_v28 = vadd.f32 %v9787_v38, %v4900_v20  ;;  %v5157_v62 = vmul.f32 %v9774_v50, %v10085_v46 }
 0x169   : > { %v10501_v30 = vpop.f32.mrb[65].mxu1  ;;  %v10503_v61 = vpop.f32.mrb[66].mxu0  ;;  %14157 = vst [vmem:[#allocation94_spill] sm:$0xff] %v10524_v25  ;;  %14158 = vst [vmem:[#allocation95_spill] sm:$0xff] %v10536_v32  ;;  %v10553_v55 = vadd.f32 %v9787_v38, %v5156_v53  ;;  %v10556_v6 = vadd.f32 %v9787_v38, %v4903_v3  ;;  %v10561_v46 = vadd.f32 %v9787_v38, %v5159_v14 }
 0x16a   : > { %v10517_v10 = vpop.f32.mrb[66].mxu1  ;;  %v10519_v18 = vpop.f32.mrb[67].mxu0  ;;  %14159 = vst [vmem:[#allocation96_spill] sm:$0xff] %v10541_v52  ;;  %14160 = vst [vmem:[#allocation97_spill] sm:$0xff] %v10544_v28  ;;  %v4904_v20 = vmul.f32 %v9774_v50, %v10138_v45  ;;  %v5160_v14 = vmul.f32 %v9774_v50, %v10150_v49  ;;  %v10585_v3 = vadd.f32 %v9787_v38, %v5157_v62  ;;  %v9224_v49 = vld [vmem:[%s9361_s22 + $0x6c8] sm:$0xff]  }
 0x16b   : > { %v10530_v33 = vpop.f32.mrb[67].mxu1  ;;  %14161 = vst [vmem:[#allocation98_spill] sm:$0xff] %v10553_v55  ;;  %14162 = vst [vmem:[#allocation99_spill] sm:$0xff] %v10556_v6  ;;  %v5163_v40 = vmul.f32 %v10164_v17, %v9774_v50  ;;  %v4905_v62 = vmul.f32 %v9774_v50, %v10166_v42  ;;  %v5161_v25 = vmul.f32 %v9774_v50, %v10178_v39  ;;  %v14171_v52 = vld [vmem:[#allocation7_spill] sm:$0xff] }
 0x16c   : > { %8695 = vmatmul.mubr.msk.bf16.gmra.mrb[172].mxu0 %vm1999_vm0, %v9219_v23  ;;  %14163 = vst [vmem:[#allocation100_spill] sm:$0xff] %v10561_v46  ;;  %14165 = vst [vmem:[#allocation102_spill] sm:$0xff] %v10585_v3  ;;  %v10619_v42 = vadd.f32 %v9787_v38, %v4904_v20  ;;  %v10622_v6 = vadd.f32 %v9787_v38, %v5160_v14  ;;  %v4910_v48 = vmul.f32 %v10211_v29, %v9774_v50  ;;  %v14178_v3 = vld [vmem:[#allocation12_spill] sm:$0xff] }
 0x16d   : > { %8951 = vmatmul.mubr.msk.bf16.gmra.mrb[172].mxu1 %vm1999_vm0, %v9220_v5  ;;  %8698 = vmatprep.mubr.msk.bf16.mxu0 %vm1999_vm0, %v9221_v22  ;;  %v10564_v22 = vadd.f32 %v9787_v38, %v4901_v0  ;;  %v4906_v5 = vmul.f32 %v10128_v35, %v9774_v50  ;;  %v9223_v35 = vld [vmem:[%s9361_s22 + $0x2c8] sm:$0xff]   ;;  %v4908_v20 = vmul.f32 %v9774_v50, %v14171_v52 }
 0x16e   : > { %8954 = vmatprep.mubr.msk.bf16.mxu1 %vm1999_vm0, %v9222_v16  ;;  %v5162_v16 = vmul.f32 %v10136_v1, %v9774_v50  ;;  %v4907_v1 = vmul.f32 %v10152_v9, %v9774_v50  ;;  %v9226_v9 = vld [vmem:[%s9361_s22 + $0x6d0] sm:$0xff]   ;;  %14168 = vst [vmem:[#allocation105_spill] sm:$0xff] %v10619_v42  ;;  %14169 = vst [vmem:[#allocation106_spill] sm:$0xff] %v10622_v6  ;;  %v10638_v14 = vadd.f32 %v9787_v38, %v5163_v40  ;;  %v9228_v6 = vld [vmem:[%s9361_s22 + $0x6d8] sm:$0xff]  }
 0x16f   : > { %14164 = vst [vmem:[#allocation101_spill] sm:$0xff] %v10564_v22  ;;  %v10568_v53 = vpop.f32.mrb[68].mxu0  ;;  %v10609_v15 = vadd.f32 %v9787_v38, %v4906_v5  ;;  %v10641_v29 = vadd.f32 %v9787_v38, %v4905_v62  ;;  %v14175_v5 = vld [vmem:[#allocation10_spill] sm:$0xff]  ;;  %v4909_v62 = vmul.f32 %v9774_v50, %v14178_v3  ;;  %v10662_v52 = vadd.f32 %v9787_v38, %v4910_v48 }
 0x170   : > { %v10577_v0 = vpop.f32.mrb[68].mxu1  ;;  %v10579_v23 = vpop.f32.mrb[69].mxu0  ;;  %v10616_v17 = vadd.f32 %v9787_v38, %v5162_v16  ;;  %v10629_v39 = vadd.f32 %v9787_v38, %v4907_v1  ;;  %v5166_v16 = vmul.f32 %v10224_v24, %v9774_v50  ;;  %14172 = vst [vmem:[#allocation7_spill] sm:$0xff] %v10638_v14  ;;  %v4911_v24 = vmul.f32 %v14175_v5, %v9774_v50  ;;  %v9229_v42 = vld [vmem:[%s9361_s22 + $0x2e0] sm:$0xff]  }
 0x171   : > { %v10589_v45 = vpop.f32.mrb[69].mxu1  ;;  %v10591_v63 = vpop.f32.mrb[70].mxu0  ;;  %14166 = vst [vmem:[#allocation103_spill] sm:$0xff] %v10609_v15  ;;  %14173 = vst [vmem:[#allocation108_spill] sm:$0xff] %v10641_v29  ;;  %v5170_v29 = vmul.f32 %v10313_v47, %v9774_v50  ;;  %v4912_v14 = vmul.f32 %v9774_v50, %v10315_v56  ;;  %v14188_v47 = vld [vmem:[#allocation18_spill] sm:$0xff] }
 0x172   : > { %v10601_v54 = vpop.f32.mrb[70].mxu1  ;;  %v10603_v28 = vpop.f32.mrb[71].mxu0  ;;  %14167 = vst [vmem:[#allocation104_spill] sm:$0xff] %v10616_v17  ;;  %14170 = vst [vmem:[#allocation107_spill] sm:$0xff] %v10629_v39  ;;  %v10671_v46 = vadd.f32 %v9787_v38, %v5166_v16  ;;  %v10690_v16 = vadd.f32 %v9787_v38, %v4911_v24  ;;  %v10702_v17 = vadd.f32 %v9787_v38, %v4909_v62  ;;  %v10724_v24 = vld [vmem:[%s13777_s2] ss:$0 sm:$0xff] }
 0x173   : > { %v10613_v32 = vpop.f32.mrb[71].mxu1  ;;  %14179 = vst [vmem:[#allocation10_spill] sm:$0xff] %v10662_v52  ;;  %v4915_v56 = vmul.f32 %v10724_v24, %v14188_v47 }
 0x174   : > { %8699 = vmatmul.mubr.msk.bf16.gmra.mrb[176].mxu0 %vm1999_vm0, %v9223_v35  ;;  %v14174_v35 = vld [vmem:[#allocation9_spill] sm:$0xff]  ;;  %14183 = vst [vmem:[#allocation110_spill] sm:$0xff] %v10690_v16  ;;  %14185 = vst [vmem:[#allocation112_spill] sm:$0xff] %v10702_v17  ;;  %v9232_v17 = vld [vmem:[%s9361_s22 + $0x6e8] sm:$0xff]  }
 0x175   : > { %8955 = vmatmul.mubr.msk.bf16.gmra.mrb[176].mxu1 %vm1999_vm0, %v9224_v49  ;;  %8702 = vmatprep.mubr.msk.bf16.mxu0 %vm1999_vm0, %v9225_v26  ;;  %v5164_v1 = vmul.f32 %v9774_v50, %v14174_v35  ;;  %v10650_v49 = vadd.f32 %v9787_v38, %v5161_v25  ;;  %v14177_v26 = vld [vmem:[#allocation11_spill] sm:$0xff]  ;;  %v10674_v35 = vadd.f32 %v9787_v38, %v4908_v20 }
 0x176   : > { %8958 = vmatprep.mubr.msk.bf16.mxu1 %vm1999_vm0, %v9226_v9  ;;  %v5167_v40 = vmul.f32 %v14177_v26, %v9774_v50  ;;  %v9227_v26 = vld [vmem:[%s9361_s22 + $0x2d8] sm:$0xff]   ;;  %14180 = vst [vmem:[#allocation11_spill] sm:$0xff] %v10671_v46  ;;  %v5165_v9 = vmul.f32 %v9774_v50, %v10266_v36  ;;  %v9230_v36 = vld [vmem:[%s9361_s22 + $0x6e0] sm:$0xff]  }
 0x177   : > { %14176 = vst [vmem:[#allocation9_spill] sm:$0xff] %v10650_v49  ;;  %v10656_v22 = vpop.f32.mrb[72].mxu0  ;;  %14181 = vst [vmem:[#allocation12_spill] sm:$0xff] %v10674_v35  ;;  %v10687_v3 = vadd.f32 %v9787_v38, %v5164_v1  ;;  %v4914_v1 = vmul.f32 %v10304_v8, %v9774_v50  ;;  %v9237_v35 = vld [vmem:[%s9361_s22 + $0x300] sm:$0xff]  }
 0x178   : > { %v10664_v25 = vpop.f32.mrb[72].mxu1  ;;  %v10666_v15 = vpop.f32.mrb[73].mxu0  ;;  %v10699_v12 = vadd.f32 %v9787_v38, %v5167_v40  ;;  %v5168_v40 = vmul.f32 %v9774_v50, %v14186_v51  ;;  %v10719_v8 = vadd.f32 %v9787_v38, %v5165_v9  ;;  %v5171_v38 = vmul.f32 %v10724_v24, %v10337_v44 }
 0x179   : > { %v10678_v5 = vpop.f32.mrb[73].mxu1  ;;  %v10680_v48 = vpop.f32.mrb[74].mxu0  ;;  %14182 = vst [vmem:[#allocation109_spill] sm:$0xff] %v10687_v3  ;;  %v4913_v9 = vmul.f32 %v10724_v24, %v10339_v60  ;;  %v5169_v44 = vmul.f32 %v10724_v24, %v10349_v34  ;;  %v9231_v34 = vld [vmem:[%s9361_s22 + $0x2e8] sm:$0xff]   ;;  %v9234_v3 = vld [vmem:[%s9361_s22 + $0x6f0] sm:$0xff]  }
 0x17a   : > { %v10692_v20 = vpop.f32.mrb[74].mxu1  ;;  %v10694_v39 = vpop.f32.mrb[75].mxu0  ;;  %14184 = vst [vmem:[#allocation111_spill] sm:$0xff] %v10699_v12  ;;  %14187 = vst [vmem:[#allocation17_spill] sm:$0xff] %v10719_v8  ;;  %v9233_v12 = vld [vmem:[%s9361_s22 + $0x2f0] sm:$0xff]  }
 0x17b   : > { %v10706_v55 = vpop.f32.mrb[75].mxu1 }
 0x17c   : > { %8703 = vmatmul.mubr.msk.bf16.gmra.mrb[180].mxu0 %vm1999_vm0, %v9227_v26 }
 0x17d   : > { %8959 = vmatmul.mubr.msk.bf16.gmra.mrb[180].mxu1 %vm1999_vm0, %v9228_v6  ;;  %8706 = vmatprep.mubr.msk.bf16.mxu0 %vm1999_vm0, %v9229_v42  ;;  %v10742_v6 = vld [vmem:[%s13778_s3] ss:$0 sm:$0xff] }
 0x17e   : > { %8962 = vmatprep.mubr.msk.bf16.mxu1 %vm1999_vm0, %v9230_v36  ;;  %v10745_v42 = vadd.f32 %v10742_v6, %v4914_v1  ;;  %v10752_v36 = vadd.f32 %v10742_v6, %v5170_v29  ;;  %v10755_v47 = vadd.f32 %v10742_v6, %v4912_v14  ;;  %v10758_v26 = vadd.f32 %v10742_v6, %v5168_v40 }
 0x17f   : > { %v10749_v60 = vpop.f32.mrb[76].mxu0  ;;  %v4918_v1 = vmul.f32 %v10724_v24, %v10392_v37  ;;  %v10769_v29 = vadd.f32 %v10742_v6, %v4915_v56  ;;  %v5174_v14 = vmul.f32 %v10724_v24, %v10400_v13  ;;  %v4916_v40 = vmul.f32 %v10724_v24, %v10402_v27 }
 0x180   : > { %v10762_v51 = vpop.f32.mrb[76].mxu1  ;;  %v10764_v50 = vpop.f32.mrb[77].mxu0  ;;  %v10782_v16 = vadd.f32 %v10742_v6, %v5171_v38  ;;  %v10785_v49 = vadd.f32 %v10742_v6, %v4913_v9  ;;  %v5172_v56 = vmul.f32 %v10724_v24, %v10414_v41  ;;  %v4919_v13 = vmul.f32 %v10724_v24, %v10416_v43 }
 0x181   : > { %v10775_v62 = vpop.f32.mrb[77].mxu1  ;;  %v10777_v37 = vpop.f32.mrb[78].mxu0  ;;  %v10798_v46 = vadd.f32 %v10742_v6, %v5169_v44  ;;  %v5175_v38 = vmul.f32 %v10724_v24, %v10428_v4  ;;  %v4917_v9 = vmul.f32 %v10724_v24, %v10430_v57  ;;  %v10810_v7 = vadd.f32 %v10742_v6, %v4918_v1 }
 0x182   : > { %14189 = vst [vmem:[#allocation18_spill] sm:$0xff] %v10782_v16  ;;  %14190 = vst [vmem:[#allocation113_spill] sm:$0xff] %v10785_v49  ;;  %v10791_v8 = vpop.f32.mrb[78].mxu1  ;;  %v10793_v27 = vpop.f32.mrb[79].mxu0  ;;  %v10815_v4 = vadd.f32 %v10742_v6, %v5174_v14  ;;  %v10818_v57 = vadd.f32 %v10742_v6, %v4916_v40  ;;  %v5173_v43 = vmul.f32 %v10724_v24, %v10442_v59 }
 0x183   : > { %14191 = vst [vmem:[#allocation114_spill] sm:$0xff] %v10798_v46  ;;  %v10804_v41 = vpop.f32.mrb[79].mxu1  ;;  %14192 = vst [vmem:[#allocation115_spill] sm:$0xff] %v10810_v7  ;;  %v10827_v44 = vadd.f32 %v10742_v6, %v5172_v56  ;;  %v10830_v14 = vadd.f32 %v10742_v6, %v4919_v13  ;;  %v10835_v59 = vadd.f32 %v10742_v6, %v5175_v38 }
 0x184   : > { %8707 = vmatmul.mubr.msk.bf16.gmra.mrb[184].mxu0 %vm1999_vm0, %v9231_v34  ;;  %14193 = vst [vmem:[#allocation116_spill] sm:$0xff] %v10815_v4  ;;  %14194 = vst [vmem:[#allocation117_spill] sm:$0xff] %v10818_v57  ;;  %v4920_v40 = vmul.f32 %v10724_v24, %v10490_v31  ;;  %v5176_v38 = vmul.f32 %v10724_v24, %v10501_v30  ;;  %v10859_v13 = vadd.f32 %v10742_v6, %v5173_v43  ;;  %v9236_v30 = vld [vmem:[%s9361_s22 + $0x6f8] sm:$0xff]   ;;  %v9240_v4 = vld [vmem:[%s9361_s22 + $0x708] sm:$0xff]  }
 0x185   : > { %8963 = vmatmul.mubr.msk.bf16.gmra.mrb[184].mxu1 %vm1999_vm0, %v9232_v17  ;;  %8710 = vmatprep.mubr.msk.bf16.mxu0 %vm1999_vm0, %v9233_v12  ;;  %14195 = vst [vmem:[#allocation118_spill] sm:$0xff] %v10830_v14  ;;  %v10838_v12 = vadd.f32 %v10742_v6, %v4917_v9  ;;  %v4922_v17 = vmul.f32 %v10724_v24, %v10475_v2  ;;  %v9235_v2 = vld [vmem:[%s9361_s22 + $0x2f8] sm:$0xff]  }
 0x186   : > { %8966 = vmatprep.mubr.msk.bf16.mxu1 %vm1999_vm0, %v9234_v3  ;;  %v5178_v3 = vmul.f32 %v10724_v24, %v10488_v19  ;;  %14196 = vst [vmem:[#allocation119_spill] sm:$0xff] %v10859_v13  ;;  %v4923_v19 = vmul.f32 %v10724_v24, %v10503_v61  ;;  %v5179_v1 = vmul.f32 %v10724_v24, %v10517_v10  ;;  %v9238_v61 = vld [vmem:[%s9361_s22 + $0x700] sm:$0xff]  }
 0x187   : > { %v10842_v56 = vpop.f32.mrb[80].mxu0  ;;  %v4921_v43 = vmul.f32 %v10724_v24, %v10519_v18  ;;  %v10883_v16 = vadd.f32 %v10742_v6, %v4922_v17  ;;  %v5177_v46 = vmul.f32 %v10724_v24, %v10530_v33  ;;  %v10893_v18 = vadd.f32 %v10742_v6, %v4920_v40 }
 0x188   : > { %v10851_v9 = vpop.f32.mrb[80].mxu1  ;;  %v10853_v34 = vpop.f32.mrb[81].mxu0  ;;  %v10890_v10 = vadd.f32 %v10742_v6, %v5178_v3  ;;  %v10896_v14 = vadd.f32 %v10742_v6, %v5176_v38  ;;  %v4926_v49 = vmul.f32 %v10724_v24, %v10568_v53  ;;  %v10903_v33 = vadd.f32 %v10742_v6, %v4923_v19 }
 0x189   : > { %v10863_v31 = vpop.f32.mrb[81].mxu1  ;;  %v10865_v52 = vpop.f32.mrb[82].mxu0  ;;  %14197 = vst [vmem:[#allocation120_spill] sm:$0xff] %v10883_v16  ;;  %14199 = vst [vmem:[#allocation122_spill] sm:$0xff] %v10893_v18  ;;  %v5182_v3 = vmul.f32 %v10724_v24, %v10577_v0  ;;  %v4924_v40 = vmul.f32 %v10724_v24, %v10579_v23  ;;  %v10912_v38 = vadd.f32 %v10742_v6, %v5179_v1 }
 0x18a   : > { %v10875_v21 = vpop.f32.mrb[82].mxu1  ;;  %v10877_v57 = vpop.f32.mrb[83].mxu0  ;;  %14198 = vst [vmem:[#allocation121_spill] sm:$0xff] %v10890_v10  ;;  %14200 = vst [vmem:[#allocation123_spill] sm:$0xff] %v10896_v14  ;;  %v10915_v53 = vadd.f32 %v10742_v6, %v4921_v43  ;;  %v4927_v0 = vmul.f32 %v10724_v24, %v10591_v63  ;;  %v10924_v19 = vadd.f32 %v10742_v6, %v5177_v46  ;;  %v9241_v14 = vld [vmem:[%s9361_s22 + $0x310] sm:$0xff]  }
 0x18b   : > { %v10887_v7 = vpop.f32.mrb[83].mxu1  ;;  %14201 = vst [vmem:[#allocation124_spill] sm:$0xff] %v10903_v33  ;;  %14202 = vst [vmem:[#allocation125_spill] sm:$0xff] %v10912_v38  ;;  %v4925_v1 = vmul.f32 %v10724_v24, %v10603_v28  ;;  %v10945_v17 = vadd.f32 %v10742_v6, %v5182_v3  ;;  %v5181_v43 = vmul.f32 %v10724_v24, %v10613_v32  ;;  %v9242_v32 = vld [vmem:[%s9361_s22 + $0x710] sm:$0xff]  }
 0x18c   : > { %8711 = vmatmul.mubr.msk.bf16.gmra.mrb[188].mxu0 %vm1999_vm0, %v9235_v2  ;;  %14203 = vst [vmem:[#allocation126_spill] sm:$0xff] %v10915_v53  ;;  %v5180_v2 = vmul.f32 %v10724_v24, %v10589_v45  ;;  %14204 = vst [vmem:[#allocation127_spill] sm:$0xff] %v10924_v19  ;;  %v10948_v45 = vadd.f32 %v10742_v6, %v4924_v40  ;;  %v10964_v3 = vadd.f32 %v10742_v6, %v4927_v0 }
 0x18d   : > { %8967 = vmatmul.mubr.msk.bf16.gmra.mrb[188].mxu1 %vm1999_vm0, %v9236_v30  ;;  %8714 = vmatprep.mubr.msk.bf16.mxu0 %vm1999_vm0, %v9237_v35  ;;  %v5183_v35 = vmul.f32 %v10724_v24, %v10601_v54  ;;  %v9239_v54 = vld [vmem:[%s9361_s22 + $0x308] sm:$0xff]   ;;  %14206 = vst [vmem:[#allocation129_spill] sm:$0xff] %v10945_v17  ;;  %v10976_v18 = vadd.f32 %v10742_v6, %v4925_v1  ;;  %v9244_v1 = vld [vmem:[%s9361_s22 + $0x718] sm:$0xff]  }
 0x18e   : > { %8970 = vmatprep.mubr.msk.bf16.mxu1 %vm1999_vm0, %v9238_v61  ;;  %v10936_v61 = vadd.f32 %v10742_v6, %v4926_v49  ;;  %14207 = vst [vmem:[#allocation130_spill] sm:$0xff] %v10948_v45  ;;  %v10961_v28 = vadd.f32 %v10742_v6, %v5180_v2  ;;  %14209 = vst [vmem:[#allocation132_spill] sm:$0xff] %v10964_v3  ;;  %v4930_v2 = vmul.f32 %v10724_v24, %v10656_v22  ;;  %v9246_v3 = vld [vmem:[%s9361_s22 + $0x720] sm:$0xff]  }
 0x18f   : > { %v10930_v30 = vpop.f32.mrb[84].mxu0  ;;  %v10973_v13 = vadd.f32 %v10742_v6, %v5183_v35  ;;  %14211 = vst [vmem:[#allocation134_spill] sm:$0xff] %v10976_v18  ;;  %v5186_v53 = vmul.f32 %v10724_v24, %v10664_v25  ;;  %v4928_v38 = vmul.f32 %v10724_v24, %v10666_v15  ;;  %v5184_v35 = vmul.f32 %v10724_v24, %v10678_v5  ;;  %v9245_v18 = vld [vmem:[%s9361_s22 + $0x320] sm:$0xff]  }
 0x190   : > { %14205 = vst [vmem:[#allocation128_spill] sm:$0xff] %v10936_v61  ;;  %v10938_v46 = vpop.f32.mrb[84].mxu1  ;;  %v10940_v23 = vpop.f32.mrb[85].mxu0  ;;  %14208 = vst [vmem:[#allocation131_spill] sm:$0xff] %v10961_v28  ;;  %v10993_v22 = vadd.f32 %v10742_v6, %v5181_v43  ;;  %v4931_v0 = vmul.f32 %v10724_v24, %v10680_v48  ;;  %v5187_v25 = vmul.f32 %v10724_v24, %v10692_v20  ;;  %v9249_v28 = vld [vmem:[%s9361_s22 + $0x330] sm:$0xff]  }
 0x191   : > { %v10952_v63 = vpop.f32.mrb[85].mxu1  ;;  %v10954_v49 = vpop.f32.mrb[86].mxu0  ;;  %14210 = vst [vmem:[#allocation133_spill] sm:$0xff] %v10973_v13  ;;  %v11016_v20 = vadd.f32 %v10742_v6, %v5186_v53 }
 0x192   : > { %v10966_v40 = vpop.f32.mrb[86].mxu1  ;;  %v10968_v33 = vpop.f32.mrb[87].mxu0  ;;  %14212 = vst [vmem:[#allocation135_spill] sm:$0xff] %v10993_v22  ;;  %v11033_v53 = vadd.f32 %v10742_v6, %v4931_v0  ;;  %v11046_v13 = vadd.f32 %v10742_v6, %v5187_v25  ;;  %v5188_v0 = vmul.f32 %v10724_v24, %v10775_v62  ;;  %v5191_v25 = vmul.f32 %v10724_v24, %v10791_v8 }
 0x193   : > { %v10980_v10 = vpop.f32.mrb[87].mxu1 }
 0x194   : > { %8715 = vmatmul.mubr.msk.bf16.gmra.mrb[192].mxu0 %vm1999_vm0, %v9239_v54  ;;  %v4929_v54 = vmul.f32 %v10724_v24, %v10694_v39  ;;  %v11019_v39 = vadd.f32 %v10742_v6, %v4928_v38  ;;  %14214 = vst [vmem:[#allocation137_spill] sm:$0xff] %v11033_v53  ;;  %v5190_v38 = vmul.f32 %v10724_v24, %v10762_v51  ;;  %14215 = vst [vmem:[#allocation138_spill] sm:$0xff] %v11046_v13 }
 0x195   : > { %8971 = vmatmul.mubr.msk.bf16.gmra.mrb[192].mxu1 %vm1999_vm0, %v9240_v4  ;;  %8718 = vmatprep.mubr.msk.bf16.mxu0 %vm1999_vm0, %v9241_v14  ;;  %v11009_v4 = vadd.f32 %v10742_v6, %v4930_v2  ;;  %v5185_v14 = vmul.f32 %v10724_v24, %v10706_v55  ;;  %v4934_v2 = vmul.f32 %v10724_v24, %v10749_v60  ;;  %v9243_v55 = vld [vmem:[%s9361_s22 + $0x318] sm:$0xff]  }
 0x196   : > { %8974 = vmatprep.mubr.msk.bf16.mxu1 %vm1999_vm0, %v9242_v32  ;;  %v11022_v32 = vadd.f32 %v10742_v6, %v5184_v35  ;;  %v4932_v35 = vmul.f32 %v10724_v24, %v10764_v50  ;;  %v11049_v15 = vadd.f32 %v10742_v6, %v4929_v54  ;;  %v4935_v51 = vmul.f32 %v10724_v24, %v10777_v37 }
 0x197   : > { %v11013_v5 = vpop.f32.mrb[88].mxu0  ;;  %v11062_v45 = vadd.f32 %v10742_v6, %v5185_v14  ;;  %v4933_v54 = vmul.f32 %v10724_v24, %v10793_v27  ;;  %v11074_v19 = vadd.f32 %v10742_v6, %v4934_v2  ;;  %v11079_v8 = vadd.f32 %v10742_v6, %v5190_v38 }
 0x198   : > { %14213 = vst [vmem:[#allocation136_spill] sm:$0xff] %v11022_v32  ;;  %v11026_v48 = vpop.f32.mrb[88].mxu1  ;;  %v11028_v43 = vpop.f32.mrb[89].mxu0  ;;  %14216 = vst [vmem:[#allocation139_spill] sm:$0xff] %v11049_v15  ;;  %v11082_v27 = vadd.f32 %v10742_v6, %v4932_v35  ;;  %v5189_v37 = vmul.f32 %v10724_v24, %v10804_v41  ;;  %v11091_v14 = vadd.f32 %v10742_v6, %v5188_v0 }
 0x199   : > { %v11039_v16 = vpop.f32.mrb[89].mxu1  ;;  %v11041_v60 = vpop.f32.mrb[90].mxu0  ;;  %14217 = vst [vmem:[#allocation140_spill] sm:$0xff] %v11062_v45  ;;  %14218 = vst [vmem:[#allocation141_spill] sm:$0xff] %v11074_v19  ;;  %v11094_v38 = vadd.f32 %v10742_v6, %v4935_v51  ;;  %v11099_v41 = vadd.f32 %v10742_v6, %v5191_v25  ;;  %v4936_v35 = vmul.f32 %v10724_v24, %v10853_v34 }
 0x19a   : > { %v11055_v22 = vpop.f32.mrb[90].mxu1  ;;  %v11057_v50 = vpop.f32.mrb[91].mxu0  ;;  %14219 = vst [vmem:[#allocation142_spill] sm:$0xff] %v11079_v8  ;;  %14220 = vst [vmem:[#allocation143_spill] sm:$0xff] %v11082_v27  ;;  %v5192_v25 = vmul.f32 %v10724_v24, %v10863_v31  ;;  %v11123_v51 = vadd.f32 %v10742_v6, %v5189_v37  ;;  %v9248_v31 = vld [vmem:[%s9361_s22 + $0x728] sm:$0xff]   ;;  %v5195_v2 = vmul.f32 %v10724_v24, %v10875_v21  ;;  %v9252_v8 = vld [vmem:[%s9361_s22 + $0x738] sm:$0xff]  }
 0x19b   : > { %v11068_v62 = vpop.f32.mrb[91].mxu1  ;;  %14221 = vst [vmem:[#allocation144_spill] sm:$0xff] %v11091_v14  ;;  %14222 = vst [vmem:[#allocation145_spill] sm:$0xff] %v11094_v38  ;;  %v4937_v37 = vmul.f32 %v10724_v24, %v10877_v57  ;;  %v5193_v45 = vmul.f32 %v10724_v24, %v10887_v7  ;;  %v11157_v57 = vadd.f32 %v10742_v6, %v4936_v35 }
 0x19c   : > { %8719 = vmatmul.mubr.msk.bf16.gmra.mrb[196].mxu0 %vm1999_vm0, %v9243_v55  ;;  %14223 = vst [vmem:[#allocation146_spill] sm:$0xff] %v11099_v41  ;;  %14225 = vst [vmem:[#allocation148_spill] sm:$0xff] %v11123_v51  ;;  %v11160_v38 = vadd.f32 %v10742_v6, %v5192_v25  ;;  %v4942_v15 = vmul.f32 %v10724_v24, %v10930_v30  ;;  %v4940_v35 = vmul.f32 %v10724_v24, %v10940_v23 }
 0x19d   : > { %8975 = vmatmul.mubr.msk.bf16.gmra.mrb[196].mxu1 %vm1999_vm0, %v9244_v1  ;;  %8722 = vmatprep.mubr.msk.bf16.mxu0 %vm1999_vm0, %v9245_v18  ;;  %v11102_v18 = vadd.f32 %v10742_v6, %v4933_v54  ;;  %v4938_v1 = vmul.f32 %v10724_v24, %v10842_v56  ;;  %v9247_v56 = vld [vmem:[%s9361_s22 + $0x328] sm:$0xff]   ;;  %14228 = vst [vmem:[#allocation151_spill] sm:$0xff] %v11157_v57 }
 0x19e   : > { %8978 = vmatprep.mubr.msk.bf16.mxu1 %vm1999_vm0, %v9246_v3  ;;  %v5194_v3 = vmul.f32 %v10724_v24, %v10851_v9  ;;  %v4939_v9 = vmul.f32 %v10724_v24, %v10865_v52  ;;  %v9250_v52 = vld [vmem:[%s9361_s22 + $0x730] sm:$0xff]   ;;  %14229 = vst [vmem:[#allocation152_spill] sm:$0xff] %v11160_v38  ;;  %v11176_v25 = vadd.f32 %v10742_v6, %v5195_v2  ;;  %v9253_v38 = vld [vmem:[%s9361_s22 + $0x340] sm:$0xff]  }
 0x19f   : > { %14224 = vst [vmem:[#allocation147_spill] sm:$0xff] %v11102_v18  ;;  %v11106_v0 = vpop.f32.mrb[92].mxu0  ;;  %v11147_v13 = vadd.f32 %v10742_v6, %v4938_v1  ;;  %v11179_v30 = vadd.f32 %v10742_v6, %v4937_v37  ;;  %v4941_v2 = vmul.f32 %v10724_v24, %v10968_v33  ;;  %v5197_v37 = vmul.f32 %v10724_v24, %v10980_v10  ;;  %v9254_v10 = vld [vmem:[%s9361_s22 + $0x740] sm:$0xff]  }
 0x1a0   : > { %v11115_v54 = vpop.f32.mrb[92].mxu1  ;;  %v11117_v55 = vpop.f32.mrb[93].mxu0  ;;  %v11154_v21 = vadd.f32 %v10742_v6, %v5194_v3  ;;  %v11167_v7 = vadd.f32 %v10742_v6, %v4939_v9  ;;  %v5198_v3 = vmul.f32 %v10724_v24, %v10938_v46  ;;  %14231 = vst [vmem:[#allocation154_spill] sm:$0xff] %v11176_v25  ;;  %v4943_v46 = vmul.f32 %v10724_v24, %v10954_v49 }
 0x1a1   : > { %v11127_v34 = vpop.f32.mrb[93].mxu1  ;;  %v11129_v17 = vpop.f32.mrb[94].mxu0  ;;  %14226 = vst [vmem:[#allocation149_spill] sm:$0xff] %v11147_v13  ;;  %14232 = vst [vmem:[#allocation155_spill] sm:$0xff] %v11179_v30  ;;  %v11188_v9 = vadd.f32 %v10742_v6, %v5193_v45  ;;  %v11240_v57 = vadd.f32 %v10742_v6, %v4941_v2  ;;  %v5202_v30 = vmul.f32 %v10724_v24, %v11026_v48  ;;  %v9256_v2 = vld [vmem:[%s9361_s22 + $0x748] sm:$0xff]  }
 0x1a2   : > { %v11139_v61 = vpop.f32.mrb[94].mxu1  ;;  %v11141_v27 = vpop.f32.mrb[95].mxu0  ;;  %14227 = vst [vmem:[#allocation150_spill] sm:$0xff] %v11154_v21  ;;  %14230 = vst [vmem:[#allocation153_spill] sm:$0xff] %v11167_v7  ;;  %v11209_v1 = vadd.f32 %v10742_v6, %v5198_v3  ;;  %v11228_v3 = vadd.f32 %v10742_v6, %v4943_v46  ;;  %v4944_v25 = vmul.f32 %v10724_v24, %v11028_v43 }
 0x1a3   : > { %v11151_v19 = vpop.f32.mrb[95].mxu1  ;;  %14233 = vst [vmem:[#allocation156_spill] sm:$0xff] %v11188_v9  ;;  %14240 = vst [vmem:[#allocation163_spill] sm:$0xff] %v11240_v57  ;;  %v4947_v46 = vmul.f32 %v10724_v24, %v11041_v60  ;;  %v5203_v48 = vmul.f32 %v10724_v24, %v11055_v22  ;;  %v11280_v22 = vadd.f32 %v10742_v6, %v5202_v30  ;;  %v9257_v57 = vld [vmem:[%s9361_s22 + $0x350] sm:$0xff]  }
 0x1a4   : > { %8723 = vmatmul.mubr.msk.bf16.gmra.mrb[200].mxu0 %vm1999_vm0, %v9247_v56  ;;  %v5196_v56 = vmul.f32 %v10724_v24, %v10952_v63  ;;  %14235 = vst [vmem:[#allocation158_spill] sm:$0xff] %v11209_v1  ;;  %v11212_v63 = vadd.f32 %v10742_v6, %v4940_v35  ;;  %14238 = vst [vmem:[#allocation161_spill] sm:$0xff] %v11228_v3  ;;  %v9258_v3 = vld [vmem:[%s9361_s22 + $0x750] sm:$0xff]  }
 0x1a5   : > { %8979 = vmatmul.mubr.msk.bf16.gmra.mrb[200].mxu1 %vm1999_vm0, %v9248_v31  ;;  %8726 = vmatprep.mubr.msk.bf16.mxu0 %vm1999_vm0, %v9249_v28  ;;  %v5199_v28 = vmul.f32 %v10724_v24, %v10966_v40  ;;  %v9251_v40 = vld [vmem:[%s9361_s22 + $0x338] sm:$0xff]   ;;  %14243 = vst [vmem:[#allocation166_spill] sm:$0xff] %v11280_v22  ;;  %v11297_v30 = vadd.f32 %v10742_v6, %v4947_v46 }
 0x1a6   : > { %8982 = vmatprep.mubr.msk.bf16.mxu1 %vm1999_vm0, %v9250_v52  ;;  %v11200_v52 = vadd.f32 %v10742_v6, %v4942_v15  ;;  %14236 = vst [vmem:[#allocation159_spill] sm:$0xff] %v11212_v63  ;;  %v11225_v33 = vadd.f32 %v10742_v6, %v5196_v56  ;;  %v4946_v56 = vmul.f32 %v10724_v24, %v11013_v5 }
 0x1a7   : > { %v11194_v31 = vpop.f32.mrb[96].mxu0  ;;  %v11237_v51 = vadd.f32 %v10742_v6, %v5199_v28  ;;  %v5200_v28 = vmul.f32 %v10724_v24, %v11039_v16  ;;  %v11257_v5 = vadd.f32 %v10742_v6, %v5197_v37  ;;  %14246 = vst [vmem:[#allocation169_spill] sm:$0xff] %v11297_v30  ;;  %v5204_v46 = vmul.f32 %v10724_v24, %v11127_v34 }
 0x1a8   : > { %14234 = vst [vmem:[#allocation157_spill] sm:$0xff] %v11200_v52  ;;  %v11202_v45 = vpop.f32.mrb[96].mxu1  ;;  %v11204_v23 = vpop.f32.mrb[97].mxu0  ;;  %14237 = vst [vmem:[#allocation160_spill] sm:$0xff] %v11225_v33  ;;  %v9261_v33 = vld [vmem:[%s9361_s22 + $0x360] sm:$0xff]  }
 0x1a9   : > { %v11216_v49 = vpop.f32.mrb[97].mxu1  ;;  %v11218_v15 = vpop.f32.mrb[98].mxu0  ;;  %14239 = vst [vmem:[#allocation162_spill] sm:$0xff] %v11237_v51  ;;  %14241 = vst [vmem:[#allocation164_spill] sm:$0xff] %v11257_v5  ;;  %v11310_v51 = vadd.f32 %v10742_v6, %v5203_v48  ;;  %v5207_v48 = vmul.f32 %v10724_v24, %v11139_v61 }
 0x1aa   : > { %v11230_v35 = vpop.f32.mrb[98].mxu1  ;;  %v11232_v7 = vpop.f32.mrb[99].mxu0 }
 0x1ab   : > { %v11244_v21 = vpop.f32.mrb[99].mxu1  ;;  %14247 = vst [vmem:[#allocation170_spill] sm:$0xff] %v11310_v51 }
 0x1ac   : > { %8727 = vmatmul.mubr.msk.bf16.gmra.mrb[204].mxu0 %vm1999_vm0, %v9251_v40  ;;  %v4945_v40 = vmul.f32 %v10724_v24, %v11057_v50  ;;  %v11283_v50 = vadd.f32 %v10742_v6, %v4944_v25  ;;  %v5206_v25 = vmul.f32 %v10724_v24, %v11115_v54  ;;  %v4951_v54 = vmul.f32 %v10724_v24, %v11129_v17 }
 0x1ad   : > { %8983 = vmatmul.mubr.msk.bf16.gmra.mrb[204].mxu1 %vm1999_vm0, %v9252_v8  ;;  %8730 = vmatprep.mubr.msk.bf16.mxu0 %vm1999_vm0, %v9253_v38  ;;  %v11273_v8 = vadd.f32 %v10742_v6, %v4946_v56  ;;  %v5201_v38 = vmul.f32 %v10724_v24, %v11068_v62  ;;  %v4950_v56 = vmul.f32 %v10724_v24, %v11106_v0  ;;  %v9255_v62 = vld [vmem:[%s9361_s22 + $0x348] sm:$0xff]  }
 0x1ae   : > { %8986 = vmatprep.mubr.msk.bf16.mxu1 %vm1999_vm0, %v9254_v10  ;;  %14244 = vst [vmem:[#allocation167_spill] sm:$0xff] %v11283_v50  ;;  %v11286_v10 = vadd.f32 %v10742_v6, %v5200_v28  ;;  %v4948_v28 = vmul.f32 %v10724_v24, %v11117_v55  ;;  %v11313_v43 = vadd.f32 %v10742_v6, %v4945_v40 }
 0x1af   : > { %14242 = vst [vmem:[#allocation165_spill] sm:$0xff] %v11273_v8  ;;  %v11277_v16 = vpop.f32.mrb[100].mxu0  ;;  %v11326_v63 = vadd.f32 %v10742_v6, %v5201_v38  ;;  %v4949_v40 = vmul.f32 %v10724_v24, %v11141_v27  ;;  %v11338_v9 = vadd.f32 %v10742_v6, %v4950_v56  ;;  %v11343_v61 = vadd.f32 %v10742_v6, %v5206_v25 }
 0x1b0   : > { %14245 = vst [vmem:[#allocation168_spill] sm:$0xff] %v11286_v10  ;;  %v11290_v60 = vpop.f32.mrb[100].mxu1  ;;  %v11292_v37 = vpop.f32.mrb[101].mxu0  ;;  %14248 = vst [vmem:[#allocation171_spill] sm:$0xff] %v11313_v43  ;;  %v11346_v27 = vadd.f32 %v10742_v6, %v4948_v28  ;;  %v5205_v17 = vmul.f32 %v10724_v24, %v11151_v19  ;;  %v11355_v38 = vadd.f32 %v10742_v6, %v5204_v46 }
 0x1b1   : > { %v11303_v13 = vpop.f32.mrb[101].mxu1  ;;  %v11305_v0 = vpop.f32.mrb[102].mxu0  ;;  %14249 = vst [vmem:[#allocation172_spill] sm:$0xff] %v11326_v63  ;;  %14250 = vst [vmem:[#allocation173_spill] sm:$0xff] %v11338_v9  ;;  %v11358_v25 = vadd.f32 %v10742_v6, %v4951_v54  ;;  %v11363_v19 = vadd.f32 %v10742_v6, %v5207_v48  ;;  %v4952_v28 = vmul.f32 %v10724_v24, %v11204_v23 }
 0x1b2   : > { %v11319_v5 = vpop.f32.mrb[102].mxu1  ;;  %v11321_v55 = vpop.f32.mrb[103].mxu0  ;;  %14251 = vst [vmem:[#allocation174_spill] sm:$0xff] %v11343_v61  ;;  %14252 = vst [vmem:[#allocation175_spill] sm:$0xff] %v11346_v27  ;;  %v5208_v48 = vmul.f32 %v10724_v24, %v11216_v49  ;;  %v11387_v54 = vadd.f32 %v10742_v6, %v5205_v17  ;;  %v9260_v49 = vld [vmem:[%s9361_s22 + $0x758] sm:$0xff]   ;;  %v5211_v56 = vmul.f32 %v10724_v24, %v11230_v35 }
 0x1b3   : > { %v11332_v34 = vpop.f32.mrb[103].mxu1  ;;  %14253 = vst [vmem:[#allocation176_spill] sm:$0xff] %v11355_v38  ;;  %14254 = vst [vmem:[#allocation177_spill] sm:$0xff] %v11358_v25  ;;  %v4953_v17 = vmul.f32 %v10724_v24, %v11232_v7  ;;  %v5209_v63 = vmul.f32 %v10724_v24, %v11244_v21  ;;  %v11421_v7 = vadd.f32 %v10742_v6, %v4952_v28 }
 0x1b4   : > { %8731 = vmatmul.mubr.msk.bf16.gmra.mrb[208].mxu0 %vm1999_vm0, %v9255_v62  ;;  %14255 = vst [vmem:[#allocation178_spill] sm:$0xff] %v11363_v19  ;;  %14257 = vst [vmem:[#allocation180_spill] sm:$0xff] %v11387_v54  ;;  %v11424_v25 = vadd.f32 %v10742_v6, %v5208_v48  ;;  %v4958_v43 = vmul.f32 %v10724_v24, %v11277_v16  ;;  %v4956_v28 = vmul.f32 %v10724_v24, %v11292_v37 }
 0x1b5   : > { %8987 = vmatmul.mubr.msk.bf16.gmra.mrb[208].mxu1 %vm1999_vm0, %v9256_v2  ;;  %8734 = vmatprep.mubr.msk.bf16.mxu0 %vm1999_vm0, %v9257_v57  ;;  %v11366_v57 = vadd.f32 %v10742_v6, %v4949_v40  ;;  %v4954_v2 = vmul.f32 %v10724_v24, %v11194_v31  ;;  %v9259_v31 = vld [vmem:[%s9361_s22 + $0x358] sm:$0xff]   ;;  %14260 = vst [vmem:[#allocation183_spill] sm:$0xff] %v11421_v7 }
 0x1b6   : > { %8990 = vmatprep.mubr.msk.bf16.mxu1 %vm1999_vm0, %v9258_v3  ;;  %v5210_v3 = vmul.f32 %v10724_v24, %v11202_v45  ;;  %v4955_v45 = vmul.f32 %v10724_v24, %v11218_v15  ;;  %v9262_v15 = vld [vmem:[%s9361_s22 + $0x760] sm:$0xff]   ;;  %14261 = vst [vmem:[#allocation184_spill] sm:$0xff] %v11424_v25  ;;  %v11440_v48 = vadd.f32 %v10742_v6, %v5211_v56  ;;  %v9264_v25 = vld [vmem:[%s9361_s22 + $0x768] sm:$0xff]  }
 0x1b7   : > { %14256 = vst [vmem:[#allocation179_spill] sm:$0xff] %v11366_v57  ;;  %v11370_v46 = vpop.f32.mrb[104].mxu0  ;;  %v11411_v51 = vadd.f32 %v10742_v6, %v4954_v2  ;;  %v11443_v16 = vadd.f32 %v10742_v6, %v4953_v17  ;;  %v4957_v56 = vmul.f32 %v10724_v24, %v11321_v55  ;;  %v9263_v2 = vld [vmem:[%s9361_s22 + $0x368] sm:$0xff]   ;;  %v11470_v55 = vadd.f32 %v10742_v6, %v4956_v28 }
 0x1b8   : > { %v11379_v40 = vpop.f32.mrb[104].mxu1  ;;  %v11381_v62 = vpop.f32.mrb[105].mxu0  ;;  %v11418_v35 = vadd.f32 %v10742_v6, %v5210_v3  ;;  %v11431_v21 = vadd.f32 %v10742_v6, %v4955_v45  ;;  %v5214_v3 = vmul.f32 %v10724_v24, %v11290_v60  ;;  %14263 = vst [vmem:[#allocation186_spill] sm:$0xff] %v11440_v48  ;;  %v4959_v60 = vmul.f32 %v10724_v24, %v11305_v0 }
 0x1b9   : > { %v11391_v23 = vpop.f32.mrb[105].mxu1  ;;  %v11393_v1 = vpop.f32.mrb[106].mxu0  ;;  %14258 = vst [vmem:[#allocation181_spill] sm:$0xff] %v11411_v51  ;;  %14264 = vst [vmem:[#allocation187_spill] sm:$0xff] %v11443_v16  ;;  %v11452_v45 = vadd.f32 %v10742_v6, %v5209_v63  ;;  %v5213_v0 = vmul.f32 %v10724_v24, %v11332_v34  ;;  %v11490_v57 = vadd.f32 %v10742_v6, %v4957_v56 }
 0x1ba   : > { %v11403_v52 = vpop.f32.mrb[106].mxu1  ;;  %v11405_v27 = vpop.f32.mrb[107].mxu0  ;;  %14259 = vst [vmem:[#allocation182_spill] sm:$0xff] %v11418_v35  ;;  %14262 = vst [vmem:[#allocation185_spill] sm:$0xff] %v11431_v21  ;;  %v11467_v61 = vadd.f32 %v10742_v6, %v5214_v3  ;;  %v11482_v3 = vadd.f32 %v10742_v6, %v4959_v60  ;;  %v9266_v21 = vld [vmem:[%s9361_s22 + $0x770] sm:$0xff]   ;;  %v4962_v35 = vmul.f32 %v10724_v24, %v11370_v46 }
 0x1bb   : > { %v11415_v9 = vpop.f32.mrb[107].mxu1  ;;  %14265 = vst [vmem:[#allocation188_spill] sm:$0xff] %v11452_v45  ;;  %14268 = vst [vmem:[#allocation191_spill] sm:$0xff] %v11470_v55  ;;  %v5218_v60 = vmul.f32 %v10724_v24, %v11379_v40  ;;  %v4960_v16 = vmul.f32 %v10724_v24, %v11381_v62  ;;  %v5216_v54 = vmul.f32 %v10724_v24, %v11391_v23  ;;  %v9267_v62 = vld [vmem:[%s9361_s22 + $0x378] sm:$0xff]   ;;  %v9270_v55 = vld [vmem:[%s9361_s22 + $0x780] sm:$0xff]  }
 0x1bc   : > { %8735 = vmatmul.mubr.msk.bf16.gmra.mrb[212].mxu0 %vm1999_vm0, %v9259_v31  ;;  %v5212_v31 = vmul.f32 %v10724_v24, %v11303_v13  ;;  %14267 = vst [vmem:[#allocation190_spill] sm:$0xff] %v11467_v61  ;;  %14270 = vst [vmem:[#allocation193_spill] sm:$0xff] %v11482_v3  ;;  %v11505_v46 = vadd.f32 %v10742_v6, %v5213_v0  ;;  %v5219_v23 = vmul.f32 %v10724_v24, %v11403_v52  ;;  %v9274_v45 = vld [vmem:[%s9361_s22 + $0x790] sm:$0xff]  }
 0x1bd   : > { %8991 = vmatmul.mubr.msk.bf16.gmra.mrb[212].mxu1 %vm1999_vm0, %v9260_v49  ;;  %8738 = vmatprep.mubr.msk.bf16.mxu0 %vm1999_vm0, %v9261_v33  ;;  %v5215_v33 = vmul.f32 %v10724_v24, %v11319_v5  ;;  %14272 = vst [vmem:[#allocation195_spill] sm:$0xff] %v11490_v57  ;;  %v11526_v52 = vadd.f32 %v10742_v6, %v5218_v60 }
 0x1be   : > { %8994 = vmatprep.mubr.msk.bf16.mxu1 %vm1999_vm0, %v9262_v15  ;;  %v11462_v15 = vadd.f32 %v10742_v6, %v4958_v43  ;;  %v9265_v43 = vld [vmem:[%s9361_s22 + $0x370] sm:$0xff]   ;;  %v11479_v51 = vadd.f32 %v10742_v6, %v5212_v31  ;;  %14273 = vst [vmem:[#allocation196_spill] sm:$0xff] %v11505_v46  ;;  %v4963_v31 = vmul.f32 %v10724_v24, %v11393_v1 }
 0x1bf   : > { %v8632_v49 = vpop.f32.mrb[108].mxu0  ;;  %v11487_v34 = vadd.f32 %v10742_v6, %v5215_v33  ;;  %14275 = vst [vmem:[#allocation198_spill] sm:$0xff] %v11526_v52  ;;  %v11545_v3 = vadd.f32 %v10742_v6, %v5219_v23 }
 0x1c0   : > { %14266 = vst [vmem:[#allocation189_spill] sm:$0xff] %v11462_v15  ;;  %v8888_v63 = vpop.f32.mrb[108].mxu1  ;;  %v3234_v37 = vpop.f32.mrb[109].mxu0  ;;  %14269 = vst [vmem:[#allocation192_spill] sm:$0xff] %v11479_v51  ;;  %v4966_v1 = vmul.f32 %v10724_v24, %v8632_v49 }
 0x1c1   : > { %v4258_v13 = vpop.f32.mrb[109].mxu1  ;;  %v8633_v17 = vpop.f32.mrb[110].mxu0  ;;  %14271 = vst [vmem:[#allocation194_spill] sm:$0xff] %v11487_v34  ;;  %v5222_v60 = vmul.f32 %v10724_v24, %v8888_v63  ;;  %v4964_v33 = vmul.f32 %v10724_v24, %v3234_v37  ;;  %v9268_v34 = vld [vmem:[%s9361_s22 + $0x778] sm:$0xff]   ;;  %14279 = vst [vmem:[#allocation202_spill] sm:$0xff] %v11545_v3 }
 0x1c2   : > { %v8889_v5 = vpop.f32.mrb[110].mxu1  ;;  %v3237_v28 = vpop.f32.mrb[111].mxu0  ;;  %v5220_v51 = vmul.f32 %v10724_v24, %v4258_v13  ;;  %v4967_v56 = vmul.f32 %v10724_v24, %v8633_v17  ;;  %v11563_v17 = vadd.f32 %v10742_v6, %v4966_v1 }
 0x1c3   : > { %v4261_v7 = vpop.f32.mrb[111].mxu1  ;;  %v5223_v61 = vmul.f32 %v10724_v24, %v8889_v5  ;;  %v4965_v23 = vmul.f32 %v10724_v24, %v3237_v28  ;;  %v11571_v5 = vadd.f32 %v10742_v6, %v4964_v33 }
 0x1c4   : > { %8739 = vmatmul.mubr.msk.bf16.gmra.mrb[216].mxu0 %vm1999_vm0, %v9263_v2  ;;  %v4961_v2 = vmul.f32 %v10724_v24, %v11405_v27  ;;  %v11529_v27 = vadd.f32 %v10742_v6, %v4960_v16  ;;  %14282 = vst [vmem:[#allocation205_spill] sm:$0xff] %v11563_v17  ;;  %v5221_v28 = vmul.f32 %v10724_v24, %v4261_v7 }
 0x1c5   : > { %8995 = vmatmul.mubr.msk.bf16.gmra.mrb[216].mxu1 %vm1999_vm0, %v9264_v25  ;;  %8742 = vmatprep.mubr.msk.bf16.mxu0 %vm1999_vm0, %v9265_v43  ;;  %v11521_v25 = vadd.f32 %v10742_v6, %v4962_v35  ;;  %v5217_v43 = vmul.f32 %v10724_v24, %v11415_v9  ;;  %v11538_v9 = vadd.f32 %v10742_v6, %v4963_v31 }
 0x1c6   : > { %8998 = vmatprep.mubr.msk.bf16.mxu1 %vm1999_vm0, %v9266_v21  ;;  %14276 = vst [vmem:[#allocation199_spill] sm:$0xff] %v11529_v27  ;;  %v11532_v21 = vadd.f32 %v10742_v6, %v5216_v54  ;;  %v9269_v54 = vld [vmem:[%s9361_s22 + $0x380] sm:$0xff]   ;;  %v11548_v49 = vadd.f32 %v10742_v6, %v4961_v2  ;;  %14284 = vst [vmem:[#allocation207_spill] sm:$0xff] %v11571_v5  ;;  %v11587_v7 = vadd.f32 %v10742_v6, %v5223_v61  ;;  %v9271_v61 = vld [vmem:[%s9361_s22 + $0x388] sm:$0xff]  }
 0x1c7   : > { %14274 = vst [vmem:[#allocation197_spill] sm:$0xff] %v11521_v25  ;;  %v8636_v40 = vpop.f32.mrb[112].mxu0  ;;  %14278 = vst [vmem:[#allocation201_spill] sm:$0xff] %v11538_v9  ;;  %v11555_v37 = vadd.f32 %v10742_v6, %v5217_v43  ;;  %v11568_v43 = vadd.f32 %v10742_v6, %v5222_v60  ;;  %v11582_v60 = vadd.f32 %v10742_v6, %v4967_v56  ;;  %v11631_v5 = vld [vmem:[%s13778_s3] ss:$0 sm:$0xff] }
 0x1c8   : > { %14277 = vst [vmem:[#allocation200_spill] sm:$0xff] %v11532_v21  ;;  %v8892_v0 = vpop.f32.mrb[112].mxu1  ;;  %v3250_v35 = vpop.f32.mrb[113].mxu0  ;;  %14280 = vst [vmem:[#allocation203_spill] sm:$0xff] %v11548_v49 }
 0x1c9   : > { %v4274_v16 = vpop.f32.mrb[113].mxu1  ;;  %v8637_v57 = vpop.f32.mrb[114].mxu0  ;;  %14281 = vst [vmem:[#allocation204_spill] sm:$0xff] %v11555_v37  ;;  %14283 = vst [vmem:[#allocation206_spill] sm:$0xff] %v11568_v43  ;;  %v5226_v56 = vmul.f32 %v10724_v24, %v8892_v0  ;;  %v4968_v13 = vmul.f32 %v10724_v24, %v3250_v35  ;;  %v9272_v0 = vld [vmem:[%s9361_s22 + $0x788] sm:$0xff]   ;;  %v9273_v37 = vld [vmem:[%s9361_s22 + $0x390] sm:$0xff]  }
 0x1ca   : > { %v8893_v31 = vpop.f32.mrb[114].mxu1  ;;  %v3253_v46 = vpop.f32.mrb[115].mxu0  ;;  %14286 = vst [vmem:[#allocation209_spill] sm:$0xff] %v11582_v60  ;;  %14287 = vst [vmem:[#allocation210_spill] sm:$0xff] %v11587_v7  ;;  %v4971_v2 = vmul.f32 %v10724_v24, %v8637_v57  ;;  %v11619_v35 = vld [vmem:[%s13777_s2] ss:$0 sm:$0xff] }
 0x1cb   : > { %v4277_v15 = vpop.f32.mrb[115].mxu1  ;;  %v5227_v49 = vmul.f32 %v10724_v24, %v8893_v31  ;;  %v4969_v3 = vmul.f32 %v10724_v24, %v3253_v46  ;;  %v11626_v46 = vadd.f32 %v10742_v6, %v4968_v13  ;;  %v14348_v60 = vld [vmem:[#allocation37_spill] sm:$0xff] }
 0x1cc   : > { %8743 = vmatmul.mubr.msk.bf16.gmra.mrb[220].mxu0 %vm1999_vm0, %v9267_v62  ;;  %v11579_v62 = vadd.f32 %v10742_v6, %v5220_v51 }
 0x1cd   : > { %8999 = vmatmul.mubr.msk.bf16.gmra.mrb[220].mxu1 %vm1999_vm0, %v9268_v34  ;;  %8746 = vmatprep.mubr.msk.bf16.mxu0 %vm1999_vm0, %v9269_v54  ;;  %v11590_v34 = vadd.f32 %v10742_v6, %v4965_v23  ;;  %v4970_v54 = vmul.f32 %v10724_v24, %v8636_v40  ;;  %v11601_v40 = vadd.f32 %v10742_v6, %v5221_v28 }
 0x1ce   : > { %14285 = vst [vmem:[#allocation208_spill] sm:$0xff] %v11579_v62  ;;  %9002 = vmatprep.mubr.msk.bf16.mxu1 %vm1999_vm0, %v9270_v55  ;;  %v5224_v55 = vmul.f32 %v10724_v24, %v4274_v16  ;;  %v5225_v16 = vmul.f32 %v11619_v35, %v4277_v15  ;;  %v11623_v24 = vadd.f32 %v10742_v6, %v5226_v56  ;;  %14292 = vst [vmem:[#allocation215_spill] sm:$0xff] %v11626_v46  ;;  %v9277_v46 = vld [vmem:[%s9361_s22 + $0x3a0] sm:$0xff]  }
 0x1cf   : > { %14288 = vst [vmem:[#allocation211_spill] sm:$0xff] %v11590_v34  ;;  %v8640_v1 = vpop.f32.mrb[116].mxu0  ;;  %14289 = vst [vmem:[#allocation212_spill] sm:$0xff] %v11601_v40  ;;  %v11614_v57 = vadd.f32 %v10742_v6, %v4970_v54  ;;  %v11640_v56 = vadd.f32 %v11631_v5, %v4971_v2 }
 0x1d0   : > { %v8896_v33 = vpop.f32.mrb[116].mxu1  ;;  %v3266_v63 = vpop.f32.mrb[117].mxu0  ;;  %14291 = vst [vmem:[#allocation214_spill] sm:$0xff] %v11623_v24  ;;  %v11634_v54 = vadd.f32 %v11631_v5, %v5224_v55  ;;  %v4974_v28 = vmul.f32 %v11619_v35, %v8640_v1  ;;  %v11647_v55 = vadd.f32 %v11631_v5, %v5227_v49  ;;  %v11650_v1 = vadd.f32 %v11631_v5, %v4969_v3 }
 0x1d1   : > { %v4290_v51 = vpop.f32.mrb[117].mxu1  ;;  %v8641_v17 = vpop.f32.mrb[118].mxu0  ;;  %14290 = vst [vmem:[#allocation213_spill] sm:$0xff] %v11614_v57  ;;  %14294 = vst [vmem:[#allocation217_spill] sm:$0xff] %v11640_v56  ;;  %v5230_v6 = vmul.f32 %v11619_v35, %v8896_v33  ;;  %v4972_v13 = vmul.f32 %v11619_v35, %v3266_v63  ;;  %v11656_v33 = vadd.f32 %v11631_v5, %v5225_v16  ;;  %v9278_v56 = vld [vmem:[%s9361_s22 + $0x7a0] sm:$0xff]  }
 0x1d2   : > { %v8897_v23 = vpop.f32.mrb[118].mxu1  ;;  %v3269_v43 = vpop.f32.mrb[119].mxu0  ;;  %14293 = vst [vmem:[#allocation216_spill] sm:$0xff] %v11634_v54  ;;  %14295 = vst [vmem:[#allocation218_spill] sm:$0xff] %v11647_v55  ;;  %v4975_v2 = vmul.f32 %v11619_v35, %v8641_v17  ;;  %v9276_v17 = vld [vmem:[%s9361_s22 + $0x798] sm:$0xff]  }
 0x1d3   : > { %v4293_v31 = vpop.f32.mrb[119].mxu1  ;;  %14296 = vst [vmem:[#allocation219_spill] sm:$0xff] %v11650_v1  ;;  %14297 = vst [vmem:[#allocation220_spill] sm:$0xff] %v11656_v33  ;;  %v5231_v63 = vmul.f32 %v11619_v35, %v8897_v23  ;;  %v9275_v23 = vld [vmem:[%s9361_s22 + $0x398] sm:$0xff]   ;;  %v11674_v3 = vadd.f32 %v11631_v5, %v4972_v13 }
 0x1d4   : > { %8747 = vmatmul.mubr.msk.bf16.gmra.mrb[224].mxu0 %vm1999_vm0, %v9271_v61  ;;  %v5228_v61 = vmul.f32 %v11619_v35, %v4290_v51  ;;  %v5229_v49 = vmul.f32 %v11619_v35, %v4293_v31  ;;  %v11671_v31 = vadd.f32 %v11631_v5, %v5230_v6 }
 0x1d5   : > { %9003 = vmatmul.mubr.msk.bf16.gmra.mrb[224].mxu1 %vm1999_vm0, %v9272_v0  ;;  %8750 = vmatprep.mubr.msk.bf16.mxu0 %vm1999_vm0, %v9273_v37  ;;  %v4973_v37 = vmul.f32 %v11619_v35, %v3269_v43  ;;  %14300 = vst [vmem:[#allocation223_spill] sm:$0xff] %v11674_v3  ;;  %v11684_v43 = vadd.f32 %v11631_v5, %v4975_v2 }
 0x1d6   : > { %9006 = vmatprep.mubr.msk.bf16.mxu1 %vm1999_vm0, %v9274_v45  ;;  %v11665_v45 = vadd.f32 %v11631_v5, %v4974_v28  ;;  %14299 = vst [vmem:[#allocation222_spill] sm:$0xff] %v11671_v31  ;;  %v11681_v34 = vadd.f32 %v11631_v5, %v5228_v61  ;;  %v11689_v54 = vadd.f32 %v11631_v5, %v5231_v63 }
 0x1d7   : > { %v8644_v0 = vpop.f32.mrb[120].mxu0  ;;  %14302 = vst [vmem:[#allocation225_spill] sm:$0xff] %v11684_v43  ;;  %v11692_v7 = vadd.f32 %v11631_v5, %v4973_v37  ;;  %v11695_v28 = vadd.f32 %v11631_v5, %v5229_v49 }
 0x1d8   : > { %14298 = vst [vmem:[#allocation221_spill] sm:$0xff] %v11665_v45  ;;  %v8900_v16 = vpop.f32.mrb[120].mxu1  ;;  %v3282_v15 = vpop.f32.mrb[121].mxu0  ;;  %14301 = vst [vmem:[#allocation224_spill] sm:$0xff] %v11681_v34  ;;  %v4978_v2 = vmul.f32 %v11619_v35, %v8644_v0  ;;  %v9282_v34 = vld [vmem:[%s9361_s22 + $0x7b0] sm:$0xff]  }
 0x1d9   : > { %v4306_v51 = vpop.f32.mrb[121].mxu1  ;;  %v8645_v24 = vpop.f32.mrb[122].mxu0  ;;  %14303 = vst [vmem:[#allocation226_spill] sm:$0xff] %v11689_v54  ;;  %14304 = vst [vmem:[#allocation227_spill] sm:$0xff] %v11692_v7  ;;  %v5234_v1 = vmul.f32 %v11619_v35, %v8900_v16  ;;  %v4976_v55 = vmul.f32 %v11619_v35, %v3282_v15 }
 0x1da   : > { %v8901_v40 = vpop.f32.mrb[122].mxu1  ;;  %v3285_v6 = vpop.f32.mrb[123].mxu0  ;;  %14305 = vst [vmem:[#allocation228_spill] sm:$0xff] %v11695_v28  ;;  %v5232_v37 = vmul.f32 %v11619_v35, %v4306_v51  ;;  %v4979_v49 = vmul.f32 %v11619_v35, %v8645_v24  ;;  %v11718_v0 = vadd.f32 %v11631_v5, %v4978_v2  ;;  %v9279_v24 = vld [vmem:[%s9361_s22 + $0x3a8] sm:$0xff]   ;;  %v9281_v28 = vld [vmem:[%s9361_s22 + $0x3b0] sm:$0xff]  }
 0x1db   : > { %v4309_v57 = vpop.f32.mrb[123].mxu1  ;;  %v5235_v15 = vmul.f32 %v11619_v35, %v8901_v40  ;;  %v11721_v40 = vadd.f32 %v11631_v5, %v5234_v1 }
 0x1dc   : > { %8751 = vmatmul.mubr.msk.bf16.gmra.mrb[228].mxu0 %vm1999_vm0, %v9275_v23  ;;  %v4977_v23 = vmul.f32 %v11619_v35, %v3285_v6  ;;  %14306 = vst [vmem:[#allocation229_spill] sm:$0xff] %v11718_v0  ;;  %v11724_v6 = vadd.f32 %v11631_v5, %v4976_v55  ;;  %v11729_v16 = vadd.f32 %v11631_v5, %v5232_v37  ;;  %v9280_v55 = vld [vmem:[%s9361_s22 + $0x7a8] sm:$0xff]  }
 0x1dd   : > { %9007 = vmatmul.mubr.msk.bf16.gmra.mrb[228].mxu1 %vm1999_vm0, %v9276_v17  ;;  %8754 = vmatprep.mubr.msk.bf16.mxu0 %vm1999_vm0, %v9277_v46  ;;  %v5233_v46 = vmul.f32 %v11619_v35, %v4309_v57  ;;  %14307 = vst [vmem:[#allocation230_spill] sm:$0xff] %v11721_v40  ;;  %v11732_v57 = vadd.f32 %v11631_v5, %v4979_v49 }
 0x1de   : > { %9010 = vmatprep.mubr.msk.bf16.mxu1 %vm1999_vm0, %v9278_v56  ;;  %14308 = vst [vmem:[#allocation231_spill] sm:$0xff] %v11724_v6  ;;  %14309 = vst [vmem:[#allocation232_spill] sm:$0xff] %v11729_v16  ;;  %v11742_v7 = vadd.f32 %v11631_v5, %v4977_v23 }
 0x1df   : > { %v8648_v17 = vpop.f32.mrb[124].mxu0  ;;  %14310 = vst [vmem:[#allocation233_spill] sm:$0xff] %v11732_v57 }
 0x1e0   : > { %v4982_v56 = vmul.f32 %v11619_v35, %v8648_v17  ;;  %v8904_v13 = vpop.f32.mrb[124].mxu1  ;;  %v3298_v51 = vpop.f32.mrb[125].mxu0  ;;  %v11739_v17 = vadd.f32 %v11631_v5, %v5235_v15  ;;  %14312 = vst [vmem:[#allocation235_spill] sm:$0xff] %v11742_v7 }
 0x1e1   : > { %v5238_v2 = vmul.f32 %v11619_v35, %v8904_v13  ;;  %v4980_v1 = vmul.f32 %v11619_v35, %v3298_v51  ;;  %v4322_v63 = vpop.f32.mrb[125].mxu1  ;;  %v8649_v61 = vpop.f32.mrb[126].mxu0  ;;  %v11748_v13 = vadd.f32 %v11631_v5, %v5233_v46 }
 0x1e2   : > { %14311 = vst [vmem:[#allocation234_spill] sm:$0xff] %v11739_v17  ;;  %v5236_v37 = vmul.f32 %v11619_v35, %v4322_v63  ;;  %v4983_v54 = vmul.f32 %v11619_v35, %v8649_v61  ;;  %v8905_v49 = vpop.f32.mrb[126].mxu1  ;;  %v3301_v43 = vpop.f32.mrb[127].mxu0  ;;  %v11751_v51 = vadd.f32 %v11631_v5, %v4982_v56  ;;  %v9283_v56 = vld [vmem:[%s9361_s22 + $0x3b8] sm:$0xff]  }
 0x1e3   : > { %14313 = vst [vmem:[#allocation236_spill] sm:$0xff] %v11748_v13  ;;  %v11754_v3 = vadd.f32 %v11631_v5, %v5238_v2  ;;  %v5239_v15 = vmul.f32 %v11619_v35, %v8905_v49  ;;  %v4325_v23 = vpop.f32.mrb[127].mxu1  ;;  %v11759_v63 = vadd.f32 %v11631_v5, %v4980_v1  ;;  %v4981_v46 = vmul.f32 %v11619_v35, %v3301_v43 }
 0x1e4   : > { %14314 = vst [vmem:[#allocation237_spill] sm:$0xff] %v11751_v51  ;;  %v11762_v61 = vadd.f32 %v11631_v5, %v5236_v37  ;;  %8755 = vmatmul.mubr.msk.bf16.gmra.mrb[232].mxu0 %vm1999_vm0, %v9279_v24  ;;  %v11769_v45 = vadd.f32 %v11631_v5, %v4983_v54  ;;  %v5237_v49 = vmul.f32 %v11619_v35, %v4325_v23 }
 0x1e5   : > { %14315 = vst [vmem:[#allocation238_spill] sm:$0xff] %v11754_v3  ;;  %14316 = vst [vmem:[#allocation239_spill] sm:$0xff] %v11759_v63  ;;  %9011 = vmatmul.mubr.msk.bf16.gmra.mrb[232].mxu1 %vm1999_vm0, %v9280_v55  ;;  %8758 = vmatprep.mubr.msk.bf16.mxu0 %vm1999_vm0, %v9281_v28  ;;  %v11778_v37 = vadd.f32 %v11631_v5, %v5239_v15  ;;  %v11788_v15 = vadd.f32 %v11631_v5, %v4981_v46  ;;  %v9285_v46 = vld [vmem:[%s9361_s22 + $0x3c0] sm:$0xff]  }
 0x1e6   : > { %14317 = vst [vmem:[#allocation240_spill] sm:$0xff] %v11762_v61  ;;  %14318 = vst [vmem:[#allocation241_spill] sm:$0xff] %v11769_v45  ;;  %9014 = vmatprep.mubr.msk.bf16.mxu1 %vm1999_vm0, %v9282_v34  ;;  %v11794_v23 = vadd.f32 %v11631_v5, %v5237_v49  ;;  %v9284_v61 = vld [vmem:[%s9361_s22 + $0x7b8] sm:$0xff]  }
 0x1e7   : > { %14319 = vst [vmem:[#allocation242_spill] sm:$0xff] %v11778_v37  ;;  %v8652_v1 = vpop.f32.mrb[128].mxu0  ;;  %14320 = vst [vmem:[#allocation243_spill] sm:$0xff] %v11788_v15 }
 0x1e8   : > { %v4986_v34 = vmul.f32 %v11619_v35, %v8652_v1  ;;  %v8908_v2 = vpop.f32.mrb[128].mxu1  ;;  %v3314_v54 = vpop.f32.mrb[129].mxu0  ;;  %14321 = vst [vmem:[#allocation244_spill] sm:$0xff] %v11794_v23  ;;  %v9286_v23 = vld [vmem:[%s9361_s22 + $0x7c0] sm:$0xff]  }
 0x1e9   : > { %v5242_v28 = vmul.f32 %v11619_v35, %v8908_v2  ;;  %v4984_v43 = vmul.f32 %v11619_v35, %v3314_v54  ;;  %v4338_v31 = vpop.f32.mrb[129].mxu1  ;;  %v8653_v24 = vpop.f32.mrb[130].mxu0 }
 0x1ea   : > { %v5505_v1 = vadd.f32 %v11631_v5, %v4986_v34  ;;  %v5240_v63 = vmul.f32 %v11619_v35, %v4338_v31  ;;  %v4987_v55 = vmul.f32 %v11619_v35, %v8653_v24  ;;  %v8909_v45 = vpop.f32.mrb[130].mxu1  ;;  %v3317_v49 = vpop.f32.mrb[131].mxu0 }
 0x1eb   : > { %v5761_v2 = vadd.f32 %v11631_v5, %v5242_v28  ;;  %v5503_v54 = vadd.f32 %v11631_v5, %v4984_v43  ;;  %v5243_v3 = vmul.f32 %v11619_v35, %v8909_v45  ;;  %v4985_v51 = vmul.f32 %v11619_v35, %v3317_v49  ;;  %v4341_v13 = vpop.f32.mrb[131].mxu1  ;;  %v14322_v45 = vld [vmem:[#allocation22_spill] sm:$0xff] }
 0x1ec   : > { %v6017_v15 = vmax.f32 %v5505_v1, 0.0  ;;  %v5759_v34 = vadd.f32 %v11631_v5, %v5240_v63  ;;  %v5506_v31 = vadd.f32 %v11631_v5, %v4987_v55  ;;  %v5241_v24 = vmul.f32 %v11619_v35, %v4341_v13  ;;  %8759 = vmatmul.mubr.msk.bf16.gmra.mrb[236].mxu0 %vm1999_vm0, %v9283_v56  ;;  %v14324_v56 = vld [vmem:[#allocation23_spill] sm:$0xff] }
 0x1ed   : > { %v6273_v37 = vmax.f32 %v5761_v2, 0.0  ;;  %v6015_v7 = vmax.f32 %v5503_v54, 0.0  ;;  %v5762_v28 = vadd.f32 %v11631_v5, %v5243_v3  ;;  %v5504_v43 = vadd.f32 %v11631_v5, %v4985_v51  ;;  %9015 = vmatmul.mubr.msk.bf16.gmra.mrb[236].mxu1 %vm1999_vm0, %v9284_v61  ;;  %8762 = vmatprep.mubr.msk.bf16.mxu0 %vm1999_vm0, %v9285_v46  ;;  %v14326_v54 = vld [vmem:[#allocation24_spill] sm:$0xff] }
 0x1ee   : > { %v14323_v1 = vmax.f32 %v14322_v45, 0.0  ;;  %v6271_v63 = vmax.f32 %v5759_v34, 0.0  ;;  %v6018_v55 = vmax.f32 %v5506_v31, 0.0  ;;  %v5760_v13 = vadd.f32 %v11631_v5, %v5241_v24  ;;  %9018 = vmatprep.mubr.msk.bf16.mxu1 %vm1999_vm0, %v9286_v23  ;;  %v14330_v31 = vld [vmem:[#allocation26_spill] sm:$0xff] }
 0x1ef   : > { %v14325_v2 = vmax.f32 %v14324_v56, 0.0  ;;  %v14327_v51 = vmax.f32 %v14326_v54, 0.0  ;;  %v6274_v61 = vmax.f32 %v5762_v28, 0.0  ;;  %v6016_v46 = vmax.f32 %v5504_v43, 0.0  ;;  %v8656_v45 = vpop.f32.mrb[132].mxu0  ;;  %v14334_v43 = vld [vmem:[#allocation28_spill] sm:$0xff] }
 0x1f0   : > { %v6401_v49 = vmax.f32 %v14323_v1, %v6017_v15  ;;  %v14328_v15 = vld [vmem:[#allocation25_spill] sm:$0xff]  ;;  %v14331_v57 = vmax.f32 %v14330_v31, 0.0  ;;  %v6272_v16 = vmax.f32 %v5760_v13, 0.0  ;;  %v4990_v23 = vmul.f32 %v11619_v35, %v8656_v45  ;;  %v8912_v6 = vpop.f32.mrb[132].mxu1  ;;  %v3330_v56 = vpop.f32.mrb[133].mxu0  ;;  %v9288_v31 = vld [vmem:[%s9361_s22 + $0x7c8] sm:$0xff]  }
 0x1f1   : > { %v6529_v3 = vmax.f32 %v14325_v2, %v6273_v37  ;;  %v6399_v17 = vmax.f32 %v14327_v51, %v6015_v7  ;;  %v14329_v34 = vmax.f32 %v14328_v15, 0.0  ;;  %v9287_v37 = vld [vmem:[%s9361_s22 + $0x3c8] sm:$0xff]   ;;  %v14335_v51 = vmax.f32 %v14334_v43, 0.0  ;;  %v14336_v13 = vld [vmem:[#allocation29_spill] sm:$0xff] }
 0x1f2   : > { %v6402_v24 = vmax.f32 %v14331_v57, %v6018_v55  ;;  %v14332_v7 = vld [vmem:[#allocation27_spill] sm:$0xff]  ;;  %v5246_v15 = vmul.f32 %v11619_v35, %v8912_v6  ;;  %v9289_v57 = vld [vmem:[%s9361_s22 + $0x3d0] sm:$0xff]  }
 0x1f3   : > { %v6527_v1 = vmax.f32 %v14329_v34, %v6271_v63  ;;  %v6657_v2 = vmax.f32 %v6401_v49, %v6529_v3  ;;  %v14333_v28 = vmax.f32 %v14332_v7, 0.0  ;;  %v6400_v40 = vmax.f32 %v14335_v51, %v6016_v46  ;;  %v4354_v63 = vpop.f32.mrb[133].mxu1  ;;  %v8657_v34 = vpop.f32.mrb[134].mxu0  ;;  %v9290_v7 = vld [vmem:[%s9361_s22 + $0x7d0] sm:$0xff]  }
 0x1f4   : > { %v14337_v49 = vmax.f32 %v14336_v13, 0.0  ;;  %v4988_v46 = vmul.f32 %v11619_v35, %v3330_v56  ;;  %v8913_v45 = vpop.f32.mrb[134].mxu1  ;;  %v3333_v6 = vpop.f32.mrb[135].mxu0  ;;  %v5765_v51 = vadd.f32 %v11631_v5, %v5246_v15  ;;  %v5244_v0 = vmul.f32 %v11619_v35, %v4354_v63  ;;  %8763 = vmatmul.mubr.msk.bf16.gmra.mrb[240].mxu0 %vm1999_vm0, %v9287_v37 }
 0x1f5   : > { %v6530_v54 = vmax.f32 %v14333_v28, %v6274_v61  ;;  %v6655_v55 = vmax.f32 %v6399_v17, %v6527_v1  ;;  %v5509_v61 = vadd.f32 %v11631_v5, %v4990_v23  ;;  %v8137_v28 = vpack.c.bf16 %v6657_v2, %v6657_v2  ;;  %v4357_v33 = vpop.f32.mrb[135].mxu1  ;;  %9019 = vmatmul.mubr.msk.bf16.gmra.mrb[240].mxu1 %vm1999_vm0, %v9288_v31 }
 0x1f6   : > { %v6528_v3 = vmax.f32 %v14337_v49, %v6272_v16  ;;  %v5507_v16 = vadd.f32 %v11631_v5, %v4988_v46  ;;  %v6277_v56 = vmax.f32 %v5765_v51, 0.0  ;;  %v4991_v2 = vmul.f32 %v11619_v35, %v8657_v34  ;;  %8766 = vmatprep.mubr.msk.bf16.mxu0 %vm1999_vm0, %v9289_v57  ;;  %9022 = vmatprep.mubr.msk.bf16.mxu1 %vm1999_vm0, %v9290_v7  ;;  %v14342_v46 = vld [vmem:[#allocation32_spill] sm:$0xff] }
 0x1f7   : > { %v6658_v43 = vmax.f32 %v6402_v24, %v6530_v54  ;;  %v8135_v17 = vpack.c.bf16 %v6655_v55, %v6655_v55  ;;  %v6021_v13 = vmax.f32 %v5509_v61, 0.0  ;;  %7298 = vst.msk [vmem:[%s11842_s12 + $0x8] sm:$0xf] %vm7295_vm1, %v8137_v28  ;;  %v5763_v24 = vadd.f32 %v11631_v5, %v5244_v0  ;;  %v14338_v54 = vld [vmem:[#allocation30_spill] sm:$0xff]  ;;  %v14340_v0 = vld [vmem:[#allocation31_spill] sm:$0xff]  ;;  %v8660_v61 = vpop.f32.mrb[136].mxu0 }
 0x1f8   : > { %v6656_v1 = vmax.f32 %v6400_v40, %v6528_v3  ;;  %v14339_v15 = vmax.f32 %v14338_v54, 0.0  ;;  %v6019_v37 = vmax.f32 %v5507_v16, 0.0  ;;  %v5247_v55 = vmul.f32 %v11619_v35, %v8913_v45 }
 0x1f9   : > { %v8138_v23 = vpack.c.bf16 %v6658_v43, %v6658_v43  ;;  %7296 = vst.msk [vmem:[%s11842_s12] sm:$0xf] %vm7295_vm1, %v8135_v17  ;;  %v14341_v34 = vmax.f32 %v14340_v0, 0.0  ;;  %v6275_v31 = vmax.f32 %v5763_v24, 0.0  ;;  %v5510_v57 = vadd.f32 %v11631_v5, %v4991_v2  ;;  %v8916_v17 = vpop.f32.mrb[136].mxu1 }
 0x1fa   : > { %v8136_v40 = vpack.c.bf16 %v6656_v1, %v6656_v1  ;;  %v6405_v63 = vmax.f32 %v14339_v15, %v6021_v13  ;;  %v4989_v3 = vmul.f32 %v11619_v35, %v3333_v6  ;;  %v14343_v28 = vmax.f32 %v14342_v46, 0.0  ;;  %v3346_v1 = vpop.f32.mrb[137].mxu0  ;;  %v9291_v13 = vld [vmem:[%s9361_s22 + $0x3d8] sm:$0xff]   ;;  %v14344_v6 = vld [vmem:[#allocation35_spill] sm:$0xff] }
 0x1fb   : > { %7299 = vst.msk [vmem:[%s11842_s12 + $0xc] sm:$0xf] %vm7295_vm1, %v8138_v23  ;;  %v6533_v49 = vmax.f32 %v14341_v34, %v6277_v56  ;;  %v5766_v45 = vadd.f32 %v11631_v5, %v5247_v55  ;;  %v5245_v7 = vmul.f32 %v11619_v35, %v4357_v33  ;;  %v4994_v51 = vmul.f32 %v11619_v35, %v8660_v61  ;;  %v8661_v54 = vpop.f32.mrb[138].mxu0  ;;  %v9292_v15 = vld [vmem:[%s9361_s22 + $0x7d8] sm:$0xff]  }
 0x1fc   : > { %7297 = vst.msk [vmem:[%s11842_s12 + $0x4] sm:$0xf] %vm7295_vm1, %v8136_v40  ;;  %v6403_v43 = vmax.f32 %v14343_v28, %v6019_v37  ;;  %v14345_v23 = vmax.f32 %v14344_v6, 0.0  ;;  %v6022_v24 = vmax.f32 %v5510_v57, 0.0  ;;  %v5508_v2 = vadd.f32 %v11631_v5, %v4989_v3  ;;  %v4370_v40 = vpop.f32.mrb[137].mxu1  ;;  %v3349_v61 = vpop.f32.mrb[139].mxu0  ;;  %8767 = vmatmul.mubr.msk.bf16.gmra.mrb[244].mxu0 %vm1999_vm0, %v9291_v13 }
 0x1fd   : > { %v6661_v16 = vmax.f32 %v6405_v63, %v6533_v49  ;;  %v6278_v37 = vmax.f32 %v5766_v45, 0.0  ;;  %v5764_v33 = vadd.f32 %v11631_v5, %v5245_v7  ;;  %v5513_v55 = vadd.f32 %v11631_v5, %v4994_v51  ;;  %v8917_v34 = vpop.f32.mrb[138].mxu1  ;;  %v9293_v63 = vld [vmem:[%s9361_s22 + $0x3e0] sm:$0xff]   ;;  %v14346_v57 = vld [vmem:[#allocation36_spill] sm:$0xff]  ;;  %9023 = vmatmul.mubr.msk.bf16.gmra.mrb[244].mxu1 %vm1999_vm0, %v9292_v15 }
 0x1fe   : > { %v6531_v56 = vmax.f32 %v14345_v23, %v6275_v31  ;;  %v5250_v0 = vmul.f32 %v11619_v35, %v8916_v17  ;;  %v9294_v49 = vld [vmem:[%s9361_s22 + $0x7e0] sm:$0xff]   ;;  %v14347_v28 = vmax.f32 %v14346_v57, 0.0  ;;  %v6020_v6 = vmax.f32 %v5508_v2, 0.0  ;;  %v4373_v23 = vpop.f32.mrb[139].mxu1  ;;  %v14354_v57 = vld [vmem:[#allocation40_spill] sm:$0xff]  ;;  %8770 = vmatprep.mubr.msk.bf16.mxu0 %vm1999_vm0, %v9293_v63 }
 0x1ff   : > { %v8141_v46 = vpack.c.bf16 %v6661_v16, %v6661_v16  ;;  %v14349_v45 = vmax.f32 %v14348_v60, 0.0  ;;  %v6276_v7 = vmax.f32 %v5764_v33, 0.0  ;;  %v6025_v51 = vmax.f32 %v5513_v55, 0.0  ;;  %v14350_v16 = vld [vmem:[#allocation38_spill] sm:$0xff]  ;;  %9026 = vmatprep.mubr.msk.bf16.mxu1 %vm1999_vm0, %v9294_v49 }
 0x200   : > { %v6659_v31 = vmax.f32 %v6403_v43, %v6531_v56  ;;  %v6406_v3 = vmax.f32 %v14347_v28, %v6022_v24  ;;  %v5769_v9 = vadd.f32 %v11631_v5, %v5250_v0  ;;  %v14351_v43 = vmax.f32 %v14350_v16, 0.0 }
 0x201   : > { %v6534_v62 = vmax.f32 %v14349_v45, %v6278_v37  ;;  %7302 = vst.msk [vmem:[%s11842_s12 + $0x18] sm:$0xf] %vm7295_vm1, %v8141_v46  ;;  %v4992_v24 = vmul.f32 %v11619_v35, %v3346_v1  ;;  %v5248_v2 = vmul.f32 %v11619_v35, %v4370_v40  ;;  %v14352_v37 = vld [vmem:[#allocation39_spill] sm:$0xff]  ;;  %v14355_v0 = vmax.f32 %v14354_v57, 0.0  ;;  %v8664_v46 = vpop.f32.mrb[140].mxu0  ;;  %v8920_v45 = vpop.f32.mrb[140].mxu1 }
 0x202   : > { %v8139_v17 = vpack.c.bf16 %v6659_v31, %v6659_v31  ;;  %v6404_v56 = vmax.f32 %v14351_v43, %v6020_v6  ;;  %v14353_v33 = vmax.f32 %v14352_v37, 0.0  ;;  %v6281_v13 = vmax.f32 %v5769_v9, 0.0  ;;  %v14356_v9 = vld [vmem:[#allocation41_spill] sm:$0xff]  ;;  %v4386_v43 = vpop.f32.mrb[141].mxu1  ;;  %v9297_v57 = vld [vmem:[%s9361_s22 + $0x3f0] sm:$0xff]  }
 0x203   : > { %v6662_v60 = vmax.f32 %v6406_v3, %v6534_v62  ;;  %v6409_v28 = vmax.f32 %v14355_v0, %v6025_v51  ;;  %v5511_v1 = vadd.f32 %v11631_v5, %v4992_v24  ;;  %v5767_v40 = vadd.f32 %v11631_v5, %v5248_v2  ;;  %v9295_v51 = vld [vmem:[%s9361_s22 + $0x3e8] sm:$0xff]   ;;  %v9298_v0 = vld [vmem:[%s9361_s22 + $0x7f0] sm:$0xff]  }
 0x204   : > { %v6532_v55 = vmax.f32 %v14353_v33, %v6276_v7  ;;  %7300 = vst.msk [vmem:[%s11842_s12 + $0x10] sm:$0xf] %vm7295_vm1, %v8139_v17  ;;  %v4995_v62 = vmul.f32 %v11619_v35, %v8661_v54  ;;  %v5251_v15 = vmul.f32 %v11619_v35, %v8917_v34  ;;  %v14357_v6 = vmax.f32 %v14356_v9, 0.0  ;;  %v3362_v7 = vpop.f32.mrb[141].mxu0  ;;  %v8921_v33 = vpop.f32.mrb[142].mxu1  ;;  %8771 = vmatmul.mubr.msk.bf16.gmra.mrb[248].mxu0 %vm1999_vm0, %v9295_v51 }
 0x205   : > { %v8142_v31 = vpack.c.bf16 %v6662_v60, %v6662_v60  ;;  %v4993_v49 = vmul.f32 %v11619_v35, %v3349_v61  ;;  %v6023_v17 = vmax.f32 %v5511_v1, 0.0  ;;  %v6279_v16 = vmax.f32 %v5767_v40, 0.0  ;;  %v8665_v24 = vpop.f32.mrb[142].mxu0  ;;  %8774 = vmatprep.mubr.msk.bf16.mxu0 %vm1999_vm0, %v9297_v57 }
 0x206   : > { %v6660_v3 = vmax.f32 %v6404_v56, %v6532_v55  ;;  %v6537_v63 = vmax.f32 %v14357_v6, %v6281_v13  ;;  %v5514_v54 = vadd.f32 %v11631_v5, %v4995_v62  ;;  %v5770_v34 = vadd.f32 %v11631_v5, %v5251_v15  ;;  %v9296_v56 = vld [vmem:[%s9361_s22 + $0x7e8] sm:$0xff]   ;;  %v3365_v55 = vpop.f32.mrb[143].mxu0  ;;  %v14358_v13 = vld [vmem:[#allocation42_spill] sm:$0xff] }
 0x207   : > { %7303 = vst.msk [vmem:[%s11842_s12 + $0x1c] sm:$0xf] %vm7295_vm1, %v8142_v31  ;;  %v5512_v61 = vadd.f32 %v11631_v5, %v4993_v49  ;;  %v5249_v37 = vmul.f32 %v11619_v35, %v4373_v23  ;;  %v14359_v1 = vmax.f32 %v14358_v13, 0.0  ;;  %v14360_v62 = vld [vmem:[#allocation43_spill] sm:$0xff]  ;;  %v4389_v31 = vpop.f32.mrb[143].mxu1  ;;  %v14362_v13 = vld [vmem:[#allocation44_spill] sm:$0xff]  ;;  %9027 = vmatmul.mubr.msk.bf16.gmra.mrb[248].mxu1 %vm1999_vm0, %v9296_v56  ;;  %v4996_v51 = vmul.f32 %v11619_v35, %v3362_v7 }
 0x208   : > { %v8140_v2 = vpack.c.bf16 %v6660_v3, %v6660_v3  ;;  %v6665_v60 = vmax.f32 %v6409_v28, %v6537_v63  ;;  %v14361_v15 = vmax.f32 %v14360_v62, 0.0  ;;  %v6026_v6 = vmax.f32 %v5514_v54, 0.0  ;;  %v14364_v62 = vld [vmem:[#allocation45_spill] sm:$0xff]  ;;  %9030 = vmatprep.mubr.msk.bf16.mxu1 %vm1999_vm0, %v9298_v0 }
 0x209   : > { %v6407_v40 = vmax.f32 %v14359_v1, %v6023_v17  ;;  %v6282_v21 = vmax.f32 %v5770_v34, 0.0  ;;  %v6024_v3 = vmax.f32 %v5512_v61, 0.0  ;;  %v5768_v23 = vadd.f32 %v11631_v5, %v5249_v37  ;;  %v14366_v34 = vld [vmem:[#allocation46_spill] sm:$0xff]  ;;  %v8668_v37 = vpop.f32.mrb[144].mxu0  ;;  %v9299_v0 = vld [vmem:[%s9361_s22 + $0x3f8] sm:$0xff]  }
 0x20a   : > { %v6535_v9 = vmax.f32 %v14361_v15, %v6279_v16  ;;  %7301 = vst.msk [vmem:[%s11842_s12 + $0x14] sm:$0xf] %vm7295_vm1, %v8140_v2  ;;  %v8145_v28 = vpack.c.bf16 %v6665_v60, %v6665_v60  ;;  %v4998_v63 = vmul.f32 %v11619_v35, %v8664_v46  ;;  %v14363_v17 = vmax.f32 %v14362_v13, 0.0  ;;  %v3378_v57 = vpop.f32.mrb[145].mxu0 }
 0x20b   : > { %v14365_v27 = vmax.f32 %v14364_v62, 0.0  ;;  %v5254_v54 = vmul.f32 %v11619_v35, %v8920_v45  ;;  %v14367_v2 = vmax.f32 %v14366_v34, 0.0  ;;  %v6280_v61 = vmax.f32 %v5768_v23, 0.0 }
 0x20c   : > { %v6663_v49 = vmax.f32 %v6407_v40, %v6535_v9  ;;  %v6410_v1 = vmax.f32 %v14363_v17, %v6026_v6  ;;  %7306 = vst.msk [vmem:[%s11842_s12 + $0x28] sm:$0xf] %vm7295_vm1, %v8145_v28  ;;  %v5517_v46 = vadd.f32 %v11631_v5, %v4998_v63  ;;  %v5252_v56 = vmul.f32 %v11619_v35, %v4386_v43  ;;  %v14368_v40 = vld [vmem:[#allocation47_spill] sm:$0xff]  ;;  %v8669_v17 = vpop.f32.mrb[146].mxu0 }
 0x20d   : > { %v6538_v16 = vmax.f32 %v14365_v27, %v6282_v21  ;;  %v6408_v60 = vmax.f32 %v14367_v2, %v6024_v3  ;;  %v5773_v45 = vadd.f32 %v11631_v5, %v5254_v54  ;;  %v14369_v15 = vmax.f32 %v14368_v40, 0.0  ;;  %v8924_v3 = vpop.f32.mrb[144].mxu1  ;;  %8775 = vmatmul.mubr.msk.bf16.gmra.mrb[252].mxu0 %vm1999_vm0, %v9299_v0 }
 0x20e   : > { %v8143_v27 = vpack.c.bf16 %v6663_v49, %v6663_v49  ;;  %v6029_v6 = vmax.f32 %v5517_v46, 0.0  ;;  %v5515_v28 = vadd.f32 %v11631_v5, %v4996_v51  ;;  %v4999_v7 = vmul.f32 %v11619_v35, %v8665_v24  ;;  %v4402_v13 = vpop.f32.mrb[145].mxu1  ;;  %v3381_v46 = vpop.f32.mrb[147].mxu0  ;;  %v14372_v51 = vld [vmem:[#allocation49_spill] sm:$0xff] }
 0x20f   : > { %v6666_v21 = vmax.f32 %v6410_v1, %v6538_v16  ;;  %v6536_v9 = vmax.f32 %v14369_v15, %v6280_v61  ;;  %v6285_v63 = vmax.f32 %v5773_v45, 0.0  ;;  %v5771_v43 = vadd.f32 %v11631_v5, %v5252_v56  ;;  %v9300_v1 = vld [vmem:[%s9361_s22 + $0x7f8] sm:$0xff]   ;;  %v14370_v16 = vld [vmem:[#allocation48_spill] sm:$0xff]  ;;  %v8925_v61 = vpop.f32.mrb[146].mxu1  ;;  %v14374_v15 = vld [vmem:[#allocation50_spill] sm:$0xff] }
 0x210   : > { %7304 = vst.msk [vmem:[%s11842_s12 + $0x20] sm:$0xf] %vm7295_vm1, %v8143_v27  ;;  %v5255_v49 = vmul.f32 %v11619_v35, %v8921_v33  ;;  %v14371_v54 = vmax.f32 %v14370_v16, 0.0  ;;  %v6027_v24 = vmax.f32 %v5515_v28, 0.0  ;;  %v5518_v2 = vadd.f32 %v11631_v5, %v4999_v7  ;;  %v14376_v16 = vld [vmem:[#allocation51_spill] sm:$0xff]  ;;  %9031 = vmatmul.mubr.msk.bf16.gmra.mrb[252].mxu1 %vm1999_vm0, %v9300_v1 }
 0x211   : > { %v8146_v23 = vpack.c.bf16 %v6666_v21, %v6666_v21  ;;  %v6664_v62 = vmax.f32 %v6408_v60, %v6536_v9  ;;  %v14373_v27 = vmax.f32 %v14372_v51, 0.0  ;;  %v6283_v45 = vmax.f32 %v5771_v43, 0.0  ;;  %v4405_v60 = vpop.f32.mrb[147].mxu1 }
 0x212   : > { %v6413_v34 = vmax.f32 %v14371_v54, %v6029_v6  ;;  %v5774_v33 = vadd.f32 %v11631_v5, %v5255_v49  ;;  %v4997_v56 = vmul.f32 %v11619_v35, %v3365_v55  ;;  %v14375_v9 = vmax.f32 %v14374_v15, 0.0  ;;  %v14378_v55 = vld [vmem:[#allocation52_spill] sm:$0xff] }
 0x213   : > { %7307 = vst.msk [vmem:[%s11842_s12 + $0x2c] sm:$0xf] %vm7295_vm1, %v8146_v23  ;;  %v6541_v21 = vmax.f32 %v14373_v27, %v6285_v63  ;;  %v8144_v40 = vpack.c.bf16 %v6664_v62, %v6664_v62  ;;  %v6030_v28 = vmax.f32 %v5518_v2, 0.0  ;;  %v5253_v7 = vmul.f32 %v11619_v35, %v4389_v31  ;;  %v14380_v27 = vld [vmem:[#allocation53_spill] sm:$0xff] }
 0x214   : > { %v6411_v6 = vmax.f32 %v14375_v9, %v6027_v24  ;;  %v14377_v54 = vmax.f32 %v14376_v16, 0.0  ;;  %v6286_v63 = vmax.f32 %v5774_v33, 0.0  ;;  %v5516_v43 = vadd.f32 %v11631_v5, %v4997_v56  ;;  %v8672_v56 = vpop.f32.mrb[148].mxu0 }
 0x215   : > { %v6669_v23 = vmax.f32 %v6413_v34, %v6541_v21  ;;  %7305 = vst.msk [vmem:[%s11842_s12 + $0x24] sm:$0xf] %vm7295_vm1, %v8144_v40  ;;  %v14379_v49 = vmax.f32 %v14378_v55, 0.0  ;;  %v5772_v24 = vadd.f32 %v11631_v5, %v5253_v7  ;;  %v5002_v31 = vmul.f32 %v11619_v35, %v8668_v37  ;;  %v3394_v7 = vpop.f32.mrb[149].mxu0 }
 0x216   : > { %v6539_v51 = vmax.f32 %v14377_v54, %v6283_v45  ;;  %v5258_v0 = vmul.f32 %v11619_v35, %v8924_v3  ;;  %v14381_v21 = vmax.f32 %v14380_v27, 0.0  ;;  %v6028_v33 = vmax.f32 %v5516_v43, 0.0  ;;  %v14384_v43 = vld [vmem:[#allocation55_spill] sm:$0xff] }
 0x217   : > { %v6414_v62 = vmax.f32 %v14379_v49, %v6030_v28  ;;  %v8149_v34 = vpack.c.bf16 %v6669_v23, %v6669_v23  ;;  %v6284_v1 = vmax.f32 %v5772_v24, 0.0  ;;  %v5521_v40 = vadd.f32 %v11631_v5, %v5002_v31  ;;  %v8928_v28 = vpop.f32.mrb[148].mxu1 }
 0x218   : > { %v6667_v2 = vmax.f32 %v6411_v6, %v6539_v51  ;;  %v6542_v45 = vmax.f32 %v14381_v21, %v6286_v63  ;;  %v5777_v15 = vadd.f32 %v11631_v5, %v5258_v0  ;;  %v5000_v9 = vmul.f32 %v11619_v35, %v3378_v57  ;;  %v14382_v6 = vld [vmem:[#allocation54_spill] sm:$0xff]  ;;  %v4418_v51 = vpop.f32.mrb[149].mxu1  ;;  %v11995_v63 = vpop.f32.mrb[150].mxu0 }
 0x219   : > { %7310 = vst.msk [vmem:[%s11842_s12 + $0x38] sm:$0xf] %vm7295_vm1, %v8149_v34  ;;  %v14383_v23 = vmax.f32 %v14382_v6, 0.0  ;;  %v5256_v54 = vmul.f32 %v11619_v35, %v4402_v13  ;;  %v14385_v55 = vmax.f32 %v14384_v43, 0.0  ;;  %v6033_v57 = vmax.f32 %v5521_v40, 0.0  ;;  %v8929_v0 = vpop.f32.mrb[150].mxu1 }
 0x21a   : > { %v8147_v37 = vpack.c.bf16 %v6667_v2, %v6667_v2  ;;  %v6670_v3 = vmax.f32 %v6414_v62, %v6542_v45  ;;  %v6289_v24 = vmax.f32 %v5777_v15, 0.0  ;;  %v5519_v31 = vadd.f32 %v11631_v5, %v5000_v9  ;;  %v12000_v34 = vpop.f32.mrb[151].mxu0  ;;  %v12007_v21 = vpop.f32.mrb[151].mxu1  ;;  %v14388_v15 = vld [vmem:[#allocation57_spill] sm:$0xff] }
 0x21b   : > { %v6412_v16 = vmax.f32 %v14383_v23, %v6028_v33  ;;  %v6540_v49 = vmax.f32 %v14385_v55, %v6284_v1  ;;  %v5775_v2 = vadd.f32 %v11631_v5, %v5256_v54  ;;  %v5003_v13 = vmul.f32 %v11619_v35, %v8669_v17  ;;  %v14386_v33 = vld [vmem:[#allocation56_spill] sm:$0xff] }
 0x21c   : > { %7308 = vst.msk [vmem:[%s11842_s12 + $0x30] sm:$0xf] %vm7295_vm1, %v8147_v37  ;;  %v8150_v62 = vpack.c.bf16 %v6670_v3, %v6670_v3  ;;  %v5259_v27 = vmul.f32 %v11619_v35, %v8925_v61  ;;  %v14387_v1 = vmax.f32 %v14386_v33, 0.0  ;;  %v14389_v9 = vmax.f32 %v14388_v15, 0.0  ;;  %v14392_v33 = vld [vmem:[#allocation59_spill] sm:$0xff] }
 0x21d   : > { %v6668_v45 = vmax.f32 %v6412_v16, %v6540_v49  ;;  %v6031_v23 = vmax.f32 %v5519_v31, 0.0  ;;  %v6287_v37 = vmax.f32 %v5775_v2, 0.0  ;;  %v5522_v3 = vadd.f32 %v11631_v5, %v5003_v13  ;;  %v14390_v16 = vld [vmem:[#allocation58_spill] sm:$0xff]  ;;  %v8676_v2 = vpop.f32.mrb[152].mxu0 }
 0x21e   : > { %v6417_v40 = vmax.f32 %v14387_v1, %v6033_v57  ;;  %v6545_v6 = vmax.f32 %v14389_v9, %v6289_v24  ;;  %7311 = vst.msk [vmem:[%s11842_s12 + $0x3c] sm:$0xf] %vm7295_vm1, %v8150_v62  ;;  %v5778_v17 = vadd.f32 %v11631_v5, %v5259_v27  ;;  %v5001_v61 = vmul.f32 %v11619_v35, %v3381_v46 }
 0x21f   : > { %v8148_v54 = vpack.c.bf16 %v6668_v45, %v6668_v45  ;;  %v14391_v55 = vmax.f32 %v14390_v16, 0.0  ;;  %v5257_v57 = vmul.f32 %v11619_v35, %v4405_v60  ;;  %v14393_v24 = vmax.f32 %v14392_v33, 0.0  ;;  %v12029_v60 = vpop.f32.mrb[153].mxu0 }
 0x220   : > { %v6673_v43 = vmax.f32 %v6417_v40, %v6545_v6  ;;  %v6034_v31 = vmax.f32 %v5522_v3, 0.0  ;;  %v6290_v15 = vmax.f32 %v5778_v17, 0.0  ;;  %v5520_v62 = vadd.f32 %v11631_v5, %v5001_v61  ;;  %v8932_v40 = vpop.f32.mrb[152].mxu1  ;;  %v14394_v6 = vld [vmem:[#allocation60_spill] sm:$0xff]  ;;  %v14396_v3 = vld [vmem:[#allocation61_spill] sm:$0xff] }
 0x221   : > { %v6415_v49 = vmax.f32 %v14391_v55, %v6031_v23  ;;  %v6543_v1 = vmax.f32 %v14393_v24, %v6287_v37  ;;  %7309 = vst.msk [vmem:[%s11842_s12 + $0x34] sm:$0xf] %vm7295_vm1, %v8148_v54  ;;  %v5776_v46 = vadd.f32 %v11631_v5, %v5257_v57  ;;  %v5006_v27 = vmul.f32 %v11619_v35, %v8672_v56  ;;  %v12035_v55 = vpop.f32.mrb[153].mxu1  ;;  %v12037_v54 = vpop.f32.mrb[154].mxu0 }
 0x222   : > { %v8153_v13 = vpack.c.bf16 %v6673_v43, %v6673_v43  ;;  %v5262_v45 = vmul.f32 %v11619_v35, %v8928_v28  ;;  %v14395_v23 = vmax.f32 %v14394_v6, 0.0  ;;  %v14397_v17 = vmax.f32 %v14396_v3, 0.0  ;;  %v12044_v57 = vpop.f32.mrb[154].mxu1  ;;  %v12046_v33 = vpop.f32.mrb[155].mxu0 }
 0x223   : > { %v6671_v9 = vmax.f32 %v6415_v49, %v6543_v1  ;;  %v6032_v16 = vmax.f32 %v5520_v62, 0.0  ;;  %v6288_v56 = vmax.f32 %v5776_v46, 0.0  ;;  %v5525_v28 = vadd.f32 %v11631_v5, %v5006_v27  ;;  %v12051_v6 = vpop.f32.mrb[155].mxu1  ;;  %v14400_v46 = vld [vmem:[#allocation63_spill] sm:$0xff] }
 0x224   : > { %v6418_v37 = vmax.f32 %v14395_v23, %v6034_v31  ;;  %v6546_v61 = vmax.f32 %v14397_v17, %v6290_v15  ;;  %7314 = vst.msk [vmem:[%s11842_s12 + $0x48] sm:$0xf] %vm7295_vm1, %v8153_v13  ;;  %v5781_v43 = vadd.f32 %v11631_v5, %v5262_v45  ;;  %v5004_v49 = vmul.f32 %v11619_v35, %v3394_v7  ;;  %v14398_v31 = vld [vmem:[#allocation62_spill] sm:$0xff] }
 0x225   : > { %v8151_v24 = vpack.c.bf16 %v6671_v9, %v6671_v9  ;;  %v14399_v15 = vmax.f32 %v14398_v31, 0.0  ;;  %v5260_v13 = vmul.f32 %v11619_v35, %v4418_v51  ;;  %v14401_v27 = vmax.f32 %v14400_v46, 0.0  ;;  %v14404_v46 = vld [vmem:[#allocation65_spill] sm:$0xff] }
 0x226   : > { %v6674_v1 = vmax.f32 %v6418_v37, %v6546_v61  ;;  %v6037_v45 = vmax.f32 %v5525_v28, 0.0  ;;  %v6293_v3 = vmax.f32 %v5781_v43, 0.0  ;;  %v5523_v7 = vadd.f32 %v11631_v5, %v5004_v49 }
 0x227   : > { %v6416_v62 = vmax.f32 %v14399_v15, %v6032_v16  ;;  %v6544_v23 = vmax.f32 %v14401_v27, %v6288_v56  ;;  %7312 = vst.msk [vmem:[%s11842_s12 + $0x40] sm:$0xf] %vm7295_vm1, %v8151_v24  ;;  %v5779_v9 = vadd.f32 %v11631_v5, %v5260_v13  ;;  %v5007_v37 = vmul.f32 %v11619_v35, %v11995_v63  ;;  %v14402_v16 = vld [vmem:[#allocation64_spill] sm:$0xff]  ;;  %v14406_v27 = vld [vmem:[#allocation66_spill] sm:$0xff] }
 0x228   : > { %v8154_v17 = vpack.c.bf16 %v6674_v1, %v6674_v1  ;;  %v5263_v61 = vmul.f32 %v11619_v35, %v8929_v0  ;;  %v14403_v31 = vmax.f32 %v14402_v16, 0.0  ;;  %v14405_v56 = vmax.f32 %v14404_v46, 0.0  ;;  %v12072_v0 = vpop.f32.mrb[156].mxu0 }
 0x229   : > { %v6672_v51 = vmax.f32 %v6416_v62, %v6544_v23  ;;  %v6035_v43 = vmax.f32 %v5523_v7, 0.0  ;;  %v6291_v49 = vmax.f32 %v5779_v9, 0.0  ;;  %v5526_v24 = vadd.f32 %v11631_v5, %v5007_v37  ;;  %v12078_v7 = vpop.f32.mrb[156].mxu1  ;;  %v14408_v9 = vld [vmem:[#allocation67_spill] sm:$0xff] }
 0x22a   : > { %v6421_v15 = vmax.f32 %v14403_v31, %v6037_v45  ;;  %v6549_v28 = vmax.f32 %v14405_v56, %v6293_v3  ;;  %7315 = vst.msk [vmem:[%s11842_s12 + $0x4c] sm:$0xf] %vm7295_vm1, %v8154_v17  ;;  %v5782_v1 = vadd.f32 %v11631_v5, %v5263_v61  ;;  %v5005_v63 = vmul.f32 %v11619_v35, %v12000_v34  ;;  %v12080_v17 = vpop.f32.mrb[157].mxu0 }
 0x22b   : > { %v8152_v62 = vpack.c.bf16 %v6672_v51, %v6672_v51  ;;  %v14407_v23 = vmax.f32 %v14406_v27, 0.0  ;;  %v5261_v3 = vmul.f32 %v11619_v35, %v12007_v21  ;;  %v14409_v37 = vmax.f32 %v14408_v9, 0.0  ;;  %v12085_v51 = vpop.f32.mrb[157].mxu1 }
 0x22c   : > { %v6677_v13 = vmax.f32 %v6421_v15, %v6549_v28  ;;  %v6038_v16 = vmax.f32 %v5526_v24, 0.0  ;;  %v6294_v31 = vmax.f32 %v5782_v1, 0.0  ;;  %v5524_v34 = vadd.f32 %v11631_v5, %v5005_v63  ;;  %v12087_v15 = vpop.f32.mrb[158].mxu0  ;;  %v14410_v1 = vld [vmem:[#allocation68_spill] sm:$0xff] }
 0x22d   : > { %v6419_v45 = vmax.f32 %v14407_v23, %v6035_v43  ;;  %v6547_v61 = vmax.f32 %v14409_v37, %v6291_v49  ;;  %7313 = vst.msk [vmem:[%s11842_s12 + $0x44] sm:$0xf] %vm7295_vm1, %v8152_v62  ;;  %v5780_v21 = vadd.f32 %v11631_v5, %v5261_v3  ;;  %v5010_v56 = vmul.f32 %v11619_v35, %v8676_v2  ;;  %v12094_v43 = vpop.f32.mrb[158].mxu1  ;;  %v12096_v49 = vpop.f32.mrb[159].mxu0  ;;  %v14412_v23 = vld [vmem:[#allocation69_spill] sm:$0xff] }
 0x22e   : > { %v8157_v46 = vpack.c.bf16 %v6677_v13, %v6677_v13  ;;  %v5266_v28 = vmul.f32 %v11619_v35, %v8932_v40  ;;  %v14411_v63 = vmax.f32 %v14410_v1, 0.0  ;;  %v14413_v9 = vmax.f32 %v14412_v23, 0.0  ;;  %v12102_v13 = vpop.f32.mrb[159].mxu1 }
 0x22f   : > { %v6675_v24 = vmax.f32 %v6419_v45, %v6547_v61  ;;  %v6036_v62 = vmax.f32 %v5524_v34, 0.0  ;;  %v6292_v2 = vmax.f32 %v5780_v21, 0.0  ;;  %v5529_v40 = vadd.f32 %v11631_v5, %v5010_v56  ;;  %v14416_v34 = vld [vmem:[#allocation2_spill] sm:$0xff] }
 0x230   : > { %v6422_v27 = vmax.f32 %v14411_v63, %v6038_v16  ;;  %v6550_v37 = vmax.f32 %v14413_v9, %v6294_v31  ;;  %7318 = vst.msk [vmem:[%s11842_s12 + $0x58] sm:$0xf] %vm7295_vm1, %v8157_v46  ;;  %v5785_v3 = vadd.f32 %v11631_v5, %v5266_v28  ;;  %v5008_v45 = vmul.f32 %v11619_v35, %v12029_v60  ;;  %v14414_v16 = vld [vmem:[#allocation70_spill] sm:$0xff] }
 0x231   : > { %v8155_v61 = vpack.c.bf16 %v6675_v24, %v6675_v24  ;;  %v14415_v63 = vmax.f32 %v14414_v16, 0.0  ;;  %v5264_v31 = vmul.f32 %v11619_v35, %v12035_v55  ;;  %v14417_v9 = vmax.f32 %v14416_v34, 0.0  ;;  %v12124_v55 = vpop.f32.mrb[160].mxu0 }
 0x232   : > { %v6678_v1 = vmax.f32 %v6422_v27, %v6550_v37  ;;  %v6041_v46 = vmax.f32 %v5529_v40, 0.0  ;;  %v6297_v21 = vmax.f32 %v5785_v3, 0.0  ;;  %v5527_v56 = vadd.f32 %v11631_v5, %v5008_v45  ;;  %v14420_v3 = vld [vmem:[#allocation4_spill] sm:$0xff] }
 0x233   : > { %v6420_v23 = vmax.f32 %v14415_v63, %v6036_v62  ;;  %v6548_v52 = vmax.f32 %v14417_v9, %v6292_v2  ;;  %7316 = vst.msk [vmem:[%s11842_s12 + $0x50] sm:$0xf] %vm7295_vm1, %v8155_v61  ;;  %v5783_v60 = vadd.f32 %v11631_v5, %v5264_v31  ;;  %v5011_v24 = vmul.f32 %v11619_v35, %v12037_v54  ;;  %v14418_v62 = vld [vmem:[#allocation3_spill] sm:$0xff]  ;;  %v12130_v61 = vpop.f32.mrb[160].mxu1 }
 0x234   : > { %v8158_v28 = vpack.c.bf16 %v6678_v1, %v6678_v1  ;;  %v5267_v27 = vmul.f32 %v11619_v35, %v12044_v57  ;;  %v14419_v2 = vmax.f32 %v14418_v62, 0.0  ;;  %v14421_v16 = vmax.f32 %v14420_v3, 0.0  ;;  %v12132_v1 = vpop.f32.mrb[161].mxu0 }
 0x235   : > { %v6676_v37 = vmax.f32 %v6420_v23, %v6548_v52  ;;  %v6039_v63 = vmax.f32 %v5527_v56, 0.0  ;;  %v6295_v54 = vmax.f32 %v5783_v60, 0.0  ;;  %v5530_v31 = vadd.f32 %v11631_v5, %v5011_v24  ;;  %v12140_v23 = vpop.f32.mrb[161].mxu1  ;;  %v12142_v34 = vpop.f32.mrb[162].mxu0 }
 0x236   : > { %v6425_v40 = vmax.f32 %v14419_v2, %v6041_v46  ;;  %v6553_v45 = vmax.f32 %v14421_v16, %v6297_v21  ;;  %7319 = vst.msk [vmem:[%s11842_s12 + $0x5c] sm:$0xf] %vm7295_vm1, %v8158_v28  ;;  %v5786_v57 = vadd.f32 %v11631_v5, %v5267_v27  ;;  %v5009_v52 = vmul.f32 %v11619_v35, %v12046_v33  ;;  %v14422_v21 = vld [vmem:[#allocation5_spill] sm:$0xff]  ;;  %v12149_v28 = vld [vmem:[%s13777_s2] ss:$0 sm:$0xff]  ;;  %v12153_v60 = vpop.f32.mrb[162].mxu1 }
 0x237   : > { %v8156_v9 = vpack.c.bf16 %v6676_v37, %v6676_v37  ;;  %v14423_v56 = vmax.f32 %v14422_v21, 0.0  ;;  %v5265_v5 = vmul.f32 %v12149_v28, %v12051_v6  ;;  %v12155_v35 = vpop.f32.mrb[163].mxu0  ;;  %v14424_v33 = vld [vmem:[#allocation6_spill] sm:$0xff]  ;;  %v6042_v37 = vmax.f32 %v5530_v31, 0.0  ;;  %v12165_v16 = vpop.f32.mrb[163].mxu1 }
 0x238   : > { %v6681_v46 = vmax.f32 %v6425_v40, %v6553_v45  ;;  %v14425_v24 = vmax.f32 %v14424_v33, 0.0  ;;  %v6298_v2 = vmax.f32 %v5786_v57, 0.0  ;;  %v12162_v40 = vld [vmem:[%s13778_s3] ss:$0 sm:$0xff]  ;;  %v14426_v57 = vld [vmem:[#allocation8_spill] sm:$0xff]  ;;  %v14428_v33 = vld [vmem:[#allocation71_spill] sm:$0xff] }
 0x239   : > { %v6423_v62 = vmax.f32 %v14423_v56, %v6039_v63  ;;  %v5528_v3 = vadd.f32 %v12162_v40, %v5009_v52  ;;  %7317 = vst.msk [vmem:[%s11842_s12 + $0x54] sm:$0xf] %vm7295_vm1, %v8156_v9  ;;  %v5784_v45 = vadd.f32 %v12162_v40, %v5265_v5  ;;  %v5014_v63 = vmul.f32 %v12149_v28, %v12072_v0 }
 0x23a   : > { %v6551_v27 = vmax.f32 %v14425_v24, %v6295_v54  ;;  %v8161_v6 = vpack.c.bf16 %v6681_v46, %v6681_v46  ;;  %v5270_v54 = vmul.f32 %v12149_v28, %v12078_v7  ;;  %v14427_v21 = vmax.f32 %v14426_v57, 0.0 }
 0x23b   : > { %v14429_v24 = vmax.f32 %v14428_v33, 0.0  ;;  %v6040_v25 = vmax.f32 %v5528_v3, 0.0  ;;  %v6296_v9 = vmax.f32 %v5784_v45, 0.0  ;;  %v5533_v46 = vadd.f32 %v12162_v40, %v5014_v63  ;;  %v12188_v3 = vpop.f32.mrb[164].mxu0 }
 0x23c   : > { %v6679_v31 = vmax.f32 %v6423_v62, %v6551_v27  ;;  %v6426_v56 = vmax.f32 %v14427_v21, %v6042_v37  ;;  %7322 = vst.msk [vmem:[%s11842_s12 + $0x68] sm:$0xf] %vm7295_vm1, %v8161_v6  ;;  %v5789_v5 = vadd.f32 %v12162_v40, %v5270_v54  ;;  %v5012_v0 = vmul.f32 %v12149_v28, %v12080_v17  ;;  %v14430_v27 = vld [vmem:[#allocation72_spill] sm:$0xff]  ;;  %v14432_v6 = vld [vmem:[#allocation73_spill] sm:$0xff]  ;;  %v12195_v17 = vpop.f32.mrb[165].mxu0 }
 0x23d   : > { %v6554_v52 = vmax.f32 %v14429_v24, %v6298_v2  ;;  %v14431_v57 = vmax.f32 %v14430_v27, 0.0  ;;  %v5268_v2 = vmul.f32 %v12149_v28, %v12085_v51  ;;  %v14433_v21 = vmax.f32 %v14432_v6, 0.0  ;;  %v12193_v24 = vpop.f32.mrb[164].mxu1 }
 0x23e   : > { %v8159_v7 = vpack.c.bf16 %v6679_v31, %v6679_v31  ;;  %v6045_v33 = vmax.f32 %v5533_v46, 0.0  ;;  %v6301_v63 = vmax.f32 %v5789_v5, 0.0  ;;  %v5531_v54 = vadd.f32 %v12162_v40, %v5012_v0  ;;  %v14434_v5 = vld [vmem:[#allocation13_spill] sm:$0xff] }
 0x23f   : > { %v6682_v62 = vmax.f32 %v6426_v56, %v6554_v52  ;;  %v6424_v37 = vmax.f32 %v14431_v57, %v6040_v25  ;;  %v6552_v45 = vmax.f32 %v14433_v21, %v6296_v9  ;;  %v5787_v31 = vadd.f32 %v12162_v40, %v5268_v2  ;;  %v12204_v52 = vpop.f32.mrb[165].mxu1  ;;  %v12206_v9 = vpop.f32.mrb[166].mxu0  ;;  %v14436_v57 = vld [vmem:[#allocation14_spill] sm:$0xff] }
 0x240   : > { %7320 = vst.msk [vmem:[%s11842_s12 + $0x60] sm:$0xf] %vm7295_vm1, %v8159_v7  ;;  %v5015_v51 = vmul.f32 %v12149_v28, %v12087_v15  ;;  %v5271_v56 = vmul.f32 %v12149_v28, %v12094_v43  ;;  %v14435_v0 = vmax.f32 %v14434_v5, 0.0  ;;  %v14437_v6 = vmax.f32 %v14436_v57, 0.0  ;;  %v12212_v21 = vpop.f32.mrb[166].mxu1  ;;  %v12214_v2 = vpop.f32.mrb[167].mxu0 }
 0x241   : > { %v8162_v25 = vpack.c.bf16 %v6682_v62, %v6682_v62  ;;  %v6680_v46 = vmax.f32 %v6424_v37, %v6552_v45  ;;  %v6043_v62 = vmax.f32 %v5531_v54, 0.0  ;;  %v6299_v15 = vmax.f32 %v5787_v31, 0.0  ;;  %v12222_v45 = vpop.f32.mrb[167].mxu1  ;;  %v14438_v54 = vld [vmem:[#allocation74_spill] sm:$0xff] }
 0x242   : > { %v6429_v27 = vmax.f32 %v14435_v0, %v6045_v33  ;;  %v6557_v7 = vmax.f32 %v14437_v6, %v6301_v63  ;;  %v5534_v43 = vadd.f32 %v12162_v40, %v5015_v51  ;;  %v5790_v48 = vadd.f32 %v12162_v40, %v5271_v56 }
 0x243   : > { %7323 = vst.msk [vmem:[%s11842_s12 + $0x6c] sm:$0xf] %vm7295_vm1, %v8162_v25  ;;  %v5013_v37 = vmul.f32 %v12149_v28, %v12096_v49  ;;  %v8160_v33 = vpack.c.bf16 %v6680_v46, %v6680_v46  ;;  %v14439_v5 = vmax.f32 %v14438_v54, 0.0  ;;  %v5269_v57 = vmul.f32 %v12149_v28, %v12102_v13  ;;  %v14441_v13 = vld [vmem:[#allocation15_spill] sm:$0xff] }
 0x244   : > { %v6685_v63 = vmax.f32 %v6429_v27, %v6557_v7  ;;  %v14440_v25 = vmax.f32 %v10289_v11, 0.0  ;;  %v6046_v51 = vmax.f32 %v5534_v43, 0.0  ;;  %v6302_v6 = vmax.f32 %v5790_v48, 0.0 }
 0x245   : > { %v6427_v0 = vmax.f32 %v14439_v5, %v6043_v62  ;;  %v5532_v56 = vadd.f32 %v12162_v40, %v5013_v37  ;;  %7321 = vst.msk [vmem:[%s11842_s12 + $0x64] sm:$0xf] %vm7295_vm1, %v8160_v33  ;;  %v5788_v46 = vadd.f32 %v12162_v40, %v5269_v57  ;;  %v5018_v27 = vmul.f32 %v12149_v28, %v12124_v55  ;;  %v12242_v37 = vpop.f32.mrb[168].mxu0 }
 0x246   : > { %v6555_v31 = vmax.f32 %v14440_v25, %v6299_v15  ;;  %v8165_v49 = vpack.c.bf16 %v6685_v63, %v6685_v63  ;;  %v5274_v7 = vmul.f32 %v12149_v28, %v12130_v61  ;;  %v14442_v54 = vmax.f32 %v14441_v13, 0.0  ;;  %v14443_v15 = vld [vmem:[#allocation75_spill] sm:$0xff]  ;;  %v12252_v57 = vpop.f32.mrb[169].mxu0 }
 0x247   : > { %v14444_v43 = vmax.f32 %v14443_v15, 0.0  ;;  %v6044_v5 = vmax.f32 %v5532_v56, 0.0  ;;  %v6300_v33 = vmax.f32 %v5788_v46, 0.0  ;;  %v5537_v63 = vadd.f32 %v12162_v40, %v5018_v27  ;;  %v12260_v27 = vpop.f32.mrb[170].mxu0 }
 0x248   : > { %v6683_v62 = vmax.f32 %v6427_v0, %v6555_v31  ;;  %v6430_v11 = vmax.f32 %v14442_v54, %v6046_v51  ;;  %7326 = vst.msk [vmem:[%s11842_s12 + $0x78] sm:$0xf] %vm7295_vm1, %v8165_v49  ;;  %v5793_v55 = vadd.f32 %v12162_v40, %v5274_v7  ;;  %v5016_v61 = vmul.f32 %v12149_v28, %v12132_v1  ;;  %v12250_v0 = vpop.f32.mrb[168].mxu1  ;;  %v14445_v51 = vld [vmem:[#allocation76_spill] sm:$0xff] }
 0x249   : > { %v6558_v48 = vmax.f32 %v14444_v43, %v6302_v6  ;;  %v14446_v6 = vmax.f32 %v14445_v51, 0.0  ;;  %v5272_v49 = vmul.f32 %v12149_v28, %v12140_v23  ;;  %v12258_v46 = vpop.f32.mrb[169].mxu1  ;;  %v14447_v7 = vld [vmem:[#allocation16_spill] sm:$0xff]  ;;  %v6049_v1 = vmax.f32 %v5537_v63, 0.0 }
 0x24a   : > { %v8163_v25 = vpack.c.bf16 %v6683_v62, %v6683_v62  ;;  %v14448_v13 = vmax.f32 %v14447_v7, 0.0  ;;  %v6305_v15 = vmax.f32 %v5793_v55, 0.0  ;;  %v5535_v43 = vadd.f32 %v12162_v40, %v5016_v61  ;;  %v12265_v62 = vpop.f32.mrb[170].mxu1  ;;  %v14449_v55 = vld [vmem:[#allocation19_spill] sm:$0xff]  ;;  %v14451_v7 = vld [vmem:[#allocation20_spill] sm:$0xff] }
 0x24b   : > { %v6686_v31 = vmax.f32 %v6430_v11, %v6558_v48  ;;  %v6428_v56 = vmax.f32 %v14446_v6, %v6044_v5  ;;  %v12267_v11 = vpop.f32.mrb[171].mxu0  ;;  %v5791_v23 = vadd.f32 %v12162_v40, %v5272_v49  ;;  %v5019_v5 = vmul.f32 %v12149_v28, %v12142_v34  ;;  %v12276_v51 = vpop.f32.mrb[171].mxu1 }
 0x24c   : > { %v6556_v54 = vmax.f32 %v14448_v13, %v6300_v33  ;;  %7324 = vst.msk [vmem:[%s11842_s12 + $0x70] sm:$0xf] %vm7295_vm1, %v8163_v25  ;;  %v5275_v33 = vmul.f32 %v12149_v28, %v12153_v60  ;;  %v14450_v61 = vmax.f32 %v14449_v55, 0.0  ;;  %v14452_v13 = vmax.f32 %v14451_v7, 0.0 }
 0x24d   : > { %v8166_v48 = vpack.c.bf16 %v6686_v31, %v6686_v31  ;;  %v6047_v25 = vmax.f32 %v5535_v43, 0.0  ;;  %v6303_v31 = vmax.f32 %v5791_v23, 0.0  ;;  %v5538_v49 = vadd.f32 %v12162_v40, %v5019_v5 }
 0x24e   : > { %v6684_v63 = vmax.f32 %v6428_v56, %v6556_v54  ;;  %v6433_v6 = vmax.f32 %v14450_v61, %v6049_v1  ;;  %v6561_v19 = vmax.f32 %v14452_v13, %v6305_v15  ;;  %v5794_v34 = vadd.f32 %v12162_v40, %v5275_v33  ;;  %v14453_v54 = vld [vmem:[#allocation21_spill] sm:$0xff]  ;;  %v12295_v33 = vpop.f32.mrb[172].mxu0 }
 0x24f   : > { %7327 = vst.msk [vmem:[%s11842_s12 + $0x7c] sm:$0xf] %vm7295_vm1, %v8166_v48  ;;  %v5017_v60 = vmul.f32 %v12149_v28, %v12155_v35  ;;  %v14454_v55 = vmax.f32 %v14453_v54, 0.0  ;;  %v5273_v15 = vmul.f32 %v12149_v28, %v12165_v16  ;;  %v14455_v61 = vld [vmem:[#allocation77_spill] sm:$0xff]  ;;  %v6050_v48 = vmax.f32 %v5538_v49, 0.0  ;;  %v12306_v13 = vpop.f32.mrb[173].mxu0 }
 0x250   : > { %v8164_v38 = vpack.c.bf16 %v6684_v63, %v6684_v63  ;;  %v6689_v56 = vmax.f32 %v6433_v6, %v6561_v19  ;;  %v14456_v43 = vmax.f32 %v14455_v61, 0.0  ;;  %v6306_v23 = vmax.f32 %v5794_v34, 0.0  ;;  %v12304_v6 = vpop.f32.mrb[172].mxu1 }
 0x251   : > { %v6431_v1 = vmax.f32 %v14454_v55, %v6047_v25  ;;  %v5536_v5 = vadd.f32 %v12162_v40, %v5017_v60  ;;  %v5792_v19 = vadd.f32 %v12162_v40, %v5273_v15  ;;  %v5022_v63 = vmul.f32 %v12149_v28, %v12188_v3  ;;  %v14459_v60 = vld [vmem:[#allocation79_spill] sm:$0xff]  ;;  %v12312_v55 = vpop.f32.mrb[173].mxu1  ;;  %v12314_v15 = vpop.f32.mrb[174].mxu0 }
 0x252   : > { %v6559_v7 = vmax.f32 %v14456_v43, %v6303_v31  ;;  %7325 = vst.msk [vmem:[%s11842_s12 + $0x74] sm:$0xf] %vm7295_vm1, %v8164_v38  ;;  %v8169_v35 = vpack.c.bf16 %v6689_v56, %v6689_v56  ;;  %v5278_v16 = vmul.f32 %v12149_v28, %v12193_v24  ;;  %v14457_v31 = vld [vmem:[#allocation78_spill] sm:$0xff]  ;;  %v14460_v54 = vmax.f32 %v14459_v60, 0.0  ;;  %v12322_v43 = vpop.f32.mrb[174].mxu1 }
 0x253   : > { %v14458_v49 = vmax.f32 %v14457_v31, 0.0  ;;  %v6048_v56 = vmax.f32 %v5536_v5, 0.0  ;;  %v6304_v3 = vmax.f32 %v5792_v19, 0.0  ;;  %v5541_v24 = vadd.f32 %v12162_v40, %v5022_v63  ;;  %v14461_v5 = vld [vmem:[#allocation80_spill] sm:$0xff]  ;;  %v12330_v19 = vpop.f32.mrb[175].mxu1  ;;  %v14463_v63 = vld [vmem:[#allocation33_spill] sm:$0xff] }
 0x254   : > { %v6687_v25 = vmax.f32 %v6431_v1, %v6559_v7  ;;  %v6562_v38 = vmax.f32 %v14460_v54, %v6306_v23  ;;  %7330 = vst.msk [vmem:[%s11842_s12 + $0x88] sm:$0xf] %vm7295_vm1, %v8169_v35  ;;  %v5797_v61 = vadd.f32 %v12162_v40, %v5278_v16  ;;  %v5020_v1 = vmul.f32 %v12149_v28, %v12195_v17  ;;  %v12324_v7 = vpop.f32.mrb[175].mxu0 }
 0x255   : > { %v6434_v34 = vmax.f32 %v14458_v49, %v6050_v48  ;;  %v14462_v31 = vmax.f32 %v14461_v5, 0.0  ;;  %v5276_v35 = vmul.f32 %v12149_v28, %v12204_v52  ;;  %v14464_v16 = vmax.f32 %v14463_v63, 0.0  ;;  %v14465_v5 = vld [vmem:[#allocation34_spill] sm:$0xff] }
 0x256   : > { %v8167_v48 = vpack.c.bf16 %v6687_v25, %v6687_v25  ;;  %v6053_v54 = vmax.f32 %v5541_v24, 0.0  ;;  %v6309_v17 = vmax.f32 %v5797_v61, 0.0  ;;  %v5539_v30 = vadd.f32 %v12162_v40, %v5020_v1 }
 0x257   : > { %v6690_v23 = vmax.f32 %v6434_v34, %v6562_v38  ;;  %v6432_v49 = vmax.f32 %v14462_v31, %v6048_v56  ;;  %v6560_v60 = vmax.f32 %v14464_v16, %v6304_v3  ;;  %v5795_v34 = vadd.f32 %v12162_v40, %v5276_v35  ;;  %v14467_v3 = vld [vmem:[#allocation81_spill] sm:$0xff] }
 0x258   : > { %7328 = vst.msk [vmem:[%s11842_s12 + $0x80] sm:$0xf] %vm7295_vm1, %v8167_v48  ;;  %v5023_v38 = vmul.f32 %v12149_v28, %v12206_v9  ;;  %v5279_v52 = vmul.f32 %v12149_v28, %v12212_v21  ;;  %v14466_v31 = vmax.f32 %v14465_v5, 0.0  ;;  %v14468_v24 = vmax.f32 %v14467_v3, 0.0  ;;  %v12352_v21 = vpop.f32.mrb[176].mxu0 }
 0x259   : > { %v8170_v25 = vpack.c.bf16 %v6690_v23, %v6690_v23  ;;  %v6688_v56 = vmax.f32 %v6432_v49, %v6560_v60  ;;  %v6051_v16 = vmax.f32 %v5539_v30, 0.0  ;;  %v6307_v1 = vmax.f32 %v5795_v34, 0.0  ;;  %v14469_v60 = vld [vmem:[#allocation82_spill] sm:$0xff]  ;;  %v14471_v34 = vld [vmem:[#allocation83_spill] sm:$0xff] }
 0x25a   : > { %v6437_v63 = vmax.f32 %v14466_v31, %v6053_v54  ;;  %v6565_v61 = vmax.f32 %v14468_v24, %v6309_v17  ;;  %v5542_v48 = vadd.f32 %v12162_v40, %v5023_v38  ;;  %v5798_v23 = vadd.f32 %v12162_v40, %v5279_v52  ;;  %v12358_v17 = vpop.f32.mrb[176].mxu1 }
 0x25b   : > { %7331 = vst.msk [vmem:[%s11842_s12 + $0x8c] sm:$0xf] %vm7295_vm1, %v8170_v25  ;;  %v5021_v9 = vmul.f32 %v12149_v28, %v12214_v2  ;;  %v8168_v49 = vpack.c.bf16 %v6688_v56, %v6688_v56  ;;  %v14470_v54 = vmax.f32 %v14469_v60, 0.0  ;;  %v5277_v30 = vmul.f32 %v12149_v28, %v12222_v45  ;;  %v12360_v25 = vpop.f32.mrb[177].mxu0  ;;  %v12365_v56 = vpop.f32.mrb[177].mxu1 }
 0x25c   : > { %v6693_v35 = vmax.f32 %v6437_v63, %v6565_v61  ;;  %v14472_v38 = vmax.f32 %v14471_v34, 0.0  ;;  %v6054_v31 = vmax.f32 %v5542_v48, 0.0  ;;  %v6310_v3 = vmax.f32 %v5798_v23, 0.0  ;;  %v12367_v63 = vpop.f32.mrb[178].mxu0  ;;  %v14475_v34 = vld [vmem:[#allocation85_spill] sm:$0xff] }
 0x25d   : > { %v6435_v5 = vmax.f32 %v14470_v54, %v6051_v16  ;;  %v5540_v2 = vadd.f32 %v12162_v40, %v5021_v9  ;;  %7329 = vst.msk [vmem:[%s11842_s12 + $0x84] sm:$0xf] %vm7295_vm1, %v8168_v49  ;;  %v5796_v45 = vadd.f32 %v12162_v40, %v5277_v30  ;;  %v5026_v61 = vmul.f32 %v12149_v28, %v12242_v37  ;;  %v12378_v48 = vpop.f32.mrb[179].mxu0  ;;  %v14473_v9 = vld [vmem:[#allocation84_spill] sm:$0xff] }
 0x25e   : > { %v6563_v52 = vmax.f32 %v14472_v38, %v6307_v1  ;;  %v8173_v24 = vpack.c.bf16 %v6693_v35, %v6693_v35  ;;  %v5282_v16 = vmul.f32 %v12149_v28, %v12250_v0  ;;  %v12376_v1 = vpop.f32.mrb[178].mxu1  ;;  %v14474_v60 = vmax.f32 %v14473_v9, 0.0 }
 0x25f   : > { %v14476_v38 = vmax.f32 %v14475_v34, 0.0  ;;  %v6052_v35 = vmax.f32 %v5540_v2, 0.0  ;;  %v12384_v30 = vpop.f32.mrb[179].mxu1  ;;  %v6308_v37 = vmax.f32 %v5796_v45, 0.0  ;;  %v5545_v0 = vadd.f32 %v12162_v40, %v5026_v61  ;;  %v14479_v2 = vld [vmem:[#allocation87_spill] sm:$0xff] }
 0x260   : > { %v6691_v23 = vmax.f32 %v6435_v5, %v6563_v52  ;;  %v6438_v54 = vmax.f32 %v14474_v60, %v6054_v31  ;;  %7334 = vst.msk [vmem:[%s11842_s12 + $0x98] sm:$0xf] %vm7295_vm1, %v8173_v24  ;;  %v5801_v10 = vadd.f32 %v12162_v40, %v5282_v16  ;;  %v5024_v5 = vmul.f32 %v12149_v28, %v12252_v57  ;;  %v14477_v31 = vld [vmem:[#allocation86_spill] sm:$0xff] }
 0x261   : > { %v6566_v49 = vmax.f32 %v14476_v38, %v6310_v3  ;;  %v14478_v60 = vmax.f32 %v14477_v31, 0.0  ;;  %v5280_v3 = vmul.f32 %v12149_v28, %v12258_v46  ;;  %v14480_v38 = vmax.f32 %v14479_v2, 0.0  ;;  %v12406_v46 = vpop.f32.mrb[180].mxu0 }
 0x262   : > { %v8171_v52 = vpack.c.bf16 %v6691_v23, %v6691_v23  ;;  %v6057_v24 = vmax.f32 %v5545_v0, 0.0  ;;  %v6313_v45 = vmax.f32 %v5801_v10, 0.0  ;;  %v5543_v61 = vadd.f32 %v12162_v40, %v5024_v5  ;;  %v14482_v10 = vld [vmem:[#allocation88_spill] sm:$0xff] }
 0x263   : > { %v6694_v9 = vmax.f32 %v6438_v54, %v6566_v49  ;;  %v6436_v34 = vmax.f32 %v14478_v60, %v6052_v35  ;;  %v6564_v50 = vmax.f32 %v14480_v38, %v6308_v37  ;;  %v5799_v57 = vadd.f32 %v12162_v40, %v5280_v3  ;;  %v14484_v38 = vld [vmem:[#allocation89_spill] sm:$0xff] }
 0x264   : > { %7332 = vst.msk [vmem:[%s11842_s12 + $0x90] sm:$0xf] %vm7295_vm1, %v8171_v52  ;;  %v5027_v23 = vmul.f32 %v12149_v28, %v12260_v27  ;;  %v5283_v54 = vmul.f32 %v12149_v28, %v12265_v62  ;;  %v14481_v35 = vmax.f32 %v10471_v58, 0.0  ;;  %v14483_v0 = vmax.f32 %v14482_v10, 0.0  ;;  %v12412_v52 = vpop.f32.mrb[180].mxu1 }
 0x265   : > { %v8174_v16 = vpack.c.bf16 %v6694_v9, %v6694_v9  ;;  %v6692_v49 = vmax.f32 %v6436_v34, %v6564_v50  ;;  %v6055_v31 = vmax.f32 %v5543_v61, 0.0  ;;  %v12414_v9 = vpop.f32.mrb[181].mxu0  ;;  %v6311_v27 = vmax.f32 %v5799_v57, 0.0  ;;  %v12422_v50 = vpop.f32.mrb[181].mxu1 }
 0x266   : > { %v6441_v37 = vmax.f32 %v14481_v35, %v6057_v24  ;;  %v6569_v5 = vmax.f32 %v14483_v0, %v6313_v45  ;;  %v5546_v60 = vadd.f32 %v12162_v40, %v5027_v23  ;;  %v5802_v62 = vadd.f32 %v12162_v40, %v5283_v54  ;;  %v12424_v34 = vpop.f32.mrb[182].mxu0  ;;  %v14486_v23 = vld [vmem:[#allocation90_spill] sm:$0xff] }
 0x267   : > { %7335 = vst.msk [vmem:[%s11842_s12 + $0x9c] sm:$0xf] %vm7295_vm1, %v8174_v16  ;;  %v5025_v58 = vmul.f32 %v12149_v28, %v12267_v11  ;;  %v8172_v3 = vpack.c.bf16 %v6692_v49, %v6692_v49  ;;  %v14485_v24 = vmax.f32 %v14484_v38, 0.0  ;;  %v5281_v61 = vmul.f32 %v12149_v28, %v12276_v51  ;;  %v12430_v16 = vpop.f32.mrb[182].mxu1  ;;  %v12432_v57 = vpop.f32.mrb[183].mxu0 }
 0x268   : > { %v6697_v2 = vmax.f32 %v6441_v37, %v6569_v5  ;;  %v14487_v54 = vmax.f32 %v14486_v23, 0.0  ;;  %v6058_v35 = vmax.f32 %v5546_v60, 0.0  ;;  %v6314_v10 = vmax.f32 %v5802_v62, 0.0  ;;  %v12437_v49 = vpop.f32.mrb[183].mxu1  ;;  %v14490_v62 = vld [vmem:[#allocation92_spill] sm:$0xff] }
 0x269   : > { %v6439_v45 = vmax.f32 %v14485_v24, %v6055_v31  ;;  %v5544_v0 = vadd.f32 %v12162_v40, %v5025_v58  ;;  %7333 = vst.msk [vmem:[%s11842_s12 + $0x94] sm:$0xf] %vm7295_vm1, %v8172_v3  ;;  %v5800_v5 = vadd.f32 %v12162_v40, %v5281_v61  ;;  %v5030_v51 = vmul.f32 %v12149_v28, %v12295_v33  ;;  %v14488_v24 = vld [vmem:[#allocation91_spill] sm:$0xff] }
 0x26a   : > { %v6567_v11 = vmax.f32 %v14487_v54, %v6311_v27  ;;  %v8177_v37 = vpack.c.bf16 %v6697_v2, %v6697_v2  ;;  %v5286_v31 = vmul.f32 %v12149_v28, %v12304_v6  ;;  %v14489_v27 = vmax.f32 %v14488_v24, 0.0 }
 0x26b   : > { %v14491_v23 = vmax.f32 %v14490_v62, 0.0  ;;  %v6056_v54 = vmax.f32 %v5544_v0, 0.0  ;;  %v6312_v3 = vmax.f32 %v5800_v5, 0.0  ;;  %v5549_v2 = vadd.f32 %v12162_v40, %v5030_v51  ;;  %v12460_v0 = vpop.f32.mrb[184].mxu0 }
 0x26c   : > { %v6695_v38 = vmax.f32 %v6439_v45, %v6567_v11  ;;  %v6442_v60 = vmax.f32 %v14489_v27, %v6058_v35  ;;  %7338 = vst.msk [vmem:[%s11842_s12 + $0xa8] sm:$0xf] %vm7295_vm1, %v8177_v37  ;;  %v5805_v61 = vadd.f32 %v12162_v40, %v5286_v31  ;;  %v5028_v33 = vmul.f32 %v12149_v28, %v12306_v13  ;;  %v14492_v11 = vld [vmem:[#allocation93_spill] sm:$0xff]  ;;  %v14494_v37 = vld [vmem:[#allocation94_spill] sm:$0xff]  ;;  %v12467_v13 = vpop.f32.mrb[185].mxu0 }
 0x26d   : > { %v6570_v58 = vmax.f32 %v14491_v23, %v6314_v10  ;;  %v14493_v24 = vmax.f32 %v14492_v11, 0.0  ;;  %v5284_v10 = vmul.f32 %v12149_v28, %v12312_v55  ;;  %v14495_v27 = vmax.f32 %v14494_v37, 0.0  ;;  %v12465_v23 = vpop.f32.mrb[184].mxu1 }
 0x26e   : > { %v8175_v6 = vpack.c.bf16 %v6695_v38, %v6695_v38  ;;  %v6061_v62 = vmax.f32 %v5549_v2, 0.0  ;;  %v6317_v51 = vmax.f32 %v5805_v61, 0.0  ;;  %v5547_v31 = vadd.f32 %v12162_v40, %v5028_v33  ;;  %v14496_v61 = vld [vmem:[#allocation95_spill] sm:$0xff] }
 0x26f   : > { %v6698_v45 = vmax.f32 %v6442_v60, %v6570_v58  ;;  %v6440_v35 = vmax.f32 %v14493_v24, %v6056_v54  ;;  %v6568_v5 = vmax.f32 %v14495_v27, %v6312_v3  ;;  %v5803_v60 = vadd.f32 %v12162_v40, %v5284_v10  ;;  %v12476_v54 = vpop.f32.mrb[185].mxu1  ;;  %v12478_v3 = vpop.f32.mrb[186].mxu0  ;;  %v14498_v24 = vld [vmem:[#allocation96_spill] sm:$0xff] }
 0x270   : > { %7336 = vst.msk [vmem:[%s11842_s12 + $0xa0] sm:$0xf] %vm7295_vm1, %v8175_v6  ;;  %v5031_v55 = vmul.f32 %v12149_v28, %v12314_v15  ;;  %v5287_v58 = vmul.f32 %v12149_v28, %v12322_v43  ;;  %v14497_v33 = vmax.f32 %v14496_v61, 0.0  ;;  %v14499_v37 = vmax.f32 %v14498_v24, 0.0  ;;  %v12484_v27 = vpop.f32.mrb[186].mxu1  ;;  %v12486_v10 = vpop.f32.mrb[187].mxu0 }
 0x271   : > { %v8178_v38 = vpack.c.bf16 %v6698_v45, %v6698_v45  ;;  %v6696_v2 = vmax.f32 %v6440_v35, %v6568_v5  ;;  %v6059_v45 = vmax.f32 %v5547_v31, 0.0  ;;  %v6315_v15 = vmax.f32 %v5803_v60, 0.0  ;;  %v12494_v5 = vpop.f32.mrb[187].mxu1  ;;  %v14500_v31 = vld [vmem:[#allocation97_spill] sm:$0xff] }
 0x272   : > { %v6445_v11 = vmax.f32 %v14497_v33, %v6061_v62  ;;  %v6573_v6 = vmax.f32 %v14499_v37, %v6317_v51  ;;  %v5550_v43 = vadd.f32 %v12162_v40, %v5031_v55  ;;  %v5806_v22 = vadd.f32 %v12162_v40, %v5287_v58 }
 0x273   : > { %7339 = vst.msk [vmem:[%s11842_s12 + $0xac] sm:$0xf] %vm7295_vm1, %v8178_v38  ;;  %v5029_v35 = vmul.f32 %v12149_v28, %v12324_v7  ;;  %v8176_v62 = vpack.c.bf16 %v6696_v2, %v6696_v2  ;;  %v14501_v61 = vmax.f32 %v14500_v31, 0.0  ;;  %v5285_v24 = vmul.f32 %v12149_v28, %v12330_v19  ;;  %v14502_v38 = vld [vmem:[#allocation98_spill] sm:$0xff]  ;;  %v14504_v19 = vld [vmem:[#allocation99_spill] sm:$0xff] }
 0x274   : > { %v6701_v51 = vmax.f32 %v6445_v11, %v6573_v6  ;;  %v14503_v60 = vmax.f32 %v14502_v38, 0.0  ;;  %v6062_v55 = vmax.f32 %v5550_v43, 0.0  ;;  %v6318_v8 = vmax.f32 %v5806_v22, 0.0 }
 0x275   : > { %v6443_v33 = vmax.f32 %v14501_v61, %v6059_v45  ;;  %v5548_v58 = vadd.f32 %v12162_v40, %v5029_v35  ;;  %7337 = vst.msk [vmem:[%s11842_s12 + $0xa4] sm:$0xf] %vm7295_vm1, %v8176_v62  ;;  %v5804_v2 = vadd.f32 %v12162_v40, %v5285_v24  ;;  %v5034_v11 = vmul.f32 %v12149_v28, %v12352_v21  ;;  %v12514_v35 = vpop.f32.mrb[188].mxu0 }
 0x276   : > { %v6571_v37 = vmax.f32 %v14503_v60, %v6315_v15  ;;  %v8181_v7 = vpack.c.bf16 %v6701_v51, %v6701_v51  ;;  %v5290_v6 = vmul.f32 %v12149_v28, %v12358_v17  ;;  %v14505_v31 = vmax.f32 %v14504_v19, 0.0  ;;  %v14506_v15 = vld [vmem:[#allocation100_spill] sm:$0xff]  ;;  %v12524_v24 = vpop.f32.mrb[189].mxu0 }
 0x277   : > { %v14507_v43 = vmax.f32 %v14506_v15, 0.0  ;;  %v6060_v38 = vmax.f32 %v5548_v58, 0.0  ;;  %v6316_v62 = vmax.f32 %v5804_v2, 0.0  ;;  %v5553_v51 = vadd.f32 %v12162_v40, %v5034_v11  ;;  %v12532_v11 = vpop.f32.mrb[190].mxu0 }
 0x278   : > { %v6699_v45 = vmax.f32 %v6443_v33, %v6571_v37  ;;  %v6446_v61 = vmax.f32 %v14505_v31, %v6062_v55  ;;  %7342 = vst.msk [vmem:[%s11842_s12 + $0xb8] sm:$0xf] %vm7295_vm1, %v8181_v7  ;;  %v5809_v21 = vadd.f32 %v12162_v40, %v5290_v6  ;;  %v5032_v17 = vmul.f32 %v12149_v28, %v12360_v25  ;;  %v12522_v33 = vpop.f32.mrb[188].mxu1  ;;  %v14508_v37 = vld [vmem:[#allocation101_spill] sm:$0xff]  ;;  %v14510_v6 = vld [vmem:[#allocation102_spill] sm:$0xff] }
 0x279   : > { %v6574_v22 = vmax.f32 %v14507_v43, %v6318_v8  ;;  %v14509_v55 = vmax.f32 %v14508_v37, 0.0  ;;  %v5288_v7 = vmul.f32 %v12149_v28, %v12365_v56  ;;  %v12530_v2 = vpop.f32.mrb[189].mxu1  ;;  %v14511_v19 = vmax.f32 %v14510_v6, 0.0  ;;  %v14514_v6 = vld [vmem:[#allocation104_spill] sm:$0xff] }
 0x27a   : > { %v8179_v60 = vpack.c.bf16 %v6699_v45, %v6699_v45  ;;  %v6065_v25 = vmax.f32 %v5553_v51, 0.0  ;;  %v6321_v15 = vmax.f32 %v5809_v21, 0.0  ;;  %v5551_v43 = vadd.f32 %v12162_v40, %v5032_v17  ;;  %v12537_v45 = vpop.f32.mrb[190].mxu1  ;;  %v14512_v21 = vld [vmem:[#allocation103_spill] sm:$0xff] }
 0x27b   : > { %v6702_v8 = vmax.f32 %v6446_v61, %v6574_v22  ;;  %v6444_v58 = vmax.f32 %v14509_v55, %v6060_v38  ;;  %v6572_v31 = vmax.f32 %v14511_v19, %v6316_v62  ;;  %v12539_v61 = vpop.f32.mrb[191].mxu0  ;;  %v5807_v56 = vadd.f32 %v12162_v40, %v5288_v7  ;;  %v12548_v37 = vpop.f32.mrb[191].mxu1 }
 0x27c   : > { %7340 = vst.msk [vmem:[%s11842_s12 + $0xb0] sm:$0xf] %vm7295_vm1, %v8179_v60  ;;  %v5035_v38 = vmul.f32 %v12149_v28, %v12367_v63  ;;  %v5291_v62 = vmul.f32 %v12149_v28, %v12376_v1  ;;  %v14513_v17 = vmax.f32 %v14512_v21, 0.0  ;;  %v14515_v19 = vmax.f32 %v14514_v6, 0.0 }
 0x27d   : > { %v8182_v22 = vpack.c.bf16 %v6702_v8, %v6702_v8  ;;  %v6700_v51 = vmax.f32 %v6444_v58, %v6572_v31  ;;  %v6063_v60 = vmax.f32 %v5551_v43, 0.0  ;;  %v6319_v8 = vmax.f32 %v5807_v56, 0.0  ;;  %v14516_v31 = vld [vmem:[#allocation105_spill] sm:$0xff] }
 0x27e   : > { %v6449_v55 = vmax.f32 %v14513_v17, %v6065_v25  ;;  %v6577_v18 = vmax.f32 %v14515_v19, %v6321_v15  ;;  %v5554_v7 = vadd.f32 %v12162_v40, %v5035_v38  ;;  %v5810_v63 = vadd.f32 %v12162_v40, %v5291_v62  ;;  %v14518_v17 = vld [vmem:[#allocation106_spill] sm:$0xff]  ;;  %v12567_v62 = vpop.f32.mrb[192].mxu0 }
 0x27f   : > { %7343 = vst.msk [vmem:[%s11842_s12 + $0xbc] sm:$0xf] %vm7295_vm1, %v8182_v22  ;;  %v5033_v1 = vmul.f32 %v12149_v28, %v12378_v48  ;;  %v8180_v41 = vpack.c.bf16 %v6700_v51, %v6700_v51  ;;  %v14517_v21 = vmax.f32 %v14516_v31, 0.0  ;;  %v5289_v15 = vmul.f32 %v12149_v28, %v12384_v30  ;;  %v12578_v19 = vpop.f32.mrb[193].mxu0 }
 0x280   : > { %v6705_v58 = vmax.f32 %v6449_v55, %v6577_v18  ;;  %v14519_v43 = vmax.f32 %v14518_v17, 0.0  ;;  %v6066_v22 = vmax.f32 %v5554_v7, 0.0  ;;  %v6322_v56 = vmax.f32 %v5810_v63, 0.0  ;;  %v12576_v55 = vpop.f32.mrb[192].mxu1 }
 0x281   : > { %v6447_v25 = vmax.f32 %v14517_v21, %v6063_v60  ;;  %v5552_v38 = vadd.f32 %v12162_v40, %v5033_v1  ;;  %7341 = vst.msk [vmem:[%s11842_s12 + $0xb4] sm:$0xf] %vm7295_vm1, %v8180_v41  ;;  %v5808_v18 = vadd.f32 %v12162_v40, %v5289_v15  ;;  %v5038_v51 = vmul.f32 %v12149_v28, %v12406_v46  ;;  %v14522_v1 = vld [vmem:[#allocation7_spill] sm:$0xff]  ;;  %v12584_v21 = vpop.f32.mrb[193].mxu1  ;;  %v12586_v15 = vpop.f32.mrb[194].mxu0 }
 0x282   : > { %v6575_v6 = vmax.f32 %v14519_v43, %v6319_v8  ;;  %v8185_v48 = vpack.c.bf16 %v6705_v58, %v6705_v58  ;;  %v5294_v30 = vmul.f32 %v12149_v28, %v12412_v52  ;;  %v14520_v8 = vld [vmem:[#allocation107_spill] sm:$0xff]  ;;  %v14523_v31 = vmax.f32 %v14522_v1, 0.0  ;;  %v12594_v43 = vpop.f32.mrb[194].mxu1 }
 0x283   : > { %v14521_v7 = vmax.f32 %v14520_v8, 0.0  ;;  %v6064_v58 = vmax.f32 %v5552_v38, 0.0  ;;  %v6320_v46 = vmax.f32 %v5808_v18, 0.0  ;;  %v5557_v52 = vadd.f32 %v12162_v40, %v5038_v51  ;;  %v14524_v38 = vld [vmem:[#allocation108_spill] sm:$0xff]  ;;  %v12602_v18 = vpop.f32.mrb[195].mxu1  ;;  %v14526_v51 = vld [vmem:[#allocation9_spill] sm:$0xff] }
 0x284   : > { %v6703_v60 = vmax.f32 %v6447_v25, %v6575_v6  ;;  %v6578_v41 = vmax.f32 %v14523_v31, %v6322_v56  ;;  %7346 = vst.msk [vmem:[%s11842_s12 + $0xc8] sm:$0xf] %vm7295_vm1, %v8185_v48  ;;  %v5813_v17 = vadd.f32 %v12162_v40, %v5294_v30  ;;  %v5036_v25 = vmul.f32 %v12149_v28, %v12414_v9  ;;  %v12596_v6 = vpop.f32.mrb[195].mxu0 }
 0x285   : > { %v6450_v63 = vmax.f32 %v14521_v7, %v6066_v22  ;;  %v14525_v8 = vmax.f32 %v14524_v38, 0.0  ;;  %v5292_v48 = vmul.f32 %v12149_v28, %v12422_v50  ;;  %v14527_v30 = vmax.f32 %v14526_v51, 0.0  ;;  %v14528_v38 = vld [vmem:[#allocation10_spill] sm:$0xff] }
 0x286   : > { %v8183_v22 = vpack.c.bf16 %v6703_v60, %v6703_v60  ;;  %v6069_v31 = vmax.f32 %v5557_v52, 0.0  ;;  %v6325_v9 = vmax.f32 %v5813_v17, 0.0  ;;  %v5555_v14 = vadd.f32 %v12162_v40, %v5036_v25 }
 0x287   : > { %v6706_v56 = vmax.f32 %v6450_v63, %v6578_v41  ;;  %v6448_v7 = vmax.f32 %v14525_v8, %v6064_v58  ;;  %v6576_v1 = vmax.f32 %v14527_v30, %v6320_v46  ;;  %v5811_v63 = vadd.f32 %v12162_v40, %v5292_v48  ;;  %v14530_v46 = vld [vmem:[#allocation11_spill] sm:$0xff] }
 0x288   : > { %7344 = vst.msk [vmem:[%s11842_s12 + $0xc0] sm:$0xf] %vm7295_vm1, %v8183_v22  ;;  %v5039_v41 = vmul.f32 %v12149_v28, %v12424_v34  ;;  %v5295_v50 = vmul.f32 %v12149_v28, %v12430_v16  ;;  %v14529_v8 = vmax.f32 %v14528_v38, 0.0  ;;  %v14531_v52 = vmax.f32 %v14530_v46, 0.0  ;;  %v12624_v16 = vpop.f32.mrb[196].mxu0 }
 0x289   : > { %v8186_v60 = vpack.c.bf16 %v6706_v56, %v6706_v56  ;;  %v6704_v58 = vmax.f32 %v6448_v7, %v6576_v1  ;;  %v6067_v30 = vmax.f32 %v5555_v14, 0.0  ;;  %v6323_v25 = vmax.f32 %v5811_v63, 0.0  ;;  %v14532_v1 = vld [vmem:[#allocation12_spill] sm:$0xff]  ;;  %v14534_v63 = vld [vmem:[#allocation109_spill] sm:$0xff] }
 0x28a   : > { %v6453_v51 = vmax.f32 %v14529_v8, %v6069_v31  ;;  %v6581_v17 = vmax.f32 %v14531_v52, %v6325_v9  ;;  %v5558_v22 = vadd.f32 %v12162_v40, %v5039_v41  ;;  %v5814_v56 = vadd.f32 %v12162_v40, %v5295_v50  ;;  %v12630_v9 = vpop.f32.mrb[196].mxu1 }
 0x28b   : > { %7347 = vst.msk [vmem:[%s11842_s12 + $0xcc] sm:$0xf] %vm7295_vm1, %v8186_v60  ;;  %v5037_v34 = vmul.f32 %v12149_v28, %v12432_v57  ;;  %v8184_v7 = vpack.c.bf16 %v6704_v58, %v6704_v58  ;;  %v14533_v31 = vmax.f32 %v14532_v1, 0.0  ;;  %v5293_v14 = vmul.f32 %v12149_v28, %v12437_v49  ;;  %v12632_v60 = vpop.f32.mrb[197].mxu0  ;;  %v12637_v58 = vpop.f32.mrb[197].mxu1 }
 0x28c   : > { %v6709_v48 = vmax.f32 %v6453_v51, %v6581_v17  ;;  %v14535_v41 = vmax.f32 %v14534_v63, 0.0  ;;  %v6070_v8 = vmax.f32 %v5558_v22, 0.0  ;;  %v6326_v46 = vmax.f32 %v5814_v56, 0.0  ;;  %v12639_v51 = vpop.f32.mrb[198].mxu0  ;;  %v14538_v63 = vld [vmem:[#allocation111_spill] sm:$0xff] }
 0x28d   : > { %v6451_v38 = vmax.f32 %v14533_v31, %v6067_v30  ;;  %v5556_v57 = vadd.f32 %v12162_v40, %v5037_v34  ;;  %7345 = vst.msk [vmem:[%s11842_s12 + $0xc4] sm:$0xf] %vm7295_vm1, %v8184_v7  ;;  %v5812_v49 = vadd.f32 %v12162_v40, %v5293_v14  ;;  %v5042_v17 = vmul.f32 %v12149_v28, %v12460_v0  ;;  %v12650_v22 = vpop.f32.mrb[199].mxu0  ;;  %v14536_v34 = vld [vmem:[#allocation110_spill] sm:$0xff] }
 0x28e   : > { %v6579_v50 = vmax.f32 %v14535_v41, %v6323_v25  ;;  %v8189_v52 = vpack.c.bf16 %v6709_v48, %v6709_v48  ;;  %v5298_v30 = vmul.f32 %v12149_v28, %v12465_v23  ;;  %v12648_v25 = vpop.f32.mrb[198].mxu1  ;;  %v14537_v1 = vmax.f32 %v14536_v34, 0.0 }
 0x28f   : > { %v14539_v41 = vmax.f32 %v14538_v63, 0.0  ;;  %v6068_v48 = vmax.f32 %v5556_v57, 0.0  ;;  %v12656_v14 = vpop.f32.mrb[199].mxu1  ;;  %v6324_v0 = vmax.f32 %v5812_v49, 0.0  ;;  %v5561_v23 = vadd.f32 %v12162_v40, %v5042_v17  ;;  %v14542_v57 = vld [vmem:[#allocation17_spill] sm:$0xff] }
 0x290   : > { %v6707_v56 = vmax.f32 %v6451_v38, %v6579_v50  ;;  %v6454_v31 = vmax.f32 %v14537_v1, %v6070_v8  ;;  %7350 = vst.msk [vmem:[%s11842_s12 + $0xd8] sm:$0xf] %vm7295_vm1, %v8189_v52  ;;  %v5817_v53 = vadd.f32 %v12162_v40, %v5298_v30  ;;  %v5040_v38 = vmul.f32 %v12149_v28, %v12467_v13  ;;  %v14540_v8 = vld [vmem:[#allocation112_spill] sm:$0xff] }
 0x291   : > { %v6582_v7 = vmax.f32 %v14539_v41, %v6326_v46  ;;  %v14541_v1 = vmax.f32 %v14540_v8, 0.0  ;;  %v5296_v46 = vmul.f32 %v12149_v28, %v12476_v54  ;;  %v14543_v41 = vmax.f32 %v14542_v57, 0.0  ;;  %v12678_v54 = vpop.f32.mrb[200].mxu0 }
 0x292   : > { %v8187_v50 = vpack.c.bf16 %v6707_v56, %v6707_v56  ;;  %v6073_v52 = vmax.f32 %v5561_v23, 0.0  ;;  %v6329_v49 = vmax.f32 %v5817_v53, 0.0  ;;  %v5559_v17 = vadd.f32 %v12162_v40, %v5040_v38 }
 0x293   : > { %v6710_v34 = vmax.f32 %v6454_v31, %v6582_v7  ;;  %v6452_v63 = vmax.f32 %v14541_v1, %v6068_v48  ;;  %v6580_v32 = vmax.f32 %v14543_v41, %v6324_v0  ;;  %v5815_v13 = vadd.f32 %v12162_v40, %v5296_v46 }
 0x294   : > { %7348 = vst.msk [vmem:[%s11842_s12 + $0xd0] sm:$0xf] %vm7295_vm1, %v8187_v50  ;;  %v5043_v56 = vmul.f32 %v12149_v28, %v12478_v3  ;;  %v5299_v31 = vmul.f32 %v12149_v28, %v12484_v27  ;;  %v14544_v48 = vmax.f32 %v10745_v42, 0.0  ;;  %v14545_v53 = vmax.f32 %v10752_v36, 0.0  ;;  %v12684_v50 = vpop.f32.mrb[200].mxu1 }
 0x295   : > { %v8190_v30 = vpack.c.bf16 %v6710_v34, %v6710_v34  ;;  %v6708_v7 = vmax.f32 %v6452_v63, %v6580_v32  ;;  %v6071_v38 = vmax.f32 %v5559_v17, 0.0  ;;  %v12686_v34 = vpop.f32.mrb[201].mxu0  ;;  %v6327_v3 = vmax.f32 %v5815_v13, 0.0  ;;  %v12694_v32 = vpop.f32.mrb[201].mxu1 }
 0x296   : > { %v6457_v0 = vmax.f32 %v14544_v48, %v6073_v52  ;;  %v6585_v23 = vmax.f32 %v14545_v53, %v6329_v49  ;;  %v5562_v8 = vadd.f32 %v12162_v40, %v5043_v56  ;;  %v5818_v27 = vadd.f32 %v12162_v40, %v5299_v31  ;;  %v12696_v36 = vpop.f32.mrb[202].mxu0  ;;  %v12702_v52 = vpop.f32.mrb[202].mxu1 }
 0x297   : > { %7351 = vst.msk [vmem:[%s11842_s12 + $0xdc] sm:$0xf] %vm7295_vm1, %v8190_v30  ;;  %v5041_v42 = vmul.f32 %v12149_v28, %v12486_v10  ;;  %v8188_v1 = vpack.c.bf16 %v6708_v7, %v6708_v7  ;;  %v14546_v46 = vmax.f32 %v10755_v47, 0.0  ;;  %v5297_v41 = vmul.f32 %v12149_v28, %v12494_v5  ;;  %v12704_v49 = vpop.f32.mrb[203].mxu0  ;;  %v12709_v31 = vpop.f32.mrb[203].mxu1 }
 0x298   : > { %v6713_v63 = vmax.f32 %v6457_v0, %v6585_v23  ;;  %v14547_v17 = vmax.f32 %v10758_v26, 0.0  ;;  %v6074_v30 = vmax.f32 %v5562_v8, 0.0  ;;  %v6330_v13 = vmax.f32 %v5818_v27, 0.0  ;;  %v14549_v23 = vld [vmem:[#allocation18_spill] sm:$0xff] }
 0x299   : > { %v6455_v57 = vmax.f32 %v14546_v46, %v6071_v38  ;;  %v5560_v56 = vadd.f32 %v12162_v40, %v5041_v42  ;;  %7349 = vst.msk [vmem:[%s11842_s12 + $0xd4] sm:$0xf] %vm7295_vm1, %v8188_v1  ;;  %v5816_v7 = vadd.f32 %v12162_v40, %v5297_v41  ;;  %v5046_v5 = vmul.f32 %v12149_v28, %v12514_v35  ;;  %v14551_v46 = vld [vmem:[#allocation113_spill] sm:$0xff] }
 0x29a   : > { %v6583_v10 = vmax.f32 %v14547_v17, %v6327_v3  ;;  %v8193_v47 = vpack.c.bf16 %v6713_v63, %v6713_v63  ;;  %v5302_v48 = vmul.f32 %v12149_v28, %v12522_v33  ;;  %v14548_v26 = vmax.f32 %v10769_v29, 0.0  ;;  %v12732_v17 = vpop.f32.mrb[204].mxu0 }
 0x29b   : > { %v14550_v38 = vmax.f32 %v14549_v23, 0.0  ;;  %v6072_v8 = vmax.f32 %v5560_v56, 0.0  ;;  %v6328_v27 = vmax.f32 %v5816_v7, 0.0  ;;  %v5565_v42 = vadd.f32 %v12162_v40, %v5046_v5  ;;  %v12737_v5 = vpop.f32.mrb[204].mxu1 }
 0x29c   : > { %v6711_v0 = vmax.f32 %v6455_v57, %v6583_v10  ;;  %v6458_v53 = vmax.f32 %v14548_v26, %v6074_v30  ;;  %7354 = vst.msk [vmem:[%s11842_s12 + $0xe8] sm:$0xf] %vm7295_vm1, %v8193_v47  ;;  %v5821_v1 = vadd.f32 %v12162_v40, %v5302_v48  ;;  %v5044_v35 = vmul.f32 %v12149_v28, %v12524_v24  ;;  %v14553_v10 = vld [vmem:[#allocation114_spill] sm:$0xff]  ;;  %v12739_v24 = vpop.f32.mrb[205].mxu0 }
 0x29d   : > { %v6586_v3 = vmax.f32 %v14550_v38, %v6330_v13  ;;  %v14552_v29 = vmax.f32 %v14551_v46, 0.0  ;;  %v5300_v41 = vmul.f32 %v12149_v28, %v12530_v2  ;;  %v14554_v30 = vmax.f32 %v14553_v10, 0.0  ;;  %v12750_v23 = vpop.f32.mrb[206].mxu0 }
 0x29e   : > { %v8191_v33 = vpack.c.bf16 %v6711_v0, %v6711_v0  ;;  %v6077_v56 = vmax.f32 %v5565_v42, 0.0  ;;  %v6333_v47 = vmax.f32 %v5821_v1, 0.0  ;;  %v5563_v7 = vadd.f32 %v12162_v40, %v5044_v35  ;;  %v14557_v42 = vld [vmem:[#allocation116_spill] sm:$0xff]  ;;  %v12758_v46 = vpop.f32.mrb[207].mxu0 }
 0x29f   : > { %v6714_v63 = vmax.f32 %v6458_v53, %v6586_v3  ;;  %v6456_v57 = vmax.f32 %v14552_v29, %v6072_v8  ;;  %v6584_v13 = vmax.f32 %v14554_v30, %v6328_v27  ;;  %v5819_v0 = vadd.f32 %v12162_v40, %v5300_v41  ;;  %v12748_v53 = vpop.f32.mrb[205].mxu1  ;;  %v14555_v3 = vld [vmem:[#allocation115_spill] sm:$0xff] }
 0x2a0   : > { %7352 = vst.msk [vmem:[%s11842_s12 + $0xe0] sm:$0xf] %vm7295_vm1, %v8191_v33  ;;  %v5047_v2 = vmul.f32 %v12149_v28, %v12532_v11  ;;  %v5303_v26 = vmul.f32 %v12149_v28, %v12537_v45  ;;  %v14556_v8 = vmax.f32 %v14555_v3, 0.0  ;;  %v14558_v1 = vmax.f32 %v14557_v42, 0.0 }
 0x2a1   : > { %v8194_v48 = vpack.c.bf16 %v6714_v63, %v6714_v63  ;;  %v6712_v38 = vmax.f32 %v6456_v57, %v6584_v13  ;;  %v6075_v33 = vmax.f32 %v5563_v7, 0.0  ;;  %v12756_v63 = vpop.f32.mrb[206].mxu1  ;;  %v6331_v11 = vmax.f32 %v5819_v0, 0.0  ;;  %v14559_v13 = vld [vmem:[#allocation117_spill] sm:$0xff] }
 0x2a2   : > { %v6461_v27 = vmax.f32 %v14556_v8, %v6077_v56  ;;  %v6589_v35 = vmax.f32 %v14558_v1, %v6333_v47  ;;  %v5566_v45 = vadd.f32 %v12162_v40, %v5047_v2  ;;  %v5822_v29 = vadd.f32 %v12162_v40, %v5303_v26  ;;  %v12766_v41 = vpop.f32.mrb[207].mxu1 }
 0x2a3   : > { %7355 = vst.msk [vmem:[%s11842_s12 + $0xec] sm:$0xf] %vm7295_vm1, %v8194_v48  ;;  %v5045_v57 = vmul.f32 %v12149_v28, %v12539_v61  ;;  %v8192_v10 = vpack.c.bf16 %v6712_v38, %v6712_v38  ;;  %v14560_v56 = vmax.f32 %v14559_v13, 0.0  ;;  %v5301_v7 = vmul.f32 %v12149_v28, %v12548_v37  ;;  %v14562_v37 = vld [vmem:[#allocation118_spill] sm:$0xff] }
 0x2a4   : > { %v6717_v30 = vmax.f32 %v6461_v27, %v6589_v35  ;;  %v14561_v48 = vmax.f32 %v10827_v44, 0.0  ;;  %v6078_v2 = vmax.f32 %v5566_v45, 0.0  ;;  %v6334_v3 = vmax.f32 %v5822_v29, 0.0  ;;  %v12786_v45 = vpop.f32.mrb[208].mxu0 }
 0x2a5   : > { %v6459_v47 = vmax.f32 %v14560_v56, %v6075_v33  ;;  %v5564_v26 = vadd.f32 %v12162_v40, %v5045_v57  ;;  %7353 = vst.msk [vmem:[%s11842_s12 + $0xe4] sm:$0xf] %vm7295_vm1, %v8192_v10  ;;  %v5820_v38 = vadd.f32 %v12162_v40, %v5301_v7  ;;  %v5050_v8 = vmul.f32 %v12149_v28, %v12567_v62  ;;  %v12794_v10 = vpop.f32.mrb[208].mxu1  ;;  %v12803_v7 = vld [vmem:[%s13777_s2] ss:$0 sm:$0xff] }
 0x2a6   : > { %v6587_v0 = vmax.f32 %v14561_v48, %v6331_v11  ;;  %v8197_v61 = vpack.c.bf16 %v6717_v30, %v6717_v30  ;;  %v5306_v27 = vmul.f32 %v12149_v28, %v12576_v55  ;;  %v14563_v1 = vmax.f32 %v14562_v37, 0.0  ;;  %v12796_v30 = vpop.f32.mrb[209].mxu0  ;;  %v12807_v48 = vpop.f32.mrb[209].mxu1 }
 0x2a7   : > { %v14564_v35 = vmax.f32 %v10835_v59, 0.0  ;;  %v6076_v11 = vmax.f32 %v5564_v26, 0.0  ;;  %v6332_v29 = vmax.f32 %v5820_v38, 0.0  ;;  %v5569_v57 = vadd.f32 %v12162_v40, %v5050_v8  ;;  %v12819_v38 = vpop.f32.mrb[210].mxu1 }
 0x2a8   : > { %v6715_v42 = vmax.f32 %v6459_v47, %v6587_v0  ;;  %v6462_v44 = vmax.f32 %v14563_v1, %v6078_v2  ;;  %7358 = vst.msk [vmem:[%s11842_s12 + $0xf8] sm:$0xf] %vm7295_vm1, %v8197_v61  ;;  %v5825_v62 = vadd.f32 %v12162_v40, %v5306_v27  ;;  %v5048_v55 = vmul.f32 %v12149_v28, %v12578_v19  ;;  %v12809_v28 = vpop.f32.mrb[210].mxu0  ;;  %v14566_v19 = vld [vmem:[#allocation119_spill] sm:$0xff]  ;;  %v12830_v1 = vpop.f32.mrb[211].mxu1 }
 0x2a9   : > { %v6590_v33 = vmax.f32 %v14564_v35, %v6334_v3  ;;  %v14565_v56 = vmax.f32 %v10838_v12, 0.0  ;;  %v5304_v40 = vmul.f32 %v12803_v7, %v12584_v21  ;;  %v14567_v0 = vmax.f32 %v14566_v19, 0.0  ;;  %v12816_v12 = vld [vmem:[%s13778_s3] ss:$0 sm:$0xff]  ;;  %v12821_v21 = vpop.f32.mrb[211].mxu0  ;;  %v14568_v35 = vld [vmem:[#allocation120_spill] sm:$0xff] }
 0x2aa   : > { %v8195_v59 = vpack.c.bf16 %v6715_v42, %v6715_v42  ;;  %v6081_v3 = vmax.f32 %v5569_v57, 0.0  ;;  %v6337_v26 = vmax.f32 %v5825_v62, 0.0  ;;  %v5567_v61 = vadd.f32 %v12816_v12, %v5048_v55 }
 0x2ab   : > { %v6718_v13 = vmax.f32 %v6462_v44, %v6590_v33  ;;  %v6460_v47 = vmax.f32 %v14565_v56, %v6076_v11  ;;  %v6588_v2 = vmax.f32 %v14567_v0, %v6332_v29  ;;  %v5823_v27 = vadd.f32 %v12816_v12, %v5304_v40  ;;  %v14570_v29 = vld [vmem:[#allocation121_spill] sm:$0xff]  ;;  %v14572_v40 = vld [vmem:[#allocation122_spill] sm:$0xff] }
 0x2ac   : > { %7356 = vst.msk [vmem:[%s11842_s12 + $0xf0] sm:$0xf] %vm7295_vm1, %v8195_v59  ;;  %v5051_v42 = vmul.f32 %v12803_v7, %v12586_v15  ;;  %v5307_v37 = vmul.f32 %v12803_v7, %v12594_v43  ;;  %v14569_v33 = vmax.f32 %v14568_v35, 0.0  ;;  %v14571_v57 = vmax.f32 %v14570_v29, 0.0 }
 0x2ad   : > { %v8198_v8 = vpack.c.bf16 %v6718_v13, %v6718_v13  ;;  %v6716_v44 = vmax.f32 %v6460_v47, %v6588_v2  ;;  %v6079_v55 = vmax.f32 %v5567_v61, 0.0  ;;  %v6335_v59 = vmax.f32 %v5823_v27, 0.0 }
 0x2ae   : > { %v6465_v11 = vmax.f32 %v14569_v33, %v6081_v3  ;;  %v6593_v62 = vmax.f32 %v14571_v57, %v6337_v26  ;;  %v5570_v13 = vadd.f32 %v12816_v12, %v5051_v42  ;;  %v5826_v15 = vadd.f32 %v12816_v12, %v5307_v37  ;;  %v14574_v3 = vld [vmem:[#allocation123_spill] sm:$0xff]  ;;  %v12849_v37 = vpop.f32.mrb[212].mxu0  ;;  %v12858_v33 = vpop.f32.mrb[212].mxu1  ;;  %v14576_v57 = vld [vmem:[#allocation124_spill] sm:$0xff] }
 0x2af   : > { %7359 = vst.msk [vmem:[%s11842_s12 + $0xfc] sm:$0xf] %vm7295_vm1, %v8198_v8  ;;  %v5049_v43 = vmul.f32 %v12803_v7, %v12596_v6  ;;  %v8196_v56 = vpack.c.bf16 %v6716_v44, %v6716_v44  ;;  %v14573_v19 = vmax.f32 %v14572_v40, 0.0  ;;  %v5305_v2 = vmul.f32 %v12803_v7, %v12602_v18 }
 0x2b0   : > { %v6721_v47 = vmax.f32 %v6465_v11, %v6593_v62  ;;  %v14575_v26 = vmax.f32 %v14574_v3, 0.0  ;;  %v6082_v8 = vmax.f32 %v5570_v13, 0.0  ;;  %v6338_v27 = vmax.f32 %v5826_v15, 0.0  ;;  %v12860_v11 = vpop.f32.mrb[213].mxu0 }
 0x2b1   : > { %v6463_v0 = vmax.f32 %v14573_v19, %v6079_v55  ;;  %v5568_v42 = vadd.f32 %v12816_v12, %v5049_v43  ;;  %7357 = vst.msk [vmem:[%s11842_s12 + $0xf4] sm:$0xf] %vm7295_vm1, %v8196_v56  ;;  %v5824_v44 = vadd.f32 %v12816_v12, %v5305_v2  ;;  %v5054_v35 = vmul.f32 %v12803_v7, %v12624_v16  ;;  %v12866_v56 = vpop.f32.mrb[213].mxu1 }
 0x2b2   : > { %v6591_v61 = vmax.f32 %v14575_v26, %v6335_v59  ;;  %v8201_v6 = vpack.c.bf16 %v6721_v47, %v6721_v47  ;;  %v5310_v18 = vmul.f32 %v12803_v7, %v12630_v9  ;;  %v14577_v62 = vmax.f32 %v14576_v57, 0.0  ;;  %v14578_v59 = vld [vmem:[#allocation125_spill] sm:$0xff]  ;;  %v12868_v47 = vpop.f32.mrb[214].mxu0 }
 0x2b3   : > { %v14579_v13 = vmax.f32 %v14578_v59, 0.0  ;;  %v6080_v43 = vmax.f32 %v5568_v42, 0.0  ;;  %v6336_v16 = vmax.f32 %v5824_v44, 0.0  ;;  %v5573_v9 = vadd.f32 %v12816_v12, %v5054_v35  ;;  %v12878_v2 = vpop.f32.mrb[215].mxu0  ;;  %v14582_v44 = vld [vmem:[#allocation127_spill] sm:$0xff] }
 0x2b4   : > { %v6719_v29 = vmax.f32 %v6463_v0, %v6591_v61  ;;  %v6466_v55 = vmax.f32 %v14577_v62, %v6082_v8  ;;  %7362 = vst.msk [vmem:[%s11842_s12 + $0x108] sm:$0xf] %vm7295_vm1, %v8201_v6  ;;  %v5829_v40 = vadd.f32 %v12816_v12, %v5310_v18  ;;  %v5052_v19 = vmul.f32 %v12803_v7, %v12632_v60  ;;  %v12876_v0 = vpop.f32.mrb[214].mxu1  ;;  %v14580_v61 = vld [vmem:[#allocation126_spill] sm:$0xff] }
 0x2b5   : > { %v6594_v15 = vmax.f32 %v14579_v13, %v6338_v27  ;;  %v14581_v8 = vmax.f32 %v14580_v61, 0.0  ;;  %v5308_v42 = vmul.f32 %v12803_v7, %v12637_v58  ;;  %v12884_v6 = vpop.f32.mrb[215].mxu1  ;;  %v14583_v35 = vmax.f32 %v14582_v44, 0.0  ;;  %v14588_v44 = vld [vmem:[#allocation130_spill] sm:$0xff] }
 0x2b6   : > { %v8199_v3 = vpack.c.bf16 %v6719_v29, %v6719_v29  ;;  %v6085_v57 = vmax.f32 %v5573_v9, 0.0  ;;  %v6341_v60 = vmax.f32 %v5829_v40, 0.0  ;;  %v5571_v62 = vadd.f32 %v12816_v12, %v5052_v19 }
 0x2b7   : > { %v6722_v26 = vmax.f32 %v6466_v55, %v6594_v15  ;;  %v6464_v27 = vmax.f32 %v14581_v8, %v6080_v43  ;;  %v6592_v18 = vmax.f32 %v14583_v35, %v6336_v16  ;;  %v5827_v55 = vadd.f32 %v12816_v12, %v5308_v42  ;;  %v14584_v15 = vld [vmem:[#allocation128_spill] sm:$0xff]  ;;  %v14586_v16 = vld [vmem:[#allocation129_spill] sm:$0xff] }
 0x2b8   : > { %7360 = vst.msk [vmem:[%s11842_s12 + $0x100] sm:$0xf] %vm7295_vm1, %v8199_v3  ;;  %v5055_v59 = vmul.f32 %v12803_v7, %v12639_v51  ;;  %v5311_v58 = vmul.f32 %v12803_v7, %v12648_v25  ;;  %v14585_v43 = vmax.f32 %v14584_v15, 0.0  ;;  %v14587_v9 = vmax.f32 %v14586_v16, 0.0  ;;  %v12906_v25 = vpop.f32.mrb[216].mxu0 }
 0x2b9   : > { %v8202_v29 = vpack.c.bf16 %v6722_v26, %v6722_v26  ;;  %v6720_v13 = vmax.f32 %v6464_v27, %v6592_v18  ;;  %v6083_v8 = vmax.f32 %v5571_v62, 0.0  ;;  %v6339_v19 = vmax.f32 %v5827_v55, 0.0  ;;  %v12914_v62 = vpop.f32.mrb[217].mxu0 }
 0x2ba   : > { %v6469_v61 = vmax.f32 %v14585_v43, %v6085_v57  ;;  %v6597_v40 = vmax.f32 %v14587_v9, %v6341_v60  ;;  %v5574_v3 = vadd.f32 %v12816_v12, %v5055_v59  ;;  %v5830_v26 = vadd.f32 %v12816_v12, %v5311_v58  ;;  %v12912_v60 = vpop.f32.mrb[216].mxu1  ;;  %v12921_v43 = vpop.f32.mrb[218].mxu0 }
 0x2bb   : > { %7363 = vst.msk [vmem:[%s11842_s12 + $0x10c] sm:$0xf] %vm7295_vm1, %v8202_v29  ;;  %v5053_v51 = vmul.f32 %v12803_v7, %v12650_v22  ;;  %v8200_v27 = vpack.c.bf16 %v6720_v13, %v6720_v13  ;;  %v14589_v35 = vmax.f32 %v14588_v44, 0.0  ;;  %v5309_v57 = vmul.f32 %v12803_v7, %v12656_v14  ;;  %v14590_v29 = vld [vmem:[#allocation131_spill] sm:$0xff]  ;;  %v12919_v13 = vpop.f32.mrb[217].mxu1  ;;  %v14594_v44 = vld [vmem:[#allocation133_spill] sm:$0xff] }
 0x2bc   : > { %v6725_v42 = vmax.f32 %v6469_v61, %v6597_v40  ;;  %v14591_v55 = vmax.f32 %v14590_v29, 0.0  ;;  %v6086_v58 = vmax.f32 %v5574_v3, 0.0  ;;  %v6342_v15 = vmax.f32 %v5830_v26, 0.0  ;;  %v12930_v40 = vpop.f32.mrb[218].mxu1  ;;  %v14592_v3 = vld [vmem:[#allocation132_spill] sm:$0xff] }
 0x2bd   : > { %v6467_v18 = vmax.f32 %v14589_v35, %v6083_v8  ;;  %v5572_v22 = vadd.f32 %v12816_v12, %v5053_v51  ;;  %7361 = vst.msk [vmem:[%s11842_s12 + $0x104] sm:$0xf] %vm7295_vm1, %v8200_v27  ;;  %v5828_v14 = vadd.f32 %v12816_v12, %v5309_v57  ;;  %v5058_v16 = vmul.f32 %v12803_v7, %v12678_v54  ;;  %v12932_v8 = vpop.f32.mrb[219].mxu0  ;;  %v12938_v57 = vpop.f32.mrb[219].mxu1 }
 0x2be   : > { %v6595_v59 = vmax.f32 %v14591_v55, %v6339_v19  ;;  %v8205_v61 = vpack.c.bf16 %v6725_v42, %v6725_v42  ;;  %v5314_v9 = vmul.f32 %v12803_v7, %v12684_v50  ;;  %v14593_v26 = vmax.f32 %v14592_v3, 0.0 }
 0x2bf   : > { %v14595_v35 = vmax.f32 %v14594_v44, 0.0  ;;  %v6084_v42 = vmax.f32 %v5572_v22, 0.0  ;;  %v6340_v54 = vmax.f32 %v5828_v14, 0.0  ;;  %v5577_v50 = vadd.f32 %v12816_v12, %v5058_v16  ;;  %v14598_v22 = vld [vmem:[#allocation135_spill] sm:$0xff] }
 0x2c0   : > { %v6723_v19 = vmax.f32 %v6467_v18, %v6595_v59  ;;  %v6470_v51 = vmax.f32 %v14593_v26, %v6086_v58  ;;  %7366 = vst.msk [vmem:[%s11842_s12 + $0x118] sm:$0xf] %vm7295_vm1, %v8205_v61  ;;  %v5833_v29 = vadd.f32 %v12816_v12, %v5314_v9  ;;  %v5056_v18 = vmul.f32 %v12803_v7, %v12686_v34  ;;  %v14596_v58 = vld [vmem:[#allocation134_spill] sm:$0xff] }
 0x2c1   : > { %v6598_v27 = vmax.f32 %v14595_v35, %v6342_v15  ;;  %v14597_v3 = vmax.f32 %v14596_v58, 0.0  ;;  %v5312_v15 = vmul.f32 %v12803_v7, %v12694_v32  ;;  %v14599_v44 = vmax.f32 %v14598_v22, 0.0  ;;  %v12960_v32 = vpop.f32.mrb[220].mxu0 }
 0x2c2   : > { %v8203_v55 = vpack.c.bf16 %v6723_v19, %v6723_v19  ;;  %v6089_v61 = vmax.f32 %v5577_v50, 0.0  ;;  %v6345_v14 = vmax.f32 %v5833_v29, 0.0  ;;  %v5575_v16 = vadd.f32 %v12816_v12, %v5056_v18 }
 0x2c3   : > { %v6726_v59 = vmax.f32 %v6470_v51, %v6598_v27  ;;  %v6468_v26 = vmax.f32 %v14597_v3, %v6084_v42  ;;  %v6596_v35 = vmax.f32 %v14599_v44, %v6340_v54  ;;  %v5831_v34 = vadd.f32 %v12816_v12, %v5312_v15 }
 0x2c4   : > { %7364 = vst.msk [vmem:[%s11842_s12 + $0x110] sm:$0xf] %vm7295_vm1, %v8203_v55  ;;  %v5059_v19 = vmul.f32 %v12803_v7, %v12696_v36  ;;  %v5315_v51 = vmul.f32 %v12803_v7, %v12702_v52  ;;  %v14600_v42 = vmax.f32 %v11009_v4, 0.0  ;;  %v14601_v50 = vmax.f32 %v11016_v20, 0.0  ;;  %v12966_v55 = vpop.f32.mrb[220].mxu1 }
 0x2c5   : > { %v8206_v9 = vpack.c.bf16 %v6726_v59, %v6726_v59  ;;  %v6724_v27 = vmax.f32 %v6468_v26, %v6596_v35  ;;  %v6087_v18 = vmax.f32 %v5575_v16, 0.0  ;;  %v12968_v59 = vpop.f32.mrb[221].mxu0  ;;  %v6343_v36 = vmax.f32 %v5831_v34, 0.0  ;;  %v12976_v3 = vpop.f32.mrb[221].mxu1  ;;  %v14603_v16 = vld [vmem:[#allocation136_spill] sm:$0xff] }
 0x2c6   : > { %v6473_v54 = vmax.f32 %v14600_v42, %v6089_v61  ;;  %v6601_v29 = vmax.f32 %v14601_v50, %v6345_v14  ;;  %v5578_v58 = vadd.f32 %v12816_v12, %v5059_v19  ;;  %v5834_v52 = vadd.f32 %v12816_v12, %v5315_v51  ;;  %v12978_v20 = vpop.f32.mrb[222].mxu0  ;;  %v12984_v61 = vpop.f32.mrb[222].mxu1 }
 0x2c7   : > { %7367 = vst.msk [vmem:[%s11842_s12 + $0x11c] sm:$0xf] %vm7295_vm1, %v8206_v9  ;;  %v5057_v4 = vmul.f32 %v12803_v7, %v12704_v49  ;;  %v8204_v26 = vpack.c.bf16 %v6724_v27, %v6724_v27  ;;  %v14602_v22 = vmax.f32 %v11019_v39, 0.0  ;;  %v5313_v35 = vmul.f32 %v12803_v7, %v12709_v31  ;;  %v12986_v14 = vpop.f32.mrb[223].mxu0  ;;  %v12991_v27 = vpop.f32.mrb[223].mxu1 }
 0x2c8   : > { %v6729_v15 = vmax.f32 %v6473_v54, %v6601_v29  ;;  %v14604_v9 = vmax.f32 %v14603_v16, 0.0  ;;  %v6090_v34 = vmax.f32 %v5578_v58, 0.0  ;;  %v6346_v19 = vmax.f32 %v5834_v52, 0.0  ;;  %v14605_v29 = vld [vmem:[#allocation137_spill] sm:$0xff]  ;;  %v14607_v58 = vld [vmem:[#allocation138_spill] sm:$0xff]  ;;  %v14609_v16 = vld [vmem:[#allocation139_spill] sm:$0xff] }
 0x2c9   : > { %v6471_v44 = vmax.f32 %v14602_v22, %v6087_v18  ;;  %v5576_v51 = vadd.f32 %v12816_v12, %v5057_v4  ;;  %7365 = vst.msk [vmem:[%s11842_s12 + $0x114] sm:$0xf] %vm7295_vm1, %v8204_v26  ;;  %v5832_v42 = vadd.f32 %v12816_v12, %v5313_v35  ;;  %v5062_v31 = vmul.f32 %v12803_v7, %v12732_v17 }
 0x2ca   : > { %v6599_v49 = vmax.f32 %v14604_v9, %v6343_v36  ;;  %v8209_v39 = vpack.c.bf16 %v6729_v15, %v6729_v15  ;;  %v5318_v54 = vmul.f32 %v12803_v7, %v12737_v5  ;;  %v14606_v18 = vmax.f32 %v14605_v29, 0.0 }
 0x2cb   : > { %v14608_v52 = vmax.f32 %v14607_v58, 0.0  ;;  %v6088_v22 = vmax.f32 %v5576_v51, 0.0  ;;  %v6344_v26 = vmax.f32 %v5832_v42, 0.0  ;;  %v5581_v15 = vadd.f32 %v12816_v12, %v5062_v31  ;;  %v14611_v51 = vld [vmem:[#allocation140_spill] sm:$0xff] }
 0x2cc   : > { %v6727_v50 = vmax.f32 %v6471_v44, %v6599_v49  ;;  %v6474_v36 = vmax.f32 %v14606_v18, %v6090_v34  ;;  %7370 = vst.msk [vmem:[%s11842_s12 + $0x128] sm:$0xf] %vm7295_vm1, %v8209_v39  ;;  %v5837_v35 = vadd.f32 %v12816_v12, %v5318_v54  ;;  %v5060_v17 = vmul.f32 %v12803_v7, %v12739_v24  ;;  %v13019_v18 = vpop.f32.mrb[224].mxu1 }
 0x2cd   : > { %v6602_v4 = vmax.f32 %v14608_v52, %v6346_v19  ;;  %v14610_v9 = vmax.f32 %v14609_v16, 0.0  ;;  %v5316_v34 = vmul.f32 %v12803_v7, %v12748_v53  ;;  %v13014_v19 = vpop.f32.mrb[224].mxu0  ;;  %v14612_v39 = vmax.f32 %v14611_v51, 0.0  ;;  %v13030_v52 = vpop.f32.mrb[225].mxu1 }
 0x2ce   : > { %v8207_v5 = vpack.c.bf16 %v6727_v50, %v6727_v50  ;;  %v6093_v29 = vmax.f32 %v5581_v15, 0.0  ;;  %v6349_v31 = vmax.f32 %v5837_v35, 0.0  ;;  %v5579_v54 = vadd.f32 %v12816_v12, %v5060_v17  ;;  %v13021_v24 = vpop.f32.mrb[225].mxu0  ;;  %v14615_v17 = vld [vmem:[#allocation142_spill] sm:$0xff] }
 0x2cf   : > { %v6730_v44 = vmax.f32 %v6474_v36, %v6602_v4  ;;  %v6472_v49 = vmax.f32 %v14610_v9, %v6088_v22  ;;  %v6600_v42 = vmax.f32 %v14612_v39, %v6344_v26  ;;  %v5835_v36 = vadd.f32 %v12816_v12, %v5316_v34  ;;  %v13032_v4 = vpop.f32.mrb[226].mxu0  ;;  %v14613_v26 = vld [vmem:[#allocation141_spill] sm:$0xff]  ;;  %v13038_v9 = vpop.f32.mrb[226].mxu1 }
 0x2d0   : > { %7368 = vst.msk [vmem:[%s11842_s12 + $0x120] sm:$0xf] %vm7295_vm1, %v8207_v5  ;;  %v5063_v53 = vmul.f32 %v12803_v7, %v12750_v23  ;;  %v5319_v58 = vmul.f32 %v12803_v7, %v12756_v63  ;;  %v14614_v15 = vmax.f32 %v14613_v26, 0.0  ;;  %v14616_v16 = vmax.f32 %v14615_v17, 0.0  ;;  %v13040_v34 = vpop.f32.mrb[227].mxu0  ;;  %v13048_v39 = vpop.f32.mrb[227].mxu1 }
 0x2d1   : > { %v8210_v50 = vpack.c.bf16 %v6730_v44, %v6730_v44  ;;  %v6728_v22 = vmax.f32 %v6472_v49, %v6600_v42  ;;  %v6091_v44 = vmax.f32 %v5579_v54, 0.0  ;;  %v6347_v23 = vmax.f32 %v5835_v36, 0.0 }
 0x2d2   : > { %v6477_v35 = vmax.f32 %v14614_v15, %v6093_v29  ;;  %v6605_v5 = vmax.f32 %v14616_v16, %v6349_v31  ;;  %v5582_v63 = vadd.f32 %v12816_v12, %v5063_v53  ;;  %v5838_v51 = vadd.f32 %v12816_v12, %v5319_v58  ;;  %v14617_v31 = vld [vmem:[#allocation143_spill] sm:$0xff] }
 0x2d3   : > { %7371 = vst.msk [vmem:[%s11842_s12 + $0x12c] sm:$0xf] %vm7295_vm1, %v8210_v50  ;;  %v5061_v49 = vmul.f32 %v12803_v7, %v12758_v46  ;;  %v8208_v42 = vpack.c.bf16 %v6728_v22, %v6728_v22  ;;  %v14618_v54 = vmax.f32 %v14617_v31, 0.0  ;;  %v5317_v15 = vmul.f32 %v12803_v7, %v12766_v41  ;;  %v14619_v50 = vld [vmem:[#allocation144_spill] sm:$0xff]  ;;  %v14621_v41 = vld [vmem:[#allocation145_spill] sm:$0xff] }
 0x2d4   : > { %v6733_v29 = vmax.f32 %v6477_v35, %v6605_v5  ;;  %v14620_v36 = vmax.f32 %v14619_v50, 0.0  ;;  %v6094_v53 = vmax.f32 %v5582_v63, 0.0  ;;  %v6350_v16 = vmax.f32 %v5838_v51, 0.0 }
 0x2d5   : > { %v6475_v26 = vmax.f32 %v14618_v54, %v6091_v44  ;;  %v5580_v58 = vadd.f32 %v12816_v12, %v5061_v49  ;;  %7369 = vst.msk [vmem:[%s11842_s12 + $0x124] sm:$0xf] %vm7295_vm1, %v8208_v42  ;;  %v5836_v22 = vadd.f32 %v12816_v12, %v5317_v15  ;;  %v5066_v35 = vmul.f32 %v12803_v7, %v12786_v45  ;;  %v13068_v49 = vpop.f32.mrb[228].mxu0 }
 0x2d6   : > { %v6603_v17 = vmax.f32 %v14620_v36, %v6347_v23  ;;  %v8213_v46 = vpack.c.bf16 %v6733_v29, %v6733_v29  ;;  %v5322_v5 = vmul.f32 %v12803_v7, %v12794_v10  ;;  %v14622_v31 = vmax.f32 %v14621_v41, 0.0  ;;  %v14623_v23 = vld [vmem:[#allocation146_spill] sm:$0xff]  ;;  %v13078_v15 = vpop.f32.mrb[229].mxu0 }
 0x2d7   : > { %v14624_v63 = vmax.f32 %v14623_v23, 0.0  ;;  %v6092_v50 = vmax.f32 %v5580_v58, 0.0  ;;  %v6348_v42 = vmax.f32 %v5836_v22, 0.0  ;;  %v5585_v29 = vadd.f32 %v12816_v12, %v5066_v35  ;;  %v13086_v35 = vpop.f32.mrb[230].mxu0 }
 0x2d8   : > { %v6731_v44 = vmax.f32 %v6475_v26, %v6603_v17  ;;  %v6478_v54 = vmax.f32 %v14622_v31, %v6094_v53  ;;  %7374 = vst.msk [vmem:[%s11842_s12 + $0x138] sm:$0xf] %vm7295_vm1, %v8213_v46  ;;  %v5841_v45 = vadd.f32 %v12816_v12, %v5322_v5  ;;  %v5064_v10 = vmul.f32 %v12803_v7, %v12796_v30  ;;  %v13076_v26 = vpop.f32.mrb[228].mxu1  ;;  %v14625_v53 = vld [vmem:[#allocation147_spill] sm:$0xff]  ;;  %v14627_v5 = vld [vmem:[#allocation148_spill] sm:$0xff] }
 0x2d9   : > { %v6606_v51 = vmax.f32 %v14624_v63, %v6350_v16  ;;  %v14626_v16 = vmax.f32 %v14625_v53, 0.0  ;;  %v5320_v46 = vmul.f32 %v12803_v7, %v12807_v48  ;;  %v13084_v22 = vpop.f32.mrb[229].mxu1  ;;  %v14628_v41 = vmax.f32 %v14627_v5, 0.0  ;;  %v14633_v5 = vld [vmem:[#allocation150_spill] sm:$0xff] }
 0x2da   : > { %v8211_v36 = vpack.c.bf16 %v6731_v44, %v6731_v44  ;;  %v6097_v30 = vmax.f32 %v5585_v29, 0.0  ;;  %v6353_v23 = vmax.f32 %v5841_v45, 0.0  ;;  %v5583_v63 = vadd.f32 %v12816_v12, %v5064_v10  ;;  %v13091_v44 = vpop.f32.mrb[230].mxu1  ;;  %v14631_v45 = vld [vmem:[#allocation149_spill] sm:$0xff] }
 0x2db   : > { %v6734_v17 = vmax.f32 %v6478_v54, %v6606_v51  ;;  %v6476_v58 = vmax.f32 %v14626_v16, %v6092_v50  ;;  %v6604_v31 = vmax.f32 %v14628_v41, %v6348_v42  ;;  %v13093_v54 = vpop.f32.mrb[231].mxu0  ;;  %v5839_v48 = vadd.f32 %v12816_v12, %v5320_v46  ;;  %v13102_v53 = vpop.f32.mrb[231].mxu1 }
 0x2dc   : > { %14629 = vst [vmem:[#allocation22_spill] sm:$0xff] %v13093_v54  ;;  %7372 = vst.msk [vmem:[%s11842_s12 + $0x130] sm:$0xf] %vm7295_vm1, %v8211_v36  ;;  %v5067_v50 = vmul.f32 %v12803_v7, %v12809_v28  ;;  %v5323_v42 = vmul.f32 %v12803_v7, %v12819_v38  ;;  %v14632_v10 = vmax.f32 %v14631_v45, 0.0  ;;  %v14634_v41 = vmax.f32 %v14633_v5, 0.0 }
 0x2dd   : > { %v8214_v51 = vpack.c.bf16 %v6734_v17, %v6734_v17  ;;  %14630 = vst [vmem:[#allocation23_spill] sm:$0xff] %v13102_v53  ;;  %v6732_v29 = vmax.f32 %v6476_v58, %v6604_v31  ;;  %v6095_v36 = vmax.f32 %v5583_v63, 0.0  ;;  %v6351_v17 = vmax.f32 %v5839_v48, 0.0  ;;  %v14635_v31 = vld [vmem:[#allocation151_spill] sm:$0xff] }
 0x2de   : > { %v6481_v16 = vmax.f32 %v14632_v10, %v6097_v30  ;;  %v6609_v54 = vmax.f32 %v14634_v41, %v6353_v23  ;;  %v5586_v46 = vadd.f32 %v12816_v12, %v5067_v50  ;;  %v5842_v28 = vadd.f32 %v12816_v12, %v5323_v42  ;;  %v14637_v10 = vld [vmem:[#allocation152_spill] sm:$0xff]  ;;  %v13121_v42 = vpop.f32.mrb[232].mxu0 }
 0x2df   : > { %7375 = vst.msk [vmem:[%s11842_s12 + $0x13c] sm:$0xf] %vm7295_vm1, %v8214_v51  ;;  %v5065_v38 = vmul.f32 %v12803_v7, %v12821_v21  ;;  %v8212_v53 = vpack.c.bf16 %v6732_v29, %v6732_v29  ;;  %v14636_v45 = vmax.f32 %v14635_v31, 0.0  ;;  %v5321_v23 = vmul.f32 %v12803_v7, %v12830_v1  ;;  %v13132_v41 = vpop.f32.mrb[233].mxu0 }
 0x2e0   : > { %v6737_v58 = vmax.f32 %v6481_v16, %v6609_v54  ;;  %v14638_v63 = vmax.f32 %v14637_v10, 0.0  ;;  %v6098_v51 = vmax.f32 %v5586_v46, 0.0  ;;  %v6354_v48 = vmax.f32 %v5842_v28, 0.0  ;;  %v13130_v16 = vpop.f32.mrb[232].mxu1 }
 0x2e1   : > { %v6479_v30 = vmax.f32 %v14636_v45, %v6095_v36  ;;  %v5584_v50 = vadd.f32 %v12816_v12, %v5065_v38  ;;  %7373 = vst.msk [vmem:[%s11842_s12 + $0x134] sm:$0xf] %vm7295_vm1, %v8212_v53  ;;  %v5840_v54 = vadd.f32 %v12816_v12, %v5321_v23  ;;  %v5070_v29 = vmul.f32 %v12803_v7, %v12849_v37  ;;  %v14641_v38 = vld [vmem:[#allocation154_spill] sm:$0xff]  ;;  %v13138_v45 = vpop.f32.mrb[233].mxu1  ;;  %v13140_v23 = vpop.f32.mrb[234].mxu0 }
 0x2e2   : > { %v6607_v5 = vmax.f32 %v14638_v63, %v6351_v17  ;;  %v8217_v21 = vpack.c.bf16 %v6737_v58, %v6737_v58  ;;  %v5326_v1 = vmul.f32 %v12803_v7, %v12858_v33  ;;  %v14639_v17 = vld [vmem:[#allocation153_spill] sm:$0xff]  ;;  %v14642_v31 = vmax.f32 %v14641_v38, 0.0  ;;  %v13148_v63 = vpop.f32.mrb[234].mxu1 }
 0x2e3   : > { %v14640_v46 = vmax.f32 %v14639_v17, 0.0  ;;  %v6096_v58 = vmax.f32 %v5584_v50, 0.0  ;;  %v6352_v37 = vmax.f32 %v5840_v54, 0.0  ;;  %v5589_v33 = vadd.f32 %v12816_v12, %v5070_v29  ;;  %14643 = vst [vmem:[#allocation24_spill] sm:$0xff] %v13148_v63  ;;  %v14644_v50 = vld [vmem:[#allocation155_spill] sm:$0xff]  ;;  %v13156_v54 = vpop.f32.mrb[235].mxu1 }
 0x2e4   : > { %v6735_v36 = vmax.f32 %v6479_v30, %v6607_v5  ;;  %v6610_v53 = vmax.f32 %v14642_v31, %v6354_v48  ;;  %7378 = vst.msk [vmem:[%s11842_s12 + $0x148] sm:$0xf] %vm7295_vm1, %v8217_v21  ;;  %v5845_v10 = vadd.f32 %v12816_v12, %v5326_v1  ;;  %v5068_v30 = vmul.f32 %v12803_v7, %v12860_v11  ;;  %v13150_v5 = vpop.f32.mrb[235].mxu0  ;;  %v14646_v29 = vld [vmem:[#allocation156_spill] sm:$0xff] }
 0x2e5   : > { %v6482_v28 = vmax.f32 %v14640_v46, %v6098_v51  ;;  %v14645_v17 = vmax.f32 %v14644_v50, 0.0  ;;  %v5324_v21 = vmul.f32 %v12803_v7, %v12866_v56  ;;  %v14647_v1 = vmax.f32 %v14646_v29, 0.0  ;;  %v14648_v50 = vld [vmem:[#allocation157_spill] sm:$0xff] }
 0x2e6   : > { %v8215_v51 = vpack.c.bf16 %v6735_v36, %v6735_v36  ;;  %v6101_v31 = vmax.f32 %v5589_v33, 0.0  ;;  %v6357_v11 = vmax.f32 %v5845_v10, 0.0  ;;  %v5587_v63 = vadd.f32 %v12816_v12, %v5068_v30 }
 0x2e7   : > { %v6738_v48 = vmax.f32 %v6482_v28, %v6610_v53  ;;  %v6480_v46 = vmax.f32 %v14645_v17, %v6096_v58  ;;  %v6608_v38 = vmax.f32 %v14647_v1, %v6352_v37  ;;  %v5843_v28 = vadd.f32 %v12816_v12, %v5324_v21  ;;  %v14650_v37 = vld [vmem:[#allocation158_spill] sm:$0xff] }
 0x2e8   : > { %7376 = vst.msk [vmem:[%s11842_s12 + $0x140] sm:$0xf] %vm7295_vm1, %v8215_v51  ;;  %v5071_v53 = vmul.f32 %v12803_v7, %v12868_v47  ;;  %v5327_v56 = vmul.f32 %v12803_v7, %v12876_v0  ;;  %v14649_v17 = vmax.f32 %v14648_v50, 0.0  ;;  %v14651_v33 = vmax.f32 %v14650_v37, 0.0  ;;  %v13178_v0 = vpop.f32.mrb[236].mxu0 }
 0x2e9   : > { %v8218_v36 = vpack.c.bf16 %v6738_v48, %v6738_v48  ;;  %v6736_v58 = vmax.f32 %v6480_v46, %v6608_v38  ;;  %v6099_v1 = vmax.f32 %v5587_v63, 0.0  ;;  %v6355_v30 = vmax.f32 %v5843_v28, 0.0  ;;  %v14652_v38 = vld [vmem:[#allocation159_spill] sm:$0xff]  ;;  %v14654_v28 = vld [vmem:[#allocation160_spill] sm:$0xff] }
 0x2ea   : > { %v6485_v29 = vmax.f32 %v14649_v17, %v6101_v31  ;;  %v6613_v10 = vmax.f32 %v14651_v33, %v6357_v11  ;;  %v5590_v51 = vadd.f32 %v12816_v12, %v5071_v53  ;;  %v5846_v48 = vadd.f32 %v12816_v12, %v5327_v56  ;;  %v13184_v11 = vpop.f32.mrb[236].mxu1 }
 0x2eb   : > { %7379 = vst.msk [vmem:[%s11842_s12 + $0x14c] sm:$0xf] %vm7295_vm1, %v8218_v36  ;;  %v5069_v47 = vmul.f32 %v12803_v7, %v12878_v2  ;;  %v8216_v46 = vpack.c.bf16 %v6736_v58, %v6736_v58  ;;  %v14653_v31 = vmax.f32 %v14652_v38, 0.0  ;;  %v5325_v63 = vmul.f32 %v12803_v7, %v12884_v6  ;;  %v13186_v36 = vpop.f32.mrb[237].mxu0  ;;  %v13191_v58 = vpop.f32.mrb[237].mxu1 }
 0x2ec   : > { %v6741_v21 = vmax.f32 %v6485_v29, %v6613_v10  ;;  %v14655_v53 = vmax.f32 %v14654_v28, 0.0  ;;  %v6102_v17 = vmax.f32 %v5590_v51, 0.0  ;;  %v6358_v37 = vmax.f32 %v5846_v48, 0.0  ;;  %v13193_v29 = vpop.f32.mrb[238].mxu0  ;;  %v14659_v28 = vld [vmem:[#allocation162_spill] sm:$0xff] }
 0x2ed   : > { %v6483_v50 = vmax.f32 %v14653_v31, %v6099_v1  ;;  %v5588_v2 = vadd.f32 %v12816_v12, %v5069_v47  ;;  %7377 = vst.msk [vmem:[%s11842_s12 + $0x144] sm:$0xf] %vm7295_vm1, %v8216_v46  ;;  %v5844_v6 = vadd.f32 %v12816_v12, %v5325_v63  ;;  %v5074_v10 = vmul.f32 %v12803_v7, %v12906_v25  ;;  %v13204_v51 = vpop.f32.mrb[239].mxu0  ;;  %v14657_v47 = vld [vmem:[#allocation161_spill] sm:$0xff] }
 0x2ee   : > { %v6611_v56 = vmax.f32 %v14655_v53, %v6355_v30  ;;  %v8221_v33 = vpack.c.bf16 %v6741_v21, %v6741_v21  ;;  %v5330_v1 = vmul.f32 %v12803_v7, %v12912_v60  ;;  %v13202_v30 = vpop.f32.mrb[238].mxu1  ;;  %v14658_v38 = vmax.f32 %v14657_v47, 0.0 }
 0x2ef   : > { %14656 = vst [vmem:[#allocation25_spill] sm:$0xff] %v13202_v30  ;;  %v14660_v53 = vmax.f32 %v14659_v28, 0.0  ;;  %v6100_v21 = vmax.f32 %v5588_v2, 0.0  ;;  %v13210_v63 = vpop.f32.mrb[239].mxu1  ;;  %v6356_v25 = vmax.f32 %v5844_v6, 0.0  ;;  %v5593_v60 = vadd.f32 %v12816_v12, %v5074_v10  ;;  %v14664_v2 = vld [vmem:[#allocation164_spill] sm:$0xff] }
 0x2f0   : > { %v6739_v48 = vmax.f32 %v6483_v50, %v6611_v56  ;;  %v6486_v31 = vmax.f32 %v14658_v38, %v6102_v17  ;;  %14661 = vst [vmem:[#allocation26_spill] sm:$0xff] %v13210_v63  ;;  %7382 = vst.msk [vmem:[%s11842_s12 + $0x158] sm:$0xf] %vm7295_vm1, %v8221_v33  ;;  %v5849_v30 = vadd.f32 %v12816_v12, %v5330_v1  ;;  %v14662_v17 = vld [vmem:[#allocation163_spill] sm:$0xff] }
 0x2f1   : > { %v6614_v46 = vmax.f32 %v14660_v53, %v6358_v37  ;;  %v5072_v50 = vmul.f32 %v12803_v7, %v12914_v62  ;;  %v14663_v38 = vmax.f32 %v14662_v17, 0.0  ;;  %v5328_v37 = vmul.f32 %v12803_v7, %v12919_v13  ;;  %v13232_v13 = vpop.f32.mrb[240].mxu0 }
 0x2f2   : > { %v8219_v56 = vpack.c.bf16 %v6739_v48, %v6739_v48  ;;  %v14665_v53 = vmax.f32 %v14664_v2, 0.0  ;;  %v6105_v33 = vmax.f32 %v5593_v60, 0.0  ;;  %v6361_v6 = vmax.f32 %v5849_v30, 0.0  ;;  %v14668_v30 = vld [vmem:[#allocation166_spill] sm:$0xff] }
 0x2f3   : > { %v6742_v47 = vmax.f32 %v6486_v31, %v6614_v46  ;;  %v6484_v28 = vmax.f32 %v14663_v38, %v6100_v21  ;;  %v5591_v10 = vadd.f32 %v12816_v12, %v5072_v50  ;;  %v5847_v62 = vadd.f32 %v12816_v12, %v5328_v37  ;;  %v14666_v21 = vld [vmem:[#allocation165_spill] sm:$0xff] }
 0x2f4   : > { %v6612_v63 = vmax.f32 %v14665_v53, %v6356_v25  ;;  %7380 = vst.msk [vmem:[%s11842_s12 + $0x150] sm:$0xf] %vm7295_vm1, %v8219_v56  ;;  %v5075_v48 = vmul.f32 %v12803_v7, %v12921_v43  ;;  %v5331_v31 = vmul.f32 %v12803_v7, %v12930_v40  ;;  %v14667_v25 = vmax.f32 %v14666_v21, 0.0  ;;  %v13238_v56 = vpop.f32.mrb[240].mxu1 }
 0x2f5   : > { %v8222_v1 = vpack.c.bf16 %v6742_v47, %v6742_v47  ;;  %v14669_v17 = vmax.f32 %v14668_v30, 0.0  ;;  %v6103_v38 = vmax.f32 %v5591_v10, 0.0  ;;  %v13240_v47 = vpop.f32.mrb[241].mxu0  ;;  %v6359_v43 = vmax.f32 %v5847_v62, 0.0 }
 0x2f6   : > { %v6740_v46 = vmax.f32 %v6484_v28, %v6612_v63  ;;  %v6489_v60 = vmax.f32 %v14667_v25, %v6105_v33  ;;  %v5594_v37 = vadd.f32 %v12816_v12, %v5075_v48  ;;  %v5850_v40 = vadd.f32 %v12816_v12, %v5331_v31  ;;  %v13248_v28 = vpop.f32.mrb[241].mxu1  ;;  %v13250_v2 = vpop.f32.mrb[242].mxu0  ;;  %v14673_v31 = vld [vmem:[#allocation168_spill] sm:$0xff] }
 0x2f7   : > { %v6617_v50 = vmax.f32 %v14669_v17, %v6361_v6  ;;  %7383 = vst.msk [vmem:[%s11842_s12 + $0x15c] sm:$0xf] %vm7295_vm1, %v8222_v1  ;;  %v5073_v63 = vmul.f32 %v12803_v7, %v12932_v8  ;;  %14670 = vst [vmem:[#allocation27_spill] sm:$0xff] %v13250_v2  ;;  %v14671_v6 = vld [vmem:[#allocation167_spill] sm:$0xff]  ;;  %v5329_v1 = vmul.f32 %v12803_v7, %v12938_v57  ;;  %v13256_v62 = vpop.f32.mrb[242].mxu1  ;;  %v13258_v48 = vpop.f32.mrb[243].mxu0 }
 0x2f8   : > { %v8220_v53 = vpack.c.bf16 %v6740_v46, %v6740_v46  ;;  %v14672_v10 = vmax.f32 %v14671_v6, 0.0  ;;  %v14674_v25 = vmax.f32 %v14673_v31, 0.0  ;;  %v6106_v30 = vmax.f32 %v5594_v37, 0.0  ;;  %v13263_v46 = vpop.f32.mrb[243].mxu1 }
 0x2f9   : > { %v6745_v33 = vmax.f32 %v6489_v60, %v6617_v50  ;;  %v6362_v17 = vmax.f32 %v5850_v40, 0.0  ;;  %v5592_v2 = vadd.f32 %v12816_v12, %v5073_v63  ;;  %v5848_v50 = vadd.f32 %v12816_v12, %v5329_v1  ;;  %v14677_v40 = vld [vmem:[#allocation170_spill] sm:$0xff] }
 0x2fa   : > { %v6487_v21 = vmax.f32 %v14672_v10, %v6103_v38  ;;  %v6615_v8 = vmax.f32 %v14674_v25, %v6359_v43  ;;  %7381 = vst.msk [vmem:[%s11842_s12 + $0x154] sm:$0xf] %vm7295_vm1, %v8220_v53  ;;  %v5078_v57 = vmul.f32 %v12803_v7, %v12960_v32  ;;  %v5334_v38 = vmul.f32 %v12803_v7, %v12966_v55  ;;  %v14675_v10 = vld [vmem:[#allocation169_spill] sm:$0xff] }
 0x2fb   : > { %v8225_v60 = vpack.c.bf16 %v6745_v33, %v6745_v33  ;;  %v14676_v43 = vmax.f32 %v14675_v10, 0.0  ;;  %v14678_v31 = vmax.f32 %v14677_v40, 0.0  ;;  %v6104_v25 = vmax.f32 %v5592_v2, 0.0  ;;  %v13286_v2 = vpop.f32.mrb[244].mxu0 }
 0x2fc   : > { %v6743_v6 = vmax.f32 %v6487_v21, %v6615_v8  ;;  %v6360_v53 = vmax.f32 %v5848_v50, 0.0  ;;  %v5597_v33 = vadd.f32 %v12816_v12, %v5078_v57  ;;  %v5853_v1 = vadd.f32 %v12816_v12, %v5334_v38  ;;  %v14679_v8 = vld [vmem:[#allocation171_spill] sm:$0xff] }
 0x2fd   : > { %v6490_v37 = vmax.f32 %v14676_v43, %v6106_v30  ;;  %v6618_v63 = vmax.f32 %v14678_v31, %v6362_v17  ;;  %7386 = vst.msk [vmem:[%s11842_s12 + $0x168] sm:$0xf] %vm7295_vm1, %v8225_v60  ;;  %v5076_v32 = vmul.f32 %v12803_v7, %v12968_v59  ;;  %v14680_v10 = vmax.f32 %v14679_v8, 0.0  ;;  %v14681_v60 = vld [vmem:[#allocation172_spill] sm:$0xff]  ;;  %v13291_v31 = vpop.f32.mrb[244].mxu1  ;;  %v13293_v59 = vpop.f32.mrb[245].mxu0 }
 0x2fe   : > { %v8223_v55 = vpack.c.bf16 %v6743_v6, %v6743_v6  ;;  %v5332_v17 = vmul.f32 %v12803_v7, %v12976_v3  ;;  %v14682_v43 = vmax.f32 %v14681_v60, 0.0  ;;  %v6109_v40 = vmax.f32 %v5597_v33, 0.0 }
 0x2ff   : > { %v6746_v21 = vmax.f32 %v6490_v37, %v6618_v63  ;;  %v6488_v30 = vmax.f32 %v14680_v10, %v6104_v25  ;;  %v6365_v57 = vmax.f32 %v5853_v1, 0.0  ;;  %v5595_v38 = vadd.f32 %v12816_v12, %v5076_v32  ;;  %v13302_v25 = vpop.f32.mrb[245].mxu1  ;;  %v14684_v1 = vld [vmem:[#allocation173_spill] sm:$0xff]  ;;  %v14686_v10 = vld [vmem:[#allocation174_spill] sm:$0xff] }
 0x300   : > { %v6616_v50 = vmax.f32 %v14682_v43, %v6360_v53  ;;  %7384 = vst.msk [vmem:[%s11842_s12 + $0x160] sm:$0xf] %vm7295_vm1, %v8223_v55  ;;  %v5851_v37 = vadd.f32 %v12816_v12, %v5332_v17  ;;  %v5079_v3 = vmul.f32 %v12803_v7, %v12978_v20  ;;  %v5335_v63 = vmul.f32 %v12803_v7, %v12984_v61  ;;  %v13304_v53 = vpop.f32.mrb[246].mxu0  ;;  %v13310_v43 = vpop.f32.mrb[246].mxu1 }
 0x301   : > { %v8226_v6 = vpack.c.bf16 %v6746_v21, %v6746_v21  ;;  %14683 = vst [vmem:[#allocation28_spill] sm:$0xff] %v13304_v53  ;;  %v14685_v32 = vmax.f32 %v14684_v1, 0.0  ;;  %v14687_v60 = vmax.f32 %v14686_v10, 0.0  ;;  %v6107_v21 = vmax.f32 %v5595_v38, 0.0  ;;  %v13312_v17 = vpop.f32.mrb[247].mxu0  ;;  %v14689_v38 = vld [vmem:[#allocation175_spill] sm:$0xff] }
 0x302   : > { %v6744_v33 = vmax.f32 %v6488_v30, %v6616_v50  ;;  %14688 = vst [vmem:[#allocation29_spill] sm:$0xff] %v13312_v17  ;;  %v6363_v20 = vmax.f32 %v5851_v37, 0.0  ;;  %v5598_v61 = vadd.f32 %v12816_v12, %v5079_v3  ;;  %v5854_v53 = vadd.f32 %v12816_v12, %v5335_v63  ;;  %v13320_v50 = vpop.f32.mrb[247].mxu1 }
 0x303   : > { %v6493_v8 = vmax.f32 %v14685_v32, %v6109_v40  ;;  %v6621_v55 = vmax.f32 %v14687_v60, %v6365_v57  ;;  %7387 = vst.msk [vmem:[%s11842_s12 + $0x16c] sm:$0xf] %vm7295_vm1, %v8226_v6  ;;  %v5077_v30 = vmul.f32 %v12803_v7, %v12986_v14  ;;  %v14690_v1 = vmax.f32 %v14689_v38, 0.0  ;;  %v14691_v6 = vld [vmem:[#allocation176_spill] sm:$0xff] }
 0x304   : > { %v8224_v40 = vpack.c.bf16 %v6744_v33, %v6744_v33  ;;  %v5333_v10 = vmul.f32 %v12803_v7, %v12991_v27  ;;  %v14692_v37 = vmax.f32 %v14691_v6, 0.0  ;;  %v6110_v3 = vmax.f32 %v5598_v61, 0.0  ;;  %v14693_v27 = vld [vmem:[#allocation177_spill] sm:$0xff] }
 0x305   : > { %v6749_v57 = vmax.f32 %v6493_v8, %v6621_v55  ;;  %v6491_v32 = vmax.f32 %v14690_v1, %v6107_v21  ;;  %v6366_v17 = vmax.f32 %v5854_v53, 0.0  ;;  %v5596_v63 = vadd.f32 %v12816_v12, %v5077_v30  ;;  %v13340_v30 = vpop.f32.mrb[248].mxu0 }
 0x306   : > { %v6619_v60 = vmax.f32 %v14692_v37, %v6363_v20  ;;  %7385 = vst.msk [vmem:[%s11842_s12 + $0x164] sm:$0xf] %vm7295_vm1, %v8224_v40  ;;  %v5852_v33 = vadd.f32 %v12816_v12, %v5333_v10  ;;  %v5082_v8 = vmul.f32 %v12803_v7, %v13014_v19  ;;  %v5338_v55 = vmul.f32 %v12803_v7, %v13019_v18  ;;  %v14695_v20 = vld [vmem:[#allocation178_spill] sm:$0xff]  ;;  %v13350_v10 = vpop.f32.mrb[249].mxu0 }
 0x307   : > { %v8229_v14 = vpack.c.bf16 %v6749_v57, %v6749_v57  ;;  %v14694_v38 = vmax.f32 %v14693_v27, 0.0  ;;  %v14696_v61 = vmax.f32 %v14695_v20, 0.0  ;;  %v6108_v6 = vmax.f32 %v5596_v63, 0.0 }
 0x308   : > { %v6747_v21 = vmax.f32 %v6491_v32, %v6619_v60  ;;  %v6364_v40 = vmax.f32 %v5852_v33, 0.0  ;;  %v5601_v57 = vadd.f32 %v12816_v12, %v5082_v8  ;;  %v5857_v19 = vadd.f32 %v12816_v12, %v5338_v55  ;;  %v13348_v32 = vpop.f32.mrb[248].mxu1  ;;  %v14697_v60 = vld [vmem:[#allocation179_spill] sm:$0xff]  ;;  %v13358_v8 = vpop.f32.mrb[250].mxu0  ;;  %v14699_v55 = vld [vmem:[#allocation180_spill] sm:$0xff] }
 0x309   : > { %v6494_v1 = vmax.f32 %v14694_v38, %v6110_v3  ;;  %v6622_v53 = vmax.f32 %v14696_v61, %v6366_v17  ;;  %7390 = vst.msk [vmem:[%s11842_s12 + $0x178] sm:$0xf] %vm7295_vm1, %v8229_v14  ;;  %v5080_v18 = vmul.f32 %v12803_v7, %v13021_v24  ;;  %v14698_v3 = vmax.f32 %v14697_v60, 0.0  ;;  %v13356_v33 = vpop.f32.mrb[249].mxu1 }
 0x30a   : > { %v8227_v37 = vpack.c.bf16 %v6747_v21, %v6747_v21  ;;  %v5336_v14 = vmul.f32 %v12803_v7, %v13030_v52  ;;  %v14700_v27 = vmax.f32 %v14699_v55, 0.0  ;;  %v6113_v24 = vmax.f32 %v5601_v57, 0.0  ;;  %v13363_v21 = vpop.f32.mrb[250].mxu1  ;;  %v14705_v55 = vld [vmem:[#allocation182_spill] sm:$0xff] }
 0x30b   : > { %v6750_v17 = vmax.f32 %v6494_v1, %v6622_v53  ;;  %v6492_v63 = vmax.f32 %v14698_v3, %v6108_v6  ;;  %v6369_v20 = vmax.f32 %v5857_v19, 0.0  ;;  %v5599_v61 = vadd.f32 %v12816_v12, %v5080_v18  ;;  %v13365_v1 = vpop.f32.mrb[251].mxu0  ;;  %v13374_v60 = vpop.f32.mrb[251].mxu1  ;;  %v14703_v19 = vld [vmem:[#allocation181_spill] sm:$0xff] }
 0x30c   : > { %v6620_v38 = vmax.f32 %v14700_v27, %v6364_v40  ;;  %14701 = vst [vmem:[#allocation30_spill] sm:$0xff] %v13365_v1  ;;  %7388 = vst.msk [vmem:[%s11842_s12 + $0x170] sm:$0xf] %vm7295_vm1, %v8227_v37  ;;  %v5855_v52 = vadd.f32 %v12816_v12, %v5336_v14  ;;  %v5083_v6 = vmul.f32 %v12803_v7, %v13032_v4  ;;  %v14704_v18 = vmax.f32 %v14703_v19, 0.0 }
 0x30d   : > { %v8230_v53 = vpack.c.bf16 %v6750_v17, %v6750_v17  ;;  %v5339_v40 = vmul.f32 %v12803_v7, %v13038_v9  ;;  %14702 = vst [vmem:[#allocation31_spill] sm:$0xff] %v13374_v60  ;;  %v14706_v27 = vmax.f32 %v14705_v55, 0.0  ;;  %v6111_v37 = vmax.f32 %v5599_v61, 0.0 }
 0x30e   : > { %v6748_v57 = vmax.f32 %v6492_v63, %v6620_v38  ;;  %v6497_v3 = vmax.f32 %v14704_v18, %v6113_v24  ;;  %v6367_v17 = vmax.f32 %v5855_v52, 0.0  ;;  %v5602_v14 = vadd.f32 %v12816_v12, %v5083_v6  ;;  %v14707_v38 = vld [vmem:[#allocation183_spill] sm:$0xff]  ;;  %v14709_v18 = vld [vmem:[#allocation184_spill] sm:$0xff] }
 0x30f   : > { %v6625_v1 = vmax.f32 %v14706_v27, %v6369_v20  ;;  %7391 = vst.msk [vmem:[%s11842_s12 + $0x17c] sm:$0xf] %vm7295_vm1, %v8230_v53  ;;  %v5858_v4 = vadd.f32 %v12816_v12, %v5339_v40  ;;  %v5081_v9 = vmul.f32 %v12803_v7, %v13040_v34  ;;  %v14708_v19 = vmax.f32 %v14707_v38, 0.0  ;;  %v13393_v40 = vpop.f32.mrb[252].mxu0 }
 0x310   : > { %v8228_v60 = vpack.c.bf16 %v6748_v57, %v6748_v57  ;;  %v5337_v20 = vmul.f32 %v12803_v7, %v13048_v39  ;;  %v14710_v61 = vmax.f32 %v14709_v18, 0.0  ;;  %v6114_v53 = vmax.f32 %v5602_v14, 0.0  ;;  %v13404_v27 = vpop.f32.mrb[253].mxu0 }
 0x311   : > { %v6753_v63 = vmax.f32 %v6497_v3, %v6625_v1  ;;  %v6495_v24 = vmax.f32 %v14708_v19, %v6111_v37  ;;  %v6370_v52 = vmax.f32 %v5858_v4, 0.0  ;;  %v5600_v6 = vadd.f32 %v12816_v12, %v5081_v9  ;;  %v13402_v3 = vpop.f32.mrb[252].mxu1  ;;  %v14713_v9 = vld [vmem:[#allocation186_spill] sm:$0xff] }
 0x312   : > { %v6623_v55 = vmax.f32 %v14710_v61, %v6367_v17  ;;  %7389 = vst.msk [vmem:[%s11842_s12 + $0x174] sm:$0xf] %vm7295_vm1, %v8228_v60  ;;  %v5856_v1 = vadd.f32 %v12816_v12, %v5337_v20  ;;  %v5086_v57 = vmul.f32 %v12803_v7, %v13068_v49  ;;  %v5342_v39 = vmul.f32 %v12803_v7, %v13076_v26  ;;  %v14711_v17 = vld [vmem:[#allocation185_spill] sm:$0xff]  ;;  %v13410_v19 = vpop.f32.mrb[253].mxu1  ;;  %v13412_v20 = vpop.f32.mrb[254].mxu0 }
 0x313   : > { %v8233_v34 = vpack.c.bf16 %v6753_v63, %v6753_v63  ;;  %v14712_v14 = vmax.f32 %v14711_v17, 0.0  ;;  %v14714_v38 = vmax.f32 %v14713_v9, 0.0  ;;  %v6112_v63 = vmax.f32 %v5600_v6, 0.0  ;;  %v13420_v61 = vpop.f32.mrb[254].mxu1  ;;  %v14716_v6 = vld [vmem:[#allocation187_spill] sm:$0xff] }
 0x314   : > { %v6751_v37 = vmax.f32 %v6495_v24, %v6623_v55  ;;  %v6368_v49 = vmax.f32 %v5856_v1, 0.0  ;;  %v5605_v26 = vadd.f32 %v12816_v12, %v5086_v57  ;;  %v5861_v18 = vadd.f32 %v12816_v12, %v5342_v39  ;;  %14715 = vst [vmem:[#allocation32_spill] sm:$0xff] %v13420_v61  ;;  %v13422_v55 = vpop.f32.mrb[255].mxu0  ;;  %v13428_v1 = vpop.f32.mrb[255].mxu1  ;;  %v14718_v57 = vld [vmem:[#allocation188_spill] sm:$0xff] }
 0x315   : > { %v6498_v4 = vmax.f32 %v14712_v14, %v6114_v53  ;;  %v6626_v60 = vmax.f32 %v14714_v38, %v6370_v52  ;;  %7394 = vst.msk [vmem:[%s11842_s12 + $0x188] sm:$0xf] %vm7295_vm1, %v8233_v34  ;;  %v5084_v24 = vmul.f32 %v12803_v7, %v13078_v15  ;;  %v14717_v17 = vmax.f32 %v14716_v6, 0.0  ;;  %v14720_v6 = vld [vmem:[#allocation189_spill] sm:$0xff] }
 0x316   : > { %v8231_v53 = vpack.c.bf16 %v6751_v37, %v6751_v37  ;;  %v5340_v34 = vmul.f32 %v12803_v7, %v13084_v22  ;;  %v14719_v39 = vmax.f32 %v14718_v57, 0.0  ;;  %v6117_v38 = vmax.f32 %v5605_v26, 0.0 }
 0x317   : > { %v6754_v52 = vmax.f32 %v6498_v4, %v6626_v60  ;;  %v6496_v14 = vmax.f32 %v14717_v17, %v6112_v63  ;;  %v6373_v15 = vmax.f32 %v5861_v18, 0.0  ;;  %v5603_v61 = vadd.f32 %v12816_v12, %v5084_v24 }
 0x318   : > { %v6624_v9 = vmax.f32 %v14719_v39, %v6368_v49  ;;  %7392 = vst.msk [vmem:[%s11842_s12 + $0x180] sm:$0xf] %vm7295_vm1, %v8231_v53  ;;  %v5859_v4 = vadd.f32 %v12816_v12, %v5340_v34  ;;  %v5087_v60 = vmul.f32 %v12803_v7, %v13086_v35  ;;  %v5343_v22 = vmul.f32 %v12803_v7, %v13091_v44  ;;  %v14722_v49 = vld [vmem:[#allocation190_spill] sm:$0xff] }
 0x319   : > { %v8234_v37 = vpack.c.bf16 %v6754_v52, %v6754_v52  ;;  %v14721_v17 = vmax.f32 %v14720_v6, 0.0  ;;  %v14723_v26 = vmax.f32 %v14722_v49, 0.0  ;;  %v6115_v24 = vmax.f32 %v5603_v61, 0.0  ;;  %v14724_v35 = vld [vmem:[#allocation22_spill] sm:$0xff] }
 0x31a   : > { %v6752_v63 = vmax.f32 %v6496_v14, %v6624_v9  ;;  %v6371_v53 = vmax.f32 %v5859_v4, 0.0  ;;  %v5606_v52 = vadd.f32 %v12816_v12, %v5087_v60  ;;  %v5862_v34 = vadd.f32 %v12816_v12, %v5343_v22  ;;  %v14725_v9 = vld [vmem:[#allocation191_spill] sm:$0xff] }
 0x31b   : > { %v6501_v57 = vmax.f32 %v14721_v17, %v6117_v38  ;;  %v6629_v18 = vmax.f32 %v14723_v26, %v6373_v15  ;;  %7395 = vst.msk [vmem:[%s11842_s12 + $0x18c] sm:$0xf] %vm7295_vm1, %v8234_v37  ;;  %v5085_v39 = vmul.f32 %v12803_v7, %v14724_v35  ;;  %v14726_v6 = vmax.f32 %v14725_v9, 0.0  ;;  %v14727_v17 = vld [vmem:[#allocation23_spill] sm:$0xff]  ;;  %v14728_v15 = vld [vmem:[#allocation192_spill] sm:$0xff]  ;;  %v14732_v35 = vld [vmem:[#allocation194_spill] sm:$0xff] }
 0x31c   : > { %v8232_v44 = vpack.c.bf16 %v6752_v63, %v6752_v63  ;;  %v5341_v49 = vmul.f32 %v12803_v7, %v14727_v17  ;;  %v14729_v61 = vmax.f32 %v14728_v15, 0.0  ;;  %v6118_v4 = vmax.f32 %v5606_v52, 0.0  ;;  %v13462_v63 = vld [vmem:[%s13778_s3] ss:$0 sm:$0xff] }
 0x31d   : > { %v6757_v14 = vmax.f32 %v6501_v57, %v6629_v18  ;;  %v6499_v38 = vmax.f32 %v14726_v6, %v6115_v24  ;;  %v6374_v26 = vmax.f32 %v5862_v34, 0.0  ;;  %v5604_v60 = vadd.f32 %v12816_v12, %v5085_v39  ;;  %v13468_v7 = vld [vmem:[%s13777_s2] ss:$0 sm:$0xff] }
 0x31e   : > { %v6627_v37 = vmax.f32 %v14729_v61, %v6371_v53  ;;  %7393 = vst.msk [vmem:[%s11842_s12 + $0x184] sm:$0xf] %vm7295_vm1, %v8232_v44  ;;  %v5860_v57 = vadd.f32 %v13462_v63, %v5341_v49  ;;  %v5090_v18 = vmul.f32 %v13468_v7, %v13121_v42  ;;  %v5346_v12 = vmul.f32 %v13468_v7, %v13130_v16  ;;  %v14730_v53 = vld [vmem:[#allocation193_spill] sm:$0xff]  ;;  %v14734_v49 = vld [vmem:[#allocation195_spill] sm:$0xff] }
 0x31f   : > { %v8237_v22 = vpack.c.bf16 %v6757_v14, %v6757_v14  ;;  %v14731_v52 = vmax.f32 %v14730_v53, 0.0  ;;  %v14733_v39 = vmax.f32 %v14732_v35, 0.0  ;;  %v6116_v14 = vmax.f32 %v5604_v60, 0.0  ;;  %v14738_v53 = vld [vmem:[#allocation24_spill] sm:$0xff] }
 0x320   : > { %v6755_v24 = vmax.f32 %v6499_v38, %v6627_v37  ;;  %v6372_v9 = vmax.f32 %v5860_v57, 0.0  ;;  %v5609_v6 = vadd.f32 %v13462_v63, %v5090_v18  ;;  %v5865_v17 = vadd.f32 %v13462_v63, %v5346_v12 }
 0x321   : > { %v6502_v34 = vmax.f32 %v14731_v52, %v6118_v4  ;;  %v6630_v44 = vmax.f32 %v14733_v39, %v6374_v26  ;;  %7398 = vst.msk [vmem:[%s11842_s12 + $0x198] sm:$0xf] %vm7295_vm1, %v8237_v22  ;;  %v5088_v42 = vmul.f32 %v13468_v7, %v13132_v41  ;;  %v14735_v15 = vmax.f32 %v14734_v49, 0.0  ;;  %v14736_v4 = vld [vmem:[#allocation196_spill] sm:$0xff] }
 0x322   : > { %v8235_v16 = vpack.c.bf16 %v6755_v24, %v6755_v24  ;;  %v5344_v37 = vmul.f32 %v13468_v7, %v13138_v45  ;;  %v14737_v26 = vmax.f32 %v14736_v4, 0.0  ;;  %v6121_v22 = vmax.f32 %v5609_v6, 0.0  ;;  %v14739_v45 = vld [vmem:[#allocation197_spill] sm:$0xff] }
 0x323   : > { %v6758_v38 = vmax.f32 %v6502_v34, %v6630_v44  ;;  %v6500_v61 = vmax.f32 %v14735_v15, %v6116_v14  ;;  %v6377_v57 = vmax.f32 %v5865_v17, 0.0  ;;  %v5607_v18 = vadd.f32 %v13462_v63, %v5088_v42  ;;  %v14741_v44 = vld [vmem:[#allocation198_spill] sm:$0xff]  ;;  %v14743_v15 = vld [vmem:[#allocation199_spill] sm:$0xff] }
 0x324   : > { %v6628_v60 = vmax.f32 %v14737_v26, %v6372_v9  ;;  %7396 = vst.msk [vmem:[%s11842_s12 + $0x190] sm:$0xf] %vm7295_vm1, %v8235_v16  ;;  %v5863_v41 = vadd.f32 %v13462_v63, %v5344_v37  ;;  %v5091_v24 = vmul.f32 %v13468_v7, %v13140_v23  ;;  %v5347_v52 = vmul.f32 %v13468_v7, %v14738_v53  ;;  %v14745_v26 = vld [vmem:[#allocation200_spill] sm:$0xff] }
 0x325   : > { %v8238_v12 = vpack.c.bf16 %v6758_v38, %v6758_v38  ;;  %v14740_v35 = vmax.f32 %v14739_v45, 0.0  ;;  %v14742_v14 = vmax.f32 %v14741_v44, 0.0  ;;  %v6119_v6 = vmax.f32 %v5607_v18, 0.0 }
 0x326   : > { %v6756_v34 = vmax.f32 %v6500_v61, %v6628_v60  ;;  %v6375_v17 = vmax.f32 %v5863_v41, 0.0  ;;  %v5610_v42 = vadd.f32 %v13462_v63, %v5091_v24  ;;  %v5866_v16 = vadd.f32 %v13462_v63, %v5347_v52 }
 0x327   : > { %v6505_v39 = vmax.f32 %v14740_v35, %v6121_v22  ;;  %v6633_v9 = vmax.f32 %v14742_v14, %v6377_v57  ;;  %7399 = vst.msk [vmem:[%s11842_s12 + $0x19c] sm:$0xf] %vm7295_vm1, %v8238_v12  ;;  %v5089_v23 = vmul.f32 %v13468_v7, %v13150_v5  ;;  %v14744_v61 = vmax.f32 %v14743_v15, 0.0  ;;  %v14749_v35 = vld [vmem:[#allocation202_spill] sm:$0xff]  ;;  %v14753_v15 = vld [vmem:[#allocation204_spill] sm:$0xff] }
 0x328   : > { %v8236_v38 = vpack.c.bf16 %v6756_v34, %v6756_v34  ;;  %v5345_v4 = vmul.f32 %v13468_v7, %v13156_v54  ;;  %v14746_v60 = vmax.f32 %v14745_v26, 0.0  ;;  %v6122_v57 = vmax.f32 %v5610_v42, 0.0  ;;  %v14747_v54 = vld [vmem:[#allocation201_spill] sm:$0xff] }
 0x329   : > { %v6761_v49 = vmax.f32 %v6505_v39, %v6633_v9  ;;  %v6503_v37 = vmax.f32 %v14744_v61, %v6119_v6  ;;  %v6378_v18 = vmax.f32 %v5866_v16, 0.0  ;;  %v5608_v12 = vadd.f32 %v13462_v63, %v5089_v23  ;;  %v14751_v16 = vld [vmem:[#allocation203_spill] sm:$0xff] }
 0x32a   : > { %v6631_v22 = vmax.f32 %v14746_v60, %v6375_v17  ;;  %7397 = vst.msk [vmem:[%s11842_s12 + $0x194] sm:$0xf] %vm7295_vm1, %v8236_v38  ;;  %v5864_v5 = vadd.f32 %v13462_v63, %v5345_v4  ;;  %v5094_v24 = vmul.f32 %v13468_v7, %v13178_v0  ;;  %v5350_v53 = vmul.f32 %v13468_v7, %v13184_v11 }
 0x32b   : > { %v8241_v41 = vpack.c.bf16 %v6761_v49, %v6761_v49  ;;  %v14748_v34 = vmax.f32 %v14747_v54, 0.0  ;;  %v14750_v39 = vmax.f32 %v14749_v35, 0.0  ;;  %v6120_v14 = vmax.f32 %v5608_v12, 0.0 }
 0x32c   : > { %v6759_v52 = vmax.f32 %v6503_v37, %v6631_v22  ;;  %v6376_v9 = vmax.f32 %v5864_v5, 0.0  ;;  %v5613_v6 = vadd.f32 %v13462_v63, %v5094_v24  ;;  %v5869_v17 = vadd.f32 %v13462_v63, %v5350_v53  ;;  %v14758_v53 = vld [vmem:[#allocation206_spill] sm:$0xff] }
 0x32d   : > { %v6506_v45 = vmax.f32 %v14748_v34, %v6122_v57  ;;  %v6634_v44 = vmax.f32 %v14750_v39, %v6378_v18  ;;  %7402 = vst.msk [vmem:[%s11842_s12 + $0x1a8] sm:$0xf] %vm7295_vm1, %v8241_v41  ;;  %v5092_v0 = vmul.f32 %v13468_v7, %v13186_v36  ;;  %v14752_v23 = vmax.f32 %v14751_v16, 0.0  ;;  %v14755_v18 = vld [vmem:[#allocation25_spill] sm:$0xff] }
 0x32e   : > { %v8239_v11 = vpack.c.bf16 %v6759_v52, %v6759_v52  ;;  %v5348_v49 = vmul.f32 %v13468_v7, %v13191_v58  ;;  %v14754_v61 = vmax.f32 %v14753_v15, 0.0  ;;  %v6125_v4 = vmax.f32 %v5613_v6, 0.0  ;;  %v14756_v58 = vld [vmem:[#allocation205_spill] sm:$0xff] }
 0x32f   : > { %v6762_v42 = vmax.f32 %v6506_v45, %v6634_v44  ;;  %v6504_v38 = vmax.f32 %v14752_v23, %v6120_v14  ;;  %v6381_v26 = vmax.f32 %v5869_v17, 0.0  ;;  %v5611_v60 = vadd.f32 %v13462_v63, %v5092_v0  ;;  %v14762_v0 = vld [vmem:[#allocation26_spill] sm:$0xff] }
 0x330   : > { %v6632_v37 = vmax.f32 %v14754_v61, %v6376_v9  ;;  %7400 = vst.msk [vmem:[%s11842_s12 + $0x1a0] sm:$0xf] %vm7295_vm1, %v8239_v11  ;;  %v5867_v36 = vadd.f32 %v13462_v63, %v5348_v49  ;;  %v5095_v57 = vmul.f32 %v13468_v7, %v13193_v29  ;;  %v5351_v12 = vmul.f32 %v13468_v7, %v14755_v18  ;;  %v14760_v9 = vld [vmem:[#allocation207_spill] sm:$0xff] }
 0x331   : > { %v8242_v22 = vpack.c.bf16 %v6762_v42, %v6762_v42  ;;  %v14757_v5 = vmax.f32 %v14756_v58, 0.0  ;;  %v14759_v52 = vmax.f32 %v14758_v53, 0.0  ;;  %v6123_v34 = vmax.f32 %v5611_v60, 0.0  ;;  %v14763_v42 = vld [vmem:[#allocation208_spill] sm:$0xff]  ;;  %v14765_v60 = vld [vmem:[#allocation209_spill] sm:$0xff] }
 0x332   : > { %v6760_v41 = vmax.f32 %v6504_v38, %v6632_v37  ;;  %v6379_v45 = vmax.f32 %v5867_v36, 0.0  ;;  %v5614_v35 = vadd.f32 %v13462_v63, %v5095_v57  ;;  %v5870_v39 = vadd.f32 %v13462_v63, %v5351_v12  ;;  %v14767_v57 = vld [vmem:[#allocation210_spill] sm:$0xff] }
 0x333   : > { %v6509_v24 = vmax.f32 %v14757_v5, %v6125_v4  ;;  %v6637_v54 = vmax.f32 %v14759_v52, %v6381_v26  ;;  %7403 = vst.msk [vmem:[%s11842_s12 + $0x1ac] sm:$0xf] %vm7295_vm1, %v8242_v22  ;;  %v5093_v29 = vmul.f32 %v13468_v7, %v13204_v51  ;;  %v14761_v6 = vmax.f32 %v14760_v9, 0.0  ;;  %v14769_v52 = vld [vmem:[#allocation211_spill] sm:$0xff] }
 0x334   : > { %v8240_v44 = vpack.c.bf16 %v6760_v41, %v6760_v41  ;;  %v5349_v11 = vmul.f32 %v13468_v7, %v14762_v0  ;;  %v14764_v16 = vmax.f32 %v14763_v42, 0.0  ;;  %v6126_v38 = vmax.f32 %v5614_v35, 0.0  ;;  %v14771_v35 = vld [vmem:[#allocation212_spill] sm:$0xff] }
 0x335   : > { %v6765_v14 = vmax.f32 %v6509_v24, %v6637_v54  ;;  %v6507_v17 = vmax.f32 %v14761_v6, %v6123_v34  ;;  %v6382_v49 = vmax.f32 %v5870_v39, 0.0  ;;  %v5612_v15 = vadd.f32 %v13462_v63, %v5093_v29 }
 0x336   : > { %v6635_v23 = vmax.f32 %v14764_v16, %v6379_v45  ;;  %7401 = vst.msk [vmem:[%s11842_s12 + $0x1a4] sm:$0xf] %vm7295_vm1, %v8240_v44  ;;  %v5868_v51 = vadd.f32 %v13462_v63, %v5349_v11  ;;  %v5098_v37 = vmul.f32 %v13468_v7, %v13232_v13  ;;  %v5354_v4 = vmul.f32 %v13468_v7, %v13238_v56 }
 0x337   : > { %v8245_v61 = vpack.c.bf16 %v6765_v14, %v6765_v14  ;;  %v14766_v22 = vmax.f32 %v14765_v60, 0.0  ;;  %v14768_v18 = vmax.f32 %v14767_v57, 0.0  ;;  %v6124_v41 = vmax.f32 %v5612_v15, 0.0 }
 0x338   : > { %v6763_v26 = vmax.f32 %v6507_v17, %v6635_v23  ;;  %v6380_v58 = vmax.f32 %v5868_v51, 0.0  ;;  %v5617_v5 = vadd.f32 %v13462_v63, %v5098_v37  ;;  %v5873_v24 = vadd.f32 %v13462_v63, %v5354_v4  ;;  %v14773_v17 = vld [vmem:[#allocation27_spill] sm:$0xff] }
 0x339   : > { %v6510_v36 = vmax.f32 %v14766_v22, %v6126_v38  ;;  %v6638_v12 = vmax.f32 %v14768_v18, %v6382_v49  ;;  %7406 = vst.msk [vmem:[%s11842_s12 + $0x1b8] sm:$0xf] %vm7295_vm1, %v8245_v61  ;;  %v5096_v13 = vmul.f32 %v13468_v7, %v13240_v47  ;;  %v14770_v54 = vmax.f32 %v14769_v52, 0.0  ;;  %v14776_v38 = vld [vmem:[#allocation214_spill] sm:$0xff]  ;;  %v14778_v22 = vld [vmem:[#allocation215_spill] sm:$0xff] }
 0x33a   : > { %v8243_v56 = vpack.c.bf16 %v6763_v26, %v6763_v26  ;;  %v5352_v45 = vmul.f32 %v13468_v7, %v13248_v28  ;;  %v14772_v39 = vmax.f32 %v14771_v35, 0.0  ;;  %v6129_v44 = vmax.f32 %v5617_v5, 0.0  ;;  %v14774_v28 = vld [vmem:[#allocation213_spill] sm:$0xff]  ;;  %v14784_v35 = vld [vmem:[#allocation218_spill] sm:$0xff] }
 0x33b   : > { %v6766_v53 = vmax.f32 %v6510_v36, %v6638_v12  ;;  %v6508_v34 = vmax.f32 %v14770_v54, %v6124_v41  ;;  %v6385_v14 = vmax.f32 %v5873_v24, 0.0  ;;  %v5615_v9 = vadd.f32 %v13462_v63, %v5096_v13  ;;  %v14780_v12 = vld [vmem:[#allocation216_spill] sm:$0xff] }
 0x33c   : > { %v6636_v29 = vmax.f32 %v14772_v39, %v6380_v58  ;;  %7404 = vst.msk [vmem:[%s11842_s12 + $0x1b0] sm:$0xf] %vm7295_vm1, %v8243_v56  ;;  %v5871_v47 = vadd.f32 %v13462_v63, %v5352_v45  ;;  %v5099_v0 = vmul.f32 %v13468_v7, %v14773_v17  ;;  %v5355_v11 = vmul.f32 %v13468_v7, %v13256_v62  ;;  %v14786_v17 = vld [vmem:[#allocation219_spill] sm:$0xff] }
 0x33d   : > { %v8246_v6 = vpack.c.bf16 %v6766_v53, %v6766_v53  ;;  %v14775_v16 = vmax.f32 %v14774_v28, 0.0  ;;  %v14777_v49 = vmax.f32 %v14776_v38, 0.0  ;;  %v6127_v61 = vmax.f32 %v5615_v9, 0.0  ;;  %v14788_v28 = vld [vmem:[#allocation220_spill] sm:$0xff] }
 0x33e   : > { %v6764_v42 = vmax.f32 %v6508_v34, %v6636_v29  ;;  %v6383_v51 = vmax.f32 %v5871_v47, 0.0  ;;  %v5618_v37 = vadd.f32 %v13462_v63, %v5099_v0  ;;  %v5874_v4 = vadd.f32 %v13462_v63, %v5355_v11 }
 0x33f   : > { %v6513_v23 = vmax.f32 %v14775_v16, %v6129_v44  ;;  %v6641_v15 = vmax.f32 %v14777_v49, %v6385_v14  ;;  %7407 = vst.msk [vmem:[%s11842_s12 + $0x1bc] sm:$0xf] %vm7295_vm1, %v8246_v6  ;;  %v5097_v26 = vmul.f32 %v13468_v7, %v13258_v48  ;;  %v14779_v36 = vmax.f32 %v14778_v22, 0.0  ;;  %v14793_v22 = vld [vmem:[#allocation222_spill] sm:$0xff] }
 0x340   : > { %v8244_v62 = vpack.c.bf16 %v6764_v42, %v6764_v42  ;;  %v5353_v18 = vmul.f32 %v13468_v7, %v13263_v46  ;;  %v14781_v41 = vmax.f32 %v14780_v12, 0.0  ;;  %v6130_v5 = vmax.f32 %v5618_v37, 0.0  ;;  %v14782_v46 = vld [vmem:[#allocation217_spill] sm:$0xff] }
 0x341   : > { %v6769_v60 = vmax.f32 %v6513_v23, %v6641_v15  ;;  %v6511_v57 = vmax.f32 %v14779_v36, %v6127_v61  ;;  %v6386_v24 = vmax.f32 %v5874_v4, 0.0  ;;  %v5616_v13 = vadd.f32 %v13462_v63, %v5097_v26 }
 0x342   : > { %v6639_v58 = vmax.f32 %v14781_v41, %v6383_v51  ;;  %7405 = vst.msk [vmem:[%s11842_s12 + $0x1b4] sm:$0xf] %vm7295_vm1, %v8244_v62  ;;  %v5872_v48 = vadd.f32 %v13462_v63, %v5353_v18  ;;  %v5102_v53 = vmul.f32 %v13468_v7, %v13286_v2  ;;  %v5358_v52 = vmul.f32 %v13468_v7, %v13291_v31  ;;  %v14790_v51 = vld [vmem:[#allocation28_spill] sm:$0xff] }
 0x343   : > { %v8249_v56 = vpack.c.bf16 %v6769_v60, %v6769_v60  ;;  %v14783_v34 = vmax.f32 %v14782_v46, 0.0  ;;  %v14785_v39 = vmax.f32 %v14784_v35, 0.0  ;;  %v6128_v44 = vmax.f32 %v5616_v13, 0.0 }
 0x344   : > { %v6767_v54 = vmax.f32 %v6511_v57, %v6639_v58  ;;  %v6384_v14 = vmax.f32 %v5872_v48, 0.0  ;;  %v5621_v9 = vadd.f32 %v13462_v63, %v5102_v53  ;;  %v5877_v6 = vadd.f32 %v13462_v63, %v5358_v52 }
 0x345   : > { %v6514_v45 = vmax.f32 %v14783_v34, %v6130_v5  ;;  %v6642_v29 = vmax.f32 %v14785_v39, %v6386_v24  ;;  %7410 = vst.msk [vmem:[%s11842_s12 + $0x1c8] sm:$0xf] %vm7295_vm1, %v8249_v56  ;;  %v5100_v2 = vmul.f32 %v13468_v7, %v13293_v59  ;;  %v14787_v0 = vmax.f32 %v14786_v17, 0.0  ;;  %v14795_v5 = vld [vmem:[#allocation29_spill] sm:$0xff]  ;;  %v14796_v56 = vld [vmem:[#allocation223_spill] sm:$0xff] }
 0x346   : > { %v8247_v31 = vpack.c.bf16 %v6767_v54, %v6767_v54  ;;  %v5356_v42 = vmul.f32 %v13468_v7, %v13302_v25  ;;  %v14789_v16 = vmax.f32 %v14788_v28, 0.0  ;;  %v6133_v38 = vmax.f32 %v5621_v9, 0.0  ;;  %v14791_v25 = vld [vmem:[#allocation221_spill] sm:$0xff]  ;;  %v14798_v54 = vld [vmem:[#allocation224_spill] sm:$0xff] }
 0x347   : > { %v6770_v47 = vmax.f32 %v6514_v45, %v6642_v29  ;;  %v6512_v11 = vmax.f32 %v14787_v0, %v6128_v44  ;;  %v6389_v49 = vmax.f32 %v5877_v6, 0.0  ;;  %v5619_v15 = vadd.f32 %v13462_v63, %v5100_v2 }
 0x348   : > { %v6640_v23 = vmax.f32 %v14789_v16, %v6384_v14  ;;  %7408 = vst.msk [vmem:[%s11842_s12 + $0x1c0] sm:$0xf] %vm7295_vm1, %v8247_v31  ;;  %v5875_v59 = vadd.f32 %v13462_v63, %v5356_v42  ;;  %v5103_v37 = vmul.f32 %v13468_v7, %v14790_v51  ;;  %v5359_v4 = vmul.f32 %v13468_v7, %v13310_v43 }
 0x349   : > { %v8250_v61 = vpack.c.bf16 %v6770_v47, %v6770_v47  ;;  %v14792_v62 = vmax.f32 %v14791_v25, 0.0  ;;  %v14794_v36 = vmax.f32 %v14793_v22, 0.0  ;;  %v6131_v18 = vmax.f32 %v5619_v15, 0.0  ;;  %v14802_v47 = vld [vmem:[#allocation226_spill] sm:$0xff] }
 0x34a   : > { %v6768_v26 = vmax.f32 %v6512_v11, %v6640_v23  ;;  %v6387_v12 = vmax.f32 %v5875_v59, 0.0  ;;  %v5622_v41 = vadd.f32 %v13462_v63, %v5103_v37  ;;  %v5878_v58 = vadd.f32 %v13462_v63, %v5359_v4  ;;  %v14806_v59 = vld [vmem:[#allocation228_spill] sm:$0xff] }
 0x34b   : > { %v6517_v60 = vmax.f32 %v14792_v62, %v6133_v38  ;;  %v6645_v57 = vmax.f32 %v14794_v36, %v6389_v49  ;;  %7411 = vst.msk [vmem:[%s11842_s12 + $0x1cc] sm:$0xf] %vm7295_vm1, %v8250_v61  ;;  %v5101_v24 = vmul.f32 %v13468_v7, %v14795_v5  ;;  %v14797_v48 = vmax.f32 %v14796_v56, 0.0  ;;  %v14804_v38 = vld [vmem:[#allocation227_spill] sm:$0xff] }
 0x34c   : > { %v8248_v43 = vpack.c.bf16 %v6768_v26, %v6768_v26  ;;  %v5357_v52 = vmul.f32 %v13468_v7, %v13320_v50  ;;  %v14799_v46 = vmax.f32 %v14798_v54, 0.0  ;;  %v6134_v45 = vmax.f32 %v5622_v41, 0.0  ;;  %v14800_v50 = vld [vmem:[#allocation225_spill] sm:$0xff] }
 0x34d   : > { %v6773_v13 = vmax.f32 %v6517_v60, %v6645_v57  ;;  %v6515_v53 = vmax.f32 %v14797_v48, %v6131_v18  ;;  %v6390_v35 = vmax.f32 %v5878_v58, 0.0  ;;  %v5620_v39 = vadd.f32 %v13462_v63, %v5101_v24 }
 0x34e   : > { %v6643_v34 = vmax.f32 %v14799_v46, %v6387_v12  ;;  %7409 = vst.msk [vmem:[%s11842_s12 + $0x1c4] sm:$0xf] %vm7295_vm1, %v8248_v43  ;;  %v5876_v44 = vadd.f32 %v13462_v63, %v5357_v52  ;;  %v5106_v14 = vmul.f32 %v13468_v7, %v13340_v30  ;;  %v5362_v9 = vmul.f32 %v13468_v7, %v13348_v32  ;;  %v14810_v12 = vld [vmem:[#allocation230_spill] sm:$0xff]  ;;  %v14815_v46 = vld [vmem:[#allocation31_spill] sm:$0xff] }
 0x34f   : > { %v8253_v29 = vpack.c.bf16 %v6773_v13, %v6773_v13  ;;  %v14801_v2 = vmax.f32 %v14800_v50, 0.0  ;;  %v14803_v17 = vmax.f32 %v14802_v47, 0.0  ;;  %v6132_v11 = vmax.f32 %v5620_v39, 0.0  ;;  %v14818_v47 = vld [vmem:[#allocation233_spill] sm:$0xff] }
 0x350   : > { %v6771_v6 = vmax.f32 %v6515_v53, %v6643_v34  ;;  %v6388_v42 = vmax.f32 %v5876_v44, 0.0  ;;  %v5625_v28 = vadd.f32 %v13462_v63, %v5106_v14  ;;  %v5881_v16 = vadd.f32 %v13462_v63, %v5362_v9  ;;  %v14813_v53 = vld [vmem:[#allocation231_spill] sm:$0xff] }
 0x351   : > { %v6518_v31 = vmax.f32 %v14801_v2, %v6134_v45  ;;  %v6646_v0 = vmax.f32 %v14803_v17, %v6390_v35  ;;  %7414 = vst.msk [vmem:[%s11842_s12 + $0x1d8] sm:$0xf] %vm7295_vm1, %v8253_v29  ;;  %v5104_v30 = vmul.f32 %v13468_v7, %v13350_v10  ;;  %v14805_v49 = vmax.f32 %v14804_v38, 0.0  ;;  %v14816_v45 = vld [vmem:[#allocation232_spill] sm:$0xff] }
 0x352   : > { %v8251_v32 = vpack.c.bf16 %v6771_v6, %v6771_v6  ;;  %v5360_v61 = vmul.f32 %v13468_v7, %v13356_v33  ;;  %v14807_v51 = vmax.f32 %v14806_v59, 0.0  ;;  %v6137_v4 = vmax.f32 %v5625_v28, 0.0  ;;  %v14808_v33 = vld [vmem:[#allocation229_spill] sm:$0xff] }
 0x353   : > { %v6774_v23 = vmax.f32 %v6518_v31, %v6646_v0  ;;  %v6516_v15 = vmax.f32 %v14805_v49, %v6132_v11  ;;  %v6393_v26 = vmax.f32 %v5881_v16, 0.0  ;;  %v5623_v25 = vadd.f32 %v13462_v63, %v5104_v30  ;;  %v14820_v11 = vld [vmem:[#allocation234_spill] sm:$0xff]  ;;  %v14822_v49 = vld [vmem:[#allocation235_spill] sm:$0xff] }
 0x354   : > { %v6644_v37 = vmax.f32 %v14807_v51, %v6388_v42  ;;  %7412 = vst.msk [vmem:[%s11842_s12 + $0x1d0] sm:$0xf] %vm7295_vm1, %v8251_v32  ;;  %v5879_v10 = vadd.f32 %v13462_v63, %v5360_v61  ;;  %v5107_v60 = vmul.f32 %v13468_v7, %v13358_v8  ;;  %v5363_v22 = vmul.f32 %v13468_v7, %v13363_v21  ;;  %v14812_v8 = vld [vmem:[#allocation30_spill] sm:$0xff]  ;;  %v14824_v51 = vld [vmem:[#allocation236_spill] sm:$0xff] }
 0x355   : > { %v8254_v62 = vpack.c.bf16 %v6774_v23, %v6774_v23  ;;  %v14809_v57 = vmax.f32 %v14808_v33, 0.0  ;;  %v14811_v41 = vmax.f32 %v14810_v12, 0.0  ;;  %v6135_v5 = vmax.f32 %v5623_v25, 0.0  ;;  %v14829_v12 = vld [vmem:[#allocation238_spill] sm:$0xff] }
 0x356   : > { %v6772_v36 = vmax.f32 %v6516_v15, %v6644_v37  ;;  %v6391_v24 = vmax.f32 %v5879_v10, 0.0  ;;  %v5626_v43 = vadd.f32 %v13462_v63, %v5107_v60  ;;  %v5882_v13 = vadd.f32 %v13462_v63, %v5363_v22  ;;  %v14826_v22 = vld [vmem:[#allocation32_spill] sm:$0xff] }
 0x357   : > { %v6521_v18 = vmax.f32 %v14809_v57, %v6137_v4  ;;  %v6649_v58 = vmax.f32 %v14811_v41, %v6393_v26  ;;  %7415 = vst.msk [vmem:[%s11842_s12 + $0x1dc] sm:$0xf] %vm7295_vm1, %v8254_v62  ;;  %v5105_v56 = vmul.f32 %v13468_v7, %v14812_v8  ;;  %v14814_v52 = vmax.f32 %v14813_v53, 0.0 }
 0x358   : > { %v8252_v21 = vpack.c.bf16 %v6772_v36, %v6772_v36  ;;  %v5361_v34 = vmul.f32 %v13468_v7, %v14815_v46  ;;  %v14817_v35 = vmax.f32 %v14816_v45, 0.0  ;;  %v6138_v29 = vmax.f32 %v5626_v43, 0.0 }
 0x359   : > { %v6777_v48 = vmax.f32 %v6521_v18, %v6649_v58  ;;  %v6519_v54 = vmax.f32 %v14814_v52, %v6135_v5  ;;  %v6394_v44 = vmax.f32 %v5882_v13, 0.0  ;;  %v5624_v14 = vadd.f32 %v13462_v63, %v5105_v56 }
 0x35a   : > { %v6647_v39 = vmax.f32 %v14817_v35, %v6391_v24  ;;  %7413 = vst.msk [vmem:[%s11842_s12 + $0x1d4] sm:$0xf] %vm7295_vm1, %v8252_v21  ;;  %v5880_v6 = vadd.f32 %v13462_v63, %v5361_v34  ;;  %v5110_v50 = vmul.f32 %v13468_v7, %v13393_v40  ;;  %v5366_v2 = vmul.f32 %v13468_v7, %v13402_v3  ;;  %v14831_v21 = vld [vmem:[#allocation239_spill] sm:$0xff] }
 0x35b   : > { %v8257_v9 = vpack.c.bf16 %v6777_v48, %v6777_v48  ;;  %v14819_v17 = vmax.f32 %v14818_v47, 0.0  ;;  %v14821_v42 = vmax.f32 %v14820_v11, 0.0  ;;  %v6136_v16 = vmax.f32 %v5624_v14, 0.0 }
 0x35c   : > { %v6775_v31 = vmax.f32 %v6519_v54, %v6647_v39  ;;  %v6392_v30 = vmax.f32 %v5880_v6, 0.0  ;;  %v5629_v32 = vadd.f32 %v13462_v63, %v5110_v50  ;;  %v5885_v23 = vadd.f32 %v13462_v63, %v5366_v2  ;;  %v14833_v54 = vld [vmem:[#allocation240_spill] sm:$0xff]  ;;  %v14836_v6 = vld [vmem:[#allocation241_spill] sm:$0xff] }
 0x35d   : > { %v6522_v0 = vmax.f32 %v14819_v17, %v6138_v29  ;;  %v6650_v28 = vmax.f32 %v14821_v42, %v6394_v44  ;;  %7418 = vst.msk [vmem:[%s11842_s12 + $0x1e8] sm:$0xf] %vm7295_vm1, %v8257_v9  ;;  %v5108_v40 = vmul.f32 %v13468_v7, %v13404_v27  ;;  %v14823_v15 = vmax.f32 %v14822_v49, 0.0  ;;  %v14835_v29 = vld [vmem:[#allocation243_spill] sm:$0xff]  ;;  %v14840_v17 = vld [vmem:[#allocation244_spill] sm:$0xff] }
 0x35e   : > { %v8255_v3 = vpack.c.bf16 %v6775_v31, %v6775_v31  ;;  %v5364_v59 = vmul.f32 %v13468_v7, %v13410_v19  ;;  %v14825_v37 = vmax.f32 %v14824_v51, 0.0  ;;  %v6141_v26 = vmax.f32 %v5629_v32, 0.0  ;;  %v14827_v19 = vld [vmem:[#allocation237_spill] sm:$0xff] }
 0x35f   : > { %v6778_v38 = vmax.f32 %v6522_v0, %v6650_v28  ;;  %v6520_v61 = vmax.f32 %v14823_v15, %v6136_v16  ;;  %v6397_v25 = vmax.f32 %v5885_v23, 0.0  ;;  %v5627_v62 = vadd.f32 %v13462_v63, %v5108_v40 }
 0x360   : > { %v6648_v4 = vmax.f32 %v14825_v37, %v6392_v30  ;;  %7416 = vst.msk [vmem:[%s11842_s12 + $0x1e0] sm:$0xf] %vm7295_vm1, %v8255_v3  ;;  %v5883_v27 = vadd.f32 %v13462_v63, %v5364_v59  ;;  %v5111_v60 = vmul.f32 %v13468_v7, %v13412_v20  ;;  %v5367_v36 = vmul.f32 %v13468_v7, %v14826_v22 }
 0x361   : > { %v8258_v10 = vpack.c.bf16 %v6778_v38, %v6778_v38  ;;  %v14828_v57 = vmax.f32 %v14827_v19, 0.0  ;;  %v14830_v41 = vmax.f32 %v14829_v12, 0.0  ;;  %v6139_v5 = vmax.f32 %v5627_v62, 0.0 }
 0x362   : > { %v6776_v33 = vmax.f32 %v6520_v61, %v6648_v4  ;;  %v6395_v24 = vmax.f32 %v5883_v27, 0.0  ;;  %v5630_v43 = vadd.f32 %v13462_v63, %v5111_v60  ;;  %v5886_v13 = vadd.f32 %v13462_v63, %v5367_v36 }
 0x363   : > { %v6525_v18 = vmax.f32 %v14828_v57, %v6141_v26  ;;  %v6653_v58 = vmax.f32 %v14830_v41, %v6397_v25  ;;  %7419 = vst.msk [vmem:[%s11842_s12 + $0x1ec] sm:$0xf] %vm7295_vm1, %v8258_v10  ;;  %v5109_v20 = vmul.f32 %v13468_v7, %v13422_v55  ;;  %v14832_v48 = vmax.f32 %v14831_v21, 0.0 }
 0x364   : > { %v8256_v8 = vpack.c.bf16 %v6776_v33, %v6776_v33  ;;  %v5365_v52 = vmul.f32 %v13468_v7, %v13428_v1  ;;  %v14834_v46 = vmax.f32 %v14833_v54, 0.0  ;;  %v6142_v45 = vmax.f32 %v5630_v43, 0.0  ;;  %v14838_v7 = vld [vmem:[#allocation242_spill] sm:$0xff] }
 0x365   : > { %v6781_v56 = vmax.f32 %v6525_v18, %v6653_v58  ;;  %v6523_v53 = vmax.f32 %v14832_v48, %v6139_v5  ;;  %v6398_v35 = vmax.f32 %v5886_v13, 0.0  ;;  %v5628_v39 = vadd.f32 %v13462_v63, %v5109_v20 }
 0x366   : > { %v6651_v34 = vmax.f32 %v14834_v46, %v6395_v24  ;;  %v6012_v44 = vmax.f32 %v14835_v29, 0.0  ;;  %7417 = vst.msk [vmem:[%s11842_s12 + $0x1e4] sm:$0xf] %vm7295_vm1, %v8256_v8  ;;  %v5884_v14 = vadd.f32 %v13462_v63, %v5365_v52  ;;  %v14837_v50 = vmax.f32 %v14836_v6, 0.0 }
 0x367   : > { %v8261_v55 = vpack.c.bf16 %v6781_v56, %v6781_v56  ;;  %v14839_v2 = vmax.f32 %v14838_v7, 0.0  ;;  %v6140_v47 = vmax.f32 %v5628_v39, 0.0  ;;  %v6268_v0 = vmax.f32 %v14840_v17, 0.0 }
 0x368   : > { %v6779_v9 = vmax.f32 %v6523_v53, %v6651_v34  ;;  %v6526_v1 = vmax.f32 %v14837_v50, %v6142_v45  ;;  %v6396_v11 = vmax.f32 %v5884_v14, 0.0 }
 0x369   : > { %v6654_v31 = vmax.f32 %v14839_v2, %v6398_v35  ;;  %7422 = vst.msk [vmem:[%s11842_s12 + $0x1f8] sm:$0xf] %vm7295_vm1, %v8261_v55  ;;  %v6524_v16 = vmax.f32 %v6012_v44, %v6140_v47 }
 0x36a   : > { %v8259_v42 = vpack.c.bf16 %v6779_v9, %v6779_v9  ;;  %v6652_v30 = vmax.f32 %v6268_v0, %v6396_v11 }
 0x36b   : > { %v6782_v28 = vmax.f32 %v6526_v1, %v6654_v31 }
 0x36c   : > { %7420 = vst.msk [vmem:[%s11842_s12 + $0x1f0] sm:$0xf] %vm7295_vm1, %v8259_v42  ;;  %v6780_v32 = vmax.f32 %v6524_v16, %v6652_v30 }
 0x36d   : > { %v8262_v63 = vpack.c.bf16 %v6782_v28, %v6782_v28 }
 0x36e   : > { %v8260_v23 = vpack.c.bf16 %v6780_v32, %v6780_v32 }
 0x36f   : > { %7423 = vst.msk [vmem:[%s11842_s12 + $0x1fc] sm:$0xf] %vm7295_vm1, %v8262_v63 }
 0x370   : > { %7421 = vst.msk [vmem:[%s11842_s12 + $0x1f4] sm:$0xf] %vm7295_vm1, %v8260_v23 }
 0x371 PF: > { %s14_s15 = sadd.s32 1, %s9317_s15  }
 0x372   : > { %p11_p4 = scmp.ge.s32.totalorder %s14_s15, 4  }
 0x374   :  { %13 = sbr.rel (!%p11_p4) target bundleno = 1 (0x1), region = 66 }

// kernel: deep2d_encoder_forward.7
= control target key start
LH: loop header
LB: loop body
LE: loop exit
PB: predicated region body
PF: predicated region fallthrough
CT: control target
= control target key end

     0   :  { %s4453_s15 = smov 0   ;;  %s5808_s0 = inlined_call_operand.vmem [shape: bf16[2,1024,288], index: 0, kind: input, shape index: {}]   ;;  %s5809_s1 = inlined_call_operand.vmem [shape: bf16[288,32], index: 1, kind: input, shape index: {}]   ;;  %s5810_s2 = inlined_call_operand.vmem [shape: f32[1,32], index: 2, kind: input, shape index: {}]   ;;  %s5811_s3 = inlined_call_operand.vmem [shape: f32[1,32], index: 3, kind: input, shape index: {}]   ;;  %s5812_s4 = inlined_call_operand.vmem [shape: bf16[2,256,32], index: 4, kind: output, shape index: {}]  }
   0x1 LB: > { %s3552_s16 = sadd.s32 4294967295, %s4425_s15   ;;  %p3556_p0 = scmp.ge.s32.totalorder %s4425_s15, 1  ;;  %s4425_s15 = sphi %s4453_s15, %s14_s15  }
   0x2   : > { %p162_p1 = scmp.lt.s32.totalorder %s4425_s15, 3 }
   0x4   : > { %p163_p2 = pnand %p3556_p0, %p162_p1 }
   0x6   : > { %166 = sbr.rel (%p163_p2) target bundleno = 695 (0x2b7), region = 36 }
   0xd   : > { %v4143_v0 = vld [vmem:[%s5809_s1] sm:$0xff]   ;;  %v4427_v1 = vmov 0   ;;  %v4144_v2 = vld [vmem:[%s5809_s1 + $0x8] sm:$0xff]   ;;  %p188_p3 = scmp.lt.s32.totalorder %s3552_s16, 1  ;;  %v4145_v3 = vld [vmem:[%s5809_s1 + $0x10] sm:$0xff]   ;;  %vm1559_vm0 = vcmask 261120  }
   0xe   : > { %1752 = vmatprep.subr.bf16.mxu0 %v4427_v1  ;;  %4101 = vmatprep.subr.bf16.mxu1 %v4427_v1  ;;  %v4146_v4 = vld [vmem:[%s5809_s1 + $0x18] sm:$0xff]   ;;  %v4147_v5 = vld [vmem:[%s5809_s1 + $0x20] sm:$0xff]   ;;  %v4148_v7 = vld [vmem:[%s5809_s1 + $0x28] sm:$0xff]   ;;  %vm3464_vm1 = vcmask 257024  }
   0xf   : > { %1753 = vmatpush1.bf16.msra.mxu0 %v4143_v0  ;;  %4117 = vmatpush1.bf16.msra.mxu1 %v4143_v0  ;;  %s5947_s16 = smov (!%p188_p3, %s3552_s16), 1  ;;  %v4149_v9 = vld [vmem:[%s5809_s1 + $0x30] sm:$0xff]   ;;  %v4150_v10 = vld [vmem:[%s5809_s1 + $0x38] sm:$0xff]   ;;  %v4151_v11 = vld [vmem:[%s5809_s1 + $0x40] sm:$0xff]  }
  0x10   : > { %1754 = vmatprep.subr.bf16.mxu0 %v4427_v1  ;;  %4102 = vmatprep.subr.bf16.mxu1 %v4427_v1  ;;  %s4133_s25 = smul.u32 1536, %s5947_s16  ;;  %v4152_v12 = vld [vmem:[%s5809_s1 + $0x48] sm:$0xff]   ;;  %v4153_v13 = vld [vmem:[%s5809_s1 + $0x50] sm:$0xff]   ;;  %v4154_v14 = vld [vmem:[%s5809_s1 + $0x58] sm:$0xff]   ;;  %s3870_s11 = sshll.u32 %s5947_s16, 7 }
  0x11   : > { %v4155_v15 = vld [vmem:[%s5809_s1 + $0x60] sm:$0xff]   ;;  %v4156_v16 = vld [vmem:[%s5809_s1 + $0x68] sm:$0xff]   ;;  %v4157_v17 = vld [vmem:[%s5809_s1 + $0x70] sm:$0xff]   ;;  %s5495_s13 = scalar_lea.vmem %s5812_s4, %s3870_s11 }
  0x12   : > { %s4490_s30 = scalar_lea.vmem %s5808_s0, %s4133_s25  ;;  %v4158_v18 = vld [vmem:[%s5809_s1 + $0x78] sm:$0xff]   ;;  %v4165_v19 = vld [vmem:[%s5809_s1 + $0x80] sm:$0xff]   ;;  %v4214_v24 = vld [vmem:[%s5809_s1 + $0x88] sm:$0xff]  }
  0x13   : > { %1755 = vmatpush1.bf16.msra.mxu0 %v4144_v2  ;;  %4118 = vmatpush1.bf16.msra.mxu1 %v4144_v2  ;;  %v4161_v6 = vld [vmem:[%s4490_s30 + $0x4] ss:$12 sps:$4 sm:$0xff]   ;;  %v4159_v20 = vld [vmem:[%s4490_s30] ss:$12 sps:$4 sm:$0xff]   ;;  %v4166_v22 = vld [vmem:[%s4490_s30 + $0x1c] ss:$12 sps:$4 sm:$0xff]  }
  0x14   : > { %1756 = vmatprep.subr.bf16.mxu0 %v4427_v1  ;;  %4103 = vmatprep.subr.bf16.mxu1 %v4427_v1  ;;  %v4164_v8 = vld [vmem:[%s4490_s30 + $0x484] ss:$12 sps:$4 sm:$0xff]   ;;  %v4162_v21 = vld [vmem:[%s4490_s30 + $0x480] ss:$12 sps:$4 sm:$0xff]   ;;  %v4168_v23 = vld [vmem:[%s4490_s30 + $0x49c] ss:$12 sps:$4 sm:$0xff]  }
  0x15   : > { %1784 = vmatprep.mubr.bf16.mxu0 %v4161_v6  ;;  %2168 = vmatprep.mubr.bf16.mxu1 %v4164_v8  ;;  %v4170_v25 = vld [vmem:[%s4490_s30 + $0x18] ss:$12 sps:$4 sm:$0xff]   ;;  %v4172_v27 = vld [vmem:[%s4490_s30 + $0x34] ss:$12 sps:$4 sm:$0xff]   ;;  %v4176_v29 = vld [vmem:[%s4490_s30 + $0x30] ss:$12 sps:$4 sm:$0xff]  }
  0x16   : > { %v4171_v26 = vld [vmem:[%s4490_s30 + $0x498] ss:$12 sps:$4 sm:$0xff]   ;;  %v4174_v28 = vld [vmem:[%s4490_s30 + $0x4b4] ss:$12 sps:$4 sm:$0xff]   ;;  %v4177_v30 = vld [vmem:[%s4490_s30 + $0x4b0] ss:$12 sps:$4 sm:$0xff]  }
  0x17   : > { %1757 = vmatpush1.bf16.msra.mxu0 %v4145_v3  ;;  %4119 = vmatpush1.bf16.msra.mxu1 %v4145_v3  ;;  %v4178_v31 = vld [vmem:[%s4490_s30 + $0x4c] ss:$12 sps:$4 sm:$0xff]   ;;  %v4182_v33 = vld [vmem:[%s4490_s30 + $0x48] ss:$12 sps:$4 sm:$0xff]   ;;  %v4184_v35 = vld [vmem:[%s4490_s30 + $0x64] ss:$12 sps:$4 sm:$0xff]  }
  0x18   : > { %1758 = vmatprep.subr.bf16.mxu0 %v4427_v1  ;;  %4104 = vmatprep.subr.bf16.mxu1 %v4427_v1  ;;  %v4180_v32 = vld [vmem:[%s4490_s30 + $0x4cc] ss:$12 sps:$4 sm:$0xff]   ;;  %v4183_v34 = vld [vmem:[%s4490_s30 + $0x4c8] ss:$12 sps:$4 sm:$0xff]   ;;  %v4186_v36 = vld [vmem:[%s4490_s30 + $0x4e4] ss:$12 sps:$4 sm:$0xff]  }
  0x19   : > { %v4188_v37 = vld [vmem:[%s4490_s30 + $0x60] ss:$12 sps:$4 sm:$0xff]   ;;  %v4190_v39 = vld [vmem:[%s4490_s30 + $0x7c] ss:$12 sps:$4 sm:$0xff]   ;;  %v4194_v41 = vld [vmem:[%s4490_s30 + $0x78] ss:$12 sps:$4 sm:$0xff]  }
  0x1a   : > { %v4189_v38 = vld [vmem:[%s4490_s30 + $0x4e0] ss:$12 sps:$4 sm:$0xff]   ;;  %v4192_v40 = vld [vmem:[%s4490_s30 + $0x4fc] ss:$12 sps:$4 sm:$0xff]   ;;  %v4195_v42 = vld [vmem:[%s4490_s30 + $0x4f8] ss:$12 sps:$4 sm:$0xff]  }
  0x1b   : > { %1759 = vmatpush1.bf16.msra.mxu0 %v4146_v4  ;;  %4120 = vmatpush1.bf16.msra.mxu1 %v4146_v4  ;;  %v4196_v43 = vld [vmem:[%s4490_s30 + $0x94] ss:$12 sps:$4 sm:$0xff]   ;;  %v4200_v45 = vld [vmem:[%s4490_s30 + $0x90] ss:$12 sps:$4 sm:$0xff]   ;;  %v4202_v47 = vld [vmem:[%s4490_s30 + $0xac] ss:$12 sps:$4 sm:$0xff]  }
  0x1c   : > { %1760 = vmatprep.subr.bf16.mxu0 %v4427_v1  ;;  %4105 = vmatprep.subr.bf16.mxu1 %v4427_v1  ;;  %v4198_v44 = vld [vmem:[%s4490_s30 + $0x514] ss:$12 sps:$4 sm:$0xff]   ;;  %v4201_v46 = vld [vmem:[%s4490_s30 + $0x510] ss:$12 sps:$4 sm:$0xff]   ;;  %v4204_v48 = vld [vmem:[%s4490_s30 + $0x52c] ss:$12 sps:$4 sm:$0xff]  }
  0x1d   : > { %v4206_v49 = vld [vmem:[%s4490_s30 + $0xa8] ss:$12 sps:$4 sm:$0xff]   ;;  %v4208_v51 = vld [vmem:[%s4490_s30 + $0xc4] ss:$12 sps:$4 sm:$0xff]   ;;  %v4212_v53 = vld [vmem:[%s4490_s30 + $0xc0] ss:$12 sps:$4 sm:$0xff]  }
  0x1e   : > { %v4207_v50 = vld [vmem:[%s4490_s30 + $0x528] ss:$12 sps:$4 sm:$0xff]   ;;  %v4210_v52 = vld [vmem:[%s4490_s30 + $0x544] ss:$12 sps:$4 sm:$0xff]   ;;  %v4213_v54 = vld [vmem:[%s4490_s30 + $0x540] ss:$12 sps:$4 sm:$0xff]  }
  0x1f   : > { %1761 = vmatpush1.bf16.msra.mxu0 %v4147_v5  ;;  %4121 = vmatpush1.bf16.msra.mxu1 %v4147_v5  ;;  %v4215_v55 = vld [vmem:[%s4490_s30 + $0xdc] ss:$12 sps:$4 sm:$0xff]   ;;  %v4219_v57 = vld [vmem:[%s4490_s30 + $0xd8] ss:$12 sps:$4 sm:$0xff]   ;;  %v4221_v59 = vld [vmem:[%s4490_s30 + $0xf4] ss:$12 sps:$4 sm:$0xff]  }
  0x20   : > { %1762 = vmatprep.subr.bf16.mxu0 %v4427_v1  ;;  %4106 = vmatprep.subr.bf16.mxu1 %v4427_v1  ;;  %v4217_v56 = vld [vmem:[%s4490_s30 + $0x55c] ss:$12 sps:$4 sm:$0xff]   ;;  %v4220_v58 = vld [vmem:[%s4490_s30 + $0x558] ss:$12 sps:$4 sm:$0xff]   ;;  %v4223_v60 = vld [vmem:[%s4490_s30 + $0x574] ss:$12 sps:$4 sm:$0xff]  }
  0x21   : > { %v4225_v61 = vld [vmem:[%s4490_s30 + $0xf0] ss:$12 sps:$4 sm:$0xff]   ;;  %v4227_v63 = vld [vmem:[%s4490_s30 + $0x10c] ss:$12 sps:$4 sm:$0xff]   ;;  %v4232_v2 = vld [vmem:[%s4490_s30 + $0x588] ss:$12 sps:$4 sm:$0xff]  }
  0x22   : > { %v4226_v62 = vld [vmem:[%s4490_s30 + $0x570] ss:$12 sps:$4 sm:$0xff]   ;;  %v4229_v0 = vld [vmem:[%s4490_s30 + $0x58c] ss:$12 sps:$4 sm:$0xff]  }
  0x23   : > { %1763 = vmatpush1.bf16.msra.mxu0 %v4148_v7  ;;  %4122 = vmatpush1.bf16.msra.mxu1 %v4148_v7  ;;  %v4233_v3 = vld [vmem:[%s4490_s30 + $0x124] ss:$12 sps:$4 sm:$0xff]   ;;  %v4237_v5 = vld [vmem:[%s4490_s30 + $0x120] ss:$12 sps:$4 sm:$0xff]   ;;  %v4239_v7 = vld [vmem:[%s4490_s30 + $0x13c] ss:$12 sps:$4 sm:$0xff]  }
  0x24   : > { %1764 = vmatprep.subr.bf16.mxu0 %v4427_v1  ;;  %4107 = vmatprep.subr.bf16.mxu1 %v4427_v1  ;;  %v4235_v4 = vld [vmem:[%s4490_s30 + $0x5a4] ss:$12 sps:$4 sm:$0xff]   ;;  %v4238_v6 = vld [vmem:[%s4490_s30 + $0x5a0] ss:$12 sps:$4 sm:$0xff]   ;;  %v4241_v8 = vld [vmem:[%s4490_s30 + $0x5bc] ss:$12 sps:$4 sm:$0xff]  }
  0x27   : > { %1765 = vmatpush1.bf16.msra.mxu0 %v4149_v9  ;;  %4123 = vmatpush1.bf16.msra.mxu1 %v4149_v9  ;;  %v4243_v9 = vld [vmem:[%s4490_s30 + $0x138] ss:$12 sps:$4 sm:$0xff]  }
  0x28   : > { %1766 = vmatprep.subr.bf16.mxu0 %v4427_v1  ;;  %4108 = vmatprep.subr.bf16.mxu1 %v4427_v1 }
  0x2b   : > { %1767 = vmatpush1.bf16.msra.mxu0 %v4150_v10  ;;  %4124 = vmatpush1.bf16.msra.mxu1 %v4150_v10  ;;  %v4244_v10 = vld [vmem:[%s4490_s30 + $0x5b8] ss:$12 sps:$4 sm:$0xff]  }
  0x2c   : > { %1768 = vmatprep.subr.bf16.mxu0 %v4427_v1  ;;  %4109 = vmatprep.subr.bf16.mxu1 %v4427_v1 }
  0x2f   : > { %1769 = vmatpush1.bf16.msra.mxu0 %v4151_v11  ;;  %4125 = vmatpush1.bf16.msra.mxu1 %v4151_v11  ;;  %v4245_v11 = vld [vmem:[%s4490_s30 + $0x154] ss:$12 sps:$4 sm:$0xff]  }
  0x30   : > { %1770 = vmatprep.subr.bf16.mxu0 %v4427_v1  ;;  %4110 = vmatprep.subr.bf16.mxu1 %v4427_v1 }
  0x33   : > { %1771 = vmatpush1.bf16.msra.mxu0 %v4152_v12  ;;  %4126 = vmatpush1.bf16.msra.mxu1 %v4152_v12  ;;  %v4247_v12 = vld [vmem:[%s4490_s30 + $0x5d4] ss:$12 sps:$4 sm:$0xff]  }
  0x34   : > { %1772 = vmatprep.subr.bf16.mxu0 %v4427_v1  ;;  %4111 = vmatprep.subr.bf16.mxu1 %v4427_v1 }
  0x37   : > { %1773 = vmatpush1.bf16.msra.mxu0 %v4153_v13  ;;  %4127 = vmatpush1.bf16.msra.mxu1 %v4153_v13  ;;  %v4249_v13 = vld [vmem:[%s4490_s30 + $0x150] ss:$12 sps:$4 sm:$0xff]  }
  0x38   : > { %1774 = vmatprep.subr.bf16.mxu0 %v4427_v1  ;;  %4112 = vmatprep.subr.bf16.mxu1 %v4427_v1 }
  0x3b   : > { %1775 = vmatpush1.bf16.msra.mxu0 %v4154_v14  ;;  %4128 = vmatpush1.bf16.msra.mxu1 %v4154_v14  ;;  %v4250_v14 = vld [vmem:[%s4490_s30 + $0x5d0] ss:$12 sps:$4 sm:$0xff]  }
  0x3c   : > { %1776 = vmatprep.subr.bf16.mxu0 %v4427_v1  ;;  %4113 = vmatprep.subr.bf16.mxu1 %v4427_v1 }
  0x3f   : > { %1777 = vmatpush1.bf16.msra.mxu0 %v4155_v15  ;;  %4129 = vmatpush1.bf16.msra.mxu1 %v4155_v15  ;;  %v4251_v15 = vld [vmem:[%s4490_s30 + $0x16c] ss:$12 sps:$4 sm:$0xff]  }
  0x40   : > { %1778 = vmatprep.subr.bf16.mxu0 %v4427_v1  ;;  %4114 = vmatprep.subr.bf16.mxu1 %v4427_v1 }
  0x43   : > { %1779 = vmatpush1.bf16.msra.mxu0 %v4156_v16  ;;  %4130 = vmatpush1.bf16.msra.mxu1 %v4156_v16  ;;  %v4253_v16 = vld [vmem:[%s4490_s30 + $0x5ec] ss:$12 sps:$4 sm:$0xff]  }
  0x44   : > { %1780 = vmatprep.subr.bf16.mxu0 %v4427_v1  ;;  %4115 = vmatprep.subr.bf16.mxu1 %v4427_v1 }
  0x47   : > { %1781 = vmatpush1.bf16.msra.mxu0 %v4157_v17  ;;  %4131 = vmatpush1.bf16.msra.mxu1 %v4157_v17  ;;  %v4255_v17 = vld [vmem:[%s4490_s30 + $0x168] ss:$12 sps:$4 sm:$0xff]  }
  0x48   : > { %1782 = vmatprep.subr.bf16.mxu0 %v4427_v1  ;;  %4116 = vmatprep.subr.bf16.mxu1 %v4427_v1  ;;  %v4231_v1 = vld [vmem:[%s4490_s30 + $0x108] ss:$12 sps:$4 sm:$0xff]  }
  0x4b   : > { %1783 = vmatpush1.bf16.msra.mxu0 %v4158_v18  ;;  %4132 = vmatpush1.bf16.msra.mxu1 %v4158_v18  ;;  %v4256_v18 = vld [vmem:[%s4490_s30 + $0x5e8] ss:$12 sps:$4 sm:$0xff]  }
  0x4c   : > { %3969 = vmatprep.subr.bf16.mxu1 %v4165_v19 }
  0x4e   : > { %1785 = vmatmul.mubr.bf16.vlgmr.msra.gmra.mrb[0].mxu0 %v4159_v20  ;;  %2169 = vmatmul.mubr.bf16.vlgmr.msra.gmra.mrb[0].mxu1 %v4162_v21  ;;  %v4259_v20 = vld [vmem:[%s4490_s30 + $0x8] ss:$12 sps:$4 sm:$0xff]   ;;  %v4260_v21 = vld [vmem:[%s4490_s30 + $0x180] ss:$12 sps:$4 sm:$0xff]  }
  0x4f   : > { %3970 = vmatpush3.bf16.msra.mxu1 %v4165_v19  ;;  %1792 = vmatprep.mubr.bf16.mxu0 %v4166_v22  ;;  %v4257_v19 = vld [vmem:[%s4490_s30 + $0x184] ss:$12 sps:$4 sm:$0xff]   ;;  %v4261_v22 = vld [vmem:[%s4490_s30 + $0x20] ss:$12 sps:$4 sm:$0xff]  }
  0x50   : > { %2176 = vmatprep.mubr.bf16.mxu1 %v4168_v23  ;;  %3971 = vmatprep.subr.bf16.mxu1 %v4214_v24  ;;  %v4262_v23 = vld [vmem:[%s4490_s30 + $0x19c] ss:$12 sps:$4 sm:$0xff]  }
  0x53   : > { %3972 = vmatpush3.bf16.msra.mxu1 %v4214_v24  ;;  %v4264_v24 = vld [vmem:[%s4490_s30 + $0x38] ss:$12 sps:$4 sm:$0xff]  }
  0x56   : > { %1793 = vmatmul.mubr.bf16.gmra.mrb[4].mxu0 %v4170_v25  ;;  %2177 = vmatmul.mubr.bf16.gmra.mrb[4].mxu1 %v4171_v26  ;;  %v4265_v25 = vld [vmem:[%s4490_s30 + $0x198] ss:$12 sps:$4 sm:$0xff]   ;;  %v4266_v26 = vld [vmem:[%s4490_s30 + $0x50] ss:$12 sps:$4 sm:$0xff]  }
  0x57   : > { %1800 = vmatprep.mubr.bf16.mxu0 %v4172_v27  ;;  %2184 = vmatprep.mubr.bf16.mxu1 %v4174_v28  ;;  %v4267_v27 = vld [vmem:[%s4490_s30 + $0x1b4] ss:$12 sps:$4 sm:$0xff]  }
  0x58   : > { %v4269_v28 = vld [vmem:[%s4490_s30 + $0x68] ss:$12 sps:$4 sm:$0xff]  }
  0x5e   : > { %1801 = vmatmul.mubr.bf16.gmra.mrb[8].mxu0 %v4176_v29  ;;  %2185 = vmatmul.mubr.bf16.gmra.mrb[8].mxu1 %v4177_v30  ;;  %v4270_v29 = vld [vmem:[%s4490_s30 + $0x1b0] ss:$12 sps:$4 sm:$0xff]   ;;  %v4271_v30 = vld [vmem:[%s4490_s30 + $0x80] ss:$12 sps:$4 sm:$0xff]  }
  0x5f   : > { %1808 = vmatprep.mubr.bf16.mxu0 %v4178_v31  ;;  %2192 = vmatprep.mubr.bf16.mxu1 %v4180_v32  ;;  %v4272_v31 = vld [vmem:[%s4490_s30 + $0x1cc] ss:$12 sps:$4 sm:$0xff]  }
  0x60   : > { %v4274_v32 = vld [vmem:[%s4490_s30 + $0x98] ss:$12 sps:$4 sm:$0xff]  }
  0x66   : > { %1809 = vmatmul.mubr.bf16.gmra.mrb[12].mxu0 %v4182_v33  ;;  %2193 = vmatmul.mubr.bf16.gmra.mrb[12].mxu1 %v4183_v34  ;;  %v4275_v33 = vld [vmem:[%s4490_s30 + $0x1c8] ss:$12 sps:$4 sm:$0xff]   ;;  %v4276_v34 = vld [vmem:[%s4490_s30 + $0xb0] ss:$12 sps:$4 sm:$0xff]  }
  0x67   : > { %1816 = vmatprep.mubr.bf16.mxu0 %v4184_v35  ;;  %2200 = vmatprep.mubr.bf16.mxu1 %v4186_v36  ;;  %v4277_v35 = vld [vmem:[%s4490_s30 + $0x1e4] ss:$12 sps:$4 sm:$0xff]   ;;  %v4279_v36 = vld [vmem:[%s4490_s30 + $0xc8] ss:$12 sps:$4 sm:$0xff]  }
  0x6e   : > { %1817 = vmatmul.mubr.bf16.gmra.mrb[16].mxu0 %v4188_v37  ;;  %2201 = vmatmul.mubr.bf16.gmra.mrb[16].mxu1 %v4189_v38  ;;  %v4280_v37 = vld [vmem:[%s4490_s30 + $0x1e0] ss:$12 sps:$4 sm:$0xff]  }
  0x6f   : > { %1824 = vmatprep.mubr.bf16.mxu0 %v4190_v39  ;;  %2208 = vmatprep.mubr.bf16.mxu1 %v4192_v40  ;;  %v4281_v38 = vld [vmem:[%s4490_s30 + $0xe0] ss:$12 sps:$4 sm:$0xff]   ;;  %v4282_v39 = vld [vmem:[%s4490_s30 + $0x1fc] ss:$12 sps:$4 sm:$0xff]   ;;  %v4284_v40 = vld [vmem:[%s4490_s30 + $0xf8] ss:$12 sps:$4 sm:$0xff]  }
  0x76   : > { %1825 = vmatmul.mubr.bf16.gmra.mrb[20].mxu0 %v4194_v41  ;;  %2209 = vmatmul.mubr.bf16.gmra.mrb[20].mxu1 %v4195_v42  ;;  %v4285_v41 = vld [vmem:[%s4490_s30 + $0x1f8] ss:$12 sps:$4 sm:$0xff]   ;;  %v4286_v42 = vld [vmem:[%s4490_s30 + $0x110] ss:$12 sps:$4 sm:$0xff]  }
  0x77   : > { %1832 = vmatprep.mubr.bf16.mxu0 %v4196_v43  ;;  %2216 = vmatprep.mubr.bf16.mxu1 %v4198_v44  ;;  %v4287_v43 = vld [vmem:[%s4490_s30 + $0x214] ss:$12 sps:$4 sm:$0xff]  }
  0x78   : > { %v4289_v44 = vld [vmem:[%s4490_s30 + $0x128] ss:$12 sps:$4 sm:$0xff]  }
  0x7e   : > { %1833 = vmatmul.mubr.bf16.gmra.mrb[24].mxu0 %v4200_v45  ;;  %2217 = vmatmul.mubr.bf16.gmra.mrb[24].mxu1 %v4201_v46  ;;  %v4290_v45 = vld [vmem:[%s4490_s30 + $0x210] ss:$12 sps:$4 sm:$0xff]   ;;  %v4291_v46 = vld [vmem:[%s4490_s30 + $0x140] ss:$12 sps:$4 sm:$0xff]  }
  0x7f   : > { %1840 = vmatprep.mubr.bf16.mxu0 %v4202_v47  ;;  %2224 = vmatprep.mubr.bf16.mxu1 %v4204_v48  ;;  %v4292_v47 = vld [vmem:[%s4490_s30 + $0x22c] ss:$12 sps:$4 sm:$0xff]  }
  0x80   : > { %v4294_v48 = vld [vmem:[%s4490_s30 + $0x158] ss:$12 sps:$4 sm:$0xff]  }
  0x86   : > { %1841 = vmatmul.mubr.bf16.gmra.mrb[28].mxu0 %v4206_v49  ;;  %2225 = vmatmul.mubr.bf16.gmra.mrb[28].mxu1 %v4207_v50  ;;  %v4295_v49 = vld [vmem:[%s4490_s30 + $0x228] ss:$12 sps:$4 sm:$0xff]   ;;  %v4296_v50 = vld [vmem:[%s4490_s30 + $0x170] ss:$12 sps:$4 sm:$0xff]  }
  0x87   : > { %1848 = vmatprep.mubr.bf16.mxu0 %v4208_v51  ;;  %2232 = vmatprep.mubr.bf16.mxu1 %v4210_v52  ;;  %v4297_v51 = vld [vmem:[%s4490_s30 + $0x244] ss:$12 sps:$4 sm:$0xff]   ;;  %v4299_v52 = vld [vmem:[%s4490_s30 + $0x188] ss:$12 sps:$4 sm:$0xff]  }
  0x8e   : > { %1849 = vmatmul.mubr.bf16.gmra.mrb[32].mxu0 %v4212_v53  ;;  %2233 = vmatmul.mubr.bf16.gmra.mrb[32].mxu1 %v4213_v54  ;;  %v4300_v53 = vld [vmem:[%s4490_s30 + $0x240] ss:$12 sps:$4 sm:$0xff]  }
  0x8f   : > { %1856 = vmatprep.mubr.bf16.mxu0 %v4215_v55  ;;  %2240 = vmatprep.mubr.bf16.mxu1 %v4217_v56  ;;  %v4301_v54 = vld [vmem:[%s4490_s30 + $0x1a0] ss:$12 sps:$4 sm:$0xff]   ;;  %v4302_v55 = vld [vmem:[%s4490_s30 + $0x25c] ss:$12 sps:$4 sm:$0xff]   ;;  %v4304_v56 = vld [vmem:[%s4490_s30 + $0x1b8] ss:$12 sps:$4 sm:$0xff]  }
  0x96   : > { %1857 = vmatmul.mubr.bf16.gmra.mrb[36].mxu0 %v4219_v57  ;;  %2241 = vmatmul.mubr.bf16.gmra.mrb[36].mxu1 %v4220_v58  ;;  %v4305_v57 = vld [vmem:[%s4490_s30 + $0x258] ss:$12 sps:$4 sm:$0xff]   ;;  %v4306_v58 = vld [vmem:[%s4490_s30 + $0x1d0] ss:$12 sps:$4 sm:$0xff]  }
  0x97   : > { %1864 = vmatprep.mubr.bf16.mxu0 %v4221_v59  ;;  %2248 = vmatprep.mubr.bf16.mxu1 %v4223_v60  ;;  %v4307_v59 = vld [vmem:[%s4490_s30 + $0x274] ss:$12 sps:$4 sm:$0xff]  }
  0x98   : > { %v4309_v60 = vld [vmem:[%s4490_s30 + $0x1e8] ss:$12 sps:$4 sm:$0xff]  }
  0x9e   : > { %1865 = vmatmul.mubr.bf16.gmra.mrb[40].mxu0 %v4225_v61  ;;  %2249 = vmatmul.mubr.bf16.gmra.mrb[40].mxu1 %v4226_v62  ;;  %v4310_v61 = vld [vmem:[%s4490_s30 + $0x270] ss:$12 sps:$4 sm:$0xff]   ;;  %v4311_v62 = vld [vmem:[%s4490_s30 + $0x200] ss:$12 sps:$4 sm:$0xff]  }
  0x9f   : > { %1872 = vmatprep.mubr.bf16.mxu0 %v4227_v63  ;;  %2256 = vmatprep.mubr.bf16.mxu1 %v4229_v0  ;;  %v4312_v63 = vld [vmem:[%s4490_s30 + $0x28c] ss:$12 sps:$4 sm:$0xff]  }
  0xa0   : > { %v4314_v0 = vld [vmem:[%s4490_s30 + $0x218] ss:$12 sps:$4 sm:$0xff]  }
  0xa6   : > { %1873 = vmatmul.mubr.bf16.gmra.mrb[44].mxu0 %v4231_v1  ;;  %2257 = vmatmul.mubr.bf16.gmra.mrb[44].mxu1 %v4232_v2 }
  0xa7   : > { %1880 = vmatprep.mubr.bf16.mxu0 %v4233_v3  ;;  %2264 = vmatprep.mubr.bf16.mxu1 %v4235_v4 }
  0xae   : > { %1881 = vmatmul.mubr.bf16.gmra.mrb[48].mxu0 %v4237_v5  ;;  %2265 = vmatmul.mubr.bf16.gmra.mrb[48].mxu1 %v4238_v6  ;;  %v4315_v5 = vld [vmem:[%s4490_s30 + $0x288] ss:$12 sps:$4 sm:$0xff]   ;;  %v4316_v6 = vld [vmem:[%s4490_s30 + $0x230] ss:$12 sps:$4 sm:$0xff]  }
  0xaf   : > { %1888 = vmatprep.mubr.bf16.mxu0 %v4239_v7  ;;  %2272 = vmatprep.mubr.bf16.mxu1 %v4241_v8 }
  0xb6   : > { %1889 = vmatmul.mubr.bf16.gmra.mrb[52].mxu0 %v4243_v9  ;;  %2273 = vmatmul.mubr.bf16.gmra.mrb[52].mxu1 %v4244_v10  ;;  %v4317_v9 = vld [vmem:[%s4490_s30 + $0x2a4] ss:$12 sps:$4 sm:$0xff]   ;;  %v4319_v10 = vld [vmem:[%s4490_s30 + $0x248] ss:$12 sps:$4 sm:$0xff]  }
  0xb7   : > { %1896 = vmatprep.mubr.bf16.mxu0 %v4245_v11  ;;  %2280 = vmatprep.mubr.bf16.mxu1 %v4247_v12 }
  0xbe   : > { %1897 = vmatmul.mubr.bf16.gmra.mrb[56].mxu0 %v4249_v13  ;;  %2281 = vmatmul.mubr.bf16.gmra.mrb[56].mxu1 %v4250_v14 }
  0xbf   : > { %1904 = vmatprep.mubr.bf16.mxu0 %v4251_v15  ;;  %2288 = vmatprep.mubr.bf16.mxu1 %v4253_v16 }
  0xc6   : > { %1905 = vmatmul.mubr.bf16.gmra.mrb[60].mxu0 %v4255_v17  ;;  %2289 = vmatmul.mubr.bf16.gmra.mrb[60].mxu1 %v4256_v18  ;;  %v4320_v17 = vld [vmem:[%s4490_s30 + $0x2a0] ss:$12 sps:$4 sm:$0xff]  }
  0xc7   : > { %1912 = vmatprep.mubr.bf16.mxu0 %v4257_v19  ;;  %3973 = vmatprep.mubr.msk.bf16.mxu1 %vm1559_vm0, %v4259_v20  ;;  %v4321_v18 = vld [vmem:[%s4490_s30 + $0x260] ss:$12 sps:$4 sm:$0xff]  }
  0xce   : > { %1913 = vmatmul.mubr.bf16.gmra.mrb[64].mxu0 %v4260_v21  ;;  %3974 = vmatmul.mubr.msk.bf16.vlgmr.msra.gmra.mrb[64].mxu1 %vm1559_vm0, %v4261_v22  ;;  %v4322_v21 = vld [vmem:[%s4490_s30 + $0x2bc] ss:$12 sps:$4 sm:$0xff]   ;;  %v4324_v22 = vld [vmem:[%s4490_s30 + $0x278] ss:$12 sps:$4 sm:$0xff]  }
  0xcf   : > { %1920 = vmatprep.mubr.bf16.mxu0 %v4262_v23  ;;  %3977 = vmatprep.mubr.msk.bf16.mxu1 %vm1559_vm0, %v4264_v24 }
  0xd6   : > { %1921 = vmatmul.mubr.bf16.gmra.mrb[68].mxu0 %v4265_v25  ;;  %3978 = vmatmul.mubr.msk.bf16.gmra.mrb[68].mxu1 %vm1559_vm0, %v4266_v26 }
  0xd7   : > { %1928 = vmatprep.mubr.bf16.mxu0 %v4267_v27  ;;  %3981 = vmatprep.mubr.msk.bf16.mxu1 %vm1559_vm0, %v4269_v28 }
  0xde   : > { %1929 = vmatmul.mubr.bf16.gmra.mrb[72].mxu0 %v4270_v29  ;;  %3982 = vmatmul.mubr.msk.bf16.gmra.mrb[72].mxu1 %vm1559_vm0, %v4271_v30  ;;  %v4325_v29 = vld [vmem:[%s4490_s30 + $0x2b8] ss:$12 sps:$4 sm:$0xff]   ;;  %v4326_v30 = vld [vmem:[%s4490_s30 + $0x290] ss:$12 sps:$4 sm:$0xff]  }
  0xdf   : > { %1936 = vmatprep.mubr.bf16.mxu0 %v4272_v31  ;;  %3985 = vmatprep.mubr.msk.bf16.mxu1 %vm1559_vm0, %v4274_v32 }
  0xe6   : > { %1937 = vmatmul.mubr.bf16.gmra.mrb[76].mxu0 %v4275_v33  ;;  %3986 = vmatmul.mubr.msk.bf16.gmra.mrb[76].mxu1 %vm1559_vm0, %v4276_v34  ;;  %v4327_v33 = vld [vmem:[%s4490_s30 + $0x2d4] ss:$12 sps:$4 sm:$0xff]  }
  0xe7   : > { %1944 = vmatprep.mubr.bf16.mxu0 %v4277_v35  ;;  %3989 = vmatprep.mubr.msk.bf16.mxu1 %vm1559_vm0, %v4279_v36  ;;  %v4329_v34 = vld [vmem:[%s4490_s30 + $0x2a8] ss:$12 sps:$4 sm:$0xff]  }
  0xee   : > { %1945 = vmatmul.mubr.bf16.gmra.mrb[80].mxu0 %v4280_v37  ;;  %3990 = vmatmul.mubr.msk.bf16.gmra.mrb[80].mxu1 %vm1559_vm0, %v4281_v38 }
  0xef   : > { %1952 = vmatprep.mubr.bf16.mxu0 %v4282_v39  ;;  %3993 = vmatprep.mubr.msk.bf16.mxu1 %vm1559_vm0, %v4284_v40 }
  0xf6   : > { %1953 = vmatmul.mubr.bf16.gmra.mrb[84].mxu0 %v4285_v41  ;;  %3994 = vmatmul.mubr.msk.bf16.gmra.mrb[84].mxu1 %vm1559_vm0, %v4286_v42  ;;  %v4330_v41 = vld [vmem:[%s4490_s30 + $0x2d0] ss:$12 sps:$4 sm:$0xff]   ;;  %v4331_v42 = vld [vmem:[%s4490_s30 + $0x2c0] ss:$12 sps:$4 sm:$0xff]  }
  0xf7   : > { %1960 = vmatprep.mubr.bf16.mxu0 %v4287_v43  ;;  %3997 = vmatprep.mubr.msk.bf16.mxu1 %vm1559_vm0, %v4289_v44 }
  0xfe   : > { %1961 = vmatmul.mubr.bf16.gmra.mrb[88].mxu0 %v4290_v45  ;;  %3998 = vmatmul.mubr.msk.bf16.gmra.mrb[88].mxu1 %vm1559_vm0, %v4291_v46  ;;  %v4332_v45 = vld [vmem:[%s4490_s30 + $0x2ec] ss:$12 sps:$4 sm:$0xff]  }
  0xff   : > { %1968 = vmatprep.mubr.bf16.mxu0 %v4292_v47  ;;  %4001 = vmatprep.mubr.msk.bf16.mxu1 %vm1559_vm0, %v4294_v48  ;;  %v4334_v46 = vld [vmem:[%s4490_s30 + $0x2d8] ss:$12 sps:$4 sm:$0xff]  }
 0x106   : > { %1969 = vmatmul.mubr.bf16.gmra.mrb[92].mxu0 %v4295_v49  ;;  %4002 = vmatmul.mubr.msk.bf16.gmra.mrb[92].mxu1 %vm1559_vm0, %v4296_v50 }
 0x107   : > { %1976 = vmatprep.mubr.bf16.mxu0 %v4297_v51  ;;  %4005 = vmatprep.mubr.msk.bf16.mxu1 %vm1559_vm0, %v4299_v52 }
 0x10e   : > { %1977 = vmatmul.mubr.bf16.gmra.mrb[96].mxu0 %v4300_v53  ;;  %4006 = vmatmul.mubr.msk.bf16.gmra.mrb[96].mxu1 %vm1559_vm0, %v4301_v54  ;;  %v4335_v53 = vld [vmem:[%s4490_s30 + $0x2e8] ss:$12 sps:$4 sm:$0xff]   ;;  %v4336_v54 = vld [vmem:[%s4490_s30 + $0x2f0] ss:$12 sps:$4 sm:$0xff]  }
 0x10f   : > { %1984 = vmatprep.mubr.bf16.mxu0 %v4302_v55  ;;  %4009 = vmatprep.mubr.msk.bf16.mxu1 %vm1559_vm0, %v4304_v56 }
 0x116   : > { %1985 = vmatmul.mubr.bf16.gmra.mrb[100].mxu0 %v4305_v57  ;;  %4010 = vmatmul.mubr.msk.bf16.gmra.mrb[100].mxu1 %vm1559_vm0, %v4306_v58  ;;  %v4337_v57 = vld [vmem:[%s4490_s30 + $0x304] ss:$12 sps:$4 sm:$0xff]   ;;  %v4339_v58 = vld [vmem:[%s4490_s30 + $0x308] ss:$12 sps:$4 sm:$0xff]  }
 0x117   : > { %1992 = vmatprep.mubr.bf16.mxu0 %v4307_v59  ;;  %4013 = vmatprep.mubr.msk.bf16.mxu1 %vm1559_vm0, %v4309_v60 }
 0x11e   : > { %1993 = vmatmul.mubr.bf16.gmra.mrb[104].mxu0 %v4310_v61  ;;  %4014 = vmatmul.mubr.msk.bf16.gmra.mrb[104].mxu1 %vm1559_vm0, %v4311_v62 }
 0x11f   : > { %2000 = vmatprep.mubr.bf16.mxu0 %v4312_v63  ;;  %4017 = vmatprep.mubr.msk.bf16.mxu1 %vm1559_vm0, %v4314_v0 }
 0x121   : > { %v4688_v1 = vpop.f32.mrb[0].mxu0  ;;  %v4690_v2 = vpop.f32.mrb[0].mxu1 }
 0x122   : > { %5813 = vst [vmem:[#allocation2_spill] sm:$0xff] %v4690_v2  ;;  %v1788_v3 = vpop.f32.mrb[1].mxu0  ;;  %v2172_v4 = vpop.f32.mrb[1].mxu1 }
 0x123   : > { %v4694_v7 = vpop.f32.mrb[2].mxu0  ;;  %v4696_v8 = vpop.f32.mrb[2].mxu1  ;;  %v4340_v3 = vld [vmem:[%s4490_s30 + $0x300] ss:$12 sps:$4 sm:$0xff]  }
 0x124   : > { %5814 = vst [vmem:[#allocation3_spill] sm:$0xff] %v4696_v8  ;;  %v1791_v11 = vpop.f32.mrb[3].mxu0  ;;  %v2175_v12 = vpop.f32.mrb[3].mxu1  ;;  %v4341_v4 = vld [vmem:[%s4490_s30 + $0x320] ss:$12 sps:$4 sm:$0xff]  }
 0x126   : > { %2001 = vmatmul.mubr.bf16.gmra.mrb[108].mxu0 %v4315_v5  ;;  %4018 = vmatmul.mubr.msk.bf16.gmra.mrb[108].mxu1 %vm1559_vm0, %v4316_v6 }
 0x127   : > { %2008 = vmatprep.mubr.bf16.mxu0 %v4317_v9  ;;  %4021 = vmatprep.mubr.msk.bf16.mxu1 %vm1559_vm0, %v4319_v10  ;;  %v4342_v9 = vld [vmem:[%s4490_s30 + $0x31c] ss:$12 sps:$4 sm:$0xff]   ;;  %v4344_v10 = vld [vmem:[%s4490_s30 + $0x338] ss:$12 sps:$4 sm:$0xff]  }
 0x129   : > { %v4702_v13 = vpop.f32.mrb[4].mxu0  ;;  %v4704_v14 = vpop.f32.mrb[4].mxu1 }
 0x12a   : > { %5815 = vst [vmem:[#allocation4_spill] sm:$0xff] %v4704_v14  ;;  %v1796_v15 = vpop.f32.mrb[5].mxu0  ;;  %v2180_v16 = vpop.f32.mrb[5].mxu1 }
 0x12b   : > { %v4708_v19 = vpop.f32.mrb[6].mxu0  ;;  %v4710_v20 = vpop.f32.mrb[6].mxu1 }
 0x12c   : > { %5816 = vst [vmem:[#allocation5_spill] sm:$0xff] %v4710_v20  ;;  %v1799_v23 = vpop.f32.mrb[7].mxu0  ;;  %v2183_v24 = vpop.f32.mrb[7].mxu1 }
 0x12e   : > { %2009 = vmatmul.mubr.bf16.gmra.mrb[112].mxu0 %v4320_v17  ;;  %4022 = vmatmul.mubr.msk.bf16.gmra.mrb[112].mxu1 %vm1559_vm0, %v4321_v18 }
 0x12f   : > { %2016 = vmatprep.mubr.bf16.mxu0 %v4322_v21  ;;  %4025 = vmatprep.mubr.msk.bf16.mxu1 %vm1559_vm0, %v4324_v22  ;;  %v4345_v21 = vld [vmem:[%s4490_s30 + $0x318] ss:$12 sps:$4 sm:$0xff]   ;;  %v4346_v22 = vld [vmem:[%s4490_s30 + $0x350] ss:$12 sps:$4 sm:$0xff]  }
 0x131   : > { %v4716_v25 = vpop.f32.mrb[8].mxu0  ;;  %v4718_v26 = vpop.f32.mrb[8].mxu1 }
 0x132   : > { %5817 = vst [vmem:[#allocation6_spill] sm:$0xff] %v4718_v26  ;;  %v1804_v27 = vpop.f32.mrb[9].mxu0  ;;  %v2188_v28 = vpop.f32.mrb[9].mxu1 }
 0x133   : > { %v4722_v31 = vpop.f32.mrb[10].mxu0  ;;  %v4724_v32 = vpop.f32.mrb[10].mxu1  ;;  %v4347_v27 = vld [vmem:[%s4490_s30 + $0x334] ss:$12 sps:$4 sm:$0xff]  }
 0x134   : > { %5818 = vst [vmem:[#allocation7_spill] sm:$0xff] %v4724_v32  ;;  %v1807_v35 = vpop.f32.mrb[11].mxu0  ;;  %v2191_v36 = vpop.f32.mrb[11].mxu1  ;;  %v4349_v28 = vld [vmem:[%s4490_s30 + $0x368] ss:$12 sps:$4 sm:$0xff]  }
 0x136   : > { %2017 = vmatmul.mubr.bf16.gmra.mrb[116].mxu0 %v4325_v29  ;;  %4026 = vmatmul.mubr.msk.bf16.gmra.mrb[116].mxu1 %vm1559_vm0, %v4326_v30 }
 0x137   : > { %2024 = vmatprep.mubr.bf16.mxu0 %v4327_v33  ;;  %4029 = vmatprep.mubr.msk.bf16.mxu1 %vm1559_vm0, %v4329_v34 }
 0x139   : > { %v4730_v37 = vpop.f32.mrb[12].mxu0  ;;  %v4732_v38 = vpop.f32.mrb[12].mxu1 }
 0x13a   : > { %5819 = vst [vmem:[#allocation8_spill] sm:$0xff] %v4732_v38  ;;  %v1812_v39 = vpop.f32.mrb[13].mxu0  ;;  %v2196_v40 = vpop.f32.mrb[13].mxu1 }
 0x13b   : > { %v4736_v43 = vpop.f32.mrb[14].mxu0  ;;  %v4738_v44 = vpop.f32.mrb[14].mxu1  ;;  %v4350_v39 = vld [vmem:[%s4490_s30 + $0x330] ss:$12 sps:$4 sm:$0xff]   ;;  %v4351_v40 = vld [vmem:[%s4490_s30 + $0x380] ss:$12 sps:$4 sm:$0xff]  }
 0x13c   : > { %5820 = vst [vmem:[#allocation9_spill] sm:$0xff] %v4738_v44  ;;  %v1815_v47 = vpop.f32.mrb[15].mxu0  ;;  %v2199_v48 = vpop.f32.mrb[15].mxu1 }
 0x13e   : > { %2025 = vmatmul.mubr.bf16.gmra.mrb[120].mxu0 %v4330_v41  ;;  %4030 = vmatmul.mubr.msk.bf16.gmra.mrb[120].mxu1 %vm1559_vm0, %v4331_v42 }
 0x13f   : > { %2032 = vmatprep.mubr.bf16.mxu0 %v4332_v45  ;;  %4033 = vmatprep.mubr.msk.bf16.mxu1 %vm1559_vm0, %v4334_v46  ;;  %v4352_v45 = vld [vmem:[%s4490_s30 + $0x34c] ss:$12 sps:$4 sm:$0xff]  }
 0x140   : > { %v4354_v46 = vld [vmem:[%s4490_s30 + $0x398] ss:$12 sps:$4 sm:$0xff]  }
 0x141   : > { %v4744_v49 = vpop.f32.mrb[16].mxu0  ;;  %v4746_v50 = vpop.f32.mrb[16].mxu1 }
 0x142   : > { %5821 = vst [vmem:[#allocation10_spill] sm:$0xff] %v4746_v50  ;;  %v1820_v51 = vpop.f32.mrb[17].mxu0  ;;  %v2204_v52 = vpop.f32.mrb[17].mxu1 }
 0x143   : > { %v4750_v55 = vpop.f32.mrb[18].mxu0  ;;  %v4752_v56 = vpop.f32.mrb[18].mxu1 }
 0x144   : > { %5822 = vst [vmem:[#allocation11_spill] sm:$0xff] %v4752_v56  ;;  %v1823_v59 = vpop.f32.mrb[19].mxu0  ;;  %v2207_v60 = vpop.f32.mrb[19].mxu1 }
 0x146   : > { %2033 = vmatmul.mubr.bf16.gmra.mrb[124].mxu0 %v4335_v53  ;;  %4034 = vmatmul.mubr.msk.bf16.gmra.mrb[124].mxu1 %vm1559_vm0, %v4336_v54 }
 0x147   : > { %2040 = vmatprep.mubr.bf16.mxu0 %v4337_v57  ;;  %4037 = vmatprep.mubr.msk.bf16.mxu1 %vm1559_vm0, %v4339_v58  ;;  %v4355_v57 = vld [vmem:[%s4490_s30 + $0x348] ss:$12 sps:$4 sm:$0xff]   ;;  %v4356_v58 = vld [vmem:[%s4490_s30 + $0x3b0] ss:$12 sps:$4 sm:$0xff]  }
 0x149   : > { %v4758_v61 = vpop.f32.mrb[20].mxu0  ;;  %v4760_v62 = vpop.f32.mrb[20].mxu1 }
 0x14a   : > { %5823 = vst [vmem:[#allocation12_spill] sm:$0xff] %v4760_v62  ;;  %v1828_v63 = vpop.f32.mrb[21].mxu0  ;;  %v2212_v0 = vpop.f32.mrb[21].mxu1 }
 0x14b   : > { %v4764_v5 = vpop.f32.mrb[22].mxu0  ;;  %v4766_v6 = vpop.f32.mrb[22].mxu1  ;;  %v4357_v63 = vld [vmem:[%s4490_s30 + $0x364] ss:$12 sps:$4 sm:$0xff]   ;;  %v4359_v0 = vld [vmem:[%s4490_s30 + $0x3c8] ss:$12 sps:$4 sm:$0xff]  }
 0x14c   : > { %5824 = vst [vmem:[#allocation13_spill] sm:$0xff] %v4766_v6  ;;  %v1831_v11 = vpop.f32.mrb[23].mxu0  ;;  %v2215_v12 = vpop.f32.mrb[23].mxu1 }
 0x14e   : > { %2041 = vmatmul.mubr.bf16.gmra.mrb[128].mxu0 %v4340_v3  ;;  %4038 = vmatmul.mubr.msk.bf16.gmra.mrb[128].mxu1 %vm1559_vm0, %v4341_v4 }
 0x14f   : > { %2048 = vmatprep.mubr.bf16.mxu0 %v4342_v9  ;;  %4041 = vmatprep.mubr.msk.bf16.mxu1 %vm1559_vm0, %v4344_v10 }
 0x151   : > { %v4772_v15 = vpop.f32.mrb[24].mxu0  ;;  %v4774_v16 = vpop.f32.mrb[24].mxu1 }
 0x152   : > { %5825 = vst [vmem:[#allocation14_spill] sm:$0xff] %v4774_v16  ;;  %v1836_v17 = vpop.f32.mrb[25].mxu0  ;;  %v2220_v18 = vpop.f32.mrb[25].mxu1  ;;  %v4411_v16 = vld [vmem:[%s4490_s30 + $0x5c0] ss:$12 sps:$4 sm:$0xff]  }
 0x153   : > { %v4778_v23 = vpop.f32.mrb[26].mxu0  ;;  %v4780_v24 = vpop.f32.mrb[26].mxu1  ;;  %v4360_v17 = vld [vmem:[%s4490_s30 + $0x360] ss:$12 sps:$4 sm:$0xff]  }
 0x154   : > { %5826 = vst [vmem:[#allocation15_spill] sm:$0xff] %v4780_v24  ;;  %v1839_v29 = vpop.f32.mrb[27].mxu0  ;;  %v2223_v30 = vpop.f32.mrb[27].mxu1  ;;  %v4361_v18 = vld [vmem:[%s4490_s30 + $0x3e0] ss:$12 sps:$4 sm:$0xff]  }
 0x155   : > { %v4406_v24 = vld [vmem:[%s4490_s30 + $0x590] ss:$12 sps:$4 sm:$0xff]  }
 0x156   : > { %2049 = vmatmul.mubr.bf16.gmra.mrb[132].mxu0 %v4345_v21  ;;  %4042 = vmatmul.mubr.msk.bf16.gmra.mrb[132].mxu1 %vm1559_vm0, %v4346_v22 }
 0x157   : > { %2056 = vmatprep.mubr.bf16.mxu0 %v4347_v27  ;;  %4045 = vmatprep.mubr.msk.bf16.mxu1 %vm1559_vm0, %v4349_v28  ;;  %v4362_v27 = vld [vmem:[%s4490_s30 + $0x37c] ss:$12 sps:$4 sm:$0xff]   ;;  %v4364_v28 = vld [vmem:[%s4490_s30 + $0x3f8] ss:$12 sps:$4 sm:$0xff]  }
 0x159   : > { %v4786_v33 = vpop.f32.mrb[28].mxu0  ;;  %v4788_v34 = vpop.f32.mrb[28].mxu1 }
 0x15a   : > { %5827 = vst [vmem:[#allocation16_spill] sm:$0xff] %v4788_v34  ;;  %v1844_v35 = vpop.f32.mrb[29].mxu0  ;;  %v2228_v36 = vpop.f32.mrb[29].mxu1 }
 0x15b   : > { %v4792_v41 = vpop.f32.mrb[30].mxu0  ;;  %v4794_v42 = vpop.f32.mrb[30].mxu1 }
 0x15c   : > { %5828 = vst [vmem:[#allocation17_spill] sm:$0xff] %v4794_v42  ;;  %v1847_v47 = vpop.f32.mrb[31].mxu0  ;;  %v2231_v48 = vpop.f32.mrb[31].mxu1 }
 0x15e   : > { %2057 = vmatmul.mubr.bf16.gmra.mrb[136].mxu0 %v4350_v39  ;;  %4046 = vmatmul.mubr.msk.bf16.gmra.mrb[136].mxu1 %vm1559_vm0, %v4351_v40 }
 0x15f   : > { %2064 = vmatprep.mubr.bf16.mxu0 %v4352_v45  ;;  %4049 = vmatprep.mubr.msk.bf16.mxu1 %vm1559_vm0, %v4354_v46  ;;  %v4365_v45 = vld [vmem:[%s4490_s30 + $0x378] ss:$12 sps:$4 sm:$0xff]   ;;  %v4366_v46 = vld [vmem:[%s4490_s30 + $0x410] ss:$12 sps:$4 sm:$0xff]  }
 0x161   : > { %v4800_v51 = vpop.f32.mrb[32].mxu0  ;;  %v4802_v52 = vpop.f32.mrb[32].mxu1 }
 0x162   : > { %5829 = vst [vmem:[#allocation18_spill] sm:$0xff] %v4802_v52  ;;  %v1852_v53 = vpop.f32.mrb[33].mxu0  ;;  %v2236_v54 = vpop.f32.mrb[33].mxu1  ;;  %v4401_v52 = vld [vmem:[%s4490_s30 + $0x560] ss:$12 sps:$4 sm:$0xff]  }
 0x163   : > { %v4806_v59 = vpop.f32.mrb[34].mxu0  ;;  %v4808_v60 = vpop.f32.mrb[34].mxu1  ;;  %v4367_v53 = vld [vmem:[%s4490_s30 + $0x394] ss:$12 sps:$4 sm:$0xff]  }
 0x164   : > { %5830 = vst [vmem:[#allocation19_spill] sm:$0xff] %v4808_v60  ;;  %v1855_v3 = vpop.f32.mrb[35].mxu0  ;;  %v2239_v4 = vpop.f32.mrb[35].mxu1  ;;  %v4369_v54 = vld [vmem:[%s4490_s30 + $0x428] ss:$12 sps:$4 sm:$0xff]  }
 0x165   : > { %v4396_v60 = vld [vmem:[%s4490_s30 + $0x530] ss:$12 sps:$4 sm:$0xff]  }
 0x166   : > { %2065 = vmatmul.mubr.bf16.gmra.mrb[140].mxu0 %v4355_v57  ;;  %4050 = vmatmul.mubr.msk.bf16.gmra.mrb[140].mxu1 %vm1559_vm0, %v4356_v58 }
 0x167   : > { %2072 = vmatprep.mubr.bf16.mxu0 %v4357_v63  ;;  %4053 = vmatprep.mubr.msk.bf16.mxu1 %vm1559_vm0, %v4359_v0 }
 0x169   : > { %v4814_v9 = vpop.f32.mrb[36].mxu0  ;;  %v4816_v10 = vpop.f32.mrb[36].mxu1 }
 0x16a   : > { %5831 = vst [vmem:[#allocation20_spill] sm:$0xff] %v4816_v10  ;;  %v1860_v11 = vpop.f32.mrb[37].mxu0  ;;  %v2244_v12 = vpop.f32.mrb[37].mxu1 }
 0x16b   : > { %v4820_v21 = vpop.f32.mrb[38].mxu0  ;;  %v4822_v22 = vpop.f32.mrb[38].mxu1  ;;  %v4370_v11 = vld [vmem:[%s4490_s30 + $0x390] ss:$12 sps:$4 sm:$0xff]   ;;  %v4371_v12 = vld [vmem:[%s4490_s30 + $0x440] ss:$12 sps:$4 sm:$0xff]  }
 0x16c   : > { %5832 = vst [vmem:[#allocation21_spill] sm:$0xff] %v4822_v22  ;;  %v1863_v29 = vpop.f32.mrb[39].mxu0  ;;  %v2247_v30 = vpop.f32.mrb[39].mxu1 }
 0x16e   : > { %2073 = vmatmul.mubr.bf16.gmra.mrb[144].mxu0 %v4360_v17  ;;  %4054 = vmatmul.mubr.msk.bf16.gmra.mrb[144].mxu1 %vm1559_vm0, %v4361_v18 }
 0x16f   : > { %2080 = vmatprep.mubr.bf16.mxu0 %v4362_v27  ;;  %4057 = vmatprep.mubr.msk.bf16.mxu1 %vm1559_vm0, %v4364_v28  ;;  %v4372_v27 = vld [vmem:[%s4490_s30 + $0x3ac] ss:$12 sps:$4 sm:$0xff]  }
 0x170   : > { %v4374_v28 = vld [vmem:[%s4490_s30 + $0x458] ss:$12 sps:$4 sm:$0xff]  }
 0x171   : > { %v4828_v35 = vpop.f32.mrb[40].mxu0  ;;  %v4830_v36 = vpop.f32.mrb[40].mxu1 }
 0x172   : > { %5833 = vst [vmem:[#allocation22_spill] sm:$0xff] %v4830_v36  ;;  %v1868_v39 = vpop.f32.mrb[41].mxu0  ;;  %v2252_v40 = vpop.f32.mrb[41].mxu1 }
 0x173   : > { %v4834_v47 = vpop.f32.mrb[42].mxu0  ;;  %v4836_v48 = vpop.f32.mrb[42].mxu1 }
 0x174   : > { %5834 = vst [vmem:[#allocation23_spill] sm:$0xff] %v4836_v48  ;;  %v1871_v57 = vpop.f32.mrb[43].mxu0  ;;  %v2255_v58 = vpop.f32.mrb[43].mxu1 }
 0x176   : > { %2081 = vmatmul.mubr.bf16.gmra.mrb[148].mxu0 %v4365_v45  ;;  %4058 = vmatmul.mubr.msk.bf16.gmra.mrb[148].mxu1 %vm1559_vm0, %v4366_v46 }
 0x177   : > { %2088 = vmatprep.mubr.bf16.mxu0 %v4367_v53  ;;  %4061 = vmatprep.mubr.msk.bf16.mxu1 %vm1559_vm0, %v4369_v54  ;;  %v4375_v53 = vld [vmem:[%s4490_s30 + $0x3a8] ss:$12 sps:$4 sm:$0xff]   ;;  %v4376_v54 = vld [vmem:[%s4490_s30 + $0x470] ss:$12 sps:$4 sm:$0xff]  }
 0x179   : > { %v4842_v63 = vpop.f32.mrb[44].mxu0  ;;  %v4844_v0 = vpop.f32.mrb[44].mxu1 }
 0x17a   : > { %5835 = vst [vmem:[#allocation24_spill] sm:$0xff] %v4844_v0  ;;  %v1876_v3 = vpop.f32.mrb[45].mxu0  ;;  %v2260_v4 = vpop.f32.mrb[45].mxu1  ;;  %v4395_v0 = vld [vmem:[%s4490_s30 + $0x408] ss:$12 sps:$4 sm:$0xff]  }
 0x17b   : > { %v4848_v17 = vpop.f32.mrb[46].mxu0  ;;  %v4850_v18 = vpop.f32.mrb[46].mxu1  ;;  %v4377_v3 = vld [vmem:[%s4490_s30 + $0x3c4] ss:$12 sps:$4 sm:$0xff]   ;;  %v4379_v4 = vld [vmem:[%s4490_s30 + $0x488] ss:$12 sps:$4 sm:$0xff]  }
 0x17c   : > { %5836 = vst [vmem:[#allocation25_spill] sm:$0xff] %v4850_v18  ;;  %v1879_v29 = vpop.f32.mrb[47].mxu0  ;;  %v2263_v30 = vpop.f32.mrb[47].mxu1  ;;  %v4390_v18 = vld [vmem:[%s4490_s30 + $0x3f0] ss:$12 sps:$4 sm:$0xff]  }
 0x17e   : > { %2089 = vmatmul.mubr.bf16.gmra.mrb[152].mxu0 %v4370_v11  ;;  %4062 = vmatmul.mubr.msk.bf16.gmra.mrb[152].mxu1 %vm1559_vm0, %v4371_v12 }
 0x17f   : > { %2096 = vmatprep.mubr.bf16.mxu0 %v4372_v27  ;;  %4065 = vmatprep.mubr.msk.bf16.mxu1 %vm1559_vm0, %v4374_v28 }
 0x181   : > { %v4856_v39 = vpop.f32.mrb[48].mxu0  ;;  %v4858_v40 = vpop.f32.mrb[48].mxu1 }
 0x182   : > { %5837 = vst [vmem:[#allocation26_spill] sm:$0xff] %v4858_v40  ;;  %v1884_v45 = vpop.f32.mrb[49].mxu0  ;;  %v2268_v46 = vpop.f32.mrb[49].mxu1 }
 0x183   : > { %v4862_v57 = vpop.f32.mrb[50].mxu0  ;;  %v4864_v58 = vpop.f32.mrb[50].mxu1  ;;  %v4380_v45 = vld [vmem:[%s4490_s30 + $0x3c0] ss:$12 sps:$4 sm:$0xff]  }
 0x184   : > { %5838 = vst [vmem:[#allocation27_spill] sm:$0xff] %v4864_v58  ;;  %v1887_v11 = vpop.f32.mrb[51].mxu0  ;;  %v2271_v12 = vpop.f32.mrb[51].mxu1  ;;  %v4381_v46 = vld [vmem:[%s4490_s30 + $0x4a0] ss:$12 sps:$4 sm:$0xff]  }
 0x186   : > { %2097 = vmatmul.mubr.bf16.gmra.mrb[156].mxu0 %v4375_v53  ;;  %4066 = vmatmul.mubr.msk.bf16.gmra.mrb[156].mxu1 %vm1559_vm0, %v4376_v54  ;;  %v4382_v53 = vld [vmem:[%s4490_s30 + $0x3dc] ss:$12 sps:$4 sm:$0xff]   ;;  %v4384_v54 = vld [vmem:[%s4490_s30 + $0x4b8] ss:$12 sps:$4 sm:$0xff]  }
 0x187   : > { %2104 = vmatprep.mubr.bf16.mxu0 %v4377_v3  ;;  %4069 = vmatprep.mubr.msk.bf16.mxu1 %vm1559_vm0, %v4379_v4 }
 0x189   : > { %v4870_v27 = vpop.f32.mrb[52].mxu0  ;;  %v4872_v28 = vpop.f32.mrb[52].mxu1 }
 0x18a   : > { %5839 = vst [vmem:[#allocation28_spill] sm:$0xff] %v4872_v28  ;;  %v1892_v29 = vpop.f32.mrb[53].mxu0  ;;  %v2276_v30 = vpop.f32.mrb[53].mxu1  ;;  %v4385_v28 = vld [vmem:[%s4490_s30 + $0x3d8] ss:$12 sps:$4 sm:$0xff]  }
 0x18b   : > { %v4876_v58 = vpop.f32.mrb[54].mxu0  ;;  %v4878_v11 = vpop.f32.mrb[54].mxu1 }
 0x18c   : > { %5840 = vst [vmem:[#allocation29_spill] sm:$0xff] %v4878_v11  ;;  %v1895_v3 = vpop.f32.mrb[55].mxu0  ;;  %v2279_v4 = vpop.f32.mrb[55].mxu1  ;;  %v4386_v11 = vld [vmem:[%s4490_s30 + $0x4d0] ss:$12 sps:$4 sm:$0xff]  }
 0x18e   : > { %2105 = vmatmul.mubr.bf16.gmra.mrb[160].mxu0 %v4380_v45  ;;  %4070 = vmatmul.mubr.msk.bf16.gmra.mrb[160].mxu1 %vm1559_vm0, %v4381_v46  ;;  %v4387_v45 = vld [vmem:[%s4490_s30 + $0x3f4] ss:$12 sps:$4 sm:$0xff]  }
 0x18f   : > { %2112 = vmatprep.mubr.bf16.mxu0 %v4382_v53  ;;  %4073 = vmatprep.mubr.msk.bf16.mxu1 %vm1559_vm0, %v4384_v54  ;;  %v4389_v46 = vld [vmem:[%s4490_s30 + $0x4e8] ss:$12 sps:$4 sm:$0xff]  }
 0x191   : > { %v4884_v12 = vpop.f32.mrb[56].mxu0  ;;  %v4886_v29 = vpop.f32.mrb[56].mxu1 }
 0x192   : > { %5841 = vst [vmem:[#allocation30_spill] sm:$0xff] %v4886_v29  ;;  %v1900_v30 = vpop.f32.mrb[57].mxu0  ;;  %v2284_v40 = vpop.f32.mrb[57].mxu1 }
 0x193   : > { %v4890_v48 = vpop.f32.mrb[58].mxu0  ;;  %v4892_v3 = vpop.f32.mrb[58].mxu1 }
 0x194   : > { %5842 = vst [vmem:[#allocation31_spill] sm:$0xff] %v4892_v3  ;;  %v1903_v53 = vpop.f32.mrb[59].mxu0  ;;  %v2287_v54 = vpop.f32.mrb[59].mxu1  ;;  %v4391_v3 = vld [vmem:[%s4490_s30 + $0x500] ss:$12 sps:$4 sm:$0xff]  }
 0x195   : > { %v4394_v54 = vld [vmem:[%s4490_s30 + $0x518] ss:$12 sps:$4 sm:$0xff]  }
 0x196   : > { %2113 = vmatmul.mubr.bf16.gmra.mrb[164].mxu0 %v4385_v28  ;;  %4074 = vmatmul.mubr.msk.bf16.gmra.mrb[164].mxu1 %vm1559_vm0, %v4386_v11  ;;  %v4392_v28 = vld [vmem:[%s4490_s30 + $0x40c] ss:$12 sps:$4 sm:$0xff]  }
 0x197   : > { %2120 = vmatprep.mubr.bf16.mxu0 %v4387_v45  ;;  %4077 = vmatprep.mubr.msk.bf16.mxu1 %vm1559_vm0, %v4389_v46 }
 0x199   : > { %v4898_v40 = vpop.f32.mrb[60].mxu0  ;;  %v4900_v4 = vpop.f32.mrb[60].mxu1 }
 0x19a   : > { %5843 = vst [vmem:[#allocation32_spill] sm:$0xff] %v4900_v4  ;;  %v1908_v30 = vpop.f32.mrb[61].mxu0  ;;  %v2292_v29 = vpop.f32.mrb[61].mxu1 }
 0x19b   : > { %v4904_v36 = vpop.f32.mrb[62].mxu0  ;;  %v4906_v53 = vpop.f32.mrb[62].mxu1 }
 0x19c   : > { %5844 = vst [vmem:[#allocation33_spill] sm:$0xff] %v4906_v53  ;;  %v1911_v11 = vpop.f32.mrb[63].mxu0  ;;  %v2295_v45 = vpop.f32.mrb[63].mxu1 }
 0x19e   : > { %2121 = vmatmul.mubr.bf16.gmra.mrb[168].mxu0 %v4390_v18  ;;  %4078 = vmatmul.mubr.msk.bf16.gmra.mrb[168].mxu1 %vm1559_vm0, %v4391_v3  ;;  %v4397_v3 = vld [vmem:[%s4490_s30 + $0x424] ss:$12 sps:$4 sm:$0xff]  }
 0x19f   : > { %2128 = vmatprep.mubr.bf16.mxu0 %v4392_v28  ;;  %4081 = vmatprep.mubr.msk.bf16.mxu1 %vm1559_vm0, %v4394_v54  ;;  %v4399_v28 = vld [vmem:[%s4490_s30 + $0x548] ss:$12 sps:$4 sm:$0xff]  }
 0x1a1   : > { %v4912_v29 = vpop.f32.mrb[64].mxu0  ;;  %v3975_v46 = vpop.f32.mrb[64].mxu1 }
 0x1a2   : > { %v4915_v30 = vadd.f32 %v3975_v46, %v4702_v13  ;;  %v1916_v4 = vpop.f32.mrb[65].mxu0  ;;  %v2331_v53 = vpop.f32.mrb[65].mxu1 }
 0x1a3   : > { %v4920_v11 = vadd.f32 %v2331_v53, %v4688_v1  ;;  %v4922_v45 = vpop.f32.mrb[66].mxu0  ;;  %v3976_v18 = vpop.f32.mrb[66].mxu1 }
 0x1a4   : > { %v4927_v54 = vadd.f32 %v3976_v18, %v4708_v19  ;;  %v1919_v22 = vpop.f32.mrb[67].mxu0  ;;  %v2334_v13 = vpop.f32.mrb[67].mxu1  ;;  %v4400_v18 = vld [vmem:[%s4490_s30 + $0x420] ss:$12 sps:$4 sm:$0xff]  }
 0x1a5   : > { %v4930_v4 = vadd.f32 %v2334_v13, %v4694_v7 }
 0x1a6   : > { %2129 = vmatmul.mubr.bf16.gmra.mrb[172].mxu0 %v4395_v0  ;;  %4082 = vmatmul.mubr.msk.bf16.gmra.mrb[172].mxu1 %vm1559_vm0, %v4396_v60  ;;  %v4402_v60 = vld [vmem:[%s4490_s30 + $0x43c] ss:$12 sps:$4 sm:$0xff]  }
 0x1a7   : > { %2136 = vmatprep.mubr.bf16.mxu0 %v4397_v3  ;;  %4085 = vmatprep.mubr.msk.bf16.mxu1 %vm1559_vm0, %v4399_v28  ;;  %v4404_v3 = vld [vmem:[%s4490_s30 + $0x578] ss:$12 sps:$4 sm:$0xff]  }
 0x1a9   : > { %v4934_v1 = vpop.f32.mrb[68].mxu0  ;;  %v3979_v53 = vpop.f32.mrb[68].mxu1 }
 0x1aa   : > { %v4937_v46 = vadd.f32 %v3979_v53, %v4730_v37  ;;  %v1924_v19 = vpop.f32.mrb[69].mxu0  ;;  %v2347_v22 = vpop.f32.mrb[69].mxu1 }
 0x1ab   : > { %v4942_v7 = vadd.f32 %v2347_v22, %v4716_v25  ;;  %v4944_v13 = vpop.f32.mrb[70].mxu0  ;;  %v3980_v0 = vpop.f32.mrb[70].mxu1 }
 0x1ac   : > { %v4949_v28 = vadd.f32 %v3980_v0, %v4736_v43  ;;  %v1927_v10 = vpop.f32.mrb[71].mxu0  ;;  %v2350_v37 = vpop.f32.mrb[71].mxu1  ;;  %v4405_v0 = vld [vmem:[%s4490_s30 + $0x438] ss:$12 sps:$4 sm:$0xff]  }
 0x1ad   : > { %v4952_v53 = vadd.f32 %v2350_v37, %v4722_v31 }
 0x1ae   : > { %2137 = vmatmul.mubr.bf16.gmra.mrb[176].mxu0 %v4400_v18  ;;  %4086 = vmatmul.mubr.msk.bf16.gmra.mrb[176].mxu1 %vm1559_vm0, %v4401_v52  ;;  %v4407_v52 = vld [vmem:[%s4490_s30 + $0x454] ss:$12 sps:$4 sm:$0xff]  }
 0x1af   : > { %2144 = vmatprep.mubr.bf16.mxu0 %v4402_v60  ;;  %4089 = vmatprep.mubr.msk.bf16.mxu1 %vm1559_vm0, %v4404_v3  ;;  %v4409_v60 = vld [vmem:[%s4490_s30 + $0x5a8] ss:$12 sps:$4 sm:$0xff]  }
 0x1b1   : > { %v4956_v25 = vpop.f32.mrb[72].mxu0  ;;  %v3983_v19 = vpop.f32.mrb[72].mxu1 }
 0x1b2   : > { %v4959_v22 = vadd.f32 %v3983_v19, %v4758_v61  ;;  %v1932_v43 = vpop.f32.mrb[73].mxu0  ;;  %v2363_v10 = vpop.f32.mrb[73].mxu1 }
 0x1b3   : > { %v4964_v31 = vadd.f32 %v2363_v10, %v4744_v49  ;;  %v4966_v37 = vpop.f32.mrb[74].mxu0  ;;  %v3984_v18 = vpop.f32.mrb[74].mxu1 }
 0x1b4   : > { %v4971_v3 = vadd.f32 %v3984_v18, %v4764_v5  ;;  %v1935_v42 = vpop.f32.mrb[75].mxu0  ;;  %v2366_v61 = vpop.f32.mrb[75].mxu1  ;;  %v4410_v18 = vld [vmem:[%s4490_s30 + $0x450] ss:$12 sps:$4 sm:$0xff]  }
 0x1b5   : > { %v4974_v19 = vadd.f32 %v2366_v61, %v4750_v55 }
 0x1b6   : > { %2145 = vmatmul.mubr.bf16.gmra.mrb[180].mxu0 %v4405_v0  ;;  %4090 = vmatmul.mubr.msk.bf16.gmra.mrb[180].mxu1 %vm1559_vm0, %v4406_v24  ;;  %v4412_v24 = vld [vmem:[%s4490_s30 + $0x46c] ss:$12 sps:$4 sm:$0xff]  }
 0x1b7   : > { %2152 = vmatprep.mubr.bf16.mxu0 %v4407_v52  ;;  %4093 = vmatprep.mubr.msk.bf16.mxu1 %vm1559_vm0, %v4409_v60  ;;  %v4414_v52 = vld [vmem:[%s4490_s30 + $0x5d8] ss:$12 sps:$4 sm:$0xff]  }
 0x1b9   : > { %v4978_v49 = vpop.f32.mrb[76].mxu0  ;;  %v3987_v43 = vpop.f32.mrb[76].mxu1 }
 0x1ba   : > { %v4981_v10 = vadd.f32 %v3987_v43, %v4786_v33  ;;  %v1940_v5 = vpop.f32.mrb[77].mxu0  ;;  %v2379_v42 = vpop.f32.mrb[77].mxu1 }
 0x1bb   : > { %v4986_v55 = vadd.f32 %v2379_v42, %v4772_v15  ;;  %v4988_v61 = vpop.f32.mrb[78].mxu0  ;;  %v3988_v0 = vpop.f32.mrb[78].mxu1 }
 0x1bc   : > { %v4993_v60 = vadd.f32 %v3988_v0, %v4792_v41  ;;  %v1943_v34 = vpop.f32.mrb[79].mxu0  ;;  %v2382_v33 = vpop.f32.mrb[79].mxu1  ;;  %v4415_v0 = vld [vmem:[%s4490_s30 + $0x468] ss:$12 sps:$4 sm:$0xff]  }
 0x1bd   : > { %v4996_v43 = vadd.f32 %v2382_v33, %v4778_v23  ;;  %v4416_v34 = vld [vmem:[%s4490_s30 + $0x5f0] ss:$12 sps:$4 sm:$0xff]  }
 0x1be   : > { %2153 = vmatmul.mubr.bf16.gmra.mrb[184].mxu0 %v4410_v18  ;;  %4094 = vmatmul.mubr.msk.bf16.gmra.mrb[184].mxu1 %vm1559_vm0, %v4411_v16 }
 0x1bf   : > { %2160 = vmatprep.mubr.bf16.mxu0 %v4412_v24  ;;  %4097 = vmatprep.mubr.msk.bf16.mxu1 %vm1559_vm0, %v4414_v52 }
 0x1c1   : > { %v5000_v15 = vpop.f32.mrb[80].mxu0  ;;  %v3991_v5 = vpop.f32.mrb[80].mxu1 }
 0x1c2   : > { %v5003_v42 = vadd.f32 %v3991_v5, %v4814_v9  ;;  %v1948_v56 = vpop.f32.mrb[81].mxu0  ;;  %v2395_v41 = vpop.f32.mrb[81].mxu1 }
 0x1c3   : > { %v5008_v6 = vadd.f32 %v2395_v41, %v4800_v51  ;;  %v5010_v23 = vpop.f32.mrb[82].mxu0  ;;  %v3992_v18 = vpop.f32.mrb[82].mxu1 }
 0x1c4   : > { %v5013_v16 = vadd.f32 %v3992_v18, %v4820_v21  ;;  %v1951_v24 = vpop.f32.mrb[83].mxu0  ;;  %v2398_v52 = vpop.f32.mrb[83].mxu1 }
 0x1c5   : > { %v5016_v33 = vadd.f32 %v2398_v52, %v4806_v59 }
 0x1c6   : > { %2161 = vmatmul.mubr.bf16.gmra.mrb[188].mxu0 %v4415_v0  ;;  %4098 = vmatmul.mubr.msk.bf16.gmra.mrb[188].mxu1 %vm1559_vm0, %v4416_v34 }
 0x1c9   : > { %v5019_v56 = vpop.f32.mrb[84].mxu0  ;;  %v3995_v9 = vpop.f32.mrb[84].mxu1 }
 0x1ca   : > { %v5022_v51 = vadd.f32 %v3995_v9, %v4842_v63  ;;  %v1956_v5 = vpop.f32.mrb[85].mxu0  ;;  %v2411_v41 = vpop.f32.mrb[85].mxu1 }
 0x1cb   : > { %v5025_v50 = vadd.f32 %v2411_v41, %v4828_v35  ;;  %v5027_v21 = vpop.f32.mrb[86].mxu0  ;;  %v3996_v18 = vpop.f32.mrb[86].mxu1 }
 0x1cc   : > { %v5030_v59 = vadd.f32 %v3996_v18, %v4848_v17  ;;  %v1959_v0 = vpop.f32.mrb[87].mxu0  ;;  %v2414_v24 = vpop.f32.mrb[87].mxu1 }
 0x1cd   : > { %v5033_v34 = vadd.f32 %v2414_v24, %v4834_v47 }
 0x1d1   : > { %v5035_v52 = vpop.f32.mrb[88].mxu0  ;;  %v3999_v63 = vpop.f32.mrb[88].mxu1 }
 0x1d2   : > { %v5038_v9 = vadd.f32 %v3999_v63, %v4870_v27  ;;  %v1964_v5 = vpop.f32.mrb[89].mxu0  ;;  %v2427_v35 = vpop.f32.mrb[89].mxu1 }
 0x1d3   : > { %v5041_v41 = vadd.f32 %v2427_v35, %v4856_v39  ;;  %v5043_v62 = vpop.f32.mrb[90].mxu0  ;;  %v4000_v17 = vpop.f32.mrb[90].mxu1  ;;  %v5059_v35 = vld [vmem:[%s5810_s2] ss:$0 sm:$0xff] }
 0x1d4   : > { %v5046_v18 = vadd.f32 %v4000_v17, %v4876_v58  ;;  %v1967_v0 = vpop.f32.mrb[91].mxu0  ;;  %v2430_v47 = vpop.f32.mrb[91].mxu1 }
 0x1d5   : > { %v5049_v24 = vadd.f32 %v2430_v47, %v4862_v57 }
 0x1d9   : > { %v5051_v32 = vpop.f32.mrb[92].mxu0  ;;  %v4003_v27 = vpop.f32.mrb[92].mxu1 }
 0x1da   : > { %v5054_v63 = vadd.f32 %v4003_v27, %v4898_v40  ;;  %v1972_v5 = vpop.f32.mrb[93].mxu0  ;;  %v2443_v39 = vpop.f32.mrb[93].mxu1  ;;  %v2851_v27 = vmul.f32 %v5059_v35, %v4915_v30 }
 0x1db   : > { %v5062_v58 = vadd.f32 %v2443_v39, %v4884_v12  ;;  %v5064_v17 = vpop.f32.mrb[94].mxu0  ;;  %v4004_v57 = vpop.f32.mrb[94].mxu1  ;;  %v5077_v5 = vld [vmem:[%s5811_s3] ss:$0 sm:$0xff]  ;;  %v2849_v12 = vmul.f32 %v5059_v35, %v4920_v11  ;;  %v2850_v39 = vmul.f32 %v5059_v35, %v4930_v4 }
 0x1dc   : > { %v5067_v0 = vadd.f32 %v4004_v57, %v4904_v36  ;;  %v1975_v47 = vpop.f32.mrb[95].mxu0  ;;  %v2446_v44 = vpop.f32.mrb[95].mxu1  ;;  %v2852_v36 = vmul.f32 %v5059_v35, %v4927_v54 }
 0x1dd   : > { %5845 = vst [vmem:[#allocation34_spill] sm:$0xff] %v5062_v58  ;;  %v5070_v40 = vadd.f32 %v2446_v44, %v4890_v48  ;;  %v2986_v48 = vadd.f32 %v5077_v5, %v2851_v27  ;;  %v2984_v38 = vadd.f32 %v5077_v5, %v2849_v12  ;;  %v2985_v27 = vadd.f32 %v5077_v5, %v2850_v39 }
 0x1de   : > { %5846 = vst [vmem:[#allocation35_spill] sm:$0xff] %v5067_v0  ;;  %v2987_v54 = vadd.f32 %v5077_v5, %v2852_v36 }
 0x1df   : > { %5847 = vst [vmem:[#allocation36_spill] sm:$0xff] %v5070_v40  ;;  %v3114_v12 = vmax.f32 %v2986_v48, 0.0  ;;  %v2854_v48 = vmul.f32 %v5059_v35, %v4952_v53 }
 0x1e0   : > { %v3115_v39 = vmax.f32 %v2987_v54, 0.0 }
 0x1e1   : > { %v5085_v57 = vpop.f32.mrb[96].mxu0  ;;  %v4007_v44 = vpop.f32.mrb[96].mxu1 }
 0x1e2   : > { %v2468_v30 = vadd.f32 %v4007_v44, %v4934_v1  ;;  %v1980_v47 = vpop.f32.mrb[97].mxu0  ;;  %v2459_v26 = vpop.f32.mrb[97].mxu1 }
 0x1e3   : > { %v2460_v8 = vadd.f32 %v2459_v26, %v4912_v29  ;;  %v5091_v11 = vpop.f32.mrb[98].mxu0  ;;  %v4008_v20 = vpop.f32.mrb[98].mxu1  ;;  %v2855_v26 = vmul.f32 %v5059_v35, %v4937_v46  ;;  %v3112_v47 = vmax.f32 %v2984_v38, 0.0  ;;  %v3113_v46 = vmax.f32 %v2985_v27, 0.0 }
 0x1e4   : > { %v2883_v4 = vmul.f32 %v5059_v35, %v2468_v30  ;;  %v2471_v2 = vadd.f32 %v4008_v20, %v4944_v13  ;;  %v1983_v14 = vpop.f32.mrb[99].mxu0  ;;  %v2462_v40 = vpop.f32.mrb[99].mxu1  ;;  %v2853_v20 = vmul.f32 %v5059_v35, %v4942_v7 }
 0x1e5   : > { %v2881_v1 = vmul.f32 %v5059_v35, %v2460_v8  ;;  %v2463_v44 = vadd.f32 %v2462_v40, %v4922_v45  ;;  %v2856_v8 = vmul.f32 %v5059_v35, %v4949_v28 }
 0x1e6   : > { %v3018_v29 = vadd.f32 %v5077_v5, %v2883_v4  ;;  %v2884_v36 = vmul.f32 %v5059_v35, %v2471_v2  ;;  %v2990_v4 = vadd.f32 %v5077_v5, %v2855_v26  ;;  %v2988_v27 = vadd.f32 %v5077_v5, %v2853_v20 }
 0x1e7   : > { %v3016_v14 = vadd.f32 %v5077_v5, %v2881_v1  ;;  %v2882_v13 = vmul.f32 %v5059_v35, %v2463_v44  ;;  %v2991_v58 = vadd.f32 %v5077_v5, %v2856_v8  ;;  %v2989_v20 = vadd.f32 %v5077_v5, %v2854_v48 }
 0x1e8   : > { %v3146_v45 = vmax.f32 %v3018_v29, 0.0  ;;  %v3019_v40 = vadd.f32 %v5077_v5, %v2884_v36  ;;  %v2859_v8 = vmul.f32 %v5059_v35, %v4959_v22 }
 0x1e9   : > { %v3144_v2 = vmax.f32 %v3016_v14, 0.0  ;;  %v3017_v38 = vadd.f32 %v5077_v5, %v2882_v13  ;;  %v5113_v30 = vpop.f32.mrb[100].mxu0  ;;  %v4011_v7 = vpop.f32.mrb[100].mxu1  ;;  %v3119_v48 = vmax.f32 %v2991_v58, 0.0  ;;  %v3117_v22 = vmax.f32 %v2989_v20, 0.0 }
 0x1ea   : > { %v5116_v1 = vmax.f32 %v3114_v12, %v3146_v45  ;;  %v3147_v54 = vmax.f32 %v3019_v40, 0.0  ;;  %v2484_v28 = vadd.f32 %v4011_v7, %v4978_v49  ;;  %v1988_v44 = vpop.f32.mrb[101].mxu0  ;;  %v2475_v29 = vpop.f32.mrb[101].mxu1 }
 0x1eb   : > { %v5120_v36 = vmax.f32 %v3112_v47, %v3144_v2  ;;  %v3145_v53 = vmax.f32 %v3017_v38, 0.0  ;;  %v2476_v14 = vadd.f32 %v2475_v29, %v4956_v25  ;;  %v5123_v13 = vpop.f32.mrb[102].mxu0  ;;  %v4012_v0 = vpop.f32.mrb[102].mxu1  ;;  %v3118_v38 = vmax.f32 %v2990_v4, 0.0 }
 0x1ec   : > { %v5126_v26 = vmax.f32 %v3115_v39, %v3147_v54  ;;  %v2887_v12 = vmul.f32 %v5059_v35, %v2484_v28  ;;  %v2487_v49 = vadd.f32 %v4012_v0, %v4988_v61  ;;  %v1991_v45 = vpop.f32.mrb[103].mxu0  ;;  %v2478_v40 = vpop.f32.mrb[103].mxu1  ;;  %v3116_v54 = vmax.f32 %v2988_v27, 0.0 }
 0x1ed   : > { %v5131_v47 = vmax.f32 %v3113_v46, %v3145_v53  ;;  %v2885_v2 = vmul.f32 %v5059_v35, %v2476_v14  ;;  %v2479_v25 = vadd.f32 %v2478_v40, %v4966_v37  ;;  %v2857_v61 = vmul.f32 %v5059_v35, %v4964_v31 }
 0x1ee   : > { %v3022_v39 = vadd.f32 %v5077_v5, %v2887_v12  ;;  %v2888_v7 = vmul.f32 %v5059_v35, %v2487_v49  ;;  %v2860_v37 = vmul.f32 %v5059_v35, %v4971_v3  ;;  %v2858_v44 = vmul.f32 %v5059_v35, %v4974_v19 }
 0x1ef   : > { %v3020_v0 = vadd.f32 %v5077_v5, %v2885_v2  ;;  %v2886_v46 = vmul.f32 %v5059_v35, %v2479_v25  ;;  %v2994_v14 = vadd.f32 %v5077_v5, %v2859_v8  ;;  %v2992_v40 = vadd.f32 %v5077_v5, %v2857_v61 }
 0x1f0   : > { %v3150_v4 = vmax.f32 %v3022_v39, 0.0  ;;  %v3023_v28 = vadd.f32 %v5077_v5, %v2888_v7  ;;  %v2995_v7 = vadd.f32 %v5077_v5, %v2860_v37  ;;  %v2993_v61 = vadd.f32 %v5077_v5, %v2858_v44 }
 0x1f1   : > { %v3148_v29 = vmax.f32 %v3020_v0, 0.0  ;;  %v3021_v27 = vadd.f32 %v5077_v5, %v2886_v46  ;;  %v5149_v53 = vpop.f32.mrb[104].mxu0  ;;  %v4015_v31 = vpop.f32.mrb[104].mxu1  ;;  %v2863_v37 = vmul.f32 %v5059_v35, %v4981_v10 }
 0x1f2   : > { %v5152_v12 = vmax.f32 %v3118_v38, %v3150_v4  ;;  %v3151_v58 = vmax.f32 %v3023_v28, 0.0  ;;  %v2500_v3 = vadd.f32 %v4015_v31, %v5019_v56  ;;  %v1996_v49 = vpop.f32.mrb[105].mxu0  ;;  %v2491_v45 = vpop.f32.mrb[105].mxu1  ;;  %v3122_v28 = vmax.f32 %v2994_v14, 0.0 }
 0x1f3   : > { %v5156_v20 = vmax.f32 %v3116_v54, %v3148_v29  ;;  %v3149_v19 = vmax.f32 %v3021_v27, 0.0  ;;  %v2492_v2 = vadd.f32 %v2491_v45, %v5000_v15  ;;  %v5159_v25 = vpop.f32.mrb[106].mxu0  ;;  %v4016_v39 = vpop.f32.mrb[106].mxu1  ;;  %v3120_v27 = vmax.f32 %v2992_v40, 0.0 }
 0x1f4   : > { %v5162_v8 = vmax.f32 %v3119_v48, %v3151_v58  ;;  %v2891_v38 = vmul.f32 %v5059_v35, %v2500_v3  ;;  %v2503_v56 = vadd.f32 %v4016_v39, %v5027_v21  ;;  %v1999_v0 = vpop.f32.mrb[107].mxu0  ;;  %v2494_v46 = vpop.f32.mrb[107].mxu1  ;;  %v2861_v21 = vmul.f32 %v5059_v35, %v4986_v55 }
 0x1f5   : > { %v5167_v54 = vmax.f32 %v3117_v22, %v3149_v19  ;;  %v2889_v4 = vmul.f32 %v5059_v35, %v2492_v2  ;;  %v2495_v15 = vadd.f32 %v2494_v46, %v5010_v23  ;;  %v3123_v31 = vmax.f32 %v2995_v7, 0.0 }
 0x1f6   : > { %v3026_v48 = vadd.f32 %v5077_v5, %v2891_v38  ;;  %v2892_v29 = vmul.f32 %v5059_v35, %v2503_v56  ;;  %v2864_v23 = vmul.f32 %v5059_v35, %v4993_v60  ;;  %v3121_v10 = vmax.f32 %v2993_v61, 0.0 }
 0x1f7   : > { %v3024_v44 = vadd.f32 %v5077_v5, %v2889_v4  ;;  %v2890_v22 = vmul.f32 %v5059_v35, %v2495_v15  ;;  %v2862_v3 = vmul.f32 %v5059_v35, %v4996_v43  ;;  %v2998_v19 = vadd.f32 %v5077_v5, %v2863_v37 }
 0x1f8   : > { %v3154_v14 = vmax.f32 %v3026_v48, 0.0  ;;  %v3027_v58 = vadd.f32 %v5077_v5, %v2892_v29  ;;  %v2996_v56 = vadd.f32 %v5077_v5, %v2861_v21  ;;  %v2999_v15 = vadd.f32 %v5077_v5, %v2864_v23 }
 0x1f9   : > { %v3152_v49 = vmax.f32 %v3024_v44, 0.0  ;;  %v3025_v45 = vadd.f32 %v5077_v5, %v2890_v22  ;;  %v5185_v40 = vpop.f32.mrb[108].mxu0  ;;  %v4019_v55 = vpop.f32.mrb[108].mxu1  ;;  %v2997_v21 = vadd.f32 %v5077_v5, %v2862_v3  ;;  %v3126_v22 = vmax.f32 %v2998_v19, 0.0 }
 0x1fa   : > { %v5188_v2 = vmax.f32 %v3122_v28, %v3154_v14  ;;  %v3155_v39 = vmax.f32 %v3027_v58, 0.0  ;;  %v2516_v60 = vadd.f32 %v4019_v55, %v5051_v32  ;;  %v2004_v7 = vpop.f32.mrb[109].mxu0  ;;  %v2507_v38 = vpop.f32.mrb[109].mxu1  ;;  %v2867_v23 = vmul.f32 %v5059_v35, %v5003_v42 }
 0x1fb   : > { %v5192_v0 = vmax.f32 %v3120_v27, %v3152_v49  ;;  %v3153_v43 = vmax.f32 %v3025_v45, 0.0  ;;  %v2508_v46 = vadd.f32 %v2507_v38, %v5035_v52  ;;  %v5195_v61 = vpop.f32.mrb[110].mxu0  ;;  %v4020_v4 = vpop.f32.mrb[110].mxu1  ;;  %v3124_v58 = vmax.f32 %v2996_v56, 0.0 }
 0x1fc   : > { %v5198_v37 = vmax.f32 %v3123_v31, %v3155_v39  ;;  %v2895_v28 = vmul.f32 %v5059_v35, %v2516_v60  ;;  %v2519_v32 = vadd.f32 %v4020_v4, %v5064_v17  ;;  %v2007_v48 = vpop.f32.mrb[111].mxu0  ;;  %v2510_v29 = vpop.f32.mrb[111].mxu1  ;;  %v2865_v17 = vmul.f32 %v5059_v35, %v5008_v6 }
 0x1fd   : > { %v5203_v27 = vmax.f32 %v3121_v10, %v3153_v43  ;;  %v2893_v44 = vmul.f32 %v5059_v35, %v2508_v46  ;;  %v2511_v52 = vadd.f32 %v2510_v29, %v5043_v62  ;;  %v3127_v49 = vmax.f32 %v2999_v15, 0.0 }
 0x1fe   : > { %v3030_v31 = vadd.f32 %v5077_v5, %v2895_v28  ;;  %v2896_v14 = vmul.f32 %v5059_v35, %v2519_v32  ;;  %v2868_v62 = vmul.f32 %v5059_v35, %v5013_v16  ;;  %v3125_v42 = vmax.f32 %v2997_v21, 0.0 }
 0x1ff   : > { %v3028_v3 = vadd.f32 %v5077_v5, %v2893_v44  ;;  %v2894_v10 = vmul.f32 %v5059_v35, %v2511_v52  ;;  %v2866_v19 = vmul.f32 %v5059_v35, %v5016_v33  ;;  %v3002_v38 = vadd.f32 %v5077_v5, %v2867_v23 }
 0x200   : > { %v3158_v45 = vmax.f32 %v3030_v31, 0.0  ;;  %v3031_v55 = vadd.f32 %v5077_v5, %v2896_v14  ;;  %v3000_v15 = vadd.f32 %v5077_v5, %v2865_v17  ;;  %v3003_v21 = vadd.f32 %v5077_v5, %v2868_v62 }
 0x201   : > { %v3156_v39 = vmax.f32 %v3028_v3, 0.0  ;;  %v3029_v60 = vadd.f32 %v5077_v5, %v2894_v10  ;;  %v5221_v7 = vpop.f32.mrb[112].mxu0  ;;  %v4023_v6 = vpop.f32.mrb[112].mxu1  ;;  %v3001_v31 = vadd.f32 %v5077_v5, %v2866_v19  ;;  %v3130_v17 = vmax.f32 %v3002_v38, 0.0 }
 0x202   : > { %v5224_v56 = vmax.f32 %v3126_v22, %v3158_v45  ;;  %v3159_v43 = vmax.f32 %v3031_v55, 0.0  ;;  %v2532_v16 = vadd.f32 %v4023_v6, %v5113_v30  ;;  %v2012_v46 = vpop.f32.mrb[113].mxu0  ;;  %v2523_v4 = vpop.f32.mrb[113].mxu1  ;;  %v2871_v3 = vmul.f32 %v5059_v35, %v5022_v51 }
 0x203   : > { %v5228_v28 = vmax.f32 %v3124_v58, %v3156_v39  ;;  %v3157_v33 = vmax.f32 %v3029_v60, 0.0  ;;  %v2524_v32 = vadd.f32 %v2523_v4, %v5085_v57  ;;  %v5231_v48 = vpop.f32.mrb[114].mxu0  ;;  %v4024_v29 = vpop.f32.mrb[114].mxu1  ;;  %v3128_v62 = vmax.f32 %v3000_v15, 0.0 }
 0x204   : > { %v5234_v44 = vmax.f32 %v3127_v49, %v3159_v43  ;;  %v2899_v52 = vmul.f32 %v5059_v35, %v2532_v16  ;;  %v2535_v30 = vadd.f32 %v4024_v29, %v5123_v13  ;;  %v2015_v22 = vpop.f32.mrb[115].mxu0  ;;  %v2526_v23 = vpop.f32.mrb[115].mxu1  ;;  %v2869_v13 = vmul.f32 %v5059_v35, %v5025_v50 }
 0x205   : > { %v5239_v14 = vmax.f32 %v3125_v42, %v3157_v33  ;;  %v2897_v58 = vmul.f32 %v5059_v35, %v2524_v32  ;;  %v2527_v57 = vadd.f32 %v2526_v23, %v5091_v11  ;;  %v3131_v42 = vmax.f32 %v3003_v21, 0.0 }
 0x206   : > { %5848 = vst [vmem:[#allocation37_spill] sm:$0xff] %v5234_v44  ;;  %v3034_v10 = vadd.f32 %v5077_v5, %v2899_v52  ;;  %v2900_v49 = vmul.f32 %v5059_v35, %v2535_v30  ;;  %v2872_v11 = vmul.f32 %v5059_v35, %v5030_v59  ;;  %v3129_v51 = vmax.f32 %v3001_v31, 0.0 }
 0x207   : > { %5849 = vst [vmem:[#allocation38_spill] sm:$0xff] %v5239_v14  ;;  %v3032_v45 = vadd.f32 %v5077_v5, %v2897_v58  ;;  %v2898_v55 = vmul.f32 %v5059_v35, %v2527_v57  ;;  %v2870_v60 = vmul.f32 %v5059_v35, %v5033_v34  ;;  %v3006_v16 = vadd.f32 %v5077_v5, %v2871_v3 }
 0x208   : > { %v3162_v19 = vmax.f32 %v3034_v10, 0.0  ;;  %v3035_v39 = vadd.f32 %v5077_v5, %v2900_v49  ;;  %v3004_v32 = vadd.f32 %v5077_v5, %v2869_v13  ;;  %v3007_v22 = vadd.f32 %v5077_v5, %v2872_v11 }
 0x209   : > { %v3160_v6 = vmax.f32 %v3032_v45, 0.0  ;;  %v3033_v38 = vadd.f32 %v5077_v5, %v2898_v55  ;;  %v2018_v43 = vpop.f32.mrb[116].mxu0  ;;  %v4027_v50 = vpop.f32.mrb[116].mxu1  ;;  %v3134_v49 = vmax.f32 %v3006_v16, 0.0 }
 0x20a   : > { %v5258_v46 = vmax.f32 %v3130_v17, %v3162_v19  ;;  %v3163_v4 = vmax.f32 %v3035_v39, 0.0  ;;  %v2548_v15 = vadd.f32 %v4027_v50, %v5185_v40  ;;  %v2020_v59 = vpop.f32.mrb[117].mxu0  ;;  %v2539_v33 = vpop.f32.mrb[117].mxu1  ;;  %v3005_v17 = vadd.f32 %v5077_v5, %v2870_v60 }
 0x20b   : > { %v5262_v29 = vmax.f32 %v3128_v62, %v3160_v6  ;;  %v3161_v21 = vmax.f32 %v3033_v38, 0.0  ;;  %v2540_v34 = vadd.f32 %v2539_v33, %v5149_v53  ;;  %v2021_v52 = vpop.f32.mrb[118].mxu0  ;;  %v4028_v30 = vpop.f32.mrb[118].mxu1  ;;  %v2875_v62 = vmul.f32 %v5059_v35, %v5038_v9 }
 0x20c   : > { %5850 = vst [vmem:[#allocation39_spill] sm:$0xff] %v5258_v46  ;;  %v5266_v23 = vmax.f32 %v3131_v42, %v3163_v4  ;;  %v2903_v31 = vmul.f32 %v5059_v35, %v2548_v15  ;;  %v2551_v58 = vadd.f32 %v4028_v30, %v5195_v61  ;;  %v2023_v40 = vpop.f32.mrb[119].mxu0  ;;  %v2542_v57 = vpop.f32.mrb[119].mxu1  ;;  %v3132_v55 = vmax.f32 %v3004_v32, 0.0 }
 0x20d   : > { %5851 = vst [vmem:[#allocation40_spill] sm:$0xff] %v5262_v29  ;;  %v5271_v3 = vmax.f32 %v3129_v51, %v3161_v21  ;;  %v2901_v10 = vmul.f32 %v5059_v35, %v2540_v34  ;;  %v2543_v53 = vadd.f32 %v2542_v57, %v5159_v25  ;;  %v2873_v61 = vmul.f32 %v5059_v35, %v5041_v41 }
 0x20e   : > { %5852 = vst [vmem:[#allocation41_spill] sm:$0xff] %v5266_v23  ;;  %v3038_v13 = vadd.f32 %v5077_v5, %v2903_v31  ;;  %v2904_v45 = vmul.f32 %v5059_v35, %v2551_v58  ;;  %v3135_v19 = vmax.f32 %v3007_v22, 0.0  ;;  %v2876_v25 = vmul.f32 %v5059_v35, %v5046_v18 }
 0x20f   : > { %5853 = vst [vmem:[#allocation42_spill] sm:$0xff] %v5271_v3  ;;  %v3036_v42 = vadd.f32 %v5077_v5, %v2901_v10  ;;  %v2902_v11 = vmul.f32 %v5059_v35, %v2543_v53  ;;  %v3133_v9 = vmax.f32 %v3005_v17, 0.0  ;;  %v2874_v60 = vmul.f32 %v5059_v35, %v5049_v24 }
 0x210   : > { %v3166_v39 = vmax.f32 %v3038_v13, 0.0  ;;  %v3039_v51 = vadd.f32 %v5077_v5, %v2904_v45  ;;  %v3010_v16 = vadd.f32 %v5077_v5, %v2875_v62  ;;  %v3008_v32 = vadd.f32 %v5077_v5, %v2873_v61 }
 0x211   : > { %v3164_v6 = vmax.f32 %v3036_v42, 0.0  ;;  %v3037_v38 = vadd.f32 %v5077_v5, %v2902_v11  ;;  %v2026_v50 = vpop.f32.mrb[120].mxu0  ;;  %v4031_v41 = vpop.f32.mrb[120].mxu1  ;;  %v3011_v31 = vadd.f32 %v5077_v5, %v2876_v25  ;;  %v3009_v10 = vadd.f32 %v5077_v5, %v2874_v60 }
 0x212   : > { %v5290_v4 = vmax.f32 %v3134_v49, %v3166_v39  ;;  %v3167_v15 = vmax.f32 %v3039_v51, 0.0  ;;  %v2564_v59 = vadd.f32 %v4031_v41, %v2018_v43  ;;  %v2028_v33 = vpop.f32.mrb[121].mxu0  ;;  %v2555_v18 = vpop.f32.mrb[121].mxu1  ;;  %v3138_v45 = vmax.f32 %v3010_v16, 0.0  ;;  %v5858_v51 = vld [vmem:[#allocation34_spill] sm:$0xff]  ;;  %v5859_v41 = vld [vmem:[#allocation35_spill] sm:$0xff] }
 0x213   : > { %v5293_v21 = vmax.f32 %v3132_v55, %v3164_v6  ;;  %v3165_v34 = vmax.f32 %v3037_v38, 0.0  ;;  %v2556_v24 = vadd.f32 %v2555_v18, %v5221_v7  ;;  %v2029_v30 = vpop.f32.mrb[122].mxu0  ;;  %v4032_v22 = vpop.f32.mrb[122].mxu1  ;;  %v3136_v55 = vmax.f32 %v3008_v32, 0.0  ;;  %v5861_v32 = vld [vmem:[#allocation36_spill] sm:$0xff] }
 0x214   : > { %5854 = vst [vmem:[#allocation43_spill] sm:$0xff] %v5290_v4  ;;  %v5297_v58 = vmax.f32 %v3135_v19, %v3167_v15  ;;  %v2907_v40 = vmul.f32 %v5059_v35, %v2564_v59  ;;  %v2567_v57 = vadd.f32 %v4032_v22, %v2021_v52  ;;  %v2031_v17 = vpop.f32.mrb[123].mxu0  ;;  %v2558_v43 = vpop.f32.mrb[123].mxu1  ;;  %v3139_v42 = vmax.f32 %v3011_v31, 0.0 }
 0x215   : > { %5855 = vst [vmem:[#allocation44_spill] sm:$0xff] %v5293_v21  ;;  %v5301_v53 = vmax.f32 %v3133_v9, %v3165_v34  ;;  %v2905_v49 = vmul.f32 %v5059_v35, %v2556_v24  ;;  %v2559_v62 = vadd.f32 %v2558_v43, %v5231_v48  ;;  %v2879_v11 = vmul.f32 %v5059_v35, %v5054_v63 }
 0x216   : > { %5856 = vst [vmem:[#allocation45_spill] sm:$0xff] %v5297_v58  ;;  %v3042_v7 = vadd.f32 %v5077_v5, %v2907_v40  ;;  %v2908_v13 = vmul.f32 %v5059_v35, %v2567_v57  ;;  %v3137_v39 = vmax.f32 %v3009_v10, 0.0  ;;  %v2877_v48 = vmul.f32 %v5059_v35, %v5858_v51 }
 0x217   : > { %5857 = vst [vmem:[#allocation46_spill] sm:$0xff] %v5301_v53  ;;  %v3040_v61 = vadd.f32 %v5077_v5, %v2905_v49  ;;  %v2906_v52 = vmul.f32 %v5059_v35, %v2559_v62  ;;  %v2880_v16 = vmul.f32 %v5059_v35, %v5859_v41  ;;  %v2878_v34 = vmul.f32 %v5059_v35, %v5861_v32 }
 0x218   : > { %v3170_v19 = vmax.f32 %v3042_v7, 0.0  ;;  %v3043_v25 = vadd.f32 %v5077_v5, %v2908_v13  ;;  %v3014_v17 = vadd.f32 %v5077_v5, %v2879_v11  ;;  %v3012_v13 = vadd.f32 %v5077_v5, %v2877_v48 }
 0x219   : > { %v3168_v9 = vmax.f32 %v3040_v61, 0.0  ;;  %v3041_v60 = vadd.f32 %v5077_v5, %v2906_v52  ;;  %v2034_v6 = vpop.f32.mrb[124].mxu0  ;;  %v4035_v38 = vpop.f32.mrb[124].mxu1 }
 0x21a   : > { %v5317_v15 = vmax.f32 %v3138_v45, %v3170_v19  ;;  %v3171_v59 = vmax.f32 %v3043_v25, 0.0  ;;  %v2580_v33 = vadd.f32 %v4035_v38, %v2034_v6  ;;  %v2036_v63 = vpop.f32.mrb[125].mxu0  ;;  %v2571_v18 = vpop.f32.mrb[125].mxu1  ;;  %v3142_v51 = vmax.f32 %v3014_v17, 0.0 }
 0x21b   : > { %v5321_v24 = vmax.f32 %v3136_v55, %v3168_v9  ;;  %v3169_v22 = vmax.f32 %v3041_v60, 0.0  ;;  %v2572_v31 = vadd.f32 %v2571_v18, %v2026_v50  ;;  %v2037_v40 = vpop.f32.mrb[126].mxu0  ;;  %v4036_v57 = vpop.f32.mrb[126].mxu1  ;;  %v3015_v50 = vadd.f32 %v5077_v5, %v2880_v16 }
 0x21c   : > { %5860 = vst [vmem:[#allocation34_spill] sm:$0xff] %v5317_v15  ;;  %v5324_v43 = vmax.f32 %v3139_v42, %v3171_v59  ;;  %v2911_v10 = vmul.f32 %v5059_v35, %v2580_v33  ;;  %v2583_v49 = vadd.f32 %v4036_v57, %v2037_v40  ;;  %v2039_v62 = vpop.f32.mrb[127].mxu0  ;;  %v2574_v7 = vpop.f32.mrb[127].mxu1  ;;  %v3013_v42 = vadd.f32 %v5077_v5, %v2878_v34 }
 0x21d   : > { %5862 = vst [vmem:[#allocation35_spill] sm:$0xff] %v5321_v24  ;;  %v5328_v45 = vmax.f32 %v3137_v39, %v3169_v22  ;;  %v2909_v55 = vmul.f32 %v5059_v35, %v2572_v31  ;;  %v2575_v61 = vadd.f32 %v2574_v7, %v2029_v30  ;;  %v3140_v48 = vmax.f32 %v3012_v13, 0.0 }
 0x21e   : > { %5863 = vst [vmem:[#allocation36_spill] sm:$0xff] %v5324_v43  ;;  %v3046_v52 = vadd.f32 %v5077_v5, %v2911_v10  ;;  %v2912_v11 = vmul.f32 %v5059_v35, %v2583_v49  ;;  %v3143_v41 = vmax.f32 %v3015_v50, 0.0  ;;  %v3141_v18 = vmax.f32 %v3013_v42, 0.0 }
 0x21f   : > { %5864 = vst [vmem:[#allocation47_spill] sm:$0xff] %v5328_v45  ;;  %v3044_v19 = vadd.f32 %v5077_v5, %v2909_v55  ;;  %v2910_v25 = vmul.f32 %v5059_v35, %v2575_v61 }
 0x220   : > { %v3174_v9 = vmax.f32 %v3046_v52, 0.0  ;;  %v3047_v39 = vadd.f32 %v5077_v5, %v2912_v11 }
 0x221   : > { %v3172_v60 = vmax.f32 %v3044_v19, 0.0  ;;  %v3045_v30 = vadd.f32 %v5077_v5, %v2910_v25  ;;  %v2042_v6 = vpop.f32.mrb[128].mxu0  ;;  %v4039_v38 = vpop.f32.mrb[128].mxu1 }
 0x222   : > { %v5339_v16 = vmax.f32 %v3142_v51, %v3174_v9  ;;  %v3175_v59 = vmax.f32 %v3047_v39, 0.0  ;;  %v2044_v33 = vpop.f32.mrb[129].mxu0  ;;  %v2587_v63 = vpop.f32.mrb[129].mxu1 }
 0x223   : > { %v5341_v32 = vmax.f32 %v3140_v48, %v3172_v60  ;;  %v3173_v34 = vmax.f32 %v3045_v30, 0.0  ;;  %v5343_v22 = vadd.f32 %v2587_v63, %v2042_v6  ;;  %v2045_v31 = vpop.f32.mrb[130].mxu0  ;;  %v4040_v40 = vpop.f32.mrb[130].mxu1 }
 0x224   : > { %5865 = vst [vmem:[#allocation48_spill] sm:$0xff] %v5339_v16  ;;  %v5345_v57 = vmax.f32 %v3143_v41, %v3175_v59  ;;  %v2047_v17 = vpop.f32.mrb[131].mxu0  ;;  %v2590_v10 = vpop.f32.mrb[131].mxu1 }
 0x225   : > { %5866 = vst [vmem:[#allocation49_spill] sm:$0xff] %v5341_v32  ;;  %v5347_v49 = vmax.f32 %v3141_v18, %v3173_v34  ;;  %v2591_v62 = vadd.f32 %v2590_v10, %v2045_v31 }
 0x226   : > { %5867 = vst [vmem:[#allocation50_spill] sm:$0xff] %v5345_v57 }
 0x227   : > { %5868 = vst [vmem:[#allocation51_spill] sm:$0xff] %v5347_v49 }
 0x229   : > { %v2050_v7 = vpop.f32.mrb[132].mxu0  ;;  %v4043_v13 = vpop.f32.mrb[132].mxu1 }
 0x22a   : > { %v2596_v55 = vadd.f32 %v4039_v38, %v2050_v7  ;;  %v2052_v61 = vpop.f32.mrb[133].mxu0  ;;  %v2603_v50 = vpop.f32.mrb[133].mxu1 }
 0x22b   : > { %v2053_v52 = vpop.f32.mrb[134].mxu0  ;;  %v4044_v11 = vpop.f32.mrb[134].mxu1 }
 0x22c   : > { %v2599_v42 = vadd.f32 %v4040_v40, %v2053_v52  ;;  %v2055_v19 = vpop.f32.mrb[135].mxu0  ;;  %v2606_v25 = vpop.f32.mrb[135].mxu1 }
 0x22e   : > { %v2916_v15 = vmul.f32 %v5059_v35, %v2599_v42 }
 0x231   : > { %v2058_v51 = vpop.f32.mrb[136].mxu0  ;;  %v4047_v9 = vpop.f32.mrb[136].mxu1 }
 0x232   : > { %v2604_v39 = vadd.f32 %v2603_v50, %v2058_v51  ;;  %v2060_v48 = vpop.f32.mrb[137].mxu0  ;;  %v2619_v60 = vpop.f32.mrb[137].mxu1 }
 0x233   : > { %v2061_v30 = vpop.f32.mrb[138].mxu0  ;;  %v4048_v6 = vpop.f32.mrb[138].mxu1 }
 0x234   : > { %v2607_v41 = vadd.f32 %v2606_v25, %v2061_v30  ;;  %v2063_v59 = vpop.f32.mrb[139].mxu0  ;;  %v2622_v33 = vpop.f32.mrb[139].mxu1 }
 0x239   : > { %v2066_v63 = vpop.f32.mrb[140].mxu0  ;;  %v4051_v18 = vpop.f32.mrb[140].mxu1 }
 0x23a   : > { %v2612_v38 = vadd.f32 %v4043_v13, %v2066_v63  ;;  %v2068_v34 = vpop.f32.mrb[141].mxu0  ;;  %v2635_v31 = vpop.f32.mrb[141].mxu1 }
 0x23b   : > { %v2069_v17 = vpop.f32.mrb[142].mxu0  ;;  %v4052_v10 = vpop.f32.mrb[142].mxu1 }
 0x23c   : > { %v2615_v40 = vadd.f32 %v4044_v11, %v2069_v17  ;;  %v2071_v7 = vpop.f32.mrb[143].mxu0  ;;  %v2638_v61 = vpop.f32.mrb[143].mxu1 }
 0x241   : > { %v2074_v52 = vpop.f32.mrb[144].mxu0  ;;  %v5349_v19 = vpop.f32.mrb[144].mxu1 }
 0x242   : > { %v2620_v50 = vadd.f32 %v2619_v60, %v2074_v52  ;;  %v2076_v51 = vpop.f32.mrb[145].mxu0  ;;  %v5351_v48 = vpop.f32.mrb[145].mxu1 }
 0x243   : > { %v2077_v25 = vpop.f32.mrb[146].mxu0  ;;  %v5353_v30 = vpop.f32.mrb[146].mxu1 }
 0x244   : > { %v2623_v59 = vadd.f32 %v2622_v33, %v2077_v25  ;;  %v2079_v49 = vpop.f32.mrb[147].mxu0  ;;  %v5355_v13 = vpop.f32.mrb[147].mxu1 }
 0x249   : > { %v2082_v63 = vpop.f32.mrb[148].mxu0  ;;  %v5357_v34 = vpop.f32.mrb[148].mxu1 }
 0x24a   : > { %v2628_v11 = vadd.f32 %v4047_v9, %v2082_v63  ;;  %v2084_v17 = vpop.f32.mrb[149].mxu0  ;;  %v5359_v7 = vpop.f32.mrb[149].mxu1 }
 0x24b   : > { %v2085_v57 = vpop.f32.mrb[150].mxu0  ;;  %v5361_v32 = vpop.f32.mrb[150].mxu1 }
 0x24c   : > { %v2631_v60 = vadd.f32 %v4048_v6, %v2085_v57  ;;  %v2087_v52 = vpop.f32.mrb[151].mxu0  ;;  %v5363_v51 = vpop.f32.mrb[151].mxu1  ;;  %v2913_v57 = vmul.f32 %v5059_v35, %v5343_v22  ;;  %v2914_v6 = vmul.f32 %v5059_v35, %v2591_v62 }
 0x24d   : > { %v2915_v52 = vmul.f32 %v5059_v35, %v2596_v55 }
 0x24e   : > { %v5386_v22 = vadd.f32 %v5077_v5, %v2913_v57  ;;  %v5389_v62 = vadd.f32 %v5077_v5, %v2914_v6 }
 0x251   : > { %v2090_v16 = vpop.f32.mrb[152].mxu0  ;;  %v5365_v45 = vpop.f32.mrb[152].mxu1 }
 0x252   : > { %5869 = vst [vmem:[#allocation52_spill] sm:$0xff] %v5365_v45  ;;  %v2636_v49 = vadd.f32 %v2635_v31, %v2090_v16  ;;  %v2092_v33 = vpop.f32.mrb[153].mxu0  ;;  %v5367_v25 = vpop.f32.mrb[153].mxu1  ;;  %v2917_v16 = vmul.f32 %v5059_v35, %v2604_v39  ;;  %v2918_v31 = vmul.f32 %v5059_v35, %v2607_v41  ;;  %v5394_v41 = vadd.f32 %v5077_v5, %v2915_v52 }
 0x253   : > { %v2093_v43 = vpop.f32.mrb[154].mxu0  ;;  %v5369_v24 = vpop.f32.mrb[154].mxu1  ;;  %v2919_v33 = vmul.f32 %v5059_v35, %v2612_v38 }
 0x254   : > { %5870 = vst [vmem:[#allocation53_spill] sm:$0xff] %v5369_v24  ;;  %v2639_v9 = vadd.f32 %v2638_v61, %v2093_v43  ;;  %v2095_v63 = vpop.f32.mrb[155].mxu0  ;;  %v5371_v17 = vpop.f32.mrb[155].mxu1  ;;  %v2920_v43 = vmul.f32 %v5059_v35, %v2615_v40  ;;  %v2921_v61 = vmul.f32 %v5059_v35, %v2620_v50  ;;  %v5399_v50 = vadd.f32 %v5077_v5, %v2916_v15 }
 0x255   : > { %v5402_v58 = vadd.f32 %v5077_v5, %v2917_v16  ;;  %v5405_v57 = vadd.f32 %v5077_v5, %v2918_v31  ;;  %v2922_v31 = vmul.f32 %v5059_v35, %v2623_v59 }
 0x256   : > { %v5413_v52 = vadd.f32 %v5077_v5, %v2920_v43  ;;  %v2926_v43 = vmul.f32 %v5059_v35, %v2639_v9 }
 0x257   : > { %v5435_v9 = vadd.f32 %v5077_v5, %v2922_v31  ;;  %v5876_v31 = vld [vmem:[#allocation2_spill] sm:$0xff] }
 0x259   : > { %v2098_v63 = vpop.f32.mrb[156].mxu0  ;;  %v5383_v53 = vpop.f32.mrb[156].mxu1 }
 0x25a   : > { %5871 = vst [vmem:[#allocation54_spill] sm:$0xff] %v5383_v53  ;;  %v2644_v55 = vadd.f32 %v4051_v18, %v2098_v63  ;;  %v2100_v42 = vpop.f32.mrb[157].mxu0  ;;  %v5391_v39 = vpop.f32.mrb[157].mxu1 }
 0x25b   : > { %5872 = vst [vmem:[#allocation55_spill] sm:$0xff] %v5391_v39  ;;  %v2101_v38 = vpop.f32.mrb[158].mxu0  ;;  %v5396_v40 = vpop.f32.mrb[158].mxu1  ;;  %v5410_v42 = vadd.f32 %v5077_v5, %v2919_v33  ;;  %v2925_v33 = vmul.f32 %v5059_v35, %v2636_v49 }
 0x25c   : > { %5873 = vst [vmem:[#allocation56_spill] sm:$0xff] %v5396_v40  ;;  %v2647_v6 = vadd.f32 %v4052_v10, %v2101_v38  ;;  %v2103_v18 = vpop.f32.mrb[159].mxu0  ;;  %v5407_v63 = vpop.f32.mrb[159].mxu1  ;;  %v5416_v40 = vadd.f32 %v5077_v5, %v2921_v61  ;;  %v2923_v10 = vmul.f32 %v5059_v35, %v2628_v11  ;;  %v3178_v38 = vmax.f32 %v5394_v41, 0.0  ;;  %v5875_v61 = vld [vmem:[#allocation4_spill] sm:$0xff] }
 0x25d   : > { %5874 = vst [vmem:[#allocation57_spill] sm:$0xff] %v5407_v63  ;;  %v2924_v18 = vmul.f32 %v5059_v35, %v2631_v60  ;;  %v2927_v16 = vmul.f32 %v5059_v35, %v2644_v55  ;;  %v5446_v41 = vadd.f32 %v5077_v5, %v2925_v33 }
 0x25e   : > { %v2928_v60 = vmul.f32 %v5059_v35, %v2647_v6  ;;  %v5438_v53 = vadd.f32 %v5077_v5, %v2923_v10  ;;  %v5449_v6 = vadd.f32 %v5077_v5, %v2926_v43 }
 0x25f   : > { %v5443_v11 = vadd.f32 %v5077_v5, %v2924_v18  ;;  %v5453_v3 = vadd.f32 %v5077_v5, %v2927_v16 }
 0x260   : > { %v5459_v33 = vadd.f32 %v5077_v5, %v2928_v60 }
 0x261   : > { %v2106_v21 = vpop.f32.mrb[160].mxu0  ;;  %v4071_v49 = vpop.f32.mrb[160].mxu1 }
 0x262   : > { %v2652_v15 = vadd.f32 %v5351_v48, %v2106_v21  ;;  %v2724_v55 = vadd.f32 %v4071_v49, %v5875_v61  ;;  %v2108_v63 = vpop.f32.mrb[161].mxu0  ;;  %v2715_v59 = vpop.f32.mrb[161].mxu1 }
 0x263   : > { %v2716_v4 = vadd.f32 %v2715_v59, %v5876_v31  ;;  %v2109_v39 = vpop.f32.mrb[162].mxu0  ;;  %v4072_v10 = vpop.f32.mrb[162].mxu1  ;;  %v5877_v63 = vld [vmem:[#allocation5_spill] sm:$0xff]  ;;  %v5878_v31 = vld [vmem:[#allocation3_spill] sm:$0xff] }
 0x264   : > { %v2947_v21 = vmul.f32 %v5059_v35, %v2724_v55  ;;  %v2655_v48 = vadd.f32 %v5355_v13, %v2109_v39  ;;  %v2727_v18 = vadd.f32 %v4072_v10, %v5877_v63  ;;  %v2111_v61 = vpop.f32.mrb[163].mxu0  ;;  %v2718_v49 = vpop.f32.mrb[163].mxu1  ;;  %v2929_v43 = vmul.f32 %v5059_v35, %v2652_v15 }
 0x265   : > { %v2945_v59 = vmul.f32 %v5059_v35, %v2716_v4  ;;  %v2719_v23 = vadd.f32 %v2718_v49, %v5878_v31 }
 0x266   : > { %v3082_v13 = vadd.f32 %v5077_v5, %v2947_v21  ;;  %v2948_v39 = vmul.f32 %v5059_v35, %v2727_v18  ;;  %v5477_v16 = vadd.f32 %v5077_v5, %v2929_v43  ;;  %v5880_v43 = vld [vmem:[#allocation8_spill] sm:$0xff] }
 0x267   : > { %v3080_v15 = vadd.f32 %v5077_v5, %v2945_v59  ;;  %v2946_v63 = vmul.f32 %v5059_v35, %v2719_v23  ;;  %v2930_v23 = vmul.f32 %v5059_v35, %v2655_v48 }
 0x268   : > { %v3210_v49 = vmax.f32 %v3082_v13, 0.0  ;;  %v3083_v31 = vadd.f32 %v5077_v5, %v2948_v39  ;;  %v5879_v39 = vmax.f32 %v5386_v22, 0.0  ;;  %v5883_v22 = vmax.f32 %v5389_v62, 0.0 }
 0x269   : > { %v3208_v18 = vmax.f32 %v3080_v15, 0.0  ;;  %v3081_v10 = vadd.f32 %v5077_v5, %v2946_v63  ;;  %v2114_v60 = vpop.f32.mrb[164].mxu0  ;;  %v4075_v55 = vpop.f32.mrb[164].mxu1  ;;  %v5881_v15 = vld [vmem:[#allocation6_spill] sm:$0xff] }
 0x26a   : > { %v3274_v59 = vmax.f32 %v3178_v38, %v3210_v49  ;;  %v3211_v4 = vmax.f32 %v3083_v31, 0.0  ;;  %v2660_v61 = vadd.f32 %v5349_v19, %v2114_v60  ;;  %v2116_v13 = vpop.f32.mrb[165].mxu0  ;;  %v2731_v29 = vpop.f32.mrb[165].mxu1  ;;  %v2740_v24 = vadd.f32 %v4075_v55, %v5880_v43  ;;  %v5885_v43 = vld [vmem:[#allocation7_spill] sm:$0xff] }
 0x26b   : > { %v3272_v21 = vmax.f32 %v5879_v39, %v3208_v18  ;;  %v3209_v46 = vmax.f32 %v3081_v10, 0.0  ;;  %v2732_v45 = vadd.f32 %v2731_v29, %v5881_v15  ;;  %v2117_v63 = vpop.f32.mrb[166].mxu0  ;;  %v4076_v14 = vpop.f32.mrb[166].mxu1  ;;  %v5882_v38 = vmax.f32 %v5399_v50, 0.0 }
 0x26c   : > { %v3306_v44 = vmax.f32 %v5116_v1, %v3274_v59  ;;  %v2931_v49 = vmul.f32 %v5059_v35, %v2660_v61  ;;  %v2663_v19 = vadd.f32 %v5353_v30, %v2117_v63  ;;  %v2119_v60 = vpop.f32.mrb[167].mxu0  ;;  %v2734_v31 = vpop.f32.mrb[167].mxu1  ;;  %v2951_v50 = vmul.f32 %v5059_v35, %v2740_v24  ;;  %v5507_v61 = vld [vmem:[%s5810_s2] ss:$0 sm:$0xff] }
 0x26d   : > { %v3275_v48 = vmax.f32 %v5882_v38, %v3211_v4  ;;  %v3304_v29 = vmax.f32 %v5120_v36, %v3272_v21  ;;  %v3273_v1 = vmax.f32 %v5883_v22, %v3209_v46  ;;  %v2949_v55 = vmul.f32 %v5059_v35, %v2732_v45  ;;  %v5521_v45 = vld [vmem:[%s5811_s3] ss:$0 sm:$0xff] }
 0x26e   : > { %v3192_v30 = vmax.f32 %v5477_v16, 0.0  ;;  %v3873_v10 = vpack.c.bf16 %v3306_v44, %v3306_v44  ;;  %v2932_v36 = vmul.f32 %v5507_v61, %v2663_v19  ;;  %v3086_v24 = vadd.f32 %v5077_v5, %v2951_v50 }
 0x26f   : > { %v3307_v4 = vmax.f32 %v5126_v26, %v3275_v48  ;;  %v3871_v21 = vpack.c.bf16 %v3304_v29, %v3304_v29  ;;  %v3305_v46 = vmax.f32 %v5131_v47, %v3273_v1  ;;  %v3084_v35 = vadd.f32 %v5077_v5, %v2949_v55  ;;  %v5884_v47 = vld [vmem:[#allocation9_spill] sm:$0xff]  ;;  %v5889_v55 = vld [vmem:[#allocation10_spill] sm:$0xff] }
 0x270   : > { %3467 = vst.msk [vmem:[%s5495_s13 + $0x8] sm:$0xf] %vm3464_vm1, %v3873_v10  ;;  %v5516_v44 = vadd.f32 %v5077_v5, %v2930_v23  ;;  %v5524_v62 = vadd.f32 %v5521_v45, %v2931_v49  ;;  %v2743_v18 = vadd.f32 %v4076_v14, %v5884_v47  ;;  %v3214_v13 = vmax.f32 %v3086_v24, 0.0  ;;  %v5886_v49 = vld [vmem:[#allocation12_spill] sm:$0xff] }
 0x271   : > { %v3874_v26 = vpack.c.bf16 %v3307_v4, %v3307_v4  ;;  %3465 = vst.msk [vmem:[%s5495_s13] sm:$0xf] %vm3464_vm1, %v3871_v21  ;;  %v3872_v59 = vpack.c.bf16 %v3305_v46, %v3305_v46  ;;  %v3212_v39 = vmax.f32 %v3084_v35, 0.0  ;;  %v2735_v5 = vadd.f32 %v2734_v31, %v5885_v43  ;;  %v2122_v23 = vpop.f32.mrb[168].mxu0  ;;  %v4079_v15 = vpop.f32.mrb[168].mxu1 }
 0x272   : > { %v5533_v63 = vadd.f32 %v5521_v45, %v2932_v36  ;;  %v2952_v38 = vmul.f32 %v5507_v61, %v2743_v18  ;;  %v2668_v48 = vadd.f32 %v5359_v7, %v2122_v23  ;;  %v2756_v14 = vadd.f32 %v4079_v15, %v5886_v49  ;;  %v2124_v19 = vpop.f32.mrb[169].mxu0  ;;  %v2747_v60 = vpop.f32.mrb[169].mxu1 }
 0x273   : > { %3468 = vst.msk [vmem:[%s5495_s13 + $0xc] sm:$0xf] %vm3464_vm1, %v3874_v26  ;;  %3466 = vst.msk [vmem:[%s5495_s13 + $0x4] sm:$0xf] %vm3464_vm1, %v3872_v59  ;;  %v5887_v29 = vmax.f32 %v5410_v42, 0.0  ;;  %v5888_v22 = vmax.f32 %v5402_v58, 0.0  ;;  %v2950_v50 = vmul.f32 %v5507_v61, %v2735_v5  ;;  %v2748_v10 = vadd.f32 %v2747_v60, %v5889_v55 }
 0x274   : > { %v2125_v4 = vpop.f32.mrb[170].mxu0  ;;  %v4080_v36 = vpop.f32.mrb[170].mxu1  ;;  %v3087_v7 = vadd.f32 %v5521_v45, %v2952_v38  ;;  %v2933_v21 = vmul.f32 %v5507_v61, %v2668_v48  ;;  %v2955_v46 = vmul.f32 %v5507_v61, %v2756_v14  ;;  %v3193_v59 = vmax.f32 %v5516_v44, 0.0 }
 0x275   : > { %v3278_v31 = vmax.f32 %v5887_v29, %v3214_v13  ;;  %v3276_v1 = vmax.f32 %v5888_v22, %v3212_v39  ;;  %v2671_v24 = vadd.f32 %v5363_v51, %v2125_v4  ;;  %v2127_v35 = vpop.f32.mrb[171].mxu0  ;;  %v2750_v42 = vpop.f32.mrb[171].mxu1  ;;  %v3085_v47 = vadd.f32 %v5521_v45, %v2950_v50  ;;  %v5892_v29 = vld [vmem:[#allocation13_spill] sm:$0xff]  ;;  %v5893_v22 = vld [vmem:[#allocation11_spill] sm:$0xff] }
 0x276   : > { %v2953_v18 = vmul.f32 %v5507_v61, %v2748_v10  ;;  %v3194_v13 = vmax.f32 %v5524_v62, 0.0  ;;  %v3215_v39 = vmax.f32 %v3087_v7, 0.0  ;;  %v3090_v43 = vadd.f32 %v5521_v45, %v2955_v46 }
 0x277   : > { %v3310_v26 = vmax.f32 %v5152_v12, %v3278_v31  ;;  %v3308_v58 = vmax.f32 %v5156_v20, %v3276_v1  ;;  %v3213_v23 = vmax.f32 %v3085_v47, 0.0  ;;  %v3195_v15 = vmax.f32 %v5533_v63, 0.0  ;;  %v5918_v63 = vld [vmem:[#allocation41_spill] sm:$0xff] }
 0x278   : > { %v3088_v12 = vadd.f32 %v5521_v45, %v2953_v18  ;;  %v5890_v20 = vmax.f32 %v5413_v52, 0.0  ;;  %v5562_v48 = vadd.f32 %v5521_v45, %v2933_v21  ;;  %v3218_v49 = vmax.f32 %v3090_v43, 0.0  ;;  %v5896_v18 = vld [vmem:[#allocation16_spill] sm:$0xff] }
 0x279   : > { %v3877_v51 = vpack.c.bf16 %v3310_v26, %v3310_v26  ;;  %v3875_v5 = vpack.c.bf16 %v3308_v58, %v3308_v58  ;;  %v5891_v14 = vmax.f32 %v5405_v57, 0.0  ;;  %v2759_v31 = vadd.f32 %v4080_v36, %v5892_v29  ;;  %v2130_v50 = vpop.f32.mrb[172].mxu0  ;;  %v4083_v55 = vpop.f32.mrb[172].mxu1 }
 0x27a   : > { %v3279_v38 = vmax.f32 %v5890_v20, %v3215_v39  ;;  %v3216_v60 = vmax.f32 %v3088_v12, 0.0  ;;  %v2751_v1 = vadd.f32 %v2750_v42, %v5893_v22  ;;  %v5894_v10 = vmax.f32 %v5438_v53, 0.0  ;;  %v2132_v46 = vpop.f32.mrb[173].mxu0  ;;  %v2763_v35 = vpop.f32.mrb[173].mxu1 }
 0x27b   : > { %3471 = vst.msk [vmem:[%s5495_s13 + $0x18] sm:$0xf] %vm3464_vm1, %v3877_v51  ;;  %3469 = vst.msk [vmem:[%s5495_s13 + $0x10] sm:$0xf] %vm3464_vm1, %v3875_v5  ;;  %v3277_v19 = vmax.f32 %v5891_v14, %v3213_v23  ;;  %v2934_v7 = vmul.f32 %v5507_v61, %v2671_v24  ;;  %v2676_v21 = vadd.f32 %v5357_v34, %v2130_v50  ;;  %v5895_v26 = vmax.f32 %v5416_v40, 0.0  ;;  %v4084_v47 = vpop.f32.mrb[174].mxu1 }
 0x27c   : > { %v3311_v52 = vmax.f32 %v5162_v8, %v3279_v38  ;;  %v3282_v4 = vmax.f32 %v5894_v10, %v3218_v49  ;;  %v2956_v42 = vmul.f32 %v5507_v61, %v2759_v31  ;;  %v2954_v58 = vmul.f32 %v5507_v61, %v2751_v1  ;;  %v2133_v8 = vpop.f32.mrb[174].mxu0  ;;  %v5897_v38 = vld [vmem:[#allocation14_spill] sm:$0xff]  ;;  %v5898_v1 = vld [vmem:[#allocation17_spill] sm:$0xff] }
 0x27d   : > { %v3309_v57 = vmax.f32 %v5167_v54, %v3277_v19  ;;  %v3280_v36 = vmax.f32 %v5895_v26, %v3216_v60  ;;  %v3196_v24 = vmax.f32 %v5562_v48, 0.0  ;;  %v2772_v39 = vadd.f32 %v4083_v55, %v5896_v18  ;;  %v2135_v43 = vpop.f32.mrb[175].mxu0  ;;  %v2766_v54 = vpop.f32.mrb[175].mxu1 }
 0x27e   : > { %v3878_v53 = vpack.c.bf16 %v3311_v52, %v3311_v52  ;;  %v3314_v34 = vmax.f32 %v5188_v2, %v3282_v4  ;;  %v3091_v5 = vadd.f32 %v5521_v45, %v2956_v42  ;;  %v3089_v23 = vadd.f32 %v5521_v45, %v2954_v58 }
 0x27f   : > { %v3876_v40 = vpack.c.bf16 %v3309_v57, %v3309_v57  ;;  %v3312_v51 = vmax.f32 %v5192_v0, %v3280_v36  ;;  %v5591_v20 = vadd.f32 %v5521_v45, %v2934_v7  ;;  %v2959_v2 = vmul.f32 %v5507_v61, %v2772_v39  ;;  %v5901_v7 = vld [vmem:[#allocation15_spill] sm:$0xff] }
 0x280   : > { %3472 = vst.msk [vmem:[%s5495_s13 + $0x1c] sm:$0xf] %vm3464_vm1, %v3878_v53  ;;  %v3881_v12 = vpack.c.bf16 %v3314_v34, %v3314_v34  ;;  %v2764_v49 = vadd.f32 %v2763_v35, %v5897_v38  ;;  %v3219_v19 = vmax.f32 %v3091_v5, 0.0  ;;  %v3217_v0 = vmax.f32 %v3089_v23, 0.0 }
 0x281   : > { %3470 = vst.msk [vmem:[%s5495_s13 + $0x14] sm:$0xf] %vm3464_vm1, %v3876_v40  ;;  %v3879_v14 = vpack.c.bf16 %v3312_v51, %v3312_v51  ;;  %v2679_v60 = vadd.f32 %v5361_v32, %v2133_v8  ;;  %v2935_v29 = vmul.f32 %v5507_v61, %v2676_v21  ;;  %v3094_v31 = vadd.f32 %v5521_v45, %v2959_v2  ;;  %v2138_v35 = vpop.f32.mrb[176].mxu0  ;;  %v4087_v21 = vpop.f32.mrb[176].mxu1 }
 0x282   : > { %3475 = vst.msk [vmem:[%s5495_s13 + $0x28] sm:$0xf] %vm3464_vm1, %v3881_v12  ;;  %v2957_v22 = vmul.f32 %v5507_v61, %v2764_v49  ;;  %v2775_v50 = vadd.f32 %v4084_v47, %v5898_v1  ;;  %v5899_v55 = vmax.f32 %v5443_v11, 0.0  ;;  %v5900_v10 = vmax.f32 %v5435_v9, 0.0  ;;  %v2140_v58 = vpop.f32.mrb[177].mxu0  ;;  %v2779_v8 = vpop.f32.mrb[177].mxu1 }
 0x283   : > { %3473 = vst.msk [vmem:[%s5495_s13 + $0x20] sm:$0xf] %vm3464_vm1, %v3879_v14  ;;  %v2936_v32 = vmul.f32 %v5507_v61, %v2679_v60  ;;  %v2767_v46 = vadd.f32 %v2766_v54, %v5901_v7  ;;  %v3222_v57 = vmax.f32 %v3094_v31, 0.0  ;;  %v2684_v42 = vadd.f32 %v5367_v25, %v2138_v35  ;;  %v2141_v34 = vpop.f32.mrb[178].mxu0  ;;  %v4088_v18 = vpop.f32.mrb[178].mxu1 }
 0x284   : > { %v3283_v52 = vmax.f32 %v5899_v55, %v3219_v19  ;;  %v3281_v4 = vmax.f32 %v5900_v10, %v3217_v0  ;;  %v3092_v26 = vadd.f32 %v5521_v45, %v2957_v22  ;;  %v2960_v36 = vmul.f32 %v5507_v61, %v2775_v50  ;;  %v2143_v51 = vpop.f32.mrb[179].mxu0  ;;  %v2782_v5 = vpop.f32.mrb[179].mxu1  ;;  %v5904_v0 = vld [vmem:[#allocation20_spill] sm:$0xff] }
 0x285   : > { %v3197_v11 = vmax.f32 %v5591_v20, 0.0  ;;  %v2958_v53 = vmul.f32 %v5507_v61, %v2767_v46  ;;  %v5620_v39 = vadd.f32 %v5521_v45, %v2935_v29  ;;  %v5902_v43 = vmax.f32 %v5453_v3, 0.0  ;;  %v5905_v29 = vld [vmem:[#allocation18_spill] sm:$0xff] }
 0x286   : > { %v3315_v9 = vmax.f32 %v5198_v37, %v3283_v52  ;;  %v3313_v47 = vmax.f32 %v5203_v27, %v3281_v4  ;;  %v3220_v54 = vmax.f32 %v3092_v26, 0.0  ;;  %v3095_v40 = vadd.f32 %v5521_v45, %v2960_v36  ;;  %v5910_v26 = vld [vmem:[#allocation19_spill] sm:$0xff] }
 0x287   : > { %v3286_v25 = vmax.f32 %v5902_v43, %v3222_v57  ;;  %v5626_v27 = vadd.f32 %v5521_v45, %v2936_v32  ;;  %v3093_v12 = vadd.f32 %v5521_v45, %v2958_v53  ;;  %v5903_v38 = vmax.f32 %v5446_v41, 0.0  ;;  %v5909_v57 = vld [vmem:[#allocation21_spill] sm:$0xff] }
 0x288   : > { %v3882_v37 = vpack.c.bf16 %v3315_v9, %v3315_v9  ;;  %v3880_v23 = vpack.c.bf16 %v3313_v47, %v3313_v47  ;;  %v3223_v14 = vmax.f32 %v3095_v40, 0.0  ;;  %v2937_v3 = vmul.f32 %v5507_v61, %v2684_v42  ;;  %v5912_v40 = vld [vmem:[#allocation52_spill] sm:$0xff] }
 0x289   : > { %v3318_v2 = vmax.f32 %v5224_v56, %v3286_v25  ;;  %v3284_v49 = vmax.f32 %v5903_v38, %v3220_v54  ;;  %v3221_v19 = vmax.f32 %v3093_v12, 0.0  ;;  %v2788_v60 = vadd.f32 %v4087_v21, %v5904_v0  ;;  %v2146_v46 = vpop.f32.mrb[180].mxu0  ;;  %v5908_v21 = vld [vmem:[#allocation37_spill] sm:$0xff] }
 0x28a   : > { %3476 = vst.msk [vmem:[%s5495_s13 + $0x2c] sm:$0xf] %vm3464_vm1, %v3882_v37  ;;  %3474 = vst.msk [vmem:[%s5495_s13 + $0x24] sm:$0xf] %vm3464_vm1, %v3880_v23  ;;  %v2780_v31 = vadd.f32 %v2779_v8, %v5905_v29  ;;  %v2687_v22 = vadd.f32 %v5371_v17, %v2141_v34  ;;  %v3198_v56 = vmax.f32 %v5620_v39, 0.0  ;;  %v5906_v50 = vmax.f32 %v5459_v33, 0.0 }
 0x28b   : > { %v3885_v1 = vpack.c.bf16 %v3318_v2, %v3318_v2  ;;  %v3316_v41 = vmax.f32 %v5228_v28, %v3284_v49  ;;  %v3199_v52 = vmax.f32 %v5626_v27, 0.0  ;;  %v5907_v10 = vmax.f32 %v5449_v6, 0.0  ;;  %v4091_v17 = vpop.f32.mrb[180].mxu1  ;;  %v2148_v42 = vpop.f32.mrb[181].mxu0  ;;  %v5911_v6 = vld [vmem:[#allocation38_spill] sm:$0xff] }
 0x28c   : > { %v3287_v55 = vmax.f32 %v5906_v50, %v3223_v14  ;;  %v2963_v32 = vmul.f32 %v5507_v61, %v2788_v60  ;;  %v2961_v7 = vmul.f32 %v5507_v61, %v2780_v31  ;;  %v2791_v33 = vadd.f32 %v4088_v18, %v5909_v57  ;;  %v2795_v58 = vpop.f32.mrb[181].mxu1  ;;  %v2149_v34 = vpop.f32.mrb[182].mxu0  ;;  %v5914_v31 = vld [vmem:[#allocation22_spill] sm:$0xff] }
 0x28d   : > { %v3285_v4 = vmax.f32 %v5907_v10, %v3221_v19  ;;  %3479 = vst.msk [vmem:[%s5495_s13 + $0x38] sm:$0xf] %vm3464_vm1, %v3885_v1  ;;  %v3883_v35 = vpack.c.bf16 %v3316_v41, %v3316_v41  ;;  %v2783_v36 = vadd.f32 %v2782_v5, %v5910_v26  ;;  %v5656_v9 = vadd.f32 %v5521_v45, %v2937_v3  ;;  %v4092_v43 = vpop.f32.mrb[182].mxu1  ;;  %v2151_v5 = vpop.f32.mrb[183].mxu0  ;;  %v5913_v19 = vld [vmem:[#allocation24_spill] sm:$0xff]  ;;  %v5915_v1 = vld [vmem:[#allocation53_spill] sm:$0xff] }
 0x28e   : > { %v3319_v28 = vmax.f32 %v5908_v21, %v3287_v55  ;;  %v3098_v47 = vadd.f32 %v5521_v45, %v2963_v32  ;;  %v3096_v53 = vadd.f32 %v5521_v45, %v2961_v7  ;;  %v2964_v25 = vmul.f32 %v5507_v61, %v2791_v33  ;;  %v2798_v37 = vpop.f32.mrb[183].mxu1  ;;  %v5916_v32 = vld [vmem:[#allocation39_spill] sm:$0xff] }
 0x28f   : > { %v3317_v8 = vmax.f32 %v5911_v6, %v3285_v4  ;;  %3477 = vst.msk [vmem:[%s5495_s13 + $0x30] sm:$0xf] %vm3464_vm1, %v3883_v35  ;;  %v2962_v54 = vmul.f32 %v5507_v61, %v2783_v36  ;;  %v2692_v51 = vadd.f32 %v5912_v40, %v2146_v46  ;;  %v2938_v38 = vmul.f32 %v5507_v61, %v2687_v22  ;;  %v5917_v46 = vld [vmem:[#allocation40_spill] sm:$0xff]  ;;  %v5921_v5 = vld [vmem:[#allocation23_spill] sm:$0xff] }
 0x290   : > { %v3886_v18 = vpack.c.bf16 %v3319_v28, %v3319_v28  ;;  %v3226_v12 = vmax.f32 %v3098_v47, 0.0  ;;  %v3224_v2 = vmax.f32 %v3096_v53, 0.0  ;;  %v3099_v49 = vadd.f32 %v5521_v45, %v2964_v25  ;;  %v5919_v53 = vld [vmem:[#allocation42_spill] sm:$0xff] }
 0x291   : > { %v3884_v23 = vpack.c.bf16 %v3317_v8, %v3317_v8  ;;  %v3097_v14 = vadd.f32 %v5521_v45, %v2962_v54  ;;  %v2939_v3 = vmul.f32 %v5507_v61, %v2692_v51  ;;  %v2804_v0 = vadd.f32 %v4091_v17, %v5913_v19  ;;  %v2154_v16 = vpop.f32.mrb[184].mxu0 }
 0x292   : > { %3480 = vst.msk [vmem:[%s5495_s13 + $0x3c] sm:$0xf] %vm3464_vm1, %v3886_v18  ;;  %v3290_v60 = vmax.f32 %v3194_v13, %v3226_v12  ;;  %v3288_v29 = vmax.f32 %v3192_v30, %v3224_v2  ;;  %v2796_v22 = vadd.f32 %v2795_v58, %v5914_v31  ;;  %v2695_v41 = vadd.f32 %v5915_v1, %v2149_v34  ;;  %v4095_v30 = vpop.f32.mrb[184].mxu1  ;;  %v2156_v33 = vpop.f32.mrb[185].mxu0  ;;  %v5920_v34 = vld [vmem:[#allocation25_spill] sm:$0xff]  ;;  %v5922_v12 = vld [vmem:[#allocation55_spill] sm:$0xff] }
 0x293   : > { %3478 = vst.msk [vmem:[%s5495_s13 + $0x34] sm:$0xf] %vm3464_vm1, %v3884_v23  ;;  %v3200_v50 = vmax.f32 %v5656_v9, 0.0  ;;  %v3227_v55 = vmax.f32 %v3099_v49, 0.0  ;;  %v3225_v10 = vmax.f32 %v3097_v14, 0.0  ;;  %v2967_v4 = vmul.f32 %v5507_v61, %v2804_v0  ;;  %v2811_v26 = vpop.f32.mrb[185].mxu1 }
 0x294   : > { %v3322_v7 = vmax.f32 %v5916_v32, %v3290_v60  ;;  %v3320_v17 = vmax.f32 %v5917_v46, %v3288_v29  ;;  %v2965_v62 = vmul.f32 %v5507_v61, %v2796_v22  ;;  %v2940_v13 = vmul.f32 %v5507_v61, %v2695_v41  ;;  %v2157_v8 = vpop.f32.mrb[186].mxu0  ;;  %v4096_v47 = vpop.f32.mrb[186].mxu1  ;;  %v5923_v60 = vld [vmem:[#allocation28_spill] sm:$0xff]  ;;  %v5926_v1 = vld [vmem:[#allocation57_spill] sm:$0xff] }
 0x295   : > { %v5687_v35 = vadd.f32 %v5521_v45, %v2938_v38  ;;  %v3291_v21 = vmax.f32 %v3195_v15, %v3227_v55  ;;  %v3289_v28 = vmax.f32 %v3193_v59, %v3225_v10  ;;  %v3102_v57 = vadd.f32 %v5521_v45, %v2967_v4  ;;  %v2159_v25 = vpop.f32.mrb[187].mxu0  ;;  %v2814_v54 = vpop.f32.mrb[187].mxu1 }
 0x296   : > { %v3889_v36 = vpack.c.bf16 %v3322_v7, %v3322_v7  ;;  %v3887_v42 = vpack.c.bf16 %v3320_v17, %v3320_v17  ;;  %v5695_v58 = vadd.f32 %v5521_v45, %v2939_v3  ;;  %v3100_v6 = vadd.f32 %v5521_v45, %v2965_v62 }
 0x297   : > { %v3323_v15 = vmax.f32 %v5918_v63, %v3291_v21  ;;  %v3321_v44 = vmax.f32 %v5919_v53, %v3289_v28  ;;  %v3230_v59 = vmax.f32 %v3102_v57, 0.0  ;;  %v2807_v18 = vadd.f32 %v4092_v43, %v5920_v34 }
 0x298   : > { %3483 = vst.msk [vmem:[%s5495_s13 + $0x48] sm:$0xf] %vm3464_vm1, %v3889_v36  ;;  %3481 = vst.msk [vmem:[%s5495_s13 + $0x40] sm:$0xf] %vm3464_vm1, %v3887_v42  ;;  %v3228_v40 = vmax.f32 %v3100_v6, 0.0  ;;  %v5706_v51 = vadd.f32 %v5521_v45, %v2940_v13  ;;  %v2799_v23 = vadd.f32 %v2798_v37, %v5921_v5  ;;  %v2700_v2 = vadd.f32 %v5922_v12, %v2154_v16  ;;  %v5924_v37 = vld [vmem:[#allocation43_spill] sm:$0xff] }
 0x299   : > { %v3890_v38 = vpack.c.bf16 %v3323_v15, %v3323_v15  ;;  %v3888_v49 = vpack.c.bf16 %v3321_v44, %v3321_v44  ;;  %v3294_v43 = vmax.f32 %v3198_v56, %v3230_v59  ;;  %v2968_v14 = vmul.f32 %v5507_v61, %v2807_v18  ;;  %v5925_v56 = vld [vmem:[#allocation26_spill] sm:$0xff]  ;;  %v2162_v32 = vpop.f32.mrb[188].mxu0  ;;  %v4099_v7 = vpop.f32.mrb[188].mxu1  ;;  %v5928_v6 = vld [vmem:[#allocation29_spill] sm:$0xff]  ;;  %v5929_v59 = vld [vmem:[#allocation27_spill] sm:$0xff] }
 0x29a   : > { %v3292_v3 = vmax.f32 %v3196_v24, %v3228_v40  ;;  %v2966_v19 = vmul.f32 %v5507_v61, %v2799_v23  ;;  %v2941_v0 = vmul.f32 %v5507_v61, %v2700_v2  ;;  %v2820_v29 = vadd.f32 %v4095_v30, %v5923_v60  ;;  %v5927_v24 = vld [vmem:[#allocation44_spill] sm:$0xff]  ;;  %v2164_v16 = vpop.f32.mrb[189].mxu0  ;;  %v2827_v30 = vpop.f32.mrb[189].mxu1  ;;  %v5930_v18 = vld [vmem:[#allocation54_spill] sm:$0xff] }
 0x29b   : > { %3484 = vst.msk [vmem:[%s5495_s13 + $0x4c] sm:$0xf] %vm3464_vm1, %v3890_v38  ;;  %3482 = vst.msk [vmem:[%s5495_s13 + $0x44] sm:$0xf] %vm3464_vm1, %v3888_v49  ;;  %v3326_v31 = vmax.f32 %v5924_v37, %v3294_v43  ;;  %v3103_v39 = vadd.f32 %v5521_v45, %v2968_v14  ;;  %v2812_v22 = vadd.f32 %v2811_v26, %v5925_v56  ;;  %v3201_v48 = vmax.f32 %v5687_v35, 0.0  ;;  %v2165_v33 = vpop.f32.mrb[190].mxu0 }
 0x29c   : > { %v2703_v41 = vadd.f32 %v5926_v1, %v2157_v8  ;;  %v3324_v55 = vmax.f32 %v5927_v24, %v3292_v3  ;;  %v3101_v10 = vadd.f32 %v5521_v45, %v2966_v19  ;;  %v2971_v4 = vmul.f32 %v5507_v61, %v2820_v29  ;;  %v4100_v26 = vpop.f32.mrb[190].mxu1  ;;  %v2167_v63 = vpop.f32.mrb[191].mxu0  ;;  %v5932_v5 = vld [vmem:[#allocation46_spill] sm:$0xff]  ;;  %v5933_v49 = vld [vmem:[#allocation32_spill] sm:$0xff]  ;;  %v5935_v29 = vld [vmem:[#allocation35_spill] sm:$0xff] }
 0x29d   : > { %v3202_v46 = vmax.f32 %v5695_v58, 0.0  ;;  %v3893_v17 = vpack.c.bf16 %v3326_v31, %v3326_v31  ;;  %v3231_v62 = vmax.f32 %v3103_v39, 0.0  ;;  %v2969_v13 = vmul.f32 %v5507_v61, %v2812_v22  ;;  %v2830_v15 = vpop.f32.mrb[191].mxu1  ;;  %v5934_v3 = vld [vmem:[#allocation34_spill] sm:$0xff] }
 0x29e   : > { %v3891_v21 = vpack.c.bf16 %v3324_v55, %v3324_v55  ;;  %v3203_v35 = vmax.f32 %v5706_v51, 0.0  ;;  %v3229_v28 = vmax.f32 %v3101_v10, 0.0  ;;  %v3106_v57 = vadd.f32 %v5521_v45, %v2971_v4 }
 0x29f   : > { %3487 = vst.msk [vmem:[%s5495_s13 + $0x58] sm:$0xf] %vm3464_vm1, %v3893_v17  ;;  %v3295_v36 = vmax.f32 %v3199_v52, %v3231_v62  ;;  %v5739_v42 = vadd.f32 %v5521_v45, %v2941_v0  ;;  %v3104_v58 = vadd.f32 %v5521_v45, %v2969_v13  ;;  %v2823_v8 = vadd.f32 %v4096_v47, %v5928_v6  ;;  %v5931_v52 = vld [vmem:[#allocation45_spill] sm:$0xff]  ;;  %v5939_v13 = vld [vmem:[#allocation31_spill] sm:$0xff] }
 0x2a0   : > { %3485 = vst.msk [vmem:[%s5495_s13 + $0x50] sm:$0xf] %vm3464_vm1, %v3891_v21  ;;  %v3293_v53 = vmax.f32 %v3197_v11, %v3229_v28  ;;  %v3234_v44 = vmax.f32 %v3106_v57, 0.0  ;;  %v2815_v34 = vadd.f32 %v2814_v54, %v5929_v59  ;;  %v2708_v27 = vadd.f32 %v5930_v18, %v2162_v32  ;;  %v5938_v17 = vld [vmem:[#allocation33_spill] sm:$0xff]  ;;  %v5940_v21 = vld [vmem:[#allocation36_spill] sm:$0xff] }
 0x2a1   : > { %v3327_v25 = vmax.f32 %v5931_v52, %v3295_v36  ;;  %v3232_v40 = vmax.f32 %v3104_v58, 0.0  ;;  %v2942_v51 = vmul.f32 %v5507_v61, %v2703_v41  ;;  %v2972_v47 = vmul.f32 %v5507_v61, %v2823_v8  ;;  %v5937_v41 = vld [vmem:[#allocation56_spill] sm:$0xff] }
 0x2a2   : > { %v3325_v23 = vmax.f32 %v5932_v5, %v3293_v53  ;;  %v3298_v12 = vmax.f32 %v3202_v46, %v3234_v44  ;;  %v2970_v20 = vmul.f32 %v5507_v61, %v2815_v34  ;;  %v2943_v11 = vmul.f32 %v5507_v61, %v2708_v27  ;;  %v5942_v18 = vld [vmem:[#allocation48_spill] sm:$0xff] }
 0x2a3   : > { %v3894_v2 = vpack.c.bf16 %v3327_v25, %v3327_v25  ;;  %v3296_v54 = vmax.f32 %v3200_v50, %v3232_v40  ;;  %v3107_v38 = vadd.f32 %v5521_v45, %v2972_v47  ;;  %v2836_v43 = vadd.f32 %v4099_v7, %v5933_v49  ;;  %v5936_v50 = vld [vmem:[#allocation30_spill] sm:$0xff] }
 0x2a4   : > { %v3892_v14 = vpack.c.bf16 %v3325_v23, %v3325_v23  ;;  %v3330_v19 = vmax.f32 %v5934_v3, %v3298_v12  ;;  %v3105_v0 = vadd.f32 %v5521_v45, %v2970_v20  ;;  %v3078_v60 = vadd.f32 %v5521_v45, %v2943_v11  ;;  %v5944_v12 = vld [vmem:[#allocation50_spill] sm:$0xff]  ;;  %v5945_v11 = vld [vmem:[#allocation51_spill] sm:$0xff] }
 0x2a5   : > { %3488 = vst.msk [vmem:[%s5495_s13 + $0x5c] sm:$0xf] %vm3464_vm1, %v3894_v2  ;;  %v3328_v37 = vmax.f32 %v5935_v29, %v3296_v54  ;;  %v3235_v31 = vmax.f32 %v3107_v38, 0.0  ;;  %v2975_v9 = vmul.f32 %v5507_v61, %v2836_v43  ;;  %v2828_v39 = vadd.f32 %v2827_v30, %v5936_v50 }
 0x2a6   : > { %3486 = vst.msk [vmem:[%s5495_s13 + $0x54] sm:$0xf] %vm3464_vm1, %v3892_v14  ;;  %v3897_v56 = vpack.c.bf16 %v3330_v19, %v3330_v19  ;;  %v3233_v22 = vmax.f32 %v3105_v0, 0.0  ;;  %v3206_v1 = vmax.f32 %v3078_v60, 0.0  ;;  %v2711_v24 = vadd.f32 %v5937_v41, %v2165_v33  ;;  %v5941_v33 = vld [vmem:[#allocation47_spill] sm:$0xff] }
 0x2a7   : > { %v3895_v55 = vpack.c.bf16 %v3328_v37, %v3328_v37  ;;  %v3299_v10 = vmax.f32 %v3203_v35, %v3235_v31  ;;  %v3110_v4 = vadd.f32 %v5521_v45, %v2975_v9  ;;  %v2973_v32 = vmul.f32 %v5507_v61, %v2828_v39 }
 0x2a8   : > { %3491 = vst.msk [vmem:[%s5495_s13 + $0x68] sm:$0xf] %vm3464_vm1, %v3897_v56  ;;  %v3297_v7 = vmax.f32 %v3201_v48, %v3233_v22  ;;  %v2944_v46 = vmul.f32 %v5507_v61, %v2711_v24  ;;  %v2839_v62 = vadd.f32 %v4100_v26, %v5938_v17  ;;  %v2831_v16 = vadd.f32 %v2830_v15, %v5939_v13 }
 0x2a9   : > { %3489 = vst.msk [vmem:[%s5495_s13 + $0x60] sm:$0xf] %vm3464_vm1, %v3895_v55  ;;  %v3077_v30 = vadd.f32 %v5521_v45, %v2942_v51  ;;  %v3331_v35 = vmax.f32 %v5940_v21, %v3299_v10  ;;  %v3238_v28 = vmax.f32 %v3110_v4, 0.0  ;;  %v3108_v57 = vadd.f32 %v5521_v45, %v2973_v32  ;;  %v5943_v51 = vld [vmem:[#allocation49_spill] sm:$0xff] }
 0x2aa   : > { %v3329_v36 = vmax.f32 %v5941_v33, %v3297_v7  ;;  %v3079_v48 = vadd.f32 %v5521_v45, %v2944_v46  ;;  %v2976_v58 = vmul.f32 %v5507_v61, %v2839_v62  ;;  %v2974_v26 = vmul.f32 %v5507_v61, %v2831_v16 }
 0x2ab   : > { %v3204_v6 = vmax.f32 %v5739_v42, 0.0  ;;  %v3898_v8 = vpack.c.bf16 %v3331_v35, %v3331_v35  ;;  %v3302_v63 = vmax.f32 %v3206_v1, %v3238_v28  ;;  %v3236_v15 = vmax.f32 %v3108_v57, 0.0 }
 0x2ac   : > { %v3896_v53 = vpack.c.bf16 %v3329_v36, %v3329_v36  ;;  %v3207_v44 = vmax.f32 %v3079_v48, 0.0  ;;  %v3111_v59 = vadd.f32 %v5521_v45, %v2976_v58  ;;  %v3109_v34 = vadd.f32 %v5521_v45, %v2974_v26 }
 0x2ad   : > { %3492 = vst.msk [vmem:[%s5495_s13 + $0x6c] sm:$0xf] %vm3464_vm1, %v3898_v8  ;;  %v3334_v27 = vmax.f32 %v5942_v18, %v3302_v63  ;;  %v3300_v52 = vmax.f32 %v3204_v6, %v3236_v15  ;;  %v3205_v61 = vmax.f32 %v3077_v30, 0.0 }
 0x2ae   : > { %3490 = vst.msk [vmem:[%s5495_s13 + $0x64] sm:$0xf] %vm3464_vm1, %v3896_v53  ;;  %v3239_v42 = vmax.f32 %v3111_v59, 0.0  ;;  %v3237_v25 = vmax.f32 %v3109_v34, 0.0 }
 0x2af   : > { %v3901_v40 = vpack.c.bf16 %v3334_v27, %v3334_v27  ;;  %v3332_v47 = vmax.f32 %v5943_v51, %v3300_v52 }
 0x2b0   : > { %v3303_v5 = vmax.f32 %v3207_v44, %v3239_v42  ;;  %v3301_v23 = vmax.f32 %v3205_v61, %v3237_v25 }
 0x2b1   : > { %3495 = vst.msk [vmem:[%s5495_s13 + $0x78] sm:$0xf] %vm3464_vm1, %v3901_v40  ;;  %v3899_v45 = vpack.c.bf16 %v3332_v47, %v3332_v47 }
 0x2b2   : > { %v3335_v20 = vmax.f32 %v5944_v12, %v3303_v5  ;;  %v3333_v2 = vmax.f32 %v5945_v11, %v3301_v23 }
 0x2b3   : > { %3493 = vst.msk [vmem:[%s5495_s13 + $0x70] sm:$0xf] %vm3464_vm1, %v3899_v45 }
 0x2b4   : > { %v3902_v54 = vpack.c.bf16 %v3335_v20, %v3335_v20  ;;  %v3900_v38 = vpack.c.bf16 %v3333_v2, %v3333_v2 }
 0x2b6   : > { %3496 = vst.msk [vmem:[%s5495_s13 + $0x7c] sm:$0xf] %vm3464_vm1, %v3902_v54  ;;  %3494 = vst.msk [vmem:[%s5495_s13 + $0x74] sm:$0xf] %vm3464_vm1, %v3900_v38 }
 0x2b7 PF: > { %s14_s15 = sadd.s32 1, %s4425_s15  }
 0x2b8   : > { %p11_p4 = scmp.ge.s32.totalorder %s14_s15, 4  }
 0x2ba   :  { %13 = sbr.rel (!%p11_p4) target bundleno = 1 (0x1), region = 66 }

// kernel: deep2d_encoder_forward.8
= control target key start
LH: loop header
LB: loop body
LE: loop exit
PB: predicated region body
PF: predicated region fallthrough
CT: control target
= control target key end

     0   :  { %s1665_s15 = smov 0   ;;  %s1952_s0 = inlined_call_operand.vmem [shape: bf16[2,256,288], index: 0, kind: input, shape index: {}]   ;;  %s1953_s1 = inlined_call_operand.vmem [shape: bf16[288,32], index: 1, kind: input, shape index: {}]   ;;  %s1954_s2 = inlined_call_operand.vmem [shape: f32[1,32], index: 2, kind: input, shape index: {}]   ;;  %s1955_s3 = inlined_call_operand.vmem [shape: f32[1,32], index: 3, kind: input, shape index: {}]   ;;  %s1956_s4 = inlined_call_operand.vmem [shape: bf16[2,64,32], index: 4, kind: output, shape index: {}]  }
   0x1 LB: > { %s1248_s16 = sadd.s32 4294967295, %s1638_s15   ;;  %p1252_p0 = scmp.ge.s32.totalorder %s1638_s15, 1  ;;  %s1638_s15 = sphi %s1665_s15, %s14_s15  }
   0x2   : > { %p162_p1 = scmp.lt.s32.totalorder %s1638_s15, 3 }
   0x4   : > { %p163_p2 = pnand %p1252_p0, %p162_p1 }
   0x5   : > { %v1550_v0 = vld [vmem:[%s1953_s1 + $0x40] sm:$0xff] (!%p163_p2)   ;;  %v1552_v2 = vld [vmem:[%s1953_s1 + $0x48] sm:$0xff] (!%p163_p2)   ;;  %p188_p3 = scmp.lt.s32.totalorder (!%p163_p2), %s1248_s16, 1  ;;  %v1554_v4 = vld [vmem:[%s1953_s1 + $0x50] sm:$0xff] (!%p163_p2)   ;;  %vm647_vm0 = vcmask (!%p163_p2), 261120   ;;  %vm1184_vm1 = vcmask (!%p163_p2), 257024  }
   0x6   : > { %166 = sbr.rel (%p163_p2) target bundleno = 360 (0x168), region = 36  ;;  %v1551_v1 = vld [vmem:[%s1953_s1] sm:$0xff] (!%p163_p2)   ;;  %1359 = vmatprep.subr.bf16.mxu0 (!%p163_p2), %v1550_v0  ;;  %1525 = vmatprep.subr.bf16.mxu1 (!%p163_p2), %v1550_v0  ;;  %v1553_v3 = vld [vmem:[%s1953_s1 + $0x8] sm:$0xff] (!%p163_p2)   ;;  %v1555_v5 = vld [vmem:[%s1953_s1 + $0x10] sm:$0xff] (!%p163_p2)  }
   0x7   : > { %1360 = vmatpush3.bf16.msra.mxu0 (!%p163_p2), %v1551_v1  ;;  %1533 = vmatpush3.bf16.msra.mxu1 (!%p163_p2), %v1551_v1  ;;  %v1556_v6 = vld [vmem:[%s1953_s1 + $0x58] sm:$0xff] (!%p163_p2)   ;;  %v1558_v8 = vld [vmem:[%s1953_s1 + $0x60] sm:$0xff] (!%p163_p2)   ;;  %v1560_v10 = vld [vmem:[%s1953_s1 + $0x68] sm:$0xff] (!%p163_p2)  }
   0x8   : > { %1361 = vmatprep.subr.bf16.mxu0 (!%p163_p2), %v1552_v2  ;;  %1526 = vmatprep.subr.bf16.mxu1 (!%p163_p2), %v1552_v2  ;;  %v1557_v7 = vld [vmem:[%s1953_s1 + $0x18] sm:$0xff] (!%p163_p2)   ;;  %v1559_v9 = vld [vmem:[%s1953_s1 + $0x20] sm:$0xff] (!%p163_p2)   ;;  %v1561_v13 = vld [vmem:[%s1953_s1 + $0x28] sm:$0xff] (!%p163_p2)  }
   0x9   : > { %v1562_v14 = vld [vmem:[%s1953_s1 + $0x70] sm:$0xff] (!%p163_p2)   ;;  %v1564_v16 = vld [vmem:[%s1953_s1 + $0x78] sm:$0xff] (!%p163_p2)   ;;  %v1572_v18 = vld [vmem:[%s1953_s1 + $0x80] sm:$0xff] (!%p163_p2)  }
   0xa   : > { %v1563_v15 = vld [vmem:[%s1953_s1 + $0x30] sm:$0xff] (!%p163_p2)   ;;  %v1565_v17 = vld [vmem:[%s1953_s1 + $0x38] sm:$0xff] (!%p163_p2)   ;;  %v1585_v23 = vld [vmem:[%s1953_s1 + $0x88] sm:$0xff] (!%p163_p2)  }
   0xb   : > { %1362 = vmatpush3.bf16.msra.mxu0 (!%p163_p2), %v1553_v3  ;;  %1534 = vmatpush3.bf16.msra.mxu1 (!%p163_p2), %v1553_v3 }
   0xc   : > { %1363 = vmatprep.subr.bf16.mxu0 (!%p163_p2), %v1554_v4  ;;  %1527 = vmatprep.subr.bf16.mxu1 (!%p163_p2), %v1554_v4 }
   0xd   : > { %s1958_s16 = smov (!%p188_p3, %s1248_s16), 1 }
   0xe   : > { %s1541_s5 = smul.u32 384, %s1958_s16  ;;  %s1350_s11 = sshll.u32 %s1958_s16, 5 }
   0xf   : > { %1364 = vmatpush3.bf16.msra.mxu0 %v1555_v5  ;;  %1535 = vmatpush3.bf16.msra.mxu1 %v1555_v5  ;;  %s1906_s13 = scalar_lea.vmem %s1956_s4, %s1350_s11 }
  0x10   : > { %1365 = vmatprep.subr.bf16.mxu0 %v1556_v6  ;;  %1528 = vmatprep.subr.bf16.mxu1 %v1556_v6  ;;  %s1706_s12 = scalar_lea.vmem %s1952_s0, %s1541_s5 }
  0x11   : > { %v1568_v11 = vld [vmem:[%s1706_s12 + $0x4] ss:$12 sps:$4 sm:$0xff]   ;;  %v1566_v19 = vld [vmem:[%s1706_s12] ss:$12 sps:$4 sm:$0xff]   ;;  %v1573_v21 = vld [vmem:[%s1706_s12 + $0x1c] ss:$12 sps:$4 sm:$0xff]  }
  0x12   : > { %v1571_v12 = vld [vmem:[%s1706_s12 + $0x124] ss:$12 sps:$4 sm:$0xff]   ;;  %728 = vmatprep.mubr.bf16.mxu0 %v1568_v11  ;;  %v1569_v20 = vld [vmem:[%s1706_s12 + $0x120] ss:$12 sps:$4 sm:$0xff]   ;;  %v1575_v22 = vld [vmem:[%s1706_s12 + $0x13c] ss:$12 sps:$4 sm:$0xff]  }
  0x13   : > { %1366 = vmatpush3.bf16.msra.mxu0 %v1557_v7  ;;  %1536 = vmatpush3.bf16.msra.mxu1 %v1557_v7  ;;  %v1577_v24 = vld [vmem:[%s1706_s12 + $0x18] ss:$12 sps:$4 sm:$0xff]   ;;  %v1579_v26 = vld [vmem:[%s1706_s12 + $0x34] ss:$12 sps:$4 sm:$0xff]   ;;  %v1583_v28 = vld [vmem:[%s1706_s12 + $0x30] ss:$12 sps:$4 sm:$0xff]  }
  0x14   : > { %1367 = vmatprep.subr.bf16.mxu0 %v1558_v8  ;;  %1529 = vmatprep.subr.bf16.mxu1 %v1558_v8  ;;  %v1578_v25 = vld [vmem:[%s1706_s12 + $0x138] ss:$12 sps:$4 sm:$0xff]   ;;  %v1581_v27 = vld [vmem:[%s1706_s12 + $0x154] ss:$12 sps:$4 sm:$0xff]   ;;  %v1584_v29 = vld [vmem:[%s1706_s12 + $0x150] ss:$12 sps:$4 sm:$0xff]  }
  0x15   : > { %824 = vmatprep.mubr.bf16.mxu1 %v1571_v12  ;;  %v1586_v30 = vld [vmem:[%s1706_s12 + $0x4c] ss:$12 sps:$4 sm:$0xff]   ;;  %v1590_v32 = vld [vmem:[%s1706_s12 + $0x48] ss:$12 sps:$4 sm:$0xff]   ;;  %v1592_v34 = vld [vmem:[%s1706_s12 + $0x64] ss:$12 sps:$4 sm:$0xff]  }
  0x16   : > { %v1588_v31 = vld [vmem:[%s1706_s12 + $0x16c] ss:$12 sps:$4 sm:$0xff]   ;;  %v1591_v33 = vld [vmem:[%s1706_s12 + $0x168] ss:$12 sps:$4 sm:$0xff]   ;;  %v1601_v41 = vld [vmem:[%s1706_s12 + $0x50] ss:$12 sps:$4 sm:$0xff]  }
  0x17   : > { %1368 = vmatpush3.bf16.msra.mxu0 %v1559_v9  ;;  %1537 = vmatpush3.bf16.msra.mxu1 %v1559_v9  ;;  %v1594_v35 = vld [vmem:[%s1706_s12 + $0x8] ss:$12 sps:$4 sm:$0xff]   ;;  %v1595_v36 = vld [vmem:[%s1706_s12 + $0x60] ss:$12 sps:$4 sm:$0xff]   ;;  %v1599_v39 = vld [vmem:[%s1706_s12 + $0x38] ss:$12 sps:$4 sm:$0xff]  }
  0x18   : > { %1369 = vmatprep.subr.bf16.mxu0 %v1560_v10  ;;  %1530 = vmatprep.subr.bf16.mxu1 %v1560_v10  ;;  %v1596_v37 = vld [vmem:[%s1706_s12 + $0x20] ss:$12 sps:$4 sm:$0xff]   ;;  %v1597_v38 = vld [vmem:[%s1706_s12 + $0x7c] ss:$12 sps:$4 sm:$0xff]   ;;  %v1600_v40 = vld [vmem:[%s1706_s12 + $0x78] ss:$12 sps:$4 sm:$0xff]  }
  0x19   : > { %v1602_v42 = vld [vmem:[%s1706_s12 + $0x94] ss:$12 sps:$4 sm:$0xff]   ;;  %v1605_v44 = vld [vmem:[%s1706_s12 + $0x90] ss:$12 sps:$4 sm:$0xff]   ;;  %v1607_v46 = vld [vmem:[%s1706_s12 + $0xac] ss:$12 sps:$4 sm:$0xff]  }
  0x1a   : > { %v1604_v43 = vld [vmem:[%s1706_s12 + $0x68] ss:$12 sps:$4 sm:$0xff]   ;;  %v1606_v45 = vld [vmem:[%s1706_s12 + $0x80] ss:$12 sps:$4 sm:$0xff]   ;;  %v1609_v47 = vld [vmem:[%s1706_s12 + $0x98] ss:$12 sps:$4 sm:$0xff]  }
  0x1b   : > { %1370 = vmatpush3.bf16.msra.mxu0 %v1561_v13  ;;  %1538 = vmatpush3.bf16.msra.mxu1 %v1561_v13  ;;  %v1610_v48 = vld [vmem:[%s1706_s12 + $0xa8] ss:$12 sps:$4 sm:$0xff]   ;;  %v1611_v49 = vld [vmem:[%s1706_s12 + $0xb0] ss:$12 sps:$4 sm:$0xff]   ;;  %v1615_v52 = vld [vmem:[%s1706_s12 + $0xc0] ss:$12 sps:$4 sm:$0xff]  }
  0x1c   : > { %1371 = vmatprep.subr.bf16.mxu0 %v1562_v14  ;;  %1531 = vmatprep.subr.bf16.mxu1 %v1562_v14  ;;  %v1612_v50 = vld [vmem:[%s1706_s12 + $0xc4] ss:$12 sps:$4 sm:$0xff]   ;;  %v1614_v51 = vld [vmem:[%s1706_s12 + $0xc8] ss:$12 sps:$4 sm:$0xff]   ;;  %v1616_v53 = vld [vmem:[%s1706_s12 + $0xe0] ss:$12 sps:$4 sm:$0xff]  }
  0x1d   : > { %v1617_v54 = vld [vmem:[%s1706_s12 + $0xdc] ss:$12 sps:$4 sm:$0xff]   ;;  %v1619_v55 = vld [vmem:[%s1706_s12 + $0xf8] ss:$12 sps:$4 sm:$0xff]   ;;  %v1622_v58 = vld [vmem:[%s1706_s12 + $0xf4] ss:$12 sps:$4 sm:$0xff]  }
  0x1e   : > { %v1620_v56 = vld [vmem:[%s1706_s12 + $0xd8] ss:$12 sps:$4 sm:$0xff]   ;;  %v1621_v57 = vld [vmem:[%s1706_s12 + $0x110] ss:$12 sps:$4 sm:$0xff]   ;;  %v1624_v59 = vld [vmem:[%s1706_s12 + $0x128] ss:$12 sps:$4 sm:$0xff]  }
  0x1f   : > { %1372 = vmatpush3.bf16.msra.mxu0 %v1563_v15  ;;  %1539 = vmatpush3.bf16.msra.mxu1 %v1563_v15  ;;  %v1625_v60 = vld [vmem:[%s1706_s12 + $0xf0] ss:$12 sps:$4 sm:$0xff]   ;;  %v1626_v61 = vld [vmem:[%s1706_s12 + $0x140] ss:$12 sps:$4 sm:$0xff]   ;;  %v1629_v63 = vld [vmem:[%s1706_s12 + $0x158] ss:$12 sps:$4 sm:$0xff]  }
  0x20   : > { %1373 = vmatprep.subr.bf16.mxu0 %v1564_v16  ;;  %1532 = vmatprep.subr.bf16.mxu1 %v1564_v16  ;;  %v1627_v62 = vld [vmem:[%s1706_s12 + $0x10c] ss:$12 sps:$4 sm:$0xff]   ;;  %v1630_v0 = vld [vmem:[%s1706_s12 + $0x108] ss:$12 sps:$4 sm:$0xff]   ;;  %v1631_v1 = vld [vmem:[%s1706_s12 + $0x170] ss:$12 sps:$4 sm:$0xff]  }
  0x23   : > { %1374 = vmatpush3.bf16.msra.mxu0 %v1565_v17  ;;  %1540 = vmatpush3.bf16.msra.mxu1 %v1565_v17 }
  0x24   : > { %1489 = vmatprep.subr.bf16.mxu1 %v1572_v18 }
  0x26   : > { %729 = vmatmul.mubr.bf16.vlgmr.msra.gmra.mrb[0].mxu0 %v1566_v19  ;;  %825 = vmatmul.mubr.bf16.vlgmr.msra.gmra.mrb[0].mxu1 %v1569_v20 }
  0x27   : > { %1490 = vmatpush3.bf16.msra.mxu1 %v1572_v18  ;;  %736 = vmatprep.mubr.bf16.mxu0 %v1573_v21 }
  0x28   : > { %832 = vmatprep.mubr.bf16.mxu1 %v1575_v22  ;;  %1491 = vmatprep.subr.bf16.mxu1 %v1585_v23 }
  0x2b   : > { %1492 = vmatpush3.bf16.msra.mxu1 %v1585_v23 }
  0x2e   : > { %737 = vmatmul.mubr.bf16.gmra.mrb[4].mxu0 %v1577_v24  ;;  %833 = vmatmul.mubr.bf16.gmra.mrb[4].mxu1 %v1578_v25 }
  0x2f   : > { %744 = vmatprep.mubr.bf16.mxu0 %v1579_v26  ;;  %840 = vmatprep.mubr.bf16.mxu1 %v1581_v27 }
  0x36   : > { %745 = vmatmul.mubr.bf16.gmra.mrb[8].mxu0 %v1583_v28  ;;  %841 = vmatmul.mubr.bf16.gmra.mrb[8].mxu1 %v1584_v29 }
  0x37   : > { %752 = vmatprep.mubr.bf16.mxu0 %v1586_v30  ;;  %848 = vmatprep.mubr.bf16.mxu1 %v1588_v31 }
  0x3e   : > { %753 = vmatmul.mubr.bf16.gmra.mrb[12].mxu0 %v1590_v32  ;;  %849 = vmatmul.mubr.bf16.gmra.mrb[12].mxu1 %v1591_v33 }
  0x3f   : > { %760 = vmatprep.mubr.bf16.mxu0 %v1592_v34  ;;  %1493 = vmatprep.mubr.msk.bf16.mxu1 %vm647_vm0, %v1594_v35 }
  0x46   : > { %761 = vmatmul.mubr.bf16.gmra.mrb[16].mxu0 %v1595_v36  ;;  %1494 = vmatmul.mubr.msk.bf16.vlgmr.msra.gmra.mrb[16].mxu1 %vm647_vm0, %v1596_v37 }
  0x47   : > { %768 = vmatprep.mubr.bf16.mxu0 %v1597_v38  ;;  %1497 = vmatprep.mubr.msk.bf16.mxu1 %vm647_vm0, %v1599_v39 }
  0x4e   : > { %769 = vmatmul.mubr.bf16.gmra.mrb[20].mxu0 %v1600_v40  ;;  %1498 = vmatmul.mubr.msk.bf16.gmra.mrb[20].mxu1 %vm647_vm0, %v1601_v41 }
  0x4f   : > { %776 = vmatprep.mubr.bf16.mxu0 %v1602_v42  ;;  %1501 = vmatprep.mubr.msk.bf16.mxu1 %vm647_vm0, %v1604_v43 }
  0x56   : > { %777 = vmatmul.mubr.bf16.gmra.mrb[24].mxu0 %v1605_v44  ;;  %1502 = vmatmul.mubr.msk.bf16.gmra.mrb[24].mxu1 %vm647_vm0, %v1606_v45 }
  0x57   : > { %784 = vmatprep.mubr.bf16.mxu0 %v1607_v46  ;;  %1505 = vmatprep.mubr.msk.bf16.mxu1 %vm647_vm0, %v1609_v47 }
  0x5e   : > { %785 = vmatmul.mubr.bf16.gmra.mrb[28].mxu0 %v1610_v48  ;;  %1506 = vmatmul.mubr.msk.bf16.gmra.mrb[28].mxu1 %vm647_vm0, %v1611_v49 }
  0x5f   : > { %792 = vmatprep.mubr.bf16.mxu0 %v1612_v50  ;;  %1509 = vmatprep.mubr.msk.bf16.mxu1 %vm647_vm0, %v1614_v51 }
  0x66   : > { %793 = vmatmul.mubr.bf16.gmra.mrb[32].mxu0 %v1615_v52  ;;  %1510 = vmatmul.mubr.msk.bf16.gmra.mrb[32].mxu1 %vm647_vm0, %v1616_v53 }
  0x67   : > { %800 = vmatprep.mubr.bf16.mxu0 %v1617_v54  ;;  %1513 = vmatprep.mubr.msk.bf16.mxu1 %vm647_vm0, %v1619_v55 }
  0x6e   : > { %801 = vmatmul.mubr.bf16.gmra.mrb[36].mxu0 %v1620_v56  ;;  %1514 = vmatmul.mubr.msk.bf16.gmra.mrb[36].mxu1 %vm647_vm0, %v1621_v57 }
  0x6f   : > { %808 = vmatprep.mubr.bf16.mxu0 %v1622_v58  ;;  %1517 = vmatprep.mubr.msk.bf16.mxu1 %vm647_vm0, %v1624_v59 }
  0x76   : > { %809 = vmatmul.mubr.bf16.gmra.mrb[40].mxu0 %v1625_v60  ;;  %1518 = vmatmul.mubr.msk.bf16.gmra.mrb[40].mxu1 %vm647_vm0, %v1626_v61 }
  0x77   : > { %816 = vmatprep.mubr.bf16.mxu0 %v1627_v62  ;;  %1521 = vmatprep.mubr.msk.bf16.mxu1 %vm647_vm0, %v1629_v63 }
  0x7e   : > { %817 = vmatmul.mubr.bf16.gmra.mrb[44].mxu0 %v1630_v0  ;;  %1522 = vmatmul.mubr.msk.bf16.gmra.mrb[44].mxu1 %vm647_vm0, %v1631_v1 }
  0xf9   : > { %v1375_v2 = vpop.f32.mrb[0].mxu0  ;;  %v1447_v3 = vpop.f32.mrb[0].mxu1 }
  0xfa   : > { %v1376_v4 = vpop.f32.mrb[1].mxu0  ;;  %v1448_v5 = vpop.f32.mrb[1].mxu1 }
  0xfb   : > { %v1377_v6 = vadd.f32 %v1376_v4, %v1375_v2  ;;  %v1799_v7 = vadd.f32 %v1448_v5, %v1447_v3  ;;  %v1378_v8 = vpop.f32.mrb[2].mxu0  ;;  %v1450_v9 = vpop.f32.mrb[2].mxu1 }
  0xfc   : > { %v1379_v10 = vpop.f32.mrb[3].mxu0  ;;  %v1451_v11 = vpop.f32.mrb[3].mxu1 }
  0xfd   : > { %v1380_v12 = vadd.f32 %v1379_v10, %v1378_v8  ;;  %v1801_v13 = vadd.f32 %v1451_v11, %v1450_v9 }
 0x101   : > { %v1381_v14 = vpop.f32.mrb[4].mxu0  ;;  %v1453_v15 = vpop.f32.mrb[4].mxu1 }
 0x102   : > { %v1382_v16 = vpop.f32.mrb[5].mxu0  ;;  %v1454_v17 = vpop.f32.mrb[5].mxu1 }
 0x103   : > { %v1383_v18 = vadd.f32 %v1382_v16, %v1381_v14  ;;  %v1803_v19 = vadd.f32 %v1454_v17, %v1453_v15  ;;  %v1384_v20 = vpop.f32.mrb[6].mxu0  ;;  %v1456_v21 = vpop.f32.mrb[6].mxu1 }
 0x104   : > { %v1385_v22 = vpop.f32.mrb[7].mxu0  ;;  %v1457_v23 = vpop.f32.mrb[7].mxu1 }
 0x105   : > { %v1386_v24 = vadd.f32 %v1385_v22, %v1384_v20  ;;  %v1805_v25 = vadd.f32 %v1457_v23, %v1456_v21  ;;  %v1825_v20 = vld [vmem:[%s1955_s3] ss:$0 sm:$0xff] }
 0x109   : > { %v1387_v26 = vpop.f32.mrb[8].mxu0  ;;  %v1459_v27 = vpop.f32.mrb[8].mxu1 }
 0x10a   : > { %v1388_v28 = vpop.f32.mrb[9].mxu0  ;;  %v1460_v29 = vpop.f32.mrb[9].mxu1 }
 0x10b   : > { %v1389_v30 = vadd.f32 %v1388_v28, %v1387_v26  ;;  %v1807_v31 = vadd.f32 %v1460_v29, %v1459_v27  ;;  %v1390_v32 = vpop.f32.mrb[10].mxu0  ;;  %v1462_v33 = vpop.f32.mrb[10].mxu1 }
 0x10c   : > { %v1391_v34 = vpop.f32.mrb[11].mxu0  ;;  %v1463_v35 = vpop.f32.mrb[11].mxu1 }
 0x10d   : > { %v1392_v36 = vadd.f32 %v1391_v34, %v1390_v32  ;;  %v1809_v37 = vadd.f32 %v1463_v35, %v1462_v33 }
 0x111   : > { %v1393_v38 = vpop.f32.mrb[12].mxu0  ;;  %v1465_v39 = vpop.f32.mrb[12].mxu1 }
 0x112   : > { %v1394_v40 = vpop.f32.mrb[13].mxu0  ;;  %v1466_v41 = vpop.f32.mrb[13].mxu1 }
 0x113   : > { %v1395_v42 = vadd.f32 %v1394_v40, %v1393_v38  ;;  %v1811_v43 = vadd.f32 %v1466_v41, %v1465_v39  ;;  %v1396_v44 = vpop.f32.mrb[14].mxu0  ;;  %v1468_v45 = vpop.f32.mrb[14].mxu1 }
 0x114   : > { %v1397_v46 = vpop.f32.mrb[15].mxu0  ;;  %v1469_v47 = vpop.f32.mrb[15].mxu1 }
 0x115   : > { %v1398_v48 = vadd.f32 %v1397_v46, %v1396_v44  ;;  %v1813_v49 = vadd.f32 %v1469_v47, %v1468_v45 }
 0x119   : > { %v1399_v50 = vpop.f32.mrb[16].mxu0  ;;  %v1495_v51 = vpop.f32.mrb[16].mxu1 }
 0x11a   : > { %v900_v52 = vadd.f32 %v1495_v51, %v1383_v18  ;;  %v1400_v53 = vpop.f32.mrb[17].mxu0  ;;  %v891_v54 = vpop.f32.mrb[17].mxu1 }
 0x11b   : > { %v1401_v55 = vadd.f32 %v1400_v53, %v1399_v50  ;;  %v892_v56 = vadd.f32 %v1377_v6, %v891_v54  ;;  %v1402_v57 = vpop.f32.mrb[18].mxu0  ;;  %v1496_v58 = vpop.f32.mrb[18].mxu1  ;;  %v1818_v6 = vld [vmem:[%s1954_s2] ss:$0 sm:$0xff] }
 0x11c   : > { %v903_v59 = vadd.f32 %v1496_v58, %v1386_v24  ;;  %v1403_v60 = vpop.f32.mrb[19].mxu0  ;;  %v894_v61 = vpop.f32.mrb[19].mxu1 }
 0x11d   : > { %v1404_v62 = vadd.f32 %v1403_v60, %v1402_v57  ;;  %v895_v63 = vadd.f32 %v1380_v12, %v894_v61  ;;  %v1027_v12 = vmul.f32 %v1818_v6, %v900_v52  ;;  %v1025_v18 = vmul.f32 %v1818_v6, %v892_v56 }
 0x11e   : > { %v1028_v21 = vmul.f32 %v1818_v6, %v903_v59 }
 0x11f   : > { %v1026_v24 = vmul.f32 %v1818_v6, %v895_v63  ;;  %v1066_v34 = vadd.f32 %v1825_v20, %v1027_v12  ;;  %v1064_v35 = vadd.f32 %v1825_v20, %v1025_v18 }
 0x120   : > { %v1067_v41 = vadd.f32 %v1825_v20, %v1028_v21 }
 0x121   : > { %v1405_v0 = vpop.f32.mrb[20].mxu0  ;;  %v1499_v1 = vpop.f32.mrb[20].mxu1  ;;  %v1065_v46 = vadd.f32 %v1825_v20, %v1026_v24  ;;  %v1098_v52 = vmax.f32 %v1066_v34, 0.0  ;;  %v1096_v56 = vmax.f32 %v1064_v35, 0.0 }
 0x122   : > { %v916_v2 = vadd.f32 %v1499_v1, %v1395_v42  ;;  %v1406_v3 = vpop.f32.mrb[21].mxu0  ;;  %v907_v4 = vpop.f32.mrb[21].mxu1  ;;  %v1099_v57 = vmax.f32 %v1067_v41, 0.0 }
 0x123   : > { %v1407_v5 = vadd.f32 %v1406_v3, %v1405_v0  ;;  %v908_v8 = vadd.f32 %v1389_v30, %v907_v4  ;;  %v1408_v9 = vpop.f32.mrb[22].mxu0  ;;  %v1500_v10 = vpop.f32.mrb[22].mxu1 }
 0x124   : > { %v919_v11 = vadd.f32 %v1500_v10, %v1398_v48  ;;  %v1409_v14 = vpop.f32.mrb[23].mxu0  ;;  %v910_v15 = vpop.f32.mrb[23].mxu1  ;;  %v1031_v63 = vmul.f32 %v1818_v6, %v916_v2 }
 0x125   : > { %v1410_v16 = vadd.f32 %v1409_v14, %v1408_v9  ;;  %v911_v17 = vadd.f32 %v1392_v36, %v910_v15  ;;  %v1029_v53 = vmul.f32 %v1818_v6, %v908_v8 }
 0x126   : > { %v1032_v12 = vmul.f32 %v1818_v6, %v919_v11 }
 0x127   : > { %v1030_v18 = vmul.f32 %v1818_v6, %v911_v17 }
 0x128   : > { %v1071_v17 = vadd.f32 %v1825_v20, %v1032_v12 }
 0x129   : > { %v1411_v22 = vpop.f32.mrb[24].mxu0  ;;  %v1503_v23 = vpop.f32.mrb[24].mxu1 }
 0x12a   : > { %v932_v26 = vadd.f32 %v1503_v23, %v1407_v5  ;;  %v1412_v27 = vpop.f32.mrb[25].mxu0  ;;  %v923_v28 = vpop.f32.mrb[25].mxu1 }
 0x12b   : > { %v1413_v29 = vadd.f32 %v1412_v27, %v1411_v22  ;;  %v924_v30 = vadd.f32 %v1401_v55, %v923_v28  ;;  %v1414_v32 = vpop.f32.mrb[26].mxu0  ;;  %v1504_v33 = vpop.f32.mrb[26].mxu1  ;;  %v1070_v28 = vadd.f32 %v1825_v20, %v1031_v63 }
 0x12c   : > { %v1035_v36 = vmul.f32 %v1818_v6, %v932_v26  ;;  %v935_v38 = vadd.f32 %v1504_v33, %v1410_v16  ;;  %v1415_v39 = vpop.f32.mrb[27].mxu0  ;;  %v926_v40 = vpop.f32.mrb[27].mxu1  ;;  %v1068_v16 = vadd.f32 %v1825_v20, %v1029_v53  ;;  %v1069_v33 = vadd.f32 %v1825_v20, %v1030_v18 }
 0x12d   : > { %v1033_v42 = vmul.f32 %v1818_v6, %v924_v30  ;;  %v1416_v44 = vadd.f32 %v1415_v39, %v1414_v32  ;;  %v927_v45 = vadd.f32 %v1404_v62, %v926_v40  ;;  %v1097_v62 = vmax.f32 %v1065_v46, 0.0 }
 0x12e   : > { %v1074_v47 = vadd.f32 %v1825_v20, %v1035_v36  ;;  %v1036_v48 = vmul.f32 %v1818_v6, %v935_v38  ;;  %v1100_v35 = vmax.f32 %v1068_v16, 0.0 }
 0x12f   : > { %v1072_v50 = vadd.f32 %v1825_v20, %v1033_v42  ;;  %v1034_v51 = vmul.f32 %v1818_v6, %v927_v45  ;;  %v1102_v42 = vmax.f32 %v1070_v28, 0.0 }
 0x130   : > { %v1106_v54 = vmax.f32 %v1074_v47, 0.0  ;;  %v1075_v55 = vadd.f32 %v1825_v20, %v1036_v48 }
 0x131   : > { %v1104_v58 = vmax.f32 %v1072_v50, 0.0  ;;  %v1073_v59 = vadd.f32 %v1825_v20, %v1034_v51  ;;  %v1417_v60 = vpop.f32.mrb[28].mxu0  ;;  %v1507_v61 = vpop.f32.mrb[28].mxu1 }
 0x132   : > { %v1843_v0 = vmax.f32 %v1098_v52, %v1106_v54  ;;  %v1107_v1 = vmax.f32 %v1075_v55, 0.0  ;;  %v1418_v3 = vpop.f32.mrb[29].mxu0  ;;  %v939_v4 = vpop.f32.mrb[29].mxu1  ;;  %v1103_v54 = vmax.f32 %v1071_v17, 0.0  ;;  %v1101_v55 = vmax.f32 %v1069_v33, 0.0 }
 0x133   : > { %v1845_v5 = vmax.f32 %v1096_v56, %v1104_v58  ;;  %v1105_v8 = vmax.f32 %v1073_v59, 0.0  ;;  %v1419_v9 = vadd.f32 %v1418_v3, %v1417_v60  ;;  %v940_v10 = vadd.f32 %v1413_v29, %v939_v4  ;;  %v1420_v14 = vpop.f32.mrb[30].mxu0  ;;  %v1508_v15 = vpop.f32.mrb[30].mxu1 }
 0x134   : > { %v1850_v21 = vmax.f32 %v1099_v57, %v1107_v1  ;;  %v1421_v2 = vpop.f32.mrb[31].mxu0  ;;  %v942_v22 = vpop.f32.mrb[31].mxu1 }
 0x135   : > { %v1852_v23 = vmax.f32 %v1097_v62, %v1105_v8  ;;  %v948_v24 = vadd.f32 %v1507_v61, %v1419_v9  ;;  %v1037_v26 = vmul.f32 %v1818_v6, %v940_v10  ;;  %v1422_v27 = vadd.f32 %v1421_v2, %v1420_v14 }
 0x136   : > { %v943_v29 = vadd.f32 %v1416_v44, %v942_v22 }
 0x137   : > { %v1039_v30 = vmul.f32 %v1818_v6, %v948_v24  ;;  %v1076_v32 = vadd.f32 %v1825_v20, %v1037_v26  ;;  %v951_v11 = vadd.f32 %v1508_v15, %v1422_v27 }
 0x138   : > { %v1038_v34 = vmul.f32 %v1818_v6, %v943_v29 }
 0x139   : > { %v1078_v36 = vadd.f32 %v1825_v20, %v1039_v30  ;;  %v1108_v38 = vmax.f32 %v1076_v32, 0.0  ;;  %v1040_v39 = vmul.f32 %v1818_v6, %v951_v11  ;;  %v1423_v40 = vpop.f32.mrb[32].mxu0  ;;  %v1511_v41 = vpop.f32.mrb[32].mxu1 }
 0x13a   : > { %v1077_v44 = vadd.f32 %v1825_v20, %v1038_v34  ;;  %v1424_v45 = vpop.f32.mrb[33].mxu0  ;;  %v955_v46 = vpop.f32.mrb[33].mxu1 }
 0x13b   : > { %v1110_v47 = vmax.f32 %v1078_v36, 0.0  ;;  %v1864_v48 = vmax.f32 %v1100_v35, %v1108_v38  ;;  %v1079_v50 = vadd.f32 %v1825_v20, %v1040_v39  ;;  %v1425_v51 = vadd.f32 %v1424_v45, %v1423_v40  ;;  %v1426_v52 = vpop.f32.mrb[34].mxu0  ;;  %v1512_v53 = vpop.f32.mrb[34].mxu1 }
 0x13c   : > { %v1109_v56 = vmax.f32 %v1077_v44, 0.0  ;;  %v1427_v57 = vpop.f32.mrb[35].mxu0  ;;  %v958_v58 = vpop.f32.mrb[35].mxu1 }
 0x13d   : > { %v1867_v59 = vmax.f32 %v1102_v42, %v1110_v47  ;;  %v1111_v60 = vmax.f32 %v1079_v50, 0.0  ;;  %v956_v61 = vadd.f32 %v1425_v51, %v955_v46  ;;  %v1428_v62 = vadd.f32 %v1427_v57, %v1426_v52 }
 0x13e   : > { %v1869_v63 = vmax.f32 %v1101_v55, %v1109_v56 }
 0x13f   : > { %v1871_v1 = vmax.f32 %v1103_v54, %v1111_v60  ;;  %v959_v3 = vadd.f32 %v1428_v62, %v958_v58  ;;  %v1041_v26 = vmul.f32 %v1818_v6, %v956_v61 }
 0x141   : > { %v1429_v4 = vpop.f32.mrb[36].mxu0  ;;  %v1873_v8 = vpop.f32.mrb[36].mxu1  ;;  %v1042_v33 = vmul.f32 %v1818_v6, %v959_v3  ;;  %v1080_v39 = vadd.f32 %v1825_v20, %v1041_v26 }
 0x142   : > { %v1430_v9 = vpop.f32.mrb[37].mxu0  ;;  %v971_v10 = vpop.f32.mrb[37].mxu1 }
 0x143   : > { %v1431_v14 = vadd.f32 %v1430_v9, %v1429_v4  ;;  %v1432_v15 = vpop.f32.mrb[38].mxu0  ;;  %v1875_v16 = vpop.f32.mrb[38].mxu1  ;;  %v1112_v61 = vmax.f32 %v1080_v39, 0.0 }
 0x144   : > { %v1433_v12 = vpop.f32.mrb[39].mxu0  ;;  %v974_v18 = vpop.f32.mrb[39].mxu1 }
 0x145   : > { %v964_v2 = vadd.f32 %v1511_v41, %v1431_v14  ;;  %v1434_v22 = vadd.f32 %v1433_v12, %v1432_v15 }
 0x147   : > { %v967_v24 = vadd.f32 %v1512_v53, %v1434_v22  ;;  %v1043_v27 = vmul.f32 %v1818_v6, %v964_v2  ;;  %v1081_v53 = vadd.f32 %v1825_v20, %v1042_v33 }
 0x149   : > { %v1044_v28 = vmul.f32 %v1818_v6, %v967_v24  ;;  %v1435_v29 = vpop.f32.mrb[40].mxu0  ;;  %v1519_v30 = vpop.f32.mrb[40].mxu1  ;;  %v1082_v40 = vadd.f32 %v1825_v20, %v1043_v27  ;;  %v1113_v2 = vmax.f32 %v1081_v53, 0.0 }
 0x14a   : > { %v996_v32 = vadd.f32 %v1519_v30, %v1803_v19  ;;  %v1436_v11 = vpop.f32.mrb[41].mxu0  ;;  %v987_v17 = vpop.f32.mrb[41].mxu1 }
 0x14b   : > { %v1437_v34 = vadd.f32 %v1436_v11, %v1435_v29  ;;  %v988_v35 = vadd.f32 %v1799_v7, %v987_v17  ;;  %v1438_v36 = vpop.f32.mrb[42].mxu0  ;;  %v1520_v38 = vpop.f32.mrb[42].mxu1  ;;  %v1083_v19 = vadd.f32 %v1825_v20, %v1044_v28  ;;  %v1114_v56 = vmax.f32 %v1082_v40, 0.0 }
 0x14c   : > { %v1051_v41 = vmul.f32 %v1818_v6, %v996_v32  ;;  %v999_v42 = vadd.f32 %v1520_v38, %v1805_v25  ;;  %v1439_v44 = vpop.f32.mrb[43].mxu0  ;;  %v990_v45 = vpop.f32.mrb[43].mxu1 }
 0x14d   : > { %v972_v46 = vadd.f32 %v1437_v34, %v971_v10  ;;  %v1049_v47 = vmul.f32 %v1818_v6, %v988_v35  ;;  %v1440_v50 = vadd.f32 %v1439_v44, %v1438_v36  ;;  %v991_v52 = vadd.f32 %v1801_v13, %v990_v45 }
 0x14e   : > { %v1090_v7 = vadd.f32 %v1825_v20, %v1051_v41  ;;  %v1052_v51 = vmul.f32 %v1818_v6, %v999_v42  ;;  %v1115_v62 = vmax.f32 %v1083_v19, 0.0 }
 0x14f   : > { %v1045_v54 = vmul.f32 %v1818_v6, %v972_v46  ;;  %v1088_v25 = vadd.f32 %v1825_v20, %v1049_v47  ;;  %v975_v55 = vadd.f32 %v1440_v50, %v974_v18  ;;  %v1050_v60 = vmul.f32 %v1818_v6, %v991_v52 }
 0x150   : > { %v1122_v57 = vmax.f32 %v1090_v7, 0.0  ;;  %v1091_v58 = vadd.f32 %v1825_v20, %v1052_v51 }
 0x151   : > { %v1120_v3 = vmax.f32 %v1088_v25, 0.0  ;;  %v1441_v4 = vpop.f32.mrb[44].mxu0  ;;  %v1523_v9 = vpop.f32.mrb[44].mxu1  ;;  %v1089_v14 = vadd.f32 %v1825_v20, %v1050_v60  ;;  %v1084_v22 = vadd.f32 %v1825_v20, %v1045_v54  ;;  %v1046_v34 = vmul.f32 %v1818_v6, %v975_v55 }
 0x152   : > { %v1138_v13 = vmax.f32 %v1114_v56, %v1122_v57  ;;  %v1123_v10 = vmax.f32 %v1091_v58, 0.0  ;;  %v1012_v15 = vadd.f32 %v1523_v9, %v1811_v43  ;;  %v1442_v12 = vpop.f32.mrb[45].mxu0  ;;  %v1003_v18 = vpop.f32.mrb[45].mxu1 }
 0x153   : > { %v1136_v24 = vmax.f32 %v1112_v61, %v1120_v3  ;;  %v1443_v26 = vadd.f32 %v1442_v12, %v1441_v4  ;;  %v1444_v27 = vpop.f32.mrb[46].mxu0  ;;  %v1524_v28 = vpop.f32.mrb[46].mxu1  ;;  %v1121_v32 = vmax.f32 %v1089_v14, 0.0  ;;  %v1116_v50 = vmax.f32 %v1084_v22, 0.0 }
 0x154   : > { %v1146_v29 = vmax.f32 %v1843_v0, %v1138_v13  ;;  %v1139_v30 = vmax.f32 %v1115_v62, %v1123_v10  ;;  %v1055_v11 = vmul.f32 %v1818_v6, %v1012_v15  ;;  %v1445_v17 = vpop.f32.mrb[47].mxu0  ;;  %v1006_v33 = vpop.f32.mrb[47].mxu1  ;;  %v1004_v0 = vadd.f32 %v1807_v31, %v1003_v18 }
 0x155   : > { %v1144_v43 = vmax.f32 %v1845_v5, %v1136_v24  ;;  %v980_v35 = vadd.f32 %v1873_v8, %v1443_v26  ;;  %v1137_v39 = vmax.f32 %v1113_v2, %v1121_v32  ;;  %v1015_v5 = vadd.f32 %v1524_v28, %v1813_v49 }
 0x156   : > { %v1353_v36 = vpack.c.bf16 %v1146_v29, %v1146_v29  ;;  %v1147_v38 = vmax.f32 %v1850_v21, %v1139_v30  ;;  %v1094_v40 = vadd.f32 %v1825_v20, %v1055_v11  ;;  %v1053_v44 = vmul.f32 %v1818_v6, %v1004_v0 }
 0x157   : > { %v1351_v41 = vpack.c.bf16 %v1144_v43, %v1144_v43  ;;  %v1047_v42 = vmul.f32 %v1818_v6, %v980_v35  ;;  %v1145_v8 = vmax.f32 %v1852_v23, %v1137_v39  ;;  %v1446_v31 = vadd.f32 %v1445_v17, %v1444_v27 }
 0x158   : > { %1187 = vst.msk [vmem:[%s1906_s13 + $0x8] sm:$0xf] %vm1184_vm1, %v1353_v36  ;;  %v1354_v45 = vpack.c.bf16 %v1147_v38, %v1147_v38  ;;  %v1092_v19 = vadd.f32 %v1825_v20, %v1053_v44  ;;  %v1056_v46 = vmul.f32 %v1818_v6, %v1015_v5  ;;  %v1007_v47 = vadd.f32 %v1809_v37, %v1006_v33 }
 0x159   : > { %1185 = vst.msk [vmem:[%s1906_s13] sm:$0xf] %vm1184_vm1, %v1351_v41  ;;  %v1086_v21 = vadd.f32 %v1825_v20, %v1047_v42  ;;  %v1085_v49 = vadd.f32 %v1825_v20, %v1046_v34  ;;  %v1352_v7 = vpack.c.bf16 %v1145_v8, %v1145_v8  ;;  %v983_v23 = vadd.f32 %v1875_v16, %v1446_v31 }
 0x15a   : > { %1188 = vst.msk [vmem:[%s1906_s13 + $0xc] sm:$0xf] %vm1184_vm1, %v1354_v45  ;;  %v1126_v51 = vmax.f32 %v1094_v40, 0.0  ;;  %v1124_v53 = vmax.f32 %v1092_v19, 0.0  ;;  %v1054_v54 = vmul.f32 %v1818_v6, %v1007_v47  ;;  %v1095_v25 = vadd.f32 %v1825_v20, %v1056_v46 }
 0x15b   : > { %v1118_v52 = vmax.f32 %v1086_v21, 0.0  ;;  %1186 = vst.msk [vmem:[%s1906_s13 + $0x4] sm:$0xf] %vm1184_vm1, %v1352_v7  ;;  %v1048_v37 = vmul.f32 %v1818_v6, %v983_v23  ;;  %v1117_v16 = vmax.f32 %v1085_v49, 0.0 }
 0x15c   : > { %v1140_v56 = vmax.f32 %v1116_v50, %v1124_v53  ;;  %v1093_v57 = vadd.f32 %v1825_v20, %v1054_v54  ;;  %v1127_v3 = vmax.f32 %v1095_v25, 0.0 }
 0x15d   : > { %v1142_v55 = vmax.f32 %v1118_v52, %v1126_v51  ;;  %v1087_v58 = vadd.f32 %v1825_v20, %v1048_v37 }
 0x15e   : > { %v1148_v61 = vmax.f32 %v1864_v48, %v1140_v56  ;;  %v1125_v62 = vmax.f32 %v1093_v57, 0.0 }
 0x15f   : > { %v1150_v60 = vmax.f32 %v1867_v59, %v1142_v55  ;;  %v1119_v4 = vmax.f32 %v1087_v58, 0.0 }
 0x160   : > { %v1355_v13 = vpack.c.bf16 %v1148_v61, %v1148_v61  ;;  %v1141_v6 = vmax.f32 %v1117_v16, %v1125_v62 }
 0x161   : > { %v1357_v9 = vpack.c.bf16 %v1150_v60, %v1150_v60  ;;  %v1143_v10 = vmax.f32 %v1119_v4, %v1127_v3 }
 0x162   : > { %1189 = vst.msk [vmem:[%s1906_s13 + $0x10] sm:$0xf] %vm1184_vm1, %v1355_v13  ;;  %v1149_v20 = vmax.f32 %v1869_v63, %v1141_v6 }
 0x163   : > { %1191 = vst.msk [vmem:[%s1906_s13 + $0x18] sm:$0xf] %vm1184_vm1, %v1357_v9  ;;  %v1151_v14 = vmax.f32 %v1871_v1, %v1143_v10 }
 0x164   : > { %v1356_v15 = vpack.c.bf16 %v1149_v20, %v1149_v20 }
 0x165   : > { %v1358_v59 = vpack.c.bf16 %v1151_v14, %v1151_v14 }
 0x166   : > { %1190 = vst.msk [vmem:[%s1906_s13 + $0x14] sm:$0xf] %vm1184_vm1, %v1356_v15 }
 0x167   : > { %1192 = vst.msk [vmem:[%s1906_s13 + $0x1c] sm:$0xf] %vm1184_vm1, %v1358_v59 }
 0x168 PF: > { %s14_s15 = sadd.s32 1, %s1638_s15  }
 0x169   : > { %p11_p4 = scmp.ge.s32.totalorder %s14_s15, 4  }
 0x16b   :  { %13 = sbr.rel (!%p11_p4) target bundleno = 1 (0x1), region = 66 }

// kernel: deep2d_encoder_forward.9
= control target key start
LH: loop header
LB: loop body
LE: loop exit
PB: predicated region body
PF: predicated region fallthrough
CT: control target
= control target key end

     0   :  { %s873_s15 = smov 0   ;;  %s972_s0 = inlined_call_operand.vmem [shape: bf16[2,64,288], index: 0, kind: input, shape index: {}]   ;;  %s973_s1 = inlined_call_operand.vmem [shape: bf16[288,32], index: 1, kind: input, shape index: {}]   ;;  %s974_s2 = inlined_call_operand.vmem [shape: f32[1,32], index: 2, kind: input, shape index: {}]   ;;  %s975_s3 = inlined_call_operand.vmem [shape: f32[1,32], index: 3, kind: input, shape index: {}]   ;;  %s976_s4 = inlined_call_operand.vmem [shape: bf16[2,16,32], index: 4, kind: output, shape index: {}]  }
   0x1 LB: > { %s672_s16 = sadd.s32 4294967295, %s846_s15   ;;  %p676_p0 = scmp.ge.s32.totalorder %s846_s15, 1  ;;  %s846_s15 = sphi %s873_s15, %s14_s15  }
   0x2   : > { %p162_p1 = scmp.lt.s32.totalorder %s846_s15, 3 }
   0x4   : > { %p163_p2 = pnand %p676_p0, %p162_p1 }
   0x5   : > { %v806_v0 = vld [vmem:[%s973_s1 + $0x40] sm:$0xff] (!%p163_p2)   ;;  %v808_v2 = vld [vmem:[%s973_s1 + $0x48] sm:$0xff] (!%p163_p2)   ;;  %p188_p3 = scmp.lt.s32.totalorder (!%p163_p2), %s672_s16, 1  ;;  %v810_v4 = vld [vmem:[%s973_s1 + $0x50] sm:$0xff] (!%p163_p2)   ;;  %vm419_vm0 = vcmask (!%p163_p2), 261120   ;;  %vm614_vm1 = vcmask (!%p163_p2), 257024  }
   0x6   : > { %166 = sbr.rel (%p163_p2) target bundleno = 286 (0x11e), region = 36  ;;  %v807_v1 = vld [vmem:[%s973_s1] sm:$0xff] (!%p163_p2)   ;;  %723 = vmatprep.subr.bf16.mxu0 (!%p163_p2), %v806_v0  ;;  %781 = vmatprep.subr.bf16.mxu1 (!%p163_p2), %v806_v0  ;;  %v809_v3 = vld [vmem:[%s973_s1 + $0x8] sm:$0xff] (!%p163_p2)   ;;  %v811_v5 = vld [vmem:[%s973_s1 + $0x10] sm:$0xff] (!%p163_p2)  }
   0x7   : > { %724 = vmatpush3.bf16.msra.mxu0 (!%p163_p2), %v807_v1  ;;  %789 = vmatpush3.bf16.msra.mxu1 (!%p163_p2), %v807_v1  ;;  %v812_v6 = vld [vmem:[%s973_s1 + $0x58] sm:$0xff] (!%p163_p2)   ;;  %v814_v8 = vld [vmem:[%s973_s1 + $0x60] sm:$0xff] (!%p163_p2)   ;;  %v816_v10 = vld [vmem:[%s973_s1 + $0x68] sm:$0xff] (!%p163_p2)  }
   0x8   : > { %725 = vmatprep.subr.bf16.mxu0 (!%p163_p2), %v808_v2  ;;  %782 = vmatprep.subr.bf16.mxu1 (!%p163_p2), %v808_v2  ;;  %v813_v7 = vld [vmem:[%s973_s1 + $0x18] sm:$0xff] (!%p163_p2)   ;;  %v815_v9 = vld [vmem:[%s973_s1 + $0x20] sm:$0xff] (!%p163_p2)   ;;  %v817_v13 = vld [vmem:[%s973_s1 + $0x28] sm:$0xff] (!%p163_p2)  }
   0x9   : > { %v818_v14 = vld [vmem:[%s973_s1 + $0x70] sm:$0xff] (!%p163_p2)   ;;  %v820_v16 = vld [vmem:[%s973_s1 + $0x78] sm:$0xff] (!%p163_p2)   ;;  %v828_v18 = vld [vmem:[%s973_s1 + $0x80] sm:$0xff] (!%p163_p2)  }
   0xa   : > { %v819_v15 = vld [vmem:[%s973_s1 + $0x30] sm:$0xff] (!%p163_p2)   ;;  %v821_v17 = vld [vmem:[%s973_s1 + $0x38] sm:$0xff] (!%p163_p2)   ;;  %v829_v22 = vld [vmem:[%s973_s1 + $0x88] sm:$0xff] (!%p163_p2)  }
   0xb   : > { %726 = vmatpush3.bf16.msra.mxu0 (!%p163_p2), %v809_v3  ;;  %790 = vmatpush3.bf16.msra.mxu1 (!%p163_p2), %v809_v3  ;;  %v714_v45 = vld [vmem:[%s974_s2] ss:$0 sm:$0xff] (!%p163_p2) }
   0xc   : > { %727 = vmatprep.subr.bf16.mxu0 (!%p163_p2), %v810_v4  ;;  %783 = vmatprep.subr.bf16.mxu1 (!%p163_p2), %v810_v4  ;;  %v715_v51 = vld [vmem:[%s975_s3] ss:$0 sm:$0xff] (!%p163_p2) }
   0xd   : > { %s978_s16 = smov (!%p188_p3, %s672_s16), 1 }
   0xe   : > { %s797_s5 = smul.u32 96, %s978_s16  ;;  %s720_s11 = sshll.u32 %s978_s16, 3 }
   0xf   : > { %728 = vmatpush3.bf16.msra.mxu0 %v811_v5  ;;  %791 = vmatpush3.bf16.msra.mxu1 %v811_v5  ;;  %s197_s14 = scalar_lea.vmem %s976_s4, %s720_s11 }
  0x10   : > { %729 = vmatprep.subr.bf16.mxu0 %v812_v6  ;;  %784 = vmatprep.subr.bf16.mxu1 %v812_v6  ;;  %s914_s12 = scalar_lea.vmem %s972_s0, %s797_s5 }
  0x11   : > { %v824_v11 = vld [vmem:[%s914_s12 + $0x4] ss:$12 sps:$4 sm:$0xff]   ;;  %v827_v12 = vld [vmem:[%s914_s12 + $0x4c] ss:$12 sps:$4 sm:$0xff]   ;;  %v825_v20 = vld [vmem:[%s914_s12 + $0x48] ss:$12 sps:$4 sm:$0xff]  }
  0x12   : > { %464 = vmatprep.mubr.bf16.mxu0 %v824_v11  ;;  %488 = vmatprep.mubr.bf16.mxu1 %v827_v12  ;;  %v822_v19 = vld [vmem:[%s914_s12] ss:$12 sps:$4 sm:$0xff]   ;;  %v830_v21 = vld [vmem:[%s914_s12 + $0x1c] ss:$12 sps:$4 sm:$0xff]   ;;  %v833_v24 = vld [vmem:[%s914_s12 + $0x18] ss:$12 sps:$4 sm:$0xff]  }
  0x13   : > { %730 = vmatpush3.bf16.msra.mxu0 %v813_v7  ;;  %792 = vmatpush3.bf16.msra.mxu1 %v813_v7  ;;  %v832_v23 = vld [vmem:[%s914_s12 + $0x8] ss:$12 sps:$4 sm:$0xff]   ;;  %v834_v25 = vld [vmem:[%s914_s12 + $0x20] ss:$12 sps:$4 sm:$0xff]   ;;  %v837_v27 = vld [vmem:[%s914_s12 + $0x38] ss:$12 sps:$4 sm:$0xff]  }
  0x14   : > { %731 = vmatprep.subr.bf16.mxu0 %v814_v8  ;;  %785 = vmatprep.subr.bf16.mxu1 %v814_v8  ;;  %v835_v26 = vld [vmem:[%s914_s12 + $0x34] ss:$12 sps:$4 sm:$0xff]   ;;  %v838_v28 = vld [vmem:[%s914_s12 + $0x30] ss:$12 sps:$4 sm:$0xff]  }
  0x15   : > { %v839_v29 = vld [vmem:[%s914_s12 + $0x50] ss:$12 sps:$4 sm:$0xff]  }
  0x17   : > { %732 = vmatpush3.bf16.msra.mxu0 %v815_v9  ;;  %793 = vmatpush3.bf16.msra.mxu1 %v815_v9 }
  0x18   : > { %733 = vmatprep.subr.bf16.mxu0 %v816_v10  ;;  %786 = vmatprep.subr.bf16.mxu1 %v816_v10 }
  0x1b   : > { %734 = vmatpush3.bf16.msra.mxu0 %v817_v13  ;;  %794 = vmatpush3.bf16.msra.mxu1 %v817_v13 }
  0x1c   : > { %735 = vmatprep.subr.bf16.mxu0 %v818_v14  ;;  %787 = vmatprep.subr.bf16.mxu1 %v818_v14 }
  0x1f   : > { %736 = vmatpush3.bf16.msra.mxu0 %v819_v15  ;;  %795 = vmatpush3.bf16.msra.mxu1 %v819_v15 }
  0x20   : > { %737 = vmatprep.subr.bf16.mxu0 %v820_v16  ;;  %788 = vmatprep.subr.bf16.mxu1 %v820_v16 }
  0x23   : > { %738 = vmatpush3.bf16.msra.mxu0 %v821_v17  ;;  %796 = vmatpush3.bf16.msra.mxu1 %v821_v17 }
  0x24   : > { %769 = vmatprep.subr.bf16.mxu1 %v828_v18 }
  0x26   : > { %465 = vmatmul.mubr.bf16.vlgmr.msra.gmra.mrb[0].mxu0 %v822_v19  ;;  %489 = vmatmul.mubr.bf16.vlgmr.msra.gmra.mrb[0].mxu1 %v825_v20 }
  0x27   : > { %770 = vmatpush3.bf16.msra.mxu1 %v828_v18  ;;  %472 = vmatprep.mubr.bf16.mxu0 %v830_v21 }
  0x28   : > { %771 = vmatprep.subr.bf16.mxu1 %v829_v22  ;;  %773 = vmatprep.mubr.msk.bf16.mxu1 %vm419_vm0, %v832_v23 }
  0x2b   : > { %772 = vmatpush3.bf16.msra.mxu1 %v829_v22 }
  0x2e   : > { %473 = vmatmul.mubr.bf16.gmra.mrb[4].mxu0 %v833_v24  ;;  %774 = vmatmul.mubr.msk.bf16.vlgmr.msra.gmra.mrb[4].mxu1 %vm419_vm0, %v834_v25 }
  0x2f   : > { %480 = vmatprep.mubr.bf16.mxu0 %v835_v26  ;;  %777 = vmatprep.mubr.msk.bf16.mxu1 %vm419_vm0, %v837_v27 }
  0x36   : > { %481 = vmatmul.mubr.bf16.gmra.mrb[8].mxu0 %v838_v28  ;;  %778 = vmatmul.mubr.msk.bf16.gmra.mrb[8].mxu1 %vm419_vm0, %v839_v29 }
  0xf9   : > { %v739_v30 = vpop.f32.mrb[0].mxu0  ;;  %v757_v31 = vpop.f32.mrb[0].mxu1 }
  0xfa   : > { %v740_v32 = vpop.f32.mrb[1].mxu0  ;;  %v758_v33 = vpop.f32.mrb[1].mxu1 }
  0xfb   : > { %v741_v34 = vadd.f32 %v740_v32, %v739_v30  ;;  %v759_v35 = vadd.f32 %v758_v33, %v757_v31  ;;  %v742_v36 = vpop.f32.mrb[2].mxu0  ;;  %v760_v37 = vpop.f32.mrb[2].mxu1 }
  0xfc   : > { %v743_v38 = vpop.f32.mrb[3].mxu0  ;;  %v761_v39 = vpop.f32.mrb[3].mxu1 }
  0xfd   : > { %v744_v40 = vadd.f32 %v743_v38, %v742_v36  ;;  %v762_v41 = vadd.f32 %v761_v39, %v760_v37 }
 0x101   : > { %v745_v42 = vpop.f32.mrb[4].mxu0  ;;  %v775_v43 = vpop.f32.mrb[4].mxu1 }
 0x102   : > { %v746_v44 = vpop.f32.mrb[5].mxu0  ;;  %v531_v46 = vpop.f32.mrb[5].mxu1 }
 0x103   : > { %v747_v47 = vadd.f32 %v746_v44, %v745_v42  ;;  %v532_v48 = vadd.f32 %v741_v34, %v531_v46  ;;  %v748_v49 = vpop.f32.mrb[6].mxu0  ;;  %v776_v50 = vpop.f32.mrb[6].mxu1 }
 0x104   : > { %v749_v52 = vpop.f32.mrb[7].mxu0  ;;  %v534_v53 = vpop.f32.mrb[7].mxu1 }
 0x105   : > { %v540_v54 = vadd.f32 %v775_v43, %v747_v47  ;;  %v569_v55 = vmul.f32 %v714_v45, %v532_v48  ;;  %v750_v56 = vadd.f32 %v749_v52, %v748_v49  ;;  %v535_v57 = vadd.f32 %v744_v40, %v534_v53 }
 0x107   : > { %v571_v58 = vmul.f32 %v714_v45, %v540_v54  ;;  %v584_v59 = vadd.f32 %v715_v51, %v569_v55  ;;  %v543_v60 = vadd.f32 %v776_v50, %v750_v56  ;;  %v570_v61 = vmul.f32 %v714_v45, %v535_v57 }
 0x109   : > { %v586_v62 = vadd.f32 %v715_v51, %v571_v58  ;;  %v572_v63 = vmul.f32 %v714_v45, %v543_v60  ;;  %v585_v0 = vadd.f32 %v715_v51, %v570_v61  ;;  %v751_v1 = vpop.f32.mrb[8].mxu0  ;;  %v779_v2 = vpop.f32.mrb[8].mxu1  ;;  %v592_v7 = vmax.f32 %v584_v59, 0.0 }
 0x10a   : > { %v556_v3 = vadd.f32 %v779_v2, %v759_v35  ;;  %v752_v4 = vpop.f32.mrb[9].mxu0  ;;  %v547_v5 = vpop.f32.mrb[9].mxu1 }
 0x10b   : > { %v594_v6 = vmax.f32 %v586_v62, 0.0  ;;  %v587_v8 = vadd.f32 %v715_v51, %v572_v63  ;;  %v753_v9 = vadd.f32 %v752_v4, %v751_v1  ;;  %v754_v10 = vpop.f32.mrb[10].mxu0  ;;  %v780_v11 = vpop.f32.mrb[10].mxu1  ;;  %v593_v12 = vmax.f32 %v585_v0, 0.0 }
 0x10c   : > { %v575_v13 = vmul.f32 %v714_v45, %v556_v3  ;;  %v559_v14 = vadd.f32 %v780_v11, %v762_v41  ;;  %v755_v15 = vpop.f32.mrb[11].mxu0  ;;  %v550_v16 = vpop.f32.mrb[11].mxu1 }
 0x10d   : > { %v600_v17 = vmax.f32 %v592_v7, %v594_v6  ;;  %v595_v18 = vmax.f32 %v587_v8, 0.0  ;;  %v548_v19 = vadd.f32 %v753_v9, %v547_v5  ;;  %v756_v20 = vadd.f32 %v755_v15, %v754_v10 }
 0x10e   : > { %v576_v21 = vmul.f32 %v714_v45, %v559_v14  ;;  %v590_v23 = vadd.f32 %v715_v51, %v575_v13 }
 0x10f   : > { %v601_v22 = vmax.f32 %v593_v12, %v595_v18  ;;  %v573_v24 = vmul.f32 %v714_v45, %v548_v19  ;;  %v551_v25 = vadd.f32 %v756_v20, %v550_v16 }
 0x110   : > { %v591_v27 = vadd.f32 %v715_v51, %v576_v21  ;;  %v598_v29 = vmax.f32 %v590_v23, 0.0 }
 0x111   : > { %v588_v26 = vadd.f32 %v715_v51, %v573_v24  ;;  %v574_v28 = vmul.f32 %v714_v45, %v551_v25 }
 0x112   : > { %v599_v33 = vmax.f32 %v591_v27, 0.0 }
 0x113   : > { %v596_v30 = vmax.f32 %v588_v26, 0.0  ;;  %v589_v31 = vadd.f32 %v715_v51, %v574_v28 }
 0x115   : > { %v602_v32 = vmax.f32 %v596_v30, %v598_v29  ;;  %v597_v34 = vmax.f32 %v589_v31, 0.0 }
 0x117   : > { %v604_v35 = vmax.f32 %v600_v17, %v602_v32  ;;  %v603_v36 = vmax.f32 %v597_v34, %v599_v33 }
 0x119   : > { %v721_v37 = vpack.c.bf16 %v604_v35, %v604_v35  ;;  %v605_v38 = vmax.f32 %v601_v22, %v603_v36 }
 0x11b   : > { %615 = vst.msk [vmem:[%s197_s14] sm:$0xf] %vm614_vm1, %v721_v37  ;;  %v722_v39 = vpack.c.bf16 %v605_v38, %v605_v38 }
 0x11d   : > { %616 = vst.msk [vmem:[%s197_s14 + $0x4] sm:$0xf] %vm614_vm1, %v722_v39 }
 0x11e PF: > { %s14_s15 = sadd.s32 1, %s846_s15  }
 0x11f   : > { %p11_p4 = scmp.ge.s32.totalorder %s14_s15, 4  }
 0x121   :  { %13 = sbr.rel (!%p11_p4) target bundleno = 1 (0x1), region = 66 }

// kernel: deep2d_encoder_forward.11
= control target key start
LH: loop header
LB: loop body
LE: loop exit
PB: predicated region body
PF: predicated region fallthrough
CT: control target
= control target key end

     0   :  { %v259_v2 = vmov 0   ;;  %s347_s0 = inlined_call_operand.vmem [shape: bf16[2,128], index: 0, kind: input, shape index: {}]   ;;  %s348_s1 = inlined_call_operand.vmem [shape: bf16[128,256], index: 1, kind: input, shape index: {}]   ;;  %s349_s2 = inlined_call_operand.vmem [shape: f32[1,256], index: 2, kind: input, shape index: {}]   ;;  %s350_s3 = inlined_call_operand.hbm [shape: f32[2,256], index: 3, kind: output, shape index: {}]  }
   0x1   :  { %v211_v0 = vld [vmem:[%s348_s1 + $0x4] ss:$8 sps:$4 sm:$0xff]   ;;  %v213_v1 = vld [vmem:[%s348_s1] ss:$8 sps:$4 sm:$0xff]   ;;  %157 = vmatprep.mubr.bf16.mxu0 %v259_v2  ;;  %v214_v3 = vld [vmem:[%s348_s1 + $0x14] ss:$8 sps:$4 sm:$0xff]  }
   0x2   :  { %125 = vmatprep.subr.bf16.mxu0 %v211_v0  ;;  %v216_v4 = vld [vmem:[%s348_s1 + $0x10] ss:$8 sps:$4 sm:$0xff]   ;;  %v217_v5 = vld [vmem:[%s348_s1 + $0x24] ss:$8 sps:$4 sm:$0xff]   ;;  %v219_v6 = vld [vmem:[%s348_s1 + $0x20] ss:$8 sps:$4 sm:$0xff]  }
   0x3   :  { %126 = vmatpush1.bf16.msra.mxu0 %v213_v1  ;;  %v220_v7 = vld [vmem:[%s348_s1 + $0x34] ss:$8 sps:$4 sm:$0xff]   ;;  %v222_v8 = vld [vmem:[%s348_s1 + $0x30] ss:$8 sps:$4 sm:$0xff]  }
   0x4   :  { %127 = vmatprep.subr.bf16.mxu0 %v214_v3 }
   0x7   :  { %128 = vmatpush1.bf16.msra.mxu0 %v216_v4 }
   0x8   :  { %129 = vmatprep.subr.bf16.mxu0 %v217_v5 }
   0xb   :  { %130 = vmatpush1.bf16.msra.mxu0 %v219_v6 }
   0xc   :  { %8 = vsyncpa [#allocation3], 0  ;;  %131 = vmatprep.subr.bf16.mxu0 %v220_v7  ;;  %v223_v9 = vld [vmem:[%s348_s1 + $0x44] ss:$8 sps:$4 sm:$0xff]   ;;  %v225_v10 = vld [vmem:[%s348_s1 + $0x40] ss:$8 sps:$4 sm:$0xff]   ;;  %v35_v18 = vlaneseq }
   0xd   :  { %v226_v11 = vld [vmem:[%s348_s1 + $0x54] ss:$8 sps:$4 sm:$0xff]   ;;  %v228_v12 = vld [vmem:[%s348_s1 + $0x50] ss:$8 sps:$4 sm:$0xff]   ;;  %v229_v13 = vld [vmem:[%s348_s1 + $0x64] ss:$8 sps:$4 sm:$0xff]  }
   0xe   :  { %v231_v14 = vld [vmem:[%s348_s1 + $0x60] ss:$8 sps:$4 sm:$0xff]   ;;  %v232_v15 = vld [vmem:[%s348_s1 + $0x74] ss:$8 sps:$4 sm:$0xff]   ;;  %v234_v16 = vld [vmem:[%s348_s1 + $0x70] ss:$8 sps:$4 sm:$0xff]  }
   0xf   :  { %132 = vmatpush1.bf16.msra.mxu0 %v222_v8  ;;  %v16_v17 = vld [vmem:[%s347_s0] sm:$0x1]  ;;  %v36_v19 = vshrl.u32 %v35_v18, 7  ;;  %s260_s1 = smov [#allocation2]  }
  0x10   :  { %133 = vmatprep.subr.bf16.mxu0 %v223_v9  ;;  %v33_v21 = vld [vmem:[%s349_s2] sm:$0x3]  ;;  %s184_s21 = sshll.u32 %s260_s1, 4  ;;  %s185_s21 = int_to_ptr.vmem [resolvable:$true] %s184_s21 }
  0x11   :  { %v37_v20 = vsub.s32 0, %v36_v19  ;;  %v41_v22 = vsub.s32 1, %v36_v19  ;;  %s235_s0 = scalar_lea.vmem %s185_s21, 64  ;;  %p240_p1 = scmp.lt.s32.totalorder %s185_s21, %s185_s21 }
  0x12   :  { %p236_p0 = scmp.ne.s32.totalorder %s185_s21, %s235_s0  ;;  %p241_p2 = scmp.lt.s32.totalorder %s235_s0, %s235_s0 }
  0x13   :  { %134 = vmatpush1.bf16.msra.mxu0 %v225_v10  ;;  %v38_v23 = vrot.slane %v33_v21, %v37_v20  ;;  %v42_v24 = vrot.slane %v33_v21, %v41_v22 }
  0x14   :  { %135 = vmatprep.subr.bf16.mxu0 %v226_v11  ;;  %p242_p3 = por %p241_p2, %p240_p1 }
  0x16   :  { %p243_p4 = pnand %p242_p3, %p236_p0 }
  0x17   :  { %136 = vmatpush1.bf16.msra.mxu0 %v228_v12 }
  0x18   :  { %137 = vmatprep.subr.bf16.mxu0 %v229_v13 }
  0x1b   :  { %138 = vmatpush1.bf16.msra.mxu0 %v231_v14 }
  0x1c   :  { %139 = vmatprep.subr.bf16.mxu0 %v232_v15 }
  0x1f   :  { %140 = vmatpush1.bf16.msra.mxu0 %v234_v16 }
  0x22   :  { %158 = vmatmul.mubr.bf16.vlgmr.msra.gmra.mrb[0].mxu0 %v16_v17 }
  0xf5   :  { %v159_v25 = vpop.f32.mrb[0].mxu0 }
  0xf6   :  { %v160_v26 = vadd.f32 %v159_v25, %v38_v23  ;;  %v161_v27 = vpop.f32.mrb[1].mxu0 }
  0xf7   :  { %v162_v28 = vadd.f32 %v161_v27, %v42_v24  ;;  %v163_v29 = vpop.f32.mrb[2].mxu0 }
  0xf8   :  { %v164_v30 = vpop.f32.mrb[3].mxu0 }
  0xf9   :  { %v168_v31 = vcombine.low %v160_v26, %v162_v28 }
  0xfb   :  { %208 = vst.sshfl [vmem:[#allocation2] sm:$0x33 pattern:$0x76325410] %v168_v31 }
  0xfc   :  { %246 = shalt.err (!%p243_p4)
}
  0xfd   :  { %s247_s23 = scalar_lea.hbm %s350_s3, 64 }
  0xfe   :  { %p248_p5 = scmp.ne.s32.totalorder %s350_s3, %s247_s23  ;;  %p251_p6 = scmp.lt.u32.totalorder %s247_s23, %s350_s3 }
 0x100   :  { %p253_p7 = pnand %p251_p6, %p248_p5 }
 0x102   :  { %256 = shalt.err (!%p253_p7)
}
 0x103   :  { %187 = dma.vmem_to_hbm [thread:$0]  %s185_s21, 64, %s350_s3, [#allocation3]  }
 0x104   :  { %257 = dma.done.wait [#allocation3], 64  }
 0x105   :  { %258 = vsyncadd [#allocation3], 4294967232 }
 0x106   :  { %191 = vsyncpa [#allocation3], 1 }

// kernel: deep2d_encoder_forward.10
= control target key start
LH: loop header
LB: loop body
LE: loop exit
PB: predicated region body
PF: predicated region fallthrough
CT: control target
= control target key end

     0   :  { %s665_s15 = smov 0   ;;  %s746_s0 = inlined_call_operand.vmem [shape: bf16[2,16,288], index: 0, kind: input, shape index: {}]   ;;  %s747_s1 = inlined_call_operand.vmem [shape: bf16[288,32], index: 1, kind: input, shape index: {}]   ;;  %s748_s2 = inlined_call_operand.vmem [shape: f32[1,32], index: 2, kind: input, shape index: {}]   ;;  %s749_s3 = inlined_call_operand.vmem [shape: f32[1,32], index: 3, kind: input, shape index: {}]   ;;  %s750_s4 = inlined_call_operand.vmem [shape: bf16[2,4,32], index: 4, kind: output, shape index: {}]  }
   0x1 LB: > { %s531_s16 = sadd.s32 4294967295, %s636_s15   ;;  %p535_p0 = scmp.ge.s32.totalorder %s636_s15, 1  ;;  %s636_s15 = sphi %s665_s15, %s14_s15  }
   0x2   : > { %p162_p1 = scmp.lt.s32.totalorder %s636_s15, 3 }
   0x4   : > { %p163_p2 = pnand %p535_p0, %p162_p1 }
   0x5   : > { %v608_v0 = vld [vmem:[%s747_s1 + $0x40] sm:$0xff] (!%p163_p2)   ;;  %v638_v2 = vmov (!%p163_p2), 0.0   ;;  %v610_v3 = vld [vmem:[%s747_s1 + $0x48] sm:$0xff] (!%p163_p2)   ;;  %vm639_vm0 = vmmov (!%p163_p2), 0   ;;  %v612_v5 = vld [vmem:[%s747_s1 + $0x50] sm:$0xff] (!%p163_p2)   ;;  %p187_p3 = scmp.lt.s32.totalorder (!%p163_p2), %s531_s16, 1 }
   0x6   : > { %166 = sbr.rel (%p163_p2) target bundleno = 272 (0x110), region = 36  ;;  %v609_v1 = vld [vmem:[%s747_s1] sm:$0xff] (!%p163_p2)   ;;  %589 = vmatprep.subr.bf16.mxu1 (!%p163_p2), %v638_v2  ;;  %564 = vmatprep.subr.bf16.mxu0 (!%p163_p2), %v608_v0  ;;  %v611_v4 = vld [vmem:[%s747_s1 + $0x8] sm:$0xff] (!%p163_p2)   ;;  %v613_v6 = vld [vmem:[%s747_s1 + $0x10] sm:$0xff] (!%p163_p2)   ;;  %vm360_vm1 = vcmask (!%p163_p2), 261120   ;;  %vm476_vm2 = vcmask (!%p163_p2), 254976  }
   0x7   : > { %565 = vmatpush3.bf16.msra.mxu0 (!%p163_p2), %v609_v1  ;;  %593 = vmatprep.mubr.msk.bf16.mxu1 (!%p163_p2), %vm639_vm0, %v638_v2  ;;  %v614_v7 = vld [vmem:[%s747_s1 + $0x58] sm:$0xff] (!%p163_p2)   ;;  %v616_v9 = vld [vmem:[%s747_s1 + $0x60] sm:$0xff] (!%p163_p2)   ;;  %v618_v12 = vld [vmem:[%s747_s1 + $0x68] sm:$0xff] (!%p163_p2)  }
   0x8   : > { %566 = vmatprep.subr.bf16.mxu0 (!%p163_p2), %v610_v3  ;;  %v615_v8 = vld [vmem:[%s747_s1 + $0x18] sm:$0xff] (!%p163_p2)   ;;  %v622_v10 = vld [vmem:[%s747_s1 + $0x80] sm:$0xff] (!%p163_p2)   ;;  %v625_v13 = vld [vmem:[%s747_s1 + $0x88] sm:$0xff] (!%p163_p2)  }
   0x9   : > { %v617_v11 = vld [vmem:[%s747_s1 + $0x20] sm:$0xff] (!%p163_p2)   ;;  %590 = vmatpush3.bf16.msra.mxu1 (!%p163_p2), %v622_v10  ;;  %v619_v14 = vld [vmem:[%s747_s1 + $0x28] sm:$0xff] (!%p163_p2)   ;;  %v620_v16 = vld [vmem:[%s747_s1 + $0x70] sm:$0xff] (!%p163_p2)  }
   0xa   : > { %591 = vmatprep.subr.bf16.mxu1 (!%p163_p2), %v638_v2  ;;  %v621_v18 = vld [vmem:[%s747_s1 + $0x30] sm:$0xff] (!%p163_p2)   ;;  %v623_v19 = vld [vmem:[%s747_s1 + $0x78] sm:$0xff] (!%p163_p2)   ;;  %v560_v30 = vld [vmem:[%s748_s2] ss:$0 sm:$0xff] (!%p163_p2) }
   0xb   : > { %567 = vmatpush3.bf16.msra.mxu0 (!%p163_p2), %v611_v4  ;;  %v624_v20 = vld [vmem:[%s747_s1 + $0x38] sm:$0xff] (!%p163_p2)   ;;  %v561_v34 = vld [vmem:[%s749_s3] ss:$0 sm:$0xff] (!%p163_p2) }
   0xc   : > { %568 = vmatprep.subr.bf16.mxu0 (!%p163_p2), %v612_v5 }
   0xd   : > { %s752_s16 = smov (!%p187_p3, %s531_s16), 1  ;;  %592 = vmatpush3.bf16.msra.mxu1 %v625_v13 }
   0xe   : > { %s597_s9 = smul.u32 24, %s752_s16  ;;  %s537_s11 = sshll.u32 %s752_s16, 1 }
   0xf   : > { %569 = vmatpush3.bf16.msra.mxu0 %v613_v6  ;;  %s195_s14 = scalar_lea.vmem %s750_s4, %s537_s11 }
  0x10   : > { %570 = vmatprep.subr.bf16.mxu0 %v614_v7  ;;  %s191_s20 = scalar_lea.vmem %s746_s0, %s597_s9 }
  0x11   : > { %v628_v15 = vld [vmem:[%s191_s20 + $0x4] ss:$12 sps:$4 sm:$0xff]   ;;  %v629_v17 = vld [vmem:[%s191_s20 + $0x8] ss:$12 sps:$4 sm:$0xff]   ;;  %v626_v21 = vld [vmem:[%s191_s20] ss:$12 sps:$4 sm:$0xff]  }
  0x12   : > { %396 = vmatprep.mubr.bf16.mxu0 %v628_v15  ;;  %594 = vmatmul.mubr.msk.bf16.vlgmr.msra.gmra.mrb[0].mxu1 %vm360_vm1, %v629_v17 }
  0x13   : > { %571 = vmatpush3.bf16.msra.mxu0 %v615_v8 }
  0x14   : > { %572 = vmatprep.subr.bf16.mxu0 %v616_v9 }
  0x17   : > { %573 = vmatpush3.bf16.msra.mxu0 %v617_v11 }
  0x18   : > { %574 = vmatprep.subr.bf16.mxu0 %v618_v12 }
  0x1b   : > { %575 = vmatpush3.bf16.msra.mxu0 %v619_v14 }
  0x1c   : > { %576 = vmatprep.subr.bf16.mxu0 %v620_v16 }
  0x1f   : > { %577 = vmatpush3.bf16.msra.mxu0 %v621_v18 }
  0x20   : > { %578 = vmatprep.subr.bf16.mxu0 %v623_v19 }
  0x23   : > { %579 = vmatpush3.bf16.msra.mxu0 %v624_v20 }
  0x26   : > { %397 = vmatmul.mubr.bf16.vlgmr.msra.gmra.mrb[0].mxu0 %v626_v21 }
  0xe5   : > { %v439_v22 = vpop.f32.mrb[0].mxu1 }
  0xe6   : > { %v595_v23 = vpop.f32.mrb[1].mxu1 }
  0xe7   : > { %v442_v24 = vpop.f32.mrb[2].mxu1 }
  0xe8   : > { %v596_v25 = vpop.f32.mrb[3].mxu1 }
  0xf9   : > { %v580_v26 = vpop.f32.mrb[0].mxu0 }
  0xfa   : > { %v581_v27 = vpop.f32.mrb[1].mxu0 }
  0xfb   : > { %v582_v28 = vadd.f32 %v581_v27, %v580_v26  ;;  %v583_v29 = vpop.f32.mrb[2].mxu0 }
  0xfc   : > { %v584_v31 = vpop.f32.mrb[3].mxu0 }
  0xfd   : > { %v440_v32 = vadd.f32 %v582_v28, %v439_v22  ;;  %v585_v33 = vadd.f32 %v584_v31, %v583_v29 }
  0xff   : > { %v453_v35 = vmul.f32 %v560_v30, %v440_v32  ;;  %v443_v36 = vadd.f32 %v585_v33, %v442_v24 }
 0x101   : > { %v462_v37 = vadd.f32 %v561_v34, %v453_v35  ;;  %v454_v38 = vmul.f32 %v560_v30, %v443_v36 }
 0x103   : > { %v464_v39 = vmax.f32 %v462_v37, 0.0  ;;  %v463_v40 = vadd.f32 %v561_v34, %v454_v38 }
 0x105   : > { %v467_v41 = vrot.slane %v464_v39, 4  ;;  %v465_v42 = vmax.f32 %v463_v40, 0.0 }
 0x107   : > { %v471_v43 = vrot.slane %v465_v42, 4  ;;  %v469_v44 = vmax.f32 %v464_v39, %v467_v41 }
 0x109   : > { %v473_v45 = vmax.f32 %v465_v42, %v471_v43 }
 0x10b   : > { %v474_v46 = vmax.f32 %v469_v44, %v473_v45 }
 0x10d   : > { %v475_v47 = vpack.c.bf16 %v474_v46, %v474_v46 }
 0x10f   : > { %477 = vst.msk [vmem:[%s195_s14] sm:$0x3] %vm476_vm2, %v475_v47 }
 0x110 PF: > { %s14_s15 = sadd.s32 1, %s636_s15  }
 0x111   : > { %p11_p4 = scmp.ge.s32.totalorder %s14_s15, 4  }
 0x113   :  { %13 = sbr.rel (!%p11_p4) target bundleno = 1 (0x1), region = 66 }

</bundles_post_ra>
